<compile_context>
chip_gen: v6e
topology: v6e:2x2x1
jax: 0.10.0
libtpu: 0.0.40
codegen_flags: <defaults>
</compile_context>

<pallas_src>
import numpy as np
import jax
import jax.numpy as jnp
from jax.experimental import pallas as pl
from jax.experimental.pallas import tpu as pltpu

EPS = 1e-5        # BatchNorm eps
SLOPE = 0.1       # nn.LeakyReLU(0.1) in the reference module


# --------------------------- fused kernel -----------------------------------

def _fused_forward_kernel(board_ref, feat_ref,
                          t1a, s1a, c1a, t1b, s1b, c1b,
                          t2a, s2a, c2a, t2b, s2b, c2b,
                          tres, sres, cres,
                          w1a, w1b, c1, w2, c2, w3, c3, w4, c4,
                          out_ref):
    """Whole forward pass on one batch tile; every operand VMEM-resident.

    board_ref : (bm, 64*Cin)  NCHW-flattened board, bf16
    feat_ref  : (bm, 8)       chess features, bf16
    t* / tres : dense unrolled conv matrices (int8 weight-only quant or bf16)
    s* / sres : per-output-column dequant scales, f32 rows (ones if bf16)
    c* / cres : per-layer bias rows (conv bias + folded BN shift), f32
    w*        : FC weights, bf16 (BN folded);  c1..c4: FC bias rows, f32
    out_ref   : (bm, 1) f32
    """

    def conv(x_bf16, t_ref, s_ref, c_ref):
        # Weight-only int8: dequantize in-kernel (cheap vs. the halved DMA);
        # the per-output-column scale rides the existing bias epilogue.
        w = t_ref[...]
        if w.dtype != jnp.bfloat16:
            # int8 -> f32 -> bf16 (int8 magnitudes <= 127 are exact in bf16).
            w = w.astype(jnp.float32).astype(jnp.bfloat16)
        acc = jnp.dot(x_bf16, w, preferred_element_type=jnp.float32)
        return acc * s_ref[...] + c_ref[...]

    def fc(x_f32, w_ref, c_ref):
        y = jnp.dot(x_f32.astype(w_ref.dtype), w_ref[...],
                    preferred_element_type=jnp.float32)
        return y + c_ref[...]

    def lrelu(y):
        return jnp.maximum(y, SLOPE * y)     # 2 VALU ops; exact LeakyReLU(0.1)

    x0 = board_ref[...]                                    # (bm, 64*Cin) bf16

    # conv_block1 / conv_block2: each layer = one wide-K MXU matmul + epilogue.
    x = lrelu(conv(x0, t1a, s1a, c1a)).astype(jnp.bfloat16)
    x = lrelu(conv(x,  t1b, s1b, c1b)).astype(jnp.bfloat16)
    x = lrelu(conv(x,  t2a, s2a, c2a)).astype(jnp.bfloat16)
    x = lrelu(conv(x,  t2b, s2b, c2b))                     # (bm, 64*2cc) f32

    # residual 1x1 conv on the raw board (re-reads the resident input block);
    # the PyTorch model applies no BN/activation after this add.
    x = x + conv(x0, tres, sres, cres)

    # fc_block; the NCHW flatten permutation is folded into w1a so the conv
    # trunk output feeds fc1 directly.  Dropout(0.2) is identity in eval mode.
    xb = x.astype(jnp.bfloat16)
    y = lrelu(jnp.dot(xb, w1a[...], preferred_element_type=jnp.float32)
              + jnp.dot(feat_ref[...], w1b[...],
                        preferred_element_type=jnp.float32)
              + c1[...])
    y = lrelu(fc(y, w2, c2))
    y = lrelu(fc(y, w3, c3))
    out_ref[...] = fc(y, w4, c4)


# --------------------------- init-time weight transforms ---------------------

def _dense_conv3x3(w_oihw):
    """3x3 conv (padding=1) on an 8x8 board -> dense (64*Cin, 64*Cout) matrix
    acting on NCHW-flattened vectors (index = c*64 + h*8 + w)."""
    co_n, ci_n = w_oihw.shape[:2]
    T = np.zeros((64 * ci_n, 64 * co_n), np.float32)
    ci_off = np.arange(ci_n) * 64
    co_off = np.arange(co_n) * 64
    for ph in range(8):
        for pw in range(8):
            for ky in range(3):
                for kx in range(3):
                    qh, qw = ph + ky - 1, pw + kx - 1
                    if 0 <= qh < 8 and 0 <= qw < 8:
                        T[np.ix_(ci_off + qh * 8 + qw,
                                 co_off + ph * 8 + pw)] = w_oihw[:, :, ky, kx].T
    return T


def _dense_conv1x1(w_oi):
    """1x1 conv (Cout, Cin) -> block-diagonal (64*Cin, 64*Cout) matrix."""
    return np.kron(w_oi.T.astype(np.float32), np.eye(64, dtype=np.float32))


def _quantize_per_col(T, quantize):
    """Symmetric per-output-column int8 weight-only quantization."""
    if not quantize:
        return (jnp.asarray(T, jnp.bfloat16),
                jnp.asarray(np.ones((1, T.shape[1]), np.float32)))
    amax = np.max(np.abs(T), axis=0, keepdims=True)
    scale = np.where(amax > 0.0, amax / 127.0, 1.0).astype(np.float32)
    q = np.clip(np.rint(T / scale), -127, 127).astype(np.int8)
    return jnp.asarray(q), jnp.asarray(scale)


def init_params(key, input_channels=12, conv_channels=8, fc_hidden_dim=32,
                quantize_conv=True):
    """Synthetic weights mirroring the module's __init__, pre-transformed into
    kernel-ready layouts (dense unrolled convs, inference BN + biases folded,
    per-output-column int8 quantization of the conv matrices).

    Loading a real PyTorch checkpoint uses the same recipe: OIHW conv weights
    -> _dense_conv3x3, (out,in) Linear weights -> transpose, and the trained
    per-channel BN vectors substituted in bn_stats()."""
    cc, fc_dim = conv_channels, fc_hidden_dim
    gain = np.sqrt(2.0)      # kaiming_normal_(nonlinearity='leaky_relu'), a=0
    keys = jax.random.split(key, 9)

    def kaiming(k, shape, fan_in):
        return np.asarray((gain / np.sqrt(fan_in))
                          * jax.random.normal(k, shape, jnp.float32))

    def bn_stats(n):
        # Module __init__ stats: gamma=1, beta=0, mean=0, var=1 (per channel).
        return (np.ones(n, np.float32), np.zeros(n, np.float32),
                np.zeros(n, np.float32), np.ones(n, np.float32))

    def conv_bn_layer(k, ci, co):
        w = kaiming(k, (co, ci, 3, 3), ci * 9)            # PyTorch OIHW layout
        b = np.zeros(co, np.float32)                      # conv bias init = 0
        gamma, beta, mean, var = bn_stats(co)
        s = gamma / np.sqrt(var + EPS)                    # per-channel BN scale
        T = _dense_conv3x3(w * s[:, None, None, None])
        bias = beta + (b - mean) * s                      # per-channel shift
        q, scale = _quantize_per_col(T, quantize_conv)
        return q, scale, jnp.asarray(np.repeat(bias, 64)[None, :])

    def fc_bn_layer(k, ci, co, with_bn):
        w = kaiming(k, (co, ci), ci)                      # (out, in)
        b = np.zeros(co, np.float32)
        if with_bn:                                       # fold inference BN1d
            gamma, beta, mean, var = bn_stats(co)
            s = gamma / np.sqrt(var + EPS)
            w = w * s[:, None]
            b = beta + (b - mean) * s
        return (jnp.asarray(w.T, jnp.bfloat16),
                jnp.asarray(b[None, :].astype(np.float32)))

    t1a, s1a, c1a = conv_bn_layer(keys[0], input_channels, cc)
    t1b, s1b, c1b = conv_bn_layer(keys[1], cc, cc)
    t2a, s2a, c2a = conv_bn_layer(keys[2], cc, 2 * cc)
    t2b, s2b, c2b = conv_bn_layer(keys[3], 2 * cc, 2 * cc)

    # residual 1x1 conv (no BN; bias init = 0)
    wr = kaiming(keys[4], (2 * cc, input_channels), input_channels)
    tres, sres = _quantize_per_col(_dense_conv1x1(wr), quantize_conv)
    cres = jnp.asarray(np.zeros((1, 2 * cc * 64), np.float32))

    # fc1 consumes [NCHW-flattened conv trunk | chess_features]; the conv
    # trunk output is already in that flatten order, so just split the weight.
    nflat = 2 * cc * 64
    gamma, beta, mean, var = bn_stats(fc_dim)
    s = gamma / np.sqrt(var + EPS)
    w1 = kaiming(keys[5], (fc_dim, nflat + 8), nflat + 8) * s[:, None]
    b1 = beta + (np.zeros(fc_dim, np.float32) - mean) * s
    w1a = jnp.asarray(w1[:, :nflat].T, jnp.bfloat16)
    w1b = jnp.asarray(w1[:, nflat:].T, jnp.bfloat16)
    c1 = jnp.asarray(b1[None, :].astype(np.float32))

    w2, c2 = fc_bn_layer(keys[6], fc_dim, fc_dim // 2, with_bn=True)
    w3, c3 = fc_bn_layer(keys[7], fc_dim // 2, fc_dim // 4, with_bn=True)
    w4, c4 = fc_bn_layer(keys[8], fc_dim // 4, 1, with_bn=False)

    return dict(t1a=t1a, s1a=s1a, c1a=c1a, t1b=t1b, s1b=s1b, c1b=c1b,
                t2a=t2a, s2a=s2a, c2a=c2a, t2b=t2b, s2b=s2b, c2b=c2b,
                tres=tres, sres=sres, cres=cres,
                w1a=w1a, w1b=w1b, c1=c1, w2=w2, c2=c2, w3=w3, c3=c3,
                w4=w4, c4=c4)


_WEIGHT_ORDER = ("t1a", "s1a", "c1a", "t1b", "s1b", "c1b",
                 "t2a", "s2a", "c2a", "t2b", "s2b", "c2b",
                 "tres", "sres", "cres",
                 "w1a", "w1b", "c1", "w2", "c2", "w3", "c3", "w4", "c4")


# --------------------------- forward -----------------------------------------

def _batch_tiling(B):
    """bm multiple of 8 in [8, 256]; nb >= 2 once B >= 16 so the 'parallel'
    grid axis shards across both v7x TensorCores; awkward B pads by < bm rows
    instead of collapsing to a long bm=8 grid."""
    if B < 16:
        return B, 1                         # single full-batch tile
    nb = max(2, pl.cdiv(B, 256))
    bm = ((pl.cdiv(B, nb) + 7) // 8) * 8
    return bm, nb


def forward(params, board_nchw, chess_features):
    B = board_nchw.shape[0]
    assert board_nchw.shape[2:] == (8, 8)
    n_flat = board_nchw.shape[1] * 64

    # NCHW flatten (c*64 + h*8 + w) — a free reshape matching the layout the
    # dense conv matrices were built for; bf16 halves the input DMA.
    x0 = board_nchw.reshape(B, n_flat).astype(jnp.bfloat16)
    feats = chess_features.astype(jnp.bfloat16)

    bm, nb = _batch_tiling(B)
    Bp = bm * nb
    if Bp != B:                              # pad; padded rows sliced off below
        pad = Bp - B
        x0 = jnp.concatenate([x0, jnp.zeros((pad, n_flat), x0.dtype)], axis=0)
        feats = jnp.concatenate(
            [feats, jnp.zeros((pad, feats.shape[1]), feats.dtype)], axis=0)

    weights = [params[name] for name in _WEIGHT_ORDER]

    def batch_spec(ncols):
        return pl.BlockSpec((bm, ncols), lambda i: (i, 0))

    def full_spec(arr):
        # Constant block index: fetched once, stays VMEM-resident across grid.
        return pl.BlockSpec(arr.shape, lambda i: (0, 0))

    grid_spec = pltpu.PrefetchScalarGridSpec(
        num_scalar_prefetch=0,
        grid=(nb,),
        in_specs=[batch_spec(n_flat), batch_spec(feats.shape[1])]
                 + [full_spec(w) for w in weights],
        out_specs=pl.BlockSpec((bm, 1), lambda i: (i, 0)),
    )

    # Generation-aware scoped-VMEM limit (v7x: 64 MiB physical vs 128 MiB on
    # v5e/v6e).  Weights are double-buffered by the default pipeline.
    w_bytes = sum(int(np.prod(w.shape)) * w.dtype.itemsize for w in weights)
    io_bytes = 2 * bm * (n_flat + feats.shape[1]) * 2 + 2 * bm * 4
    try:
        cap = int(pltpu.get_tpu_info().vmem_capacity_bytes)
    except Exception:
        cap = 64 * 2 ** 20                   # conservative (v7x) fallback
    vmem_limit = min(int(0.85 * cap),
                     max(32 * 2 ** 20, 2 * w_bytes + io_bytes + 16 * 2 ** 20))

    out = pl.pallas_call(
        _fused_forward_kernel,
        out_shape=jax.ShapeDtypeStruct((Bp, 1), jnp.float32),
        grid_spec=grid_spec,
        compiler_params=pltpu.CompilerParams(
            dimension_semantics=("parallel",),
            vmem_limit_bytes=vmem_limit),
    )(x0, feats, *weights)
    return out[:B]


# --------------------------- demo --------------------------------------------

if __name__ == "__main__":
    key = jax.random.PRNGKey(0)
    k_board, k_feat, k_param = jax.random.split(key, 3)

    B = 2
    board_tensor = jax.random.normal(k_board, (B, 12, 8, 8), dtype=jnp.float32)
    chess_features = jax.random.normal(k_feat, (B, 8), dtype=jnp.float32)

    params = init_params(k_param, input_channels=12, conv_channels=8,
                         fc_hidden_dim=32, quantize_conv=True)

    out = jax.block_until_ready(
        jax.jit(forward)(params, board_tensor, chess_features))
    assert out.shape == (B, 1) and out.dtype == jnp.float32
    assert bool(jnp.all(jnp.isfinite(out)))
    print("KERNEL_OK")
</pallas_src>

<mosaic_0001>
module attributes {stable_mosaic.version = 11 : i64} {
  func.func @_fused_forward_kernel(%arg0: i32, %arg1: memref<2x768xbf16, #tpu.memory_space<vmem>>, %arg2: memref<2x8xbf16, #tpu.memory_space<vmem>>, %arg3: memref<768x512xi8, #tpu.memory_space<vmem>>, %arg4: memref<1x512xf32, #tpu.memory_space<vmem>>, %arg5: memref<1x512xf32, #tpu.memory_space<vmem>>, %arg6: memref<512x512xi8, #tpu.memory_space<vmem>>, %arg7: memref<1x512xf32, #tpu.memory_space<vmem>>, %arg8: memref<1x512xf32, #tpu.memory_space<vmem>>, %arg9: memref<512x1024xi8, #tpu.memory_space<vmem>>, %arg10: memref<1x1024xf32, #tpu.memory_space<vmem>>, %arg11: memref<1x1024xf32, #tpu.memory_space<vmem>>, %arg12: memref<1024x1024xi8, #tpu.memory_space<vmem>>, %arg13: memref<1x1024xf32, #tpu.memory_space<vmem>>, %arg14: memref<1x1024xf32, #tpu.memory_space<vmem>>, %arg15: memref<768x1024xi8, #tpu.memory_space<vmem>>, %arg16: memref<1x1024xf32, #tpu.memory_space<vmem>>, %arg17: memref<1x1024xf32, #tpu.memory_space<vmem>>, %arg18: memref<1024x32xbf16, #tpu.memory_space<vmem>>, %arg19: memref<8x32xbf16, #tpu.memory_space<vmem>>, %arg20: memref<1x32xf32, #tpu.memory_space<vmem>>, %arg21: memref<32x16xbf16, #tpu.memory_space<vmem>>, %arg22: memref<1x16xf32, #tpu.memory_space<vmem>>, %arg23: memref<16x8xbf16, #tpu.memory_space<vmem>>, %arg24: memref<1x8xf32, #tpu.memory_space<vmem>>, %arg25: memref<8x1xbf16, #tpu.memory_space<vmem>>, %arg26: memref<1x1xf32, #tpu.memory_space<vmem>>, %arg27: memref<2x1xf32, #tpu.memory_space<vmem>>) attributes {dimension_semantics = [#tpu.dimension_semantics<parallel>], iteration_bounds = array<i64: 1>, scalar_prefetch = 0 : i64, scratch_operands = 0 : i64, tpu.core_type = #tpu.core_type<tc>, window_params = [{transform_indices = @transform_0, window_bounds = array<i64: 2, 768>}, {transform_indices = @transform_1, window_bounds = array<i64: 2, 8>}, {pipeline_mode = #tpu.pipeline_mode<synchronous>, transform_indices = @transform_2, window_bounds = array<i64: 768, 512>}, {pipeline_mode = #tpu.pipeline_mode<synchronous>, transform_indices = @transform_3, window_bounds = array<i64: 1, 512>}, {pipeline_mode = #tpu.pipeline_mode<synchronous>, transform_indices = @transform_4, window_bounds = array<i64: 1, 512>}, {pipeline_mode = #tpu.pipeline_mode<synchronous>, transform_indices = @transform_5, window_bounds = array<i64: 512, 512>}, {pipeline_mode = #tpu.pipeline_mode<synchronous>, transform_indices = @transform_6, window_bounds = array<i64: 1, 512>}, {pipeline_mode = #tpu.pipeline_mode<synchronous>, transform_indices = @transform_7, window_bounds = array<i64: 1, 512>}, {pipeline_mode = #tpu.pipeline_mode<synchronous>, transform_indices = @transform_8, window_bounds = array<i64: 512, 1024>}, {pipeline_mode = #tpu.pipeline_mode<synchronous>, transform_indices = @transform_9, window_bounds = array<i64: 1, 1024>}, {pipeline_mode = #tpu.pipeline_mode<synchronous>, transform_indices = @transform_10, window_bounds = array<i64: 1, 1024>}, {pipeline_mode = #tpu.pipeline_mode<synchronous>, transform_indices = @transform_11, window_bounds = array<i64: 1024, 1024>}, {pipeline_mode = #tpu.pipeline_mode<synchronous>, transform_indices = @transform_12, window_bounds = array<i64: 1, 1024>}, {pipeline_mode = #tpu.pipeline_mode<synchronous>, transform_indices = @transform_13, window_bounds = array<i64: 1, 1024>}, {pipeline_mode = #tpu.pipeline_mode<synchronous>, transform_indices = @transform_14, window_bounds = array<i64: 768, 1024>}, {pipeline_mode = #tpu.pipeline_mode<synchronous>, transform_indices = @transform_15, window_bounds = array<i64: 1, 1024>}, {pipeline_mode = #tpu.pipeline_mode<synchronous>, transform_indices = @transform_16, window_bounds = array<i64: 1, 1024>}, {pipeline_mode = #tpu.pipeline_mode<synchronous>, transform_indices = @transform_17, window_bounds = array<i64: 1024, 32>}, {pipeline_mode = #tpu.pipeline_mode<synchronous>, transform_indices = @transform_18, window_bounds = array<i64: 8, 32>}, {pipeline_mode = #tpu.pipeline_mode<synchronous>, transform_indices = @transform_19, window_bounds = array<i64: 1, 32>}, {pipeline_mode = #tpu.pipeline_mode<synchronous>, transform_indices = @transform_20, window_bounds = array<i64: 32, 16>}, {pipeline_mode = #tpu.pipeline_mode<synchronous>, transform_indices = @transform_21, window_bounds = array<i64: 1, 16>}, {pipeline_mode = #tpu.pipeline_mode<synchronous>, transform_indices = @transform_22, window_bounds = array<i64: 16, 8>}, {pipeline_mode = #tpu.pipeline_mode<synchronous>, transform_indices = @transform_23, window_bounds = array<i64: 1, 8>}, {pipeline_mode = #tpu.pipeline_mode<synchronous>, transform_indices = @transform_24, window_bounds = array<i64: 8, 1>}, {pipeline_mode = #tpu.pipeline_mode<synchronous>, transform_indices = @transform_25, window_bounds = array<i64: 1, 1>}, {transform_indices = @transform_26, window_bounds = array<i64: 2, 1>}]} {
    %c0 = arith.constant 0 : index
    %c0_0 = arith.constant 0 : index
    %0 = vector.load %arg1[%c0, %c0_0] : memref<2x768xbf16, #tpu.memory_space<vmem>>, vector<2x768xbf16>
    %c0_1 = arith.constant 0 : index
    %c0_2 = arith.constant 0 : index
    %1 = vector.load %arg3[%c0_1, %c0_2] : memref<768x512xi8, #tpu.memory_space<vmem>>, vector<768x512xi8>
    %2 = arith.sitofp %1 : vector<768x512xi8> to vector<768x512xf32>
    %3 = arith.truncf %2 : vector<768x512xf32> to vector<768x512xbf16>
    %cst = arith.constant dense<0.000000e+00> : vector<2x512xf32>
    %4 = tpu.matmul %0, %3, %cst {dimension_numbers = #tpu.dot_dimension_numbers<[1], [0], [0], [1], [0, 0, 1, 1], [], []>} : vector<2x768xbf16>, vector<768x512xbf16>, vector<2x512xf32> -> vector<2x512xf32>
    %c0_3 = arith.constant 0 : index
    %c0_4 = arith.constant 0 : index
    %5 = vector.load %arg4[%c0_3, %c0_4] : memref<1x512xf32, #tpu.memory_space<vmem>>, vector<1x512xf32>
    %6 = vector.broadcast %5 : vector<1x512xf32> to vector<2x512xf32>
    %7 = arith.mulf %4, %6 : vector<2x512xf32>
    %c0_5 = arith.constant 0 : index
    %c0_6 = arith.constant 0 : index
    %8 = vector.load %arg5[%c0_5, %c0_6] : memref<1x512xf32, #tpu.memory_space<vmem>>, vector<1x512xf32>
    %9 = vector.broadcast %8 : vector<1x512xf32> to vector<2x512xf32>
    %10 = arith.addf %7, %9 : vector<2x512xf32>
    %cst_7 = arith.constant 1.000000e-01 : f32
    %11 = vector.broadcast %cst_7 : f32 to vector<2x512xf32>
    %12 = arith.mulf %11, %10 : vector<2x512xf32>
    %13 = arith.maximumf %10, %12 : vector<2x512xf32>
    %14 = arith.truncf %13 : vector<2x512xf32> to vector<2x512xbf16>
    %c0_8 = arith.constant 0 : index
    %c0_9 = arith.constant 0 : index
    %15 = vector.load %arg6[%c0_8, %c0_9] : memref<512x512xi8, #tpu.memory_space<vmem>>, vector<512x512xi8>
    %16 = arith.sitofp %15 : vector<512x512xi8> to vector<512x512xf32>
    %17 = arith.truncf %16 : vector<512x512xf32> to vector<512x512xbf16>
    %cst_10 = arith.constant dense<0.000000e+00> : vector<2x512xf32>
    %18 = tpu.matmul %14, %17, %cst_10 {dimension_numbers = #tpu.dot_dimension_numbers<[1], [0], [0], [1], [0, 0, 1, 1], [], []>} : vector<2x512xbf16>, vector<512x512xbf16>, vector<2x512xf32> -> vector<2x512xf32>
    %c0_11 = arith.constant 0 : index
    %c0_12 = arith.constant 0 : index
    %19 = vector.load %arg7[%c0_11, %c0_12] : memref<1x512xf32, #tpu.memory_space<vmem>>, vector<1x512xf32>
    %20 = vector.broadcast %19 : vector<1x512xf32> to vector<2x512xf32>
    %21 = arith.mulf %18, %20 : vector<2x512xf32>
    %c0_13 = arith.constant 0 : index
    %c0_14 = arith.constant 0 : index
    %22 = vector.load %arg8[%c0_13, %c0_14] : memref<1x512xf32, #tpu.memory_space<vmem>>, vector<1x512xf32>
    %23 = vector.broadcast %22 : vector<1x512xf32> to vector<2x512xf32>
    %24 = arith.addf %21, %23 : vector<2x512xf32>
    %cst_15 = arith.constant 1.000000e-01 : f32
    %25 = vector.broadcast %cst_15 : f32 to vector<2x512xf32>
    %26 = arith.mulf %25, %24 : vector<2x512xf32>
    %27 = arith.maximumf %24, %26 : vector<2x512xf32>
    %28 = arith.truncf %27 : vector<2x512xf32> to vector<2x512xbf16>
    %c0_16 = arith.constant 0 : index
    %c0_17 = arith.constant 0 : index
    %29 = vector.load %arg9[%c0_16, %c0_17] : memref<512x1024xi8, #tpu.memory_space<vmem>>, vector<512x1024xi8>
    %30 = arith.sitofp %29 : vector<512x1024xi8> to vector<512x1024xf32>
    %31 = arith.truncf %30 : vector<512x1024xf32> to vector<512x1024xbf16>
    %cst_18 = arith.constant dense<0.000000e+00> : vector<2x1024xf32>
    %32 = tpu.matmul %28, %31, %cst_18 {dimension_numbers = #tpu.dot_dimension_numbers<[1], [0], [0], [1], [0, 0, 1, 1], [], []>} : vector<2x512xbf16>, vector<512x1024xbf16>, vector<2x1024xf32> -> vector<2x1024xf32>
    %c0_19 = arith.constant 0 : index
    %c0_20 = arith.constant 0 : index
    %33 = vector.load %arg10[%c0_19, %c0_20] : memref<1x1024xf32, #tpu.memory_space<vmem>>, vector<1x1024xf32>
    %34 = vector.broadcast %33 : vector<1x1024xf32> to vector<2x1024xf32>
    %35 = arith.mulf %32, %34 : vector<2x1024xf32>
    %c0_21 = arith.constant 0 : index
    %c0_22 = arith.constant 0 : index
    %36 = vector.load %arg11[%c0_21, %c0_22] : memref<1x1024xf32, #tpu.memory_space<vmem>>, vector<1x1024xf32>
    %37 = vector.broadcast %36 : vector<1x1024xf32> to vector<2x1024xf32>
    %38 = arith.addf %35, %37 : vector<2x1024xf32>
    %cst_23 = arith.constant 1.000000e-01 : f32
    %39 = vector.broadcast %cst_23 : f32 to vector<2x1024xf32>
    %40 = arith.mulf %39, %38 : vector<2x1024xf32>
    %41 = arith.maximumf %38, %40 : vector<2x1024xf32>
    %42 = arith.truncf %41 : vector<2x1024xf32> to vector<2x1024xbf16>
    %c0_24 = arith.constant 0 : index
    %c0_25 = arith.constant 0 : index
    %43 = vector.load %arg12[%c0_24, %c0_25] : memref<1024x1024xi8, #tpu.memory_space<vmem>>, vector<1024x1024xi8>
    %44 = arith.sitofp %43 : vector<1024x1024xi8> to vector<1024x1024xf32>
    %45 = arith.truncf %44 : vector<1024x1024xf32> to vector<1024x1024xbf16>
    %cst_26 = arith.constant dense<0.000000e+00> : vector<2x1024xf32>
    %46 = tpu.matmul %42, %45, %cst_26 {dimension_numbers = #tpu.dot_dimension_numbers<[1], [0], [0], [1], [0, 0, 1, 1], [], []>} : vector<2x1024xbf16>, vector<1024x1024xbf16>, vector<2x1024xf32> -> vector<2x1024xf32>
    %c0_27 = arith.constant 0 : index
    %c0_28 = arith.constant 0 : index
    %47 = vector.load %arg13[%c0_27, %c0_28] : memref<1x1024xf32, #tpu.memory_space<vmem>>, vector<1x1024xf32>
    %48 = vector.broadcast %47 : vector<1x1024xf32> to vector<2x1024xf32>
    %49 = arith.mulf %46, %48 : vector<2x1024xf32>
    %c0_29 = arith.constant 0 : index
    %c0_30 = arith.constant 0 : index
    %50 = vector.load %arg14[%c0_29, %c0_30] : memref<1x1024xf32, #tpu.memory_space<vmem>>, vector<1x1024xf32>
    %51 = vector.broadcast %50 : vector<1x1024xf32> to vector<2x1024xf32>
    %52 = arith.addf %49, %51 : vector<2x1024xf32>
    %cst_31 = arith.constant 1.000000e-01 : f32
    %53 = vector.broadcast %cst_31 : f32 to vector<2x1024xf32>
    %54 = arith.mulf %53, %52 : vector<2x1024xf32>
    %55 = arith.maximumf %52, %54 : vector<2x1024xf32>
    %c0_32 = arith.constant 0 : index
    %c0_33 = arith.constant 0 : index
    %56 = vector.load %arg15[%c0_32, %c0_33] : memref<768x1024xi8, #tpu.memory_space<vmem>>, vector<768x1024xi8>
    %57 = arith.sitofp %56 : vector<768x1024xi8> to vector<768x1024xf32>
    %58 = arith.truncf %57 : vector<768x1024xf32> to vector<768x1024xbf16>
    %cst_34 = arith.constant dense<0.000000e+00> : vector<2x1024xf32>
    %59 = tpu.matmul %0, %58, %cst_34 {dimension_numbers = #tpu.dot_dimension_numbers<[1], [0], [0], [1], [0, 0, 1, 1], [], []>} : vector<2x768xbf16>, vector<768x1024xbf16>, vector<2x1024xf32> -> vector<2x1024xf32>
    %c0_35 = arith.constant 0 : index
    %c0_36 = arith.constant 0 : index
    %60 = vector.load %arg16[%c0_35, %c0_36] : memref<1x1024xf32, #tpu.memory_space<vmem>>, vector<1x1024xf32>
    %61 = vector.broadcast %60 : vector<1x1024xf32> to vector<2x1024xf32>
    %62 = arith.mulf %59, %61 : vector<2x1024xf32>
    %c0_37 = arith.constant 0 : index
    %c0_38 = arith.constant 0 : index
    %63 = vector.load %arg17[%c0_37, %c0_38] : memref<1x1024xf32, #tpu.memory_space<vmem>>, vector<1x1024xf32>
    %64 = vector.broadcast %63 : vector<1x1024xf32> to vector<2x1024xf32>
    %65 = arith.addf %62, %64 : vector<2x1024xf32>
    %66 = arith.addf %55, %65 : vector<2x1024xf32>
    %67 = arith.truncf %66 : vector<2x1024xf32> to vector<2x1024xbf16>
    %c0_39 = arith.constant 0 : index
    %c0_40 = arith.constant 0 : index
    %68 = vector.load %arg18[%c0_39, %c0_40] : memref<1024x32xbf16, #tpu.memory_space<vmem>>, vector<1024x32xbf16>
    %cst_41 = arith.constant dense<0.000000e+00> : vector<2x32xf32>
    %69 = tpu.matmul %67, %68, %cst_41 {dimension_numbers = #tpu.dot_dimension_numbers<[1], [0], [0], [1], [0, 0, 1, 1], [], []>} : vector<2x1024xbf16>, vector<1024x32xbf16>, vector<2x32xf32> -> vector<2x32xf32>
    %c0_42 = arith.constant 0 : index
    %c0_43 = arith.constant 0 : index
    %70 = vector.load %arg2[%c0_42, %c0_43] : memref<2x8xbf16, #tpu.memory_space<vmem>>, vector<2x8xbf16>
    %c0_44 = arith.constant 0 : index
    %c0_45 = arith.constant 0 : index
    %71 = vector.load %arg19[%c0_44, %c0_45] : memref<8x32xbf16, #tpu.memory_space<vmem>>, vector<8x32xbf16>
    %cst_46 = arith.constant dense<0.000000e+00> : vector<2x32xf32>
    %72 = tpu.matmul %70, %71, %cst_46 {dimension_numbers = #tpu.dot_dimension_numbers<[1], [0], [0], [1], [0, 0, 1, 1], [], []>} : vector<2x8xbf16>, vector<8x32xbf16>, vector<2x32xf32> -> vector<2x32xf32>
    %73 = arith.addf %69, %72 : vector<2x32xf32>
    %c0_47 = arith.constant 0 : index
    %c0_48 = arith.constant 0 : index
    %74 = vector.load %arg20[%c0_47, %c0_48] : memref<1x32xf32, #tpu.memory_space<vmem>>, vector<1x32xf32>
    %75 = vector.broadcast %74 : vector<1x32xf32> to vector<2x32xf32>
    %76 = arith.addf %73, %75 : vector<2x32xf32>
    %cst_49 = arith.constant 1.000000e-01 : f32
    %77 = vector.broadcast %cst_49 : f32 to vector<2x32xf32>
    %78 = arith.mulf %77, %76 : vector<2x32xf32>
    %79 = arith.maximumf %76, %78 : vector<2x32xf32>
    %80 = arith.truncf %79 : vector<2x32xf32> to vector<2x32xbf16>
    %c0_50 = arith.constant 0 : index
    %c0_51 = arith.constant 0 : index
    %81 = vector.load %arg21[%c0_50, %c0_51] : memref<32x16xbf16, #tpu.memory_space<vmem>>, vector<32x16xbf16>
    %cst_52 = arith.constant dense<0.000000e+00> : vector<2x16xf32>
    %82 = tpu.matmul %80, %81, %cst_52 {dimension_numbers = #tpu.dot_dimension_numbers<[1], [0], [0], [1], [0, 0, 1, 1], [], []>} : vector<2x32xbf16>, vector<32x16xbf16>, vector<2x16xf32> -> vector<2x16xf32>
    %c0_53 = arith.constant 0 : index
    %c0_54 = arith.constant 0 : index
    %83 = vector.load %arg22[%c0_53, %c0_54] : memref<1x16xf32, #tpu.memory_space<vmem>>, vector<1x16xf32>
    %84 = vector.broadcast %83 : vector<1x16xf32> to vector<2x16xf32>
    %85 = arith.addf %82, %84 : vector<2x16xf32>
    %cst_55 = arith.constant 1.000000e-01 : f32
    %86 = vector.broadcast %cst_55 : f32 to vector<2x16xf32>
    %87 = arith.mulf %86, %85 : vector<2x16xf32>
    %88 = arith.maximumf %85, %87 : vector<2x16xf32>
    %89 = arith.truncf %88 : vector<2x16xf32> to vector<2x16xbf16>
    %c0_56 = arith.constant 0 : index
    %c0_57 = arith.constant 0 : index
    %90 = vector.load %arg23[%c0_56, %c0_57] : memref<16x8xbf16, #tpu.memory_space<vmem>>, vector<16x8xbf16>
    %cst_58 = arith.constant dense<0.000000e+00> : vector<2x8xf32>
    %91 = tpu.matmul %89, %90, %cst_58 {dimension_numbers = #tpu.dot_dimension_numbers<[1], [0], [0], [1], [0, 0, 1, 1], [], []>} : vector<2x16xbf16>, vector<16x8xbf16>, vector<2x8xf32> -> vector<2x8xf32>
    %c0_59 = arith.constant 0 : index
    %c0_60 = arith.constant 0 : index
    %92 = vector.load %arg24[%c0_59, %c0_60] : memref<1x8xf32, #tpu.memory_space<vmem>>, vector<1x8xf32>
    %93 = vector.broadcast %92 : vector<1x8xf32> to vector<2x8xf32>
    %94 = arith.addf %91, %93 : vector<2x8xf32>
    %cst_61 = arith.constant 1.000000e-01 : f32
    %95 = vector.broadcast %cst_61 : f32 to vector<2x8xf32>
    %96 = arith.mulf %95, %94 : vector<2x8xf32>
    %97 = arith.maximumf %94, %96 : vector<2x8xf32>
    %98 = arith.truncf %97 : vector<2x8xf32> to vector<2x8xbf16>
    %c0_62 = arith.constant 0 : index
    %c0_63 = arith.constant 0 : index
    %99 = vector.load %arg25[%c0_62, %c0_63] : memref<8x1xbf16, #tpu.memory_space<vmem>>, vector<8x1xbf16>
    %cst_64 = arith.constant dense<0.000000e+00> : vector<2x1xf32>
    %100 = tpu.matmul %98, %99, %cst_64 {dimension_numbers = #tpu.dot_dimension_numbers<[1], [0], [0], [1], [0, 0, 1, 1], [], []>} : vector<2x8xbf16>, vector<8x1xbf16>, vector<2x1xf32> -> vector<2x1xf32>
    %c0_65 = arith.constant 0 : index
    %c0_66 = arith.constant 0 : index
    %101 = vector.load %arg26[%c0_65, %c0_66] : memref<1x1xf32, #tpu.memory_space<vmem>>, vector<1x1xf32>
    %102 = vector.broadcast %101 : vector<1x1xf32> to vector<2x1xf32>
    %103 = arith.addf %100, %102 : vector<2x1xf32>
    %c0_67 = arith.constant 0 : index
    %c0_68 = arith.constant 0 : index
    %104 = vector.load %arg27[%c0_67, %c0_68] : memref<2x1xf32, #tpu.memory_space<vmem>>, vector<2x1xf32>
    tpu.vector_store %arg27[%c0_67, %c0_68], %103 {strides = array<i32>} : memref<2x1xf32, #tpu.memory_space<vmem>>, vector<2x1xf32>,
    return
  }
  func.func @transform_0(%arg0: i32) -> (i32, i32) {
    %c0_i32 = arith.constant 0 : i32
    %c0_i32_0 = arith.constant 0 : i32
    return %arg0, %c0_i32 : i32, i32
  }
  func.func @transform_1(%arg0: i32) -> (i32, i32) {
    %c0_i32 = arith.constant 0 : i32
    %c0_i32_0 = arith.constant 0 : i32
    return %arg0, %c0_i32 : i32, i32
  }
  func.func @transform_2(%arg0: i32) -> (i32, i32) {
    %c0_i32 = arith.constant 0 : i32
    %c0_i32_0 = arith.constant 0 : i32
    %c0_i32_1 = arith.constant 0 : i32
    return %c0_i32, %c0_i32_0 : i32, i32
  }
  func.func @transform_3(%arg0: i32) -> (i32, i32) {
    %c0_i32 = arith.constant 0 : i32
    %c0_i32_0 = arith.constant 0 : i32
    %c0_i32_1 = arith.constant 0 : i32
    return %c0_i32, %c0_i32_0 : i32, i32
  }
  func.func @transform_4(%arg0: i32) -> (i32, i32) {
    %c0_i32 = arith.constant 0 : i32
    %c0_i32_0 = arith.constant 0 : i32
    %c0_i32_1 = arith.constant 0 : i32
    return %c0_i32, %c0_i32_0 : i32, i32
  }
  func.func @transform_5(%arg0: i32) -> (i32, i32) {
    %c0_i32 = arith.constant 0 : i32
    %c0_i32_0 = arith.constant 0 : i32
    %c0_i32_1 = arith.constant 0 : i32
    return %c0_i32, %c0_i32_0 : i32, i32
  }
  func.func @transform_6(%arg0: i32) -> (i32, i32) {
    %c0_i32 = arith.constant 0 : i32
    %c0_i32_0 = arith.constant 0 : i32
    %c0_i32_1 = arith.constant 0 : i32
    return %c0_i32, %c0_i32_0 : i32, i32
  }
  func.func @transform_7(%arg0: i32) -> (i32, i32) {
    %c0_i32 = arith.constant 0 : i32
    %c0_i32_0 = arith.constant 0 : i32
    %c0_i32_1 = arith.constant 0 : i32
    return %c0_i32, %c0_i32_0 : i32, i32
  }
  func.func @transform_8(%arg0: i32) -> (i32, i32) {
    %c0_i32 = arith.constant 0 : i32
    %c0_i32_0 = arith.constant 0 : i32
    %c0_i32_1 = arith.constant 0 : i32
    return %c0_i32, %c0_i32_0 : i32, i32
  }
  func.func @transform_9(%arg0: i32) -> (i32, i32) {
    %c0_i32 = arith.constant 0 : i32
    %c0_i32_0 = arith.constant 0 : i32
    %c0_i32_1 = arith.constant 0 : i32
    return %c0_i32, %c0_i32_0 : i32, i32
  }
  func.func @transform_10(%arg0: i32) -> (i32, i32) {
    %c0_i32 = arith.constant 0 : i32
    %c0_i32_0 = arith.constant 0 : i32
    %c0_i32_1 = arith.constant 0 : i32
    return %c0_i32, %c0_i32_0 : i32, i32
  }
  func.func @transform_11(%arg0: i32) -> (i32, i32) {
    %c0_i32 = arith.constant 0 : i32
    %c0_i32_0 = arith.constant 0 : i32
    %c0_i32_1 = arith.constant 0 : i32
    return %c0_i32, %c0_i32_0 : i32, i32
  }
  func.func @transform_12(%arg0: i32) -> (i32, i32) {
    %c0_i32 = arith.constant 0 : i32
    %c0_i32_0 = arith.constant 0 : i32
    %c0_i32_1 = arith.constant 0 : i32
    return %c0_i32, %c0_i32_0 : i32, i32
  }
  func.func @transform_13(%arg0: i32) -> (i32, i32) {
    %c0_i32 = arith.constant 0 : i32
    %c0_i32_0 = arith.constant 0 : i32
    %c0_i32_1 = arith.constant 0 : i32
    return %c0_i32, %c0_i32_0 : i32, i32
  }
  func.func @transform_14(%arg0: i32) -> (i32, i32) {
    %c0_i32 = arith.constant 0 : i32
    %c0_i32_0 = arith.constant 0 : i32
    %c0_i32_1 = arith.constant 0 : i32
    return %c0_i32, %c0_i32_0 : i32, i32
  }
  func.func @transform_15(%arg0: i32) -> (i32, i32) {
    %c0_i32 = arith.constant 0 : i32
    %c0_i32_0 = arith.constant 0 : i32
    %c0_i32_1 = arith.constant 0 : i32
    return %c0_i32, %c0_i32_0 : i32, i32
  }
  func.func @transform_16(%arg0: i32) -> (i32, i32) {
    %c0_i32 = arith.constant 0 : i32
    %c0_i32_0 = arith.constant 0 : i32
    %c0_i32_1 = arith.constant 0 : i32
    return %c0_i32, %c0_i32_0 : i32, i32
  }
  func.func @transform_17(%arg0: i32) -> (i32, i32) {
    %c0_i32 = arith.constant 0 : i32
    %c0_i32_0 = arith.constant 0 : i32
    %c0_i32_1 = arith.constant 0 : i32
    return %c0_i32, %c0_i32_0 : i32, i32
  }
  func.func @transform_18(%arg0: i32) -> (i32, i32) {
    %c0_i32 = arith.constant 0 : i32
    %c0_i32_0 = arith.constant 0 : i32
    %c0_i32_1 = arith.constant 0 : i32
    return %c0_i32, %c0_i32_0 : i32, i32
  }
  func.func @transform_19(%arg0: i32) -> (i32, i32) {
    %c0_i32 = arith.constant 0 : i32
    %c0_i32_0 = arith.constant 0 : i32
    %c0_i32_1 = arith.constant 0 : i32
    return %c0_i32, %c0_i32_0 : i32, i32
  }
  func.func @transform_20(%arg0: i32) -> (i32, i32) {
    %c0_i32 = arith.constant 0 : i32
    %c0_i32_0 = arith.constant 0 : i32
    %c0_i32_1 = arith.constant 0 : i32
    return %c0_i32, %c0_i32_0 : i32, i32
  }
  func.func @transform_21(%arg0: i32) -> (i32, i32) {
    %c0_i32 = arith.constant 0 : i32
    %c0_i32_0 = arith.constant 0 : i32
    %c0_i32_1 = arith.constant 0 : i32
    return %c0_i32, %c0_i32_0 : i32, i32
  }
  func.func @transform_22(%arg0: i32) -> (i32, i32) {
    %c0_i32 = arith.constant 0 : i32
    %c0_i32_0 = arith.constant 0 : i32
    %c0_i32_1 = arith.constant 0 : i32
    return %c0_i32, %c0_i32_0 : i32, i32
  }
  func.func @transform_23(%arg0: i32) -> (i32, i32) {
    %c0_i32 = arith.constant 0 : i32
    %c0_i32_0 = arith.constant 0 : i32
    %c0_i32_1 = arith.constant 0 : i32
    return %c0_i32, %c0_i32_0 : i32, i32
  }
  func.func @transform_24(%arg0: i32) -> (i32, i32) {
    %c0_i32 = arith.constant 0 : i32
    %c0_i32_0 = arith.constant 0 : i32
    %c0_i32_1 = arith.constant 0 : i32
    return %c0_i32, %c0_i32_0 : i32, i32
  }
  func.func @transform_25(%arg0: i32) -> (i32, i32) {
    %c0_i32 = arith.constant 0 : i32
    %c0_i32_0 = arith.constant 0 : i32
    %c0_i32_1 = arith.constant 0 : i32
    return %c0_i32, %c0_i32_0 : i32, i32
  }
  func.func @transform_26(%arg0: i32) -> (i32, i32) {
    %c0_i32 = arith.constant 0 : i32
    %c0_i32_0 = arith.constant 0 : i32
    return %arg0, %c0_i32 : i32, i32
  }
}

</mosaic_0001>

<bundles_post_ra>
// kernel: forward.1
= control target key start
LH: loop header
LB: loop body
LE: loop exit
PB: predicated region body
PF: predicated region fallthrough
CT: control target
= control target key end

     0   :  { %s7815_s0 = inlined_call_operand.vmem [shape: bf16[2,768], index: 0, kind: input, shape index: {}]   ;;  %s7816_s1 = inlined_call_operand.vmem [shape: bf16[2,8], index: 1, kind: input, shape index: {}]   ;;  %s7817_s2 = inlined_call_operand.hbm [shape: s8[768,512], index: 2, kind: input, shape index: {}]   ;;  %s7818_s3 = inlined_call_operand.hbm [shape: f32[1,512], index: 3, kind: input, shape index: {}]   ;;  %s7819_s4 = inlined_call_operand.hbm [shape: f32[1,512], index: 4, kind: input, shape index: {}]   ;;  %s7820_s5 = inlined_call_operand.hbm [shape: s8[512,512], index: 5, kind: input, shape index: {}]   ;;  %s7821_s6 = inlined_call_operand.hbm [shape: f32[1,512], index: 6, kind: input, shape index: {}]   ;;  %s7822_s7 = inlined_call_operand.hbm [shape: f32[1,512], index: 7, kind: input, shape index: {}]   ;;  %s7823_s8 = inlined_call_operand.vmem [shape: s8[512,1024], index: 8, kind: input, shape index: {}]   ;;  %s7824_s9 = inlined_call_operand.vmem [shape: f32[1,1024], index: 9, kind: input, shape index: {}]   ;;  %s7825_s10 = inlined_call_operand.vmem [shape: f32[1,1024], index: 10, kind: input, shape index: {}]   ;;  %s7826_s11 = inlined_call_operand.hbm [shape: s8[1024,1024], index: 11, kind: input, shape index: {}]   ;;  %s7827_s12 = inlined_call_operand.hbm [shape: f32[1,1024], index: 12, kind: input, shape index: {}]   ;;  %s7828_s13 = inlined_call_operand.hbm [shape: f32[1,1024], index: 13, kind: input, shape index: {}]   ;;  %s7829_s14 = inlined_call_operand.hbm [shape: s8[768,1024], index: 14, kind: input, shape index: {}]   ;;  %s7830_s15 = inlined_call_operand.hbm [shape: f32[1,1024], index: 15, kind: input, shape index: {}]   ;;  %s7831_s16 = inlined_call_operand.hbm [shape: f32[1,1024], index: 16, kind: input, shape index: {}]   ;;  %s7832_s17 = inlined_call_operand.vmem [shape: bf16[1024,32], index: 17, kind: input, shape index: {}]   ;;  %s7833_s18 = inlined_call_operand.hbm [shape: bf16[8,32], index: 18, kind: input, shape index: {}]   ;;  %s7834_s19 = inlined_call_operand.hbm [shape: f32[1,32], index: 19, kind: input, shape index: {}]   ;;  %s7835_s20 = inlined_call_operand.vmem [shape: bf16[32,16], index: 20, kind: input, shape index: {}]   ;;  %s7836_s21 = inlined_call_operand.hbm [shape: f32[1,16], index: 21, kind: input, shape index: {}]   ;;  %s7837_s22 = inlined_call_operand.vmem [shape: bf16[16,8], index: 22, kind: input, shape index: {}]   ;;  %s7838_s23 = inlined_call_operand.hbm [shape: f32[1,8], index: 23, kind: input, shape index: {}]   ;;  %s7839_s24 = inlined_call_operand.vmem [shape: bf16[8,1], index: 24, kind: input, shape index: {}]   ;;  %s7840_s25 = inlined_call_operand.<no memory space> [shape: f32[1,1], index: 25, kind: input, shape index: {}]   ;;  %s7841_s26 = inlined_call_operand.vmem [shape: f32[2,1], index: 26, kind: output, shape index: {}]  }
   0x1   :  { %7843 = sst [smem:[#allocation37_spill]] %s7815_s0  ;;  %v31_v0 = vstv %s7840_s25 }
   0x2   :  { %7844 = sst [smem:[#allocation38_spill]] %s7816_s1  ;;  %32 = vst [vmem:[#allocation2] sm:$0x1] %v31_v0 }
   0x3   :  { %7845 = sst [smem:[#allocation39_spill]] %s7817_s2 }
   0x4   :  { %7846 = sst [smem:[#allocation40_spill]] %s7818_s3 }
   0x5   :  { %7847 = sst [smem:[#allocation41_spill]] %s7819_s4 }
   0x6   :  { %7848 = sst [smem:[#allocation42_spill]] %s7820_s5 }
   0x7   :  { %7849 = sst [smem:[#allocation43_spill]] %s7821_s6 }
   0x8   :  { %7850 = sst [smem:[#allocation44_spill]] %s7822_s7 }
   0x9   :  { %7851 = sst [smem:[#allocation45_spill]] %s7823_s8 }
   0xa   :  { %7852 = sst [smem:[#allocation46_spill]] %s7824_s9 }
   0xb   :  { %7853 = sst [smem:[#allocation47_spill]] %s7825_s10 }
   0xc   :  { %33 = vsyncpa [#allocation4], 0 }
   0xd   :  { %34 = vsyncpa [#allocation6], 0 }
   0xe   :  { %35 = vsyncpa [#allocation9], 0 }
   0xf   :  { %36 = vsyncpa [#allocation12], 0 }
  0x10   :  { %37 = vsyncpa [#allocation15], 0 }
  0x11   :  { %38 = vsyncpa [#allocation18], 0 }
  0x12   :  { %39 = vsyncpa [#allocation21], 0 }
  0x13   :  { %40 = vsyncpa [#allocation24], 0 }
  0x14   :  { %41 = vsyncpa [#allocation27], 0  ;;  %s6477_s7 = smov [#allocation5]  }
  0x15   :  { %s64_s28 = sshll.u32 %s6477_s7, 4  ;;  %s65_s28 = int_to_ptr.vmem [resolvable:$true] %s64_s28 }
  0x16   :  { %s6147_s8 = scalar_lea.vmem %s65_s28, 64  ;;  %p6152_p1 = scmp.lt.s32.totalorder %s65_s28, %s65_s28 }
  0x17   :  { %p6148_p0 = scmp.ne.s32.totalorder %s65_s28, %s6147_s8  ;;  %p6153_p2 = scmp.lt.s32.totalorder %s6147_s8, %s6147_s8 }
  0x19   :  { %p6154_p3 = por %p6153_p2, %p6152_p1 }
  0x1b   :  { %p6155_p4 = pnand %p6154_p3, %p6148_p0 }
  0x1d   :  { %6158 = shalt.err (!%p6155_p4)
}
  0x1e   :  { %s7854_s29 = sld [smem:[#allocation40_spill]]  ;;  %s6478_s0 = smov [#allocation8]  }
  0x1f   :  { %s83_s9 = sshll.u32 %s6478_s0, 4  ;;  %s6479_s30 = smov [#allocation11]   ;;  %s84_s9 = int_to_ptr.vmem [resolvable:$true] %s83_s9 }
  0x20   :  { %s106_s2 = sshll.u32 %s6479_s30, 4  ;;  %s6167_s5 = scalar_lea.vmem %s84_s9, 8192  ;;  %s107_s2 = int_to_ptr.vmem [resolvable:$true] %s106_s2 }
  0x21   :  { %p6168_p5 = scmp.ne.s32.totalorder %s84_s9, %s6167_s5  ;;  %p6172_p6 = scmp.lt.s32.totalorder %s84_s9, %s84_s9 }
  0x22   :  { %p6173_p7 = scmp.lt.s32.totalorder %s6167_s5, %s6167_s5 }
  0x24   :  { %67 = dma.hbm_to_vmem [thread:$0]  %s7854_s29, 64, %s65_s28, [#allocation6]  }
  0x25   :  { %p6174_p8 = por %p6173_p7, %p6172_p6 }
  0x27   :  { %p6175_p9 = pnand %p6174_p8, %p6168_p5 }
  0x29   :  { %6178 = shalt.err (!%p6175_p9)
}
  0x2a   :  { %s6480_s10 = smov 512   ;;  %s6481_s6 = smov 32  }
  0x2b   :  { %s7855_s3 = sld [smem:[#allocation42_spill]]  ;;  %s6187_s7 = scalar_lea.vmem %s107_s2, 64 }
  0x2c   :  { %p6188_p10 = scmp.ne.s32.totalorder %s107_s2, %s6187_s7  ;;  %p6192_p11 = scmp.lt.s32.totalorder %s107_s2, %s107_s2 }
  0x2d   :  { %p6193_p12 = scmp.lt.s32.totalorder %s6187_s7, %s6187_s7 }
  0x2f   :  { %p6194_p13 = por %p6193_p12, %p6192_p11 }
  0x31   :  { %89 = dma.hbm_to_vmem [thread:$0]  %s7855_s3, 8192, %s84_s9, [#allocation9], %s6480_s10, %s6480_s10, %s6481_s6  }
  0x32   :  { %p6195_p0 = pnand %p6194_p13, %p6188_p10 }
  0x34   :  { %6198 = shalt.err (!%p6195_p0)
}
  0x35   :  { %s7856_s25 = sld [smem:[#allocation44_spill]]  ;;  %s6482_s4 = smov [#allocation14]  }
  0x36   :  { %s134_s29 = sshll.u32 %s6482_s4, 4  ;;  %s135_s29 = int_to_ptr.vmem [resolvable:$true] %s134_s29 }
  0x37   :  { %s6207_s0 = scalar_lea.vmem %s135_s29, 128  ;;  %p6212_p2 = scmp.lt.s32.totalorder %s135_s29, %s135_s29 }
  0x38   :  { %p6208_p1 = scmp.ne.s32.totalorder %s135_s29, %s6207_s0  ;;  %p6213_p3 = scmp.lt.s32.totalorder %s6207_s0, %s6207_s0 }
  0x3a   :  { %p6214_p4 = por %p6213_p3, %p6212_p2 }
  0x3b   :  { %109 = dma.hbm_to_vmem [thread:$0]  %s7856_s25, 64, %s107_s2, [#allocation12]  }
  0x3c   :  { %p6215_p5 = pnand %p6214_p4, %p6208_p1 }
  0x3e   :  { %6218 = shalt.err (!%p6215_p5)
}
  0x3f   :  { %137 = dma.hbm_to_vmem [thread:$0]  %s7827_s12, 128, %s135_s29, [#allocation15]  }
  0x40   :  { %s6483_s5 = smov [#allocation17]   ;;  %s6484_s27 = smov [#allocation20]  }
  0x41   :  { %s153_s1 = sshll.u32 %s6483_s5, 4  ;;  %s176_s3 = sshll.u32 %s6484_s27, 4  ;;  %s154_s1 = int_to_ptr.vmem [resolvable:$true] %s153_s1  ;;  %s177_s3 = int_to_ptr.vmem [resolvable:$true] %s176_s3 }
  0x42   :  { %s6227_s2 = scalar_lea.vmem %s154_s1, 24576  ;;  %p6232_p7 = scmp.lt.s32.totalorder %s154_s1, %s154_s1 }
  0x43   :  { %p6228_p6 = scmp.ne.s32.totalorder %s154_s1, %s6227_s2  ;;  %p6233_p8 = scmp.lt.s32.totalorder %s6227_s2, %s6227_s2 }
  0x45   :  { %p6234_p9 = por %p6233_p8, %p6232_p7 }
  0x47   :  { %p6235_p10 = pnand %p6234_p9, %p6228_p6 }
  0x49   :  { %6238 = shalt.err (!%p6235_p10)
}
  0x4a   :  { %s6485_s7 = smov 1024   ;;  %s6486_s28 = smov 64  }
  0x4b   :  { %159 = dma.hbm_to_vmem [thread:$0]  %s7829_s14, 24576, %s154_s1, [#allocation18], %s6485_s7, %s6485_s7, %s6486_s28  }
  0x4c   :  { %s6247_s25 = scalar_lea.vmem %s177_s3, 128  ;;  %p6252_p12 = scmp.lt.s32.totalorder %s177_s3, %s177_s3 }
  0x4d   :  { %p6248_p11 = scmp.ne.s32.totalorder %s177_s3, %s6247_s25  ;;  %p6253_p13 = scmp.lt.s32.totalorder %s6247_s25, %s6247_s25 }
  0x4f   :  { %p6254_p0 = por %p6253_p13, %p6252_p12 }
  0x51   :  { %p6255_p1 = pnand %p6254_p0, %p6248_p11 }
  0x53   :  { %6258 = shalt.err (!%p6255_p1)
}
  0x54   :  { %179 = dma.hbm_to_vmem [thread:$0]  %s7831_s16, 128, %s177_s3, [#allocation21]  }
  0x55   :  { %s6487_s0 = smov [#allocation23]   ;;  %s6488_s30 = smov [#allocation3]  }
  0x56   :  { %s198_s9 = sshll.u32 %s6487_s0, 4  ;;  %s51_s5 = sshll.u32 %s6488_s30, 4  ;;  %s199_s9 = int_to_ptr.vmem [resolvable:$true] %s198_s9  ;;  %s52_s5 = int_to_ptr.vmem [resolvable:$true] %s51_s5 }
  0x57   :  { %s6267_s27 = scalar_lea.vmem %s199_s9, 16  ;;  %s6271_s14 = scalar_lea.vmem %s199_s9, 32 }
  0x58   :  { %p6268_p2 = scmp.ne.s32.totalorder %s199_s9, %s6267_s27  ;;  %p6272_p3 = scmp.lt.s32.totalorder %s199_s9, %s199_s9 }
  0x59   :  { %p6273_p4 = scmp.lt.s32.totalorder %s6271_s14, %s6267_s27 }
  0x5b   :  { %p6274_p5 = por %p6273_p4, %p6272_p3 }
  0x5d   :  { %p6275_p6 = pnand %p6274_p5, %p6268_p2 }
  0x5f   :  { %6278 = shalt.err (!%p6275_p6)
}
  0x60   :  { %201 = dma.hbm_to_vmem [thread:$0]  %s7834_s19, 16, %s199_s9, [#allocation24]  }
  0x61   :  { %s6287_s8 = scalar_lea.vmem %s52_s5, 12288  ;;  %p6292_p8 = scmp.lt.s32.totalorder %s52_s5, %s52_s5 }
  0x62   :  { %p6288_p7 = scmp.ne.s32.totalorder %s52_s5, %s6287_s8  ;;  %p6293_p9 = scmp.lt.s32.totalorder %s6287_s8, %s6287_s8 }
  0x64   :  { %p6294_p10 = por %p6293_p9, %p6292_p8 }
  0x66   :  { %p6295_p11 = pnand %p6294_p10, %p6288_p7 }
  0x68   :  { %6298 = shalt.err (!%p6295_p11)
}
  0x69   :  { %s7857_s12 = sld [smem:[#allocation39_spill]]  ;;  %s6489_s25 = smov [#allocation7]  }
  0x6a   :  { %s74_s4 = sshll.u32 %s6489_s25, 4  ;;  %s6490_s29 = smov [#allocation10]   ;;  %s75_s4 = int_to_ptr.vmem [resolvable:$true] %s74_s4 }
  0x6b   :  { %s96_s0 = sshll.u32 %s6490_s29, 4  ;;  %s6307_s19 = scalar_lea.vmem %s75_s4, 64  ;;  %s97_s0 = int_to_ptr.vmem [resolvable:$true] %s96_s0 }
  0x6c   :  { %p6308_p12 = scmp.ne.s32.totalorder %s75_s4, %s6307_s19  ;;  %p6312_p13 = scmp.lt.s32.totalorder %s75_s4, %s75_s4 }
  0x6d   :  { %p6313_p0 = scmp.lt.s32.totalorder %s6307_s19, %s6307_s19 }
  0x6f   :  { %57 = dma.hbm_to_vmem [thread:$0]  %s7857_s12, 12288, %s52_s5, [#allocation4], %s6480_s10, %s6480_s10, %s6481_s6  }
  0x70   :  { %p6314_p1 = por %p6313_p0, %p6312_p13 }
  0x72   :  { %p6315_p2 = pnand %p6314_p1, %p6308_p12 }
  0x74   :  { %6318 = shalt.err (!%p6315_p2)
}
  0x75   :  { %s7858_s27 = sld [smem:[#allocation41_spill]]  ;;  %s6327_s14 = scalar_lea.vmem %s97_s0, 64 }
  0x76   :  { %p6328_p3 = scmp.ne.s32.totalorder %s97_s0, %s6327_s14  ;;  %p6332_p4 = scmp.lt.s32.totalorder %s97_s0, %s97_s0 }
  0x77   :  { %p6333_p5 = scmp.lt.s32.totalorder %s6327_s14, %s6327_s14 }
  0x79   :  { %p6334_p6 = por %p6333_p5, %p6332_p4 }
  0x7b   :  { %77 = dma.hbm_to_vmem [thread:$0]  %s7858_s27, 64, %s75_s4, [#allocation6]  }
  0x7c   :  { %p6335_p7 = pnand %p6334_p6, %p6328_p3 }
  0x7e   :  { %6338 = shalt.err (!%p6335_p7)
}
  0x7f   :  { %s7859_s5 = sld [smem:[#allocation43_spill]]  ;;  %s6491_s1 = smov [#allocation13]  }
  0x80   :  { %s121_s2 = sshll.u32 %s6491_s1, 4  ;;  %s6492_s8 = smov [#allocation16]   ;;  %s122_s2 = int_to_ptr.vmem [resolvable:$true] %s121_s2 }
  0x81   :  { %s144_s16 = sshll.u32 %s6492_s8, 4  ;;  %s6347_s3 = scalar_lea.vmem %s122_s2, 32768  ;;  %s145_s16 = int_to_ptr.vmem [resolvable:$true] %s144_s16 }
  0x82   :  { %p6348_p8 = scmp.ne.s32.totalorder %s122_s2, %s6347_s3  ;;  %p6352_p9 = scmp.lt.s32.totalorder %s122_s2, %s122_s2 }
  0x83   :  { %p6353_p10 = scmp.lt.s32.totalorder %s6347_s3, %s6347_s3 }
  0x85   :  { %99 = dma.hbm_to_vmem [thread:$0]  %s7859_s5, 64, %s97_s0, [#allocation9]  }
  0x86   :  { %p6354_p11 = por %p6353_p10, %p6352_p9 }
  0x88   :  { %p6355_p12 = pnand %p6354_p11, %p6348_p8 }
  0x8a   :  { %6358 = shalt.err (!%p6355_p12)
}
  0x8b   :  { %127 = dma.hbm_to_vmem [thread:$0]  %s7826_s11, 32768, %s122_s2, [#allocation12], %s6485_s7, %s6485_s7, %s6486_s28  }
  0x8c   :  { %s6367_s4 = scalar_lea.vmem %s145_s16, 128  ;;  %p6372_p0 = scmp.lt.s32.totalorder %s145_s16, %s145_s16 }
  0x8d   :  { %p6368_p13 = scmp.ne.s32.totalorder %s145_s16, %s6367_s4  ;;  %p6373_p1 = scmp.lt.s32.totalorder %s6367_s4, %s6367_s4 }
  0x8f   :  { %p6374_p2 = por %p6373_p1, %p6372_p0 }
  0x91   :  { %p6375_p3 = pnand %p6374_p2, %p6368_p13 }
  0x93   :  { %6378 = shalt.err (!%p6375_p3)
}
  0x94   :  { %147 = dma.hbm_to_vmem [thread:$0]  %s7828_s13, 128, %s145_s16, [#allocation15]  }
  0x95   :  { %s6493_s19 = smov [#allocation19]   ;;  %s6494_s30 = smov [#allocation22]  }
  0x96   :  { %s166_s9 = sshll.u32 %s6493_s19, 4  ;;  %s188_s27 = sshll.u32 %s6494_s30, 4  ;;  %s167_s9 = int_to_ptr.vmem [resolvable:$true] %s166_s9  ;;  %s189_s27 = int_to_ptr.vmem [resolvable:$true] %s188_s27 }
  0x97   :  { %s6387_s14 = scalar_lea.vmem %s167_s9, 128  ;;  %p6392_p5 = scmp.lt.s32.totalorder %s167_s9, %s167_s9 }
  0x98   :  { %p6388_p4 = scmp.ne.s32.totalorder %s167_s9, %s6387_s14  ;;  %p6393_p6 = scmp.lt.s32.totalorder %s6387_s14, %s6387_s14 }
  0x9a   :  { %p6394_p7 = por %p6393_p6, %p6392_p5 }
  0x9c   :  { %p6395_p8 = pnand %p6394_p7, %p6388_p4 }
  0x9e   :  { %6398 = shalt.err (!%p6395_p8)
}
  0x9f   :  { %169 = dma.hbm_to_vmem [thread:$0]  %s7830_s15, 128, %s167_s9, [#allocation18]  }
  0xa0   :  { %s6407_s28 = scalar_lea.vmem %s189_s27, 64  ;;  %p6412_p10 = scmp.lt.s32.totalorder %s189_s27, %s189_s27 }
  0xa1   :  { %p6408_p9 = scmp.ne.s32.totalorder %s189_s27, %s6407_s28  ;;  %p6413_p11 = scmp.lt.s32.totalorder %s6407_s28, %s6407_s28 }
  0xa3   :  { %p6414_p12 = por %p6413_p11, %p6412_p10 }
  0xa5   :  { %p6415_p13 = pnand %p6414_p12, %p6408_p9 }
  0xa7   :  { %6418 = shalt.err (!%p6415_p13)
}
  0xa8   :  { %191 = dma.hbm_to_vmem [thread:$0]  %s7833_s18, 64, %s189_s27, [#allocation21]  }
  0xa9   :  { %s6495_s6 = smov [#allocation25]   ;;  %s6496_s1 = smov [#allocation26]  }
  0xaa   :  { %s210_s5 = sshll.u32 %s6495_s6, 4  ;;  %s222_s2 = sshll.u32 %s6496_s1, 4  ;;  %s211_s5 = int_to_ptr.vmem [resolvable:$true] %s210_s5  ;;  %s223_s2 = int_to_ptr.vmem [resolvable:$true] %s222_s2 }
  0xab   :  { %s6427_s8 = scalar_lea.vmem %s211_s5, 16  ;;  %s6431_s15 = scalar_lea.vmem %s211_s5, 32 }
  0xac   :  { %p6428_p0 = scmp.ne.s32.totalorder %s211_s5, %s6427_s8  ;;  %p6432_p1 = scmp.lt.s32.totalorder %s211_s5, %s211_s5 }
  0xad   :  { %p6433_p2 = scmp.lt.s32.totalorder %s6431_s15, %s6427_s8 }
  0xaf   :  { %p6434_p3 = por %p6433_p2, %p6432_p1 }
  0xb1   :  { %p6435_p4 = pnand %p6434_p3, %p6428_p0 }
  0xb3   :  { %6438 = shalt.err (!%p6435_p4)
}
  0xb4   :  { %213 = dma.hbm_to_vmem [thread:$0]  %s7836_s21, 16, %s211_s5, [#allocation24]  }
  0xb5   :  { %s6447_s12 = scalar_lea.vmem %s223_s2, 16  ;;  %s6451_s18 = scalar_lea.vmem %s223_s2, 32 }
  0xb6   :  { %p6448_p5 = scmp.ne.s32.totalorder %s223_s2, %s6447_s12  ;;  %p6452_p6 = scmp.lt.s32.totalorder %s223_s2, %s223_s2 }
  0xb7   :  { %p6453_p7 = scmp.lt.s32.totalorder %s6451_s18, %s6447_s12 }
  0xb9   :  { %p6454_p8 = por %p6453_p7, %p6452_p6 }
  0xbb   :  { %p6455_p9 = pnand %p6454_p8, %p6448_p5 }
  0xbd   :  { %6458 = shalt.err (!%p6455_p9)
}
  0xbe   :  { %225 = dma.hbm_to_vmem [thread:$0]  %s7838_s23, 16, %s223_s2, [#allocation27]  }
  0xbf   :  { %6459 = dma.done.wait [#allocation4], 12288  }
  0xc0   :  { %6460 = vsyncadd [#allocation4], 4294955008 }
  0xc1   :  { %6461 = dma.done.wait [#allocation6], 128  }
  0xc2   :  { %6462 = vsyncadd [#allocation6], 4294967168 }
  0xc3   :  { %6463 = dma.done.wait [#allocation9], 8256  }
  0xc4   :  { %6464 = vsyncadd [#allocation9], 4294959040 }
  0xc5   :  { %6465 = dma.done.wait [#allocation12], 32832  }
  0xc6   :  { %6466 = vsyncadd [#allocation12], 4294934464 }
  0xc7   :  { %6467 = dma.done.wait [#allocation15], 256  }
  0xc8   :  { %6468 = vsyncadd [#allocation15], 4294967040 }
  0xc9   :  { %6469 = dma.done.wait [#allocation18], 24704  }
  0xca   :  { %6470 = vsyncadd [#allocation18], 4294942592 }
  0xcb   :  { %6471 = dma.done.wait [#allocation21], 192  }
  0xcc   :  { %6472 = vsyncadd [#allocation21], 4294967104 }
  0xcd   :  { %6473 = dma.done.wait [#allocation24], 32  }
  0xce   :  { %6474 = vsyncadd [#allocation24], 4294967264 }
  0xcf   :  { %6475 = dma.done.wait [#allocation27], 16  }
  0xd0   :  { %6476 = vsyncadd [#allocation27], 4294967280  ;;  %v293_v1 = vld [vmem:[#allocation3 + $0x68] sm:$0xff]  ;;  %v292_v3 = vld [vmem:[#allocation3 + $0x60] sm:$0xff]  ;;  %v6497_v19 = vmov 1966171168   ;;  %v573_v21 = vlaneseq }
  0xd1   :  { %v325_v2 = vld [vmem:[#allocation3 + $0x168] sm:$0xff]  ;;  %v401_v4 = vunpack.c.l.s8.bf16 %v293_v1  ;;  %v405_v5 = vunpack.c.h.s8.bf16 %v293_v1  ;;  %v324_v8 = vld [vmem:[#allocation3 + $0x160] sm:$0xff]  ;;  %v404_v9 = vunpack.c.h.s8.bf16 %v292_v3  ;;  %v400_v13 = vunpack.c.l.s8.bf16 %v292_v3  ;;  %s7860_s29 = sld [smem:[#allocation37_spill]] }
  0xd2   :  { %v465_v6 = vunpack.c.l.s8.bf16 %v325_v2  ;;  %v469_v7 = vunpack.c.h.s8.bf16 %v325_v2  ;;  %v468_v10 = vunpack.c.h.s8.bf16 %v324_v8  ;;  %v289_v11 = vld [vmem:[#allocation3 + $0x48] sm:$0xff]  ;;  %v464_v14 = vunpack.c.l.s8.bf16 %v324_v8  ;;  %v288_v17 = vld [vmem:[#allocation3 + $0x40] sm:$0xff]  ;;  %s7861_s9 = sld [smem:[#allocation45_spill]] }
  0xd3   :  { %v321_v12 = vld [vmem:[#allocation3 + $0x148] sm:$0xff]  ;;  %622 = vmatprep.subr.bf16.mxu0 %v405_v5  ;;  %v397_v15 = vunpack.c.h.s8.bf16 %v289_v11  ;;  %v320_v18 = vld [vmem:[#allocation3 + $0x140] sm:$0xff]  ;;  %v571_v20 = vunpack.c.l.s4 %v6497_v19  ;;  %v396_v22 = vunpack.c.h.s8.bf16 %v288_v17  ;;  %v393_v24 = vunpack.c.l.s8.bf16 %v289_v11  ;;  %s7862_s28 = sld [smem:[#allocation46_spill]] }
  0xd4   :  { %663 = vmatprep.subr.bf16.mxu1 %v469_v7  ;;  %623 = vmatpush1.bf16.msra.mxu0 %v404_v9  ;;  %v461_v16 = vunpack.c.h.s8.bf16 %v321_v12  ;;  %v460_v23 = vunpack.c.h.s8.bf16 %v320_v18  ;;  %v457_v25 = vunpack.c.l.s8.bf16 %v321_v12  ;;  %v6698_v27 = vshrl.u32 %v573_v21, 7  ;;  %v285_v28 = vld [vmem:[#allocation3 + $0x28] sm:$0xff]  ;;  %v284_v34 = vld [vmem:[#allocation3 + $0x20] sm:$0xff]  ;;  %s7863_s6 = sld [smem:[#allocation47_spill]] }
  0xd5   :  { %664 = vmatpush1.bf16.msra.mxu1 %v468_v10  ;;  %624 = vmatprep.subr.bf16.mxu0 %v401_v4  ;;  %v572_v26 = vunpack.c.0.s8 %v571_v20  ;;  %v317_v29 = vld [vmem:[#allocation3 + $0x128] sm:$0xff]  ;;  %v392_v30 = vunpack.c.l.s8.bf16 %v288_v17  ;;  %v456_v31 = vunpack.c.l.s8.bf16 %v320_v18  ;;  %v389_v32 = vunpack.c.h.s8.bf16 %v285_v28  ;;  %v316_v35 = vld [vmem:[#allocation3 + $0x120] sm:$0xff]  ;;  %s7864_s15 = sld [smem:[#allocation38_spill]] }
  0xd6   :  { %665 = vmatprep.subr.bf16.mxu1 %v465_v6  ;;  %v453_v33 = vunpack.c.h.s8.bf16 %v317_v29  ;;  %v388_v38 = vunpack.c.h.s8.bf16 %v284_v34  ;;  %v452_v39 = vunpack.c.h.s8.bf16 %v316_v35  ;;  %v385_v40 = vunpack.c.l.s8.bf16 %v285_v28  ;;  %v281_v43 = vld [vmem:[#allocation3 + $0x8] sm:$0xff]  ;;  %v280_v50 = vld [vmem:[#allocation3] sm:$0xff] }
  0xd7   :  { %v6701_v36 = vsub.s32 %v572_v26, %v6698_v27  ;;  %v6706_v37 = vld [vmem:[%s7860_s29] sm:$0x3f]  ;;  %v449_v41 = vunpack.c.l.s8.bf16 %v317_v29  ;;  %v313_v44 = vld [vmem:[#allocation3 + $0x108] sm:$0xff]  ;;  %v384_v46 = vunpack.c.l.s8.bf16 %v284_v34  ;;  %v448_v47 = vunpack.c.l.s8.bf16 %v316_v35 }
  0xd8   :  { %625 = vmatpush1.bf16.msra.mxu0 %v400_v13  ;;  %v381_v48 = vunpack.c.h.s8.bf16 %v281_v43  ;;  %v445_v49 = vunpack.c.h.s8.bf16 %v313_v44  ;;  %v312_v51 = vld [vmem:[#allocation3 + $0x100] sm:$0xff]  ;;  %v380_v54 = vunpack.c.h.s8.bf16 %v280_v50  ;;  %v377_v56 = vunpack.c.l.s8.bf16 %v281_v43  ;;  %v309_v58 = vld [vmem:[#allocation3 + $0xe8] sm:$0xff] }
  0xd9   :  { %666 = vmatpush1.bf16.msra.mxu1 %v464_v14  ;;  %626 = vmatprep.subr.bf16.mxu0 %v397_v15  ;;  %v6710_v42 = vrot.slane %v6706_v37, %v6701_v36  ;;  %v444_v55 = vunpack.c.h.s8.bf16 %v312_v51  ;;  %v441_v57 = vunpack.c.l.s8.bf16 %v313_v44  ;;  %v341_v59 = vld [vmem:[#allocation3 + $0x1e8] sm:$0xff]  ;;  %v308_v60 = vld [vmem:[#allocation3 + $0xe0] sm:$0xff]  ;;  %v376_v62 = vunpack.c.l.s8.bf16 %v280_v50 }
  0xda   :  { %667 = vmatprep.subr.bf16.mxu1 %v461_v16  ;;  %v340_v61 = vld [vmem:[#allocation3 + $0x1e0] sm:$0xff]  ;;  %v440_v63 = vunpack.c.l.s8.bf16 %v312_v51  ;;  %v437_v0 = vunpack.c.h.s8.bf16 %v309_v58  ;;  %v501_v1 = vunpack.c.h.s8.bf16 %v341_v59  ;;  %v436_v2 = vunpack.c.h.s8.bf16 %v308_v60  ;;  %v305_v6 = vld [vmem:[#allocation3 + $0xc8] sm:$0xff] }
  0xdb   :  { %v584_v45 = vcombine.high %v6710_v42, %v6710_v42  ;;  %v500_v3 = vunpack.c.h.s8.bf16 %v340_v61  ;;  %v433_v4 = vunpack.c.l.s8.bf16 %v309_v58  ;;  %v497_v5 = vunpack.c.l.s8.bf16 %v341_v59  ;;  %v337_v7 = vld [vmem:[#allocation3 + $0x1c8] sm:$0xff]  ;;  %v304_v9 = vld [vmem:[#allocation3 + $0xc0] sm:$0xff] }
  0xdc   :  { %627 = vmatpush1.bf16.msra.mxu0 %v396_v22  ;;  %v569_v8 = vcombine.high %v6706_v37, %v6706_v37  ;;  %v336_v10 = vld [vmem:[#allocation3 + $0x1c0] sm:$0xff]  ;;  %v432_v11 = vunpack.c.l.s8.bf16 %v308_v60  ;;  %v496_v12 = vunpack.c.l.s8.bf16 %v340_v61  ;;  %v429_v14 = vunpack.c.h.s8.bf16 %v305_v6  ;;  %v301_v21 = vld [vmem:[#allocation3 + $0xa8] sm:$0xff] }
  0xdd   :  { %668 = vmatpush1.bf16.msra.mxu1 %v460_v23  ;;  %628 = vmatprep.subr.bf16.mxu0 %v393_v24  ;;  %v6715_v52 = vrot.slane %v584_v45, %v6701_v36  ;;  %v493_v15 = vunpack.c.h.s8.bf16 %v337_v7  ;;  %v428_v17 = vunpack.c.h.s8.bf16 %v304_v9  ;;  %v492_v18 = vunpack.c.h.s8.bf16 %v336_v10  ;;  %v333_v22 = vld [vmem:[#allocation3 + $0x1a8] sm:$0xff]  ;;  %v300_v23 = vld [vmem:[#allocation3 + $0xa0] sm:$0xff] }
  0xde   :  { %669 = vmatprep.subr.bf16.mxu1 %v457_v25  ;;  %v6726_v13 = vrot.slane %v569_v8, %v6701_v36  ;;  %v425_v19 = vunpack.c.l.s8.bf16 %v305_v6  ;;  %v489_v20 = vunpack.c.l.s8.bf16 %v337_v7  ;;  %v332_v24 = vld [vmem:[#allocation3 + $0x1a0] sm:$0xff]  ;;  %v424_v25 = vunpack.c.l.s8.bf16 %v304_v9  ;;  %v297_v34 = vld [vmem:[#allocation3 + $0x88] sm:$0xff] }
  0xdf   :  { %654 = vmatprep.mubr.bf16.mxu0 %v6715_v52  ;;  %v6720_v53 = vcombine.high %v6715_v52, %v6715_v52  ;;  %v488_v26 = vunpack.c.l.s8.bf16 %v336_v10  ;;  %v421_v28 = vunpack.c.h.s8.bf16 %v301_v21  ;;  %v485_v29 = vunpack.c.h.s8.bf16 %v333_v22  ;;  %v329_v35 = vld [vmem:[#allocation3 + $0x188] sm:$0xff]  ;;  %v296_v37 = vld [vmem:[#allocation3 + $0x80] sm:$0xff] }
  0xe0   :  { %629 = vmatpush1.bf16.msra.mxu0 %v392_v30  ;;  %v6730_v16 = vrot.slane %v6726_v13, %v6701_v36  ;;  %v420_v30 = vunpack.c.h.s8.bf16 %v300_v23  ;;  %v477_v43 = vunpack.c.h.s8.bf16 %v329_v35  ;;  %v412_v44 = vunpack.c.h.s8.bf16 %v296_v37  ;;  %v356_v51 = vld [vmem:[#allocation3 + $0x260] sm:$0xff]  ;;  %v349_v10 = vld [vmem:[#allocation3 + $0x228] sm:$0xff] }
  0xe1   :  { %670 = vmatpush1.bf16.msra.mxu1 %v456_v31  ;;  %630 = vmatprep.subr.bf16.mxu0 %v389_v32  ;;  %v484_v31 = vunpack.c.h.s8.bf16 %v332_v24  ;;  %v417_v32 = vunpack.c.l.s8.bf16 %v301_v21  ;;  %v6734_v50 = vrot.slane %v6710_v42, %v6701_v36  ;;  %v585_v59 = vcombine.high %v6726_v13, %v6726_v13 }
  0xe2   :  { %671 = vmatprep.subr.bf16.mxu1 %v453_v33  ;;  %695 = vmatprep.mubr.bf16.mxu1 %v6720_v53  ;;  %v481_v33 = vunpack.c.l.s8.bf16 %v333_v22  ;;  %v532_v42 = vunpack.c.h.s8.bf16 %v356_v51  ;;  %vm5046_vm0 = vcmask 1043456   ;;  %vm6499_vm1 = vmmov 0  }
  0xe3   :  { %v6740_v60 = vcombine.high %v6734_v50, %v6734_v50  ;;  %vm5042_vm2 = vcmask 64512   ;;  %vm5668_vm3 = vcmask 261120   ;;  %vm5730_vm4 = vcmask 130048  }
  0xe4   :  { %631 = vmatpush1.bf16.msra.mxu0 %v388_v38  ;;  %v328_v38 = vld [vmem:[#allocation3 + $0x180] sm:$0xff]  ;;  %vm5831_vm5 = vcmask 1024  }
  0xe5   :  { %672 = vmatpush1.bf16.msra.mxu1 %v452_v39  ;;  %632 = vmatprep.subr.bf16.mxu0 %v385_v40  ;;  %v416_v39 = vunpack.c.l.s8.bf16 %v300_v23  ;;  %v480_v40 = vunpack.c.l.s8.bf16 %v332_v24  ;;  %v476_v45 = vunpack.c.h.s8.bf16 %v328_v38  ;;  %v513_v23 = vunpack.c.l.s8.bf16 %v349_v10 }
  0xe6   :  { %673 = vmatprep.subr.bf16.mxu1 %v449_v41  ;;  %v413_v41 = vunpack.c.h.s8.bf16 %v297_v34 }
  0xe8   :  { %633 = vmatpush1.bf16.msra.mxu0 %v384_v46  ;;  %v409_v46 = vunpack.c.l.s8.bf16 %v297_v34 }
  0xe9   :  { %674 = vmatpush1.bf16.msra.mxu1 %v448_v47  ;;  %634 = vmatprep.subr.bf16.mxu0 %v381_v48  ;;  %v473_v47 = vunpack.c.l.s8.bf16 %v329_v35  ;;  %v357_v48 = vld [vmem:[#allocation3 + $0x268] sm:$0xff] }
  0xea   :  { %675 = vmatprep.subr.bf16.mxu1 %v445_v49  ;;  %v295_v49 = vld [vmem:[#allocation3 + $0x78] sm:$0xff] }
  0xeb   :  { %v407_v58 = vunpack.c.h.s8.bf16 %v295_v49 }
  0xec   :  { %635 = vmatpush1.bf16.msra.mxu0 %v380_v54  ;;  %v294_v54 = vld [vmem:[#allocation3 + $0x70] sm:$0xff] }
  0xed   :  { %676 = vmatpush1.bf16.msra.mxu1 %v444_v55  ;;  %636 = vmatprep.subr.bf16.mxu0 %v377_v56  ;;  %v408_v55 = vunpack.c.l.s8.bf16 %v296_v37  ;;  %v472_v56 = vunpack.c.l.s8.bf16 %v328_v38  ;;  %v406_v61 = vunpack.c.h.s8.bf16 %v294_v54  ;;  %v402_v6 = vunpack.c.l.s8.bf16 %v294_v54 }
  0xee   :  { %677 = vmatprep.subr.bf16.mxu1 %v441_v57  ;;  %v533_v57 = vunpack.c.h.s8.bf16 %v357_v48 }
  0xf0   :  { %637 = vmatpush1.bf16.msra.mxu0 %v376_v62  ;;  %v353_v62 = vld [vmem:[#allocation3 + $0x248] sm:$0xff] }
  0xf1   :  { %678 = vmatpush1.bf16.msra.mxu1 %v440_v63  ;;  %638 = vmatprep.subr.bf16.mxu0 %v437_v0  ;;  %v291_v63 = vld [vmem:[#allocation3 + $0x58] sm:$0xff]  ;;  %v529_v0 = vunpack.c.l.s8.bf16 %v357_v48  ;;  %v525_v7 = vunpack.c.h.s8.bf16 %v353_v62 }
  0xf2   :  { %679 = vmatprep.subr.bf16.mxu1 %v501_v1  ;;  %v403_v1 = vunpack.c.l.s8.bf16 %v295_v49  ;;  %v399_v8 = vunpack.c.h.s8.bf16 %v291_v63  ;;  %v395_v13 = vunpack.c.l.s8.bf16 %v291_v63 }
  0xf4   :  { %639 = vmatpush2.bf16.msra.mxu0 %v436_v2  ;;  %v6743_v2 = vrot.slane %v585_v59, %v6701_v36 }
  0xf5   :  { %680 = vmatpush2.bf16.msra.mxu1 %v500_v3  ;;  %640 = vmatprep.subr.bf16.mxu0 %v433_v4  ;;  %v352_v3 = vld [vmem:[#allocation3 + $0x240] sm:$0xff]  ;;  %v290_v4 = vld [vmem:[#allocation3 + $0x50] sm:$0xff] }
  0xf6   :  { %681 = vmatprep.subr.bf16.mxu1 %v497_v5  ;;  %v528_v5 = vunpack.c.l.s8.bf16 %v356_v51  ;;  %v524_v36 = vunpack.c.h.s8.bf16 %v352_v3  ;;  %v398_v9 = vunpack.c.h.s8.bf16 %v290_v4 }
  0xf8   :  { %641 = vmatpush2.bf16.msra.mxu0 %v432_v11  ;;  %v287_v11 = vld [vmem:[#allocation3 + $0x38] sm:$0xff] }
  0xf9   :  { %682 = vmatpush2.bf16.msra.mxu1 %v496_v12  ;;  %642 = vmatprep.subr.bf16.mxu0 %v429_v14  ;;  %v521_v12 = vunpack.c.l.s8.bf16 %v353_v62  ;;  %v520_v14 = vunpack.c.l.s8.bf16 %v352_v3  ;;  %v387_v24 = vunpack.c.l.s8.bf16 %v287_v11  ;;  %v306_v62 = vld [vmem:[#allocation3 + $0xd0] sm:$0xff] }
  0xfa   :  { %683 = vmatprep.subr.bf16.mxu1 %v493_v15  ;;  %v394_v15 = vunpack.c.l.s8.bf16 %v290_v4  ;;  %v365_v4 = vld [vmem:[#allocation3 + $0x2a8] sm:$0xff] }
  0xfc   :  { %643 = vmatpush2.bf16.msra.mxu0 %v428_v17  ;;  %v517_v17 = vunpack.c.h.s8.bf16 %v349_v10  ;;  %v302_v10 = vld [vmem:[#allocation3 + $0xb0] sm:$0xff] }
  0xfd   :  { %684 = vmatpush2.bf16.msra.mxu1 %v492_v18  ;;  %644 = vmatprep.subr.bf16.mxu0 %v425_v19  ;;  %v391_v18 = vunpack.c.h.s8.bf16 %v287_v11  ;;  %v348_v19 = vld [vmem:[#allocation3 + $0x220] sm:$0xff] }
  0xfe   :  { %685 = vmatprep.subr.bf16.mxu1 %v489_v20  ;;  %v286_v20 = vld [vmem:[#allocation3 + $0x30] sm:$0xff]  ;;  %v516_v21 = vunpack.c.h.s8.bf16 %v348_v19 }
  0xff   :  { %v390_v22 = vunpack.c.h.s8.bf16 %v286_v20 }
 0x100   :  { %645 = vmatpush2.bf16.msra.mxu0 %v424_v25  ;;  %v345_v25 = vld [vmem:[#allocation3 + $0x208] sm:$0xff] }
 0x101   :  { %686 = vmatpush2.bf16.msra.mxu1 %v488_v26  ;;  %646 = vmatprep.subr.bf16.mxu0 %v421_v28  ;;  %v283_v26 = vld [vmem:[#allocation3 + $0x18] sm:$0xff]  ;;  %v512_v28 = vunpack.c.l.s8.bf16 %v348_v19  ;;  %v505_v37 = vunpack.c.l.s8.bf16 %v345_v25  ;;  %v418_v19 = vunpack.c.l.s8.bf16 %v302_v10 }
 0x102   :  { %687 = vmatprep.subr.bf16.mxu1 %v485_v29  ;;  %v386_v29 = vunpack.c.l.s8.bf16 %v286_v20  ;;  %v379_v38 = vunpack.c.l.s8.bf16 %v283_v26 }
 0x104   :  { %647 = vmatpush2.bf16.msra.mxu0 %v420_v30  ;;  %v509_v30 = vunpack.c.h.s8.bf16 %v345_v25 }
 0x105   :  { %688 = vmatpush2.bf16.msra.mxu1 %v484_v31  ;;  %648 = vmatprep.subr.bf16.mxu0 %v417_v32  ;;  %v383_v31 = vunpack.c.h.s8.bf16 %v283_v26  ;;  %v344_v32 = vld [vmem:[#allocation3 + $0x200] sm:$0xff] }
 0x106   :  { %689 = vmatprep.subr.bf16.mxu1 %v481_v33  ;;  %v282_v33 = vld [vmem:[#allocation3 + $0x10] sm:$0xff]  ;;  %v508_v34 = vunpack.c.h.s8.bf16 %v344_v32 }
 0x107   :  { %v382_v35 = vunpack.c.h.s8.bf16 %v282_v33 }
 0x108   :  { %649 = vmatpush2.bf16.msra.mxu0 %v416_v39  ;;  %v373_v39 = vld [vmem:[#allocation3 + $0x2e8] sm:$0xff] }
 0x109   :  { %690 = vmatpush2.bf16.msra.mxu1 %v480_v40  ;;  %650 = vmatprep.subr.bf16.mxu0 %v413_v41  ;;  %v311_v40 = vld [vmem:[#allocation3 + $0xf8] sm:$0xff]  ;;  %v504_v41 = vunpack.c.l.s8.bf16 %v344_v32  ;;  %v561_v51 = vunpack.c.l.s8.bf16 %v373_v39 }
 0x10a   :  { %691 = vmatprep.subr.bf16.mxu1 %v477_v43  ;;  %v378_v43 = vunpack.c.l.s8.bf16 %v282_v33  ;;  %v435_v54 = vunpack.c.l.s8.bf16 %v311_v40 }
 0x10c   :  { %651 = vmatpush2.bf16.msra.mxu0 %v412_v44  ;;  %v565_v44 = vunpack.c.h.s8.bf16 %v373_v39 }
 0x10d   :  { %692 = vmatpush2.bf16.msra.mxu1 %v476_v45  ;;  %652 = vmatprep.subr.bf16.mxu0 %v409_v46  ;;  %v439_v45 = vunpack.c.h.s8.bf16 %v311_v40  ;;  %v372_v46 = vld [vmem:[#allocation3 + $0x2e0] sm:$0xff] }
 0x10e   :  { %693 = vmatprep.subr.bf16.mxu1 %v473_v47  ;;  %v310_v47 = vld [vmem:[#allocation3 + $0xf0] sm:$0xff]  ;;  %v564_v48 = vunpack.c.h.s8.bf16 %v372_v46 }
 0x10f   :  { %v438_v49 = vunpack.c.h.s8.bf16 %v310_v47 }
 0x110   :  { %653 = vmatpush2.bf16.msra.mxu0 %v408_v55  ;;  %v369_v55 = vld [vmem:[#allocation3 + $0x2c8] sm:$0xff] }
 0x111   :  { %694 = vmatpush2.bf16.msra.mxu1 %v472_v56  ;;  %704 = vmatprep.subr.bf16.mxu0 %v533_v57  ;;  %v307_v56 = vld [vmem:[#allocation3 + $0xd8] sm:$0xff]  ;;  %v560_v57 = vunpack.c.l.s8.bf16 %v372_v46  ;;  %v557_v59 = vunpack.c.h.s8.bf16 %v369_v55 }
 0x112   :  { %745 = vmatprep.subr.bf16.mxu1 %v407_v58  ;;  %v434_v58 = vunpack.c.l.s8.bf16 %v310_v47  ;;  %v427_v3 = vunpack.c.l.s8.bf16 %v307_v56 }
 0x113   :  { %655 = vmatmul.mubr.bf16.vlgmr.msra.gmra.mxu0 %v6734_v50 }
 0x114   :  { %696 = vmatmul.mubr.bf16.vlgmr.msra.gmra.mxu1 %v6740_v60  ;;  %705 = vmatpush1.bf16.msra.mxu0 %v532_v42  ;;  %v431_v42 = vunpack.c.h.s8.bf16 %v307_v56 }
 0x115   :  { %746 = vmatpush1.bf16.msra.mxu1 %v406_v61  ;;  %706 = vmatprep.subr.bf16.mxu0 %v529_v0  ;;  %v368_v61 = vld [vmem:[#allocation3 + $0x2c0] sm:$0xff]  ;;  %v430_v0 = vunpack.c.h.s8.bf16 %v306_v62 }
 0x116   :  { %747 = vmatprep.subr.bf16.mxu1 %v403_v1  ;;  %736 = vmatprep.mubr.bf16.mxu0 %v6743_v2  ;;  %v556_v63 = vunpack.c.h.s8.bf16 %v368_v61  ;;  %v553_v1 = vunpack.c.l.s8.bf16 %v369_v55 }
 0x117   :  { %777 = vmatprep.mubr.bf16.mxu1 %v6715_v52 }
 0x118   :  { %707 = vmatpush1.bf16.msra.mxu0 %v528_v5  ;;  %v303_v5 = vld [vmem:[#allocation3 + $0xb8] sm:$0xff] }
 0x119   :  { %748 = vmatpush1.bf16.msra.mxu1 %v402_v6  ;;  %708 = vmatprep.subr.bf16.mxu0 %v525_v7  ;;  %v552_v6 = vunpack.c.l.s8.bf16 %v368_v61  ;;  %v426_v7 = vunpack.c.l.s8.bf16 %v306_v62 }
 0x11a   :  { %749 = vmatprep.subr.bf16.mxu1 %v399_v8  ;;  %v549_v8 = vunpack.c.h.s8.bf16 %v365_v4 }
 0x11c   :  { %709 = vmatpush1.bf16.msra.mxu0 %v524_v36  ;;  %v423_v36 = vunpack.c.h.s8.bf16 %v303_v5 }
 0x11d   :  { %750 = vmatpush1.bf16.msra.mxu1 %v398_v9  ;;  %710 = vmatprep.subr.bf16.mxu0 %v521_v12  ;;  %v364_v9 = vld [vmem:[#allocation3 + $0x2a0] sm:$0xff]  ;;  %v422_v12 = vunpack.c.h.s8.bf16 %v302_v10 }
 0x11e   :  { %751 = vmatprep.subr.bf16.mxu1 %v395_v13  ;;  %v548_v11 = vunpack.c.h.s8.bf16 %v364_v9  ;;  %v545_v13 = vunpack.c.l.s8.bf16 %v365_v4 }
 0x120   :  { %711 = vmatpush1.bf16.msra.mxu0 %v520_v14  ;;  %v419_v14 = vunpack.c.l.s8.bf16 %v303_v5 }
 0x121   :  { %752 = vmatpush1.bf16.msra.mxu1 %v394_v15  ;;  %712 = vmatprep.subr.bf16.mxu0 %v517_v17  ;;  %v361_v15 = vld [vmem:[#allocation3 + $0x288] sm:$0xff]  ;;  %v299_v17 = vld [vmem:[#allocation3 + $0x98] sm:$0xff] }
 0x122   :  { %753 = vmatprep.subr.bf16.mxu1 %v391_v18  ;;  %v544_v18 = vunpack.c.l.s8.bf16 %v364_v9  ;;  %v541_v20 = vunpack.c.h.s8.bf16 %v361_v15  ;;  %v537_v26 = vunpack.c.l.s8.bf16 %v361_v15 }
 0x124   :  { %713 = vmatpush1.bf16.msra.mxu0 %v516_v21  ;;  %v415_v21 = vunpack.c.h.s8.bf16 %v299_v17 }
 0x125   :  { %754 = vmatpush1.bf16.msra.mxu1 %v390_v22  ;;  %714 = vmatprep.subr.bf16.mxu0 %v513_v23  ;;  %v360_v22 = vld [vmem:[#allocation3 + $0x280] sm:$0xff]  ;;  %v298_v23 = vld [vmem:[#allocation3 + $0x90] sm:$0xff] }
 0x126   :  { %755 = vmatprep.subr.bf16.mxu1 %v387_v24  ;;  %v540_v24 = vunpack.c.h.s8.bf16 %v360_v22  ;;  %v414_v25 = vunpack.c.h.s8.bf16 %v298_v23  ;;  %v410_v32 = vunpack.c.l.s8.bf16 %v298_v23 }
 0x128   :  { %715 = vmatpush1.bf16.msra.mxu0 %v512_v28  ;;  %v411_v28 = vunpack.c.l.s8.bf16 %v299_v17 }
 0x129   :  { %756 = vmatpush1.bf16.msra.mxu1 %v386_v29  ;;  %716 = vmatprep.subr.bf16.mxu0 %v509_v30  ;;  %v327_v29 = vld [vmem:[#allocation3 + $0x178] sm:$0xff] }
 0x12a   :  { %757 = vmatprep.subr.bf16.mxu1 %v383_v31  ;;  %v359_v30 = vld [vmem:[#allocation3 + $0x278] sm:$0xff]  ;;  %v536_v31 = vunpack.c.l.s8.bf16 %v360_v22  ;;  %v471_v33 = vunpack.c.h.s8.bf16 %v327_v29  ;;  %v467_v40 = vunpack.c.l.s8.bf16 %v327_v29 }
 0x12c   :  { %717 = vmatpush1.bf16.msra.mxu0 %v508_v34  ;;  %v535_v34 = vunpack.c.h.s8.bf16 %v359_v30 }
 0x12d   :  { %758 = vmatpush1.bf16.msra.mxu1 %v382_v35  ;;  %718 = vmatprep.subr.bf16.mxu0 %v505_v37  ;;  %v326_v35 = vld [vmem:[#allocation3 + $0x170] sm:$0xff] }
 0x12e   :  { %759 = vmatprep.subr.bf16.mxu1 %v379_v38  ;;  %v358_v37 = vld [vmem:[#allocation3 + $0x270] sm:$0xff]  ;;  %v470_v38 = vunpack.c.h.s8.bf16 %v326_v35 }
 0x12f   :  { %v534_v39 = vunpack.c.h.s8.bf16 %v358_v37  ;;  %v530_v46 = vunpack.c.l.s8.bf16 %v358_v37 }
 0x130   :  { %719 = vmatpush1.bf16.msra.mxu0 %v504_v41  ;;  %v531_v41 = vunpack.c.l.s8.bf16 %v359_v30 }
 0x131   :  { %760 = vmatpush1.bf16.msra.mxu1 %v378_v43  ;;  %720 = vmatprep.subr.bf16.mxu0 %v565_v44  ;;  %v323_v43 = vld [vmem:[#allocation3 + $0x158] sm:$0xff] }
 0x132   :  { %761 = vmatprep.subr.bf16.mxu1 %v439_v45  ;;  %v355_v44 = vld [vmem:[#allocation3 + $0x258] sm:$0xff]  ;;  %v466_v45 = vunpack.c.l.s8.bf16 %v326_v35  ;;  %v463_v47 = vunpack.c.h.s8.bf16 %v323_v43  ;;  %v459_v56 = vunpack.c.l.s8.bf16 %v323_v43 }
 0x134   :  { %721 = vmatpush2.bf16.msra.mxu0 %v564_v48  ;;  %v527_v48 = vunpack.c.h.s8.bf16 %v355_v44 }
 0x135   :  { %762 = vmatpush2.bf16.msra.mxu1 %v438_v49  ;;  %722 = vmatprep.subr.bf16.mxu0 %v561_v51  ;;  %v322_v49 = vld [vmem:[#allocation3 + $0x150] sm:$0xff] }
 0x136   :  { %763 = vmatprep.subr.bf16.mxu1 %v435_v54  ;;  %v354_v51 = vld [vmem:[#allocation3 + $0x250] sm:$0xff]  ;;  %v462_v54 = vunpack.c.h.s8.bf16 %v322_v49 }
 0x137   :  { %v526_v55 = vunpack.c.h.s8.bf16 %v354_v51  ;;  %v522_v61 = vunpack.c.l.s8.bf16 %v354_v51 }
 0x138   :  { %723 = vmatpush2.bf16.msra.mxu0 %v560_v57  ;;  %v523_v57 = vunpack.c.l.s8.bf16 %v355_v44 }
 0x139   :  { %764 = vmatpush2.bf16.msra.mxu1 %v434_v58  ;;  %724 = vmatprep.subr.bf16.mxu0 %v557_v59  ;;  %v319_v58 = vld [vmem:[#allocation3 + $0x138] sm:$0xff] }
 0x13a   :  { %765 = vmatprep.subr.bf16.mxu1 %v431_v42  ;;  %v351_v59 = vld [vmem:[#allocation3 + $0x238] sm:$0xff]  ;;  %v458_v42 = vunpack.c.l.s8.bf16 %v322_v49  ;;  %v455_v62 = vunpack.c.h.s8.bf16 %v319_v58  ;;  %v451_v5 = vunpack.c.l.s8.bf16 %v319_v58 }
 0x13c   :  { %725 = vmatpush2.bf16.msra.mxu0 %v556_v63  ;;  %v519_v63 = vunpack.c.h.s8.bf16 %v351_v59 }
 0x13d   :  { %766 = vmatpush2.bf16.msra.mxu1 %v430_v0  ;;  %726 = vmatprep.subr.bf16.mxu0 %v553_v1  ;;  %v318_v0 = vld [vmem:[#allocation3 + $0x130] sm:$0xff] }
 0x13e   :  { %767 = vmatprep.subr.bf16.mxu1 %v427_v3  ;;  %v350_v1 = vld [vmem:[#allocation3 + $0x230] sm:$0xff]  ;;  %v454_v3 = vunpack.c.h.s8.bf16 %v318_v0 }
 0x13f   :  { %v518_v4 = vunpack.c.h.s8.bf16 %v350_v1  ;;  %v514_v9 = vunpack.c.l.s8.bf16 %v350_v1 }
 0x140   :  { %727 = vmatpush2.bf16.msra.mxu0 %v552_v6  ;;  %v515_v6 = vunpack.c.l.s8.bf16 %v351_v59 }
 0x141   :  { %768 = vmatpush2.bf16.msra.mxu1 %v426_v7  ;;  %728 = vmatprep.subr.bf16.mxu0 %v549_v8  ;;  %v315_v7 = vld [vmem:[#allocation3 + $0x118] sm:$0xff] }
 0x142   :  { %769 = vmatprep.subr.bf16.mxu1 %v423_v36  ;;  %v347_v8 = vld [vmem:[#allocation3 + $0x218] sm:$0xff]  ;;  %v450_v36 = vunpack.c.l.s8.bf16 %v318_v0  ;;  %v447_v10 = vunpack.c.h.s8.bf16 %v315_v7  ;;  %v443_v17 = vunpack.c.l.s8.bf16 %v315_v7 }
 0x144   :  { %729 = vmatpush2.bf16.msra.mxu0 %v548_v11  ;;  %v511_v11 = vunpack.c.h.s8.bf16 %v347_v8 }
 0x145   :  { %770 = vmatpush2.bf16.msra.mxu1 %v422_v12  ;;  %730 = vmatprep.subr.bf16.mxu0 %v545_v13  ;;  %v314_v12 = vld [vmem:[#allocation3 + $0x110] sm:$0xff] }
 0x146   :  { %771 = vmatprep.subr.bf16.mxu1 %v419_v14  ;;  %v346_v13 = vld [vmem:[#allocation3 + $0x210] sm:$0xff]  ;;  %v446_v14 = vunpack.c.h.s8.bf16 %v314_v12 }
 0x147   :  { %v510_v15 = vunpack.c.h.s8.bf16 %v346_v13  ;;  %v506_v22 = vunpack.c.l.s8.bf16 %v346_v13  ;;  %v944_v13 = vld [vmem:[#allocation8 + $0x60] sm:$0xff] }
 0x148   :  { %731 = vmatpush2.bf16.msra.mxu0 %v544_v18  ;;  %v507_v18 = vunpack.c.l.s8.bf16 %v347_v8 }
 0x149   :  { %772 = vmatpush2.bf16.msra.mxu1 %v418_v19  ;;  %732 = vmatprep.subr.bf16.mxu0 %v541_v20  ;;  %v343_v19 = vld [vmem:[#allocation3 + $0x1f8] sm:$0xff] }
 0x14a   :  { %773 = vmatprep.subr.bf16.mxu1 %v415_v21  ;;  %v375_v20 = vld [vmem:[#allocation3 + $0x2f8] sm:$0xff]  ;;  %v442_v21 = vunpack.c.l.s8.bf16 %v314_v12  ;;  %v503_v23 = vunpack.c.h.s8.bf16 %v343_v19  ;;  %v499_v30 = vunpack.c.l.s8.bf16 %v343_v19 }
 0x14c   :  { %733 = vmatpush2.bf16.msra.mxu0 %v540_v24  ;;  %v567_v24 = vunpack.c.h.s8.bf16 %v375_v20 }
 0x14d   :  { %774 = vmatpush2.bf16.msra.mxu1 %v414_v25  ;;  %734 = vmatprep.subr.bf16.mxu0 %v537_v26  ;;  %v342_v25 = vld [vmem:[#allocation3 + $0x1f0] sm:$0xff] }
 0x14e   :  { %775 = vmatprep.subr.bf16.mxu1 %v411_v28  ;;  %v374_v26 = vld [vmem:[#allocation3 + $0x2f0] sm:$0xff]  ;;  %v502_v28 = vunpack.c.h.s8.bf16 %v342_v25 }
 0x14f   :  { %v566_v29 = vunpack.c.h.s8.bf16 %v374_v26  ;;  %v562_v35 = vunpack.c.l.s8.bf16 %v374_v26  ;;  %v936_v26 = vld [vmem:[#allocation8 + $0x20] sm:$0xff] }
 0x150   :  { %735 = vmatpush2.bf16.msra.mxu0 %v536_v31  ;;  %v563_v31 = vunpack.c.l.s8.bf16 %v375_v20  ;;  %v940_v20 = vld [vmem:[#allocation8 + $0x40] sm:$0xff] }
 0x151   :  { %776 = vmatpush2.bf16.msra.mxu1 %v410_v32  ;;  %786 = vmatprep.subr.bf16.mxu0 %v471_v33  ;;  %v339_v32 = vld [vmem:[#allocation3 + $0x1d8] sm:$0xff] }
 0x152   :  { %827 = vmatprep.subr.bf16.mxu1 %v535_v34  ;;  %v371_v33 = vld [vmem:[#allocation3 + $0x2d8] sm:$0xff]  ;;  %v498_v34 = vunpack.c.l.s8.bf16 %v342_v25  ;;  %v495_v37 = vunpack.c.h.s8.bf16 %v339_v32  ;;  %v491_v44 = vunpack.c.l.s8.bf16 %v339_v32 }
 0x153   :  { %737 = vmatmul.mubr.bf16.vlgmr.msra.gmra.mxu0 %v6730_v16 }
 0x154   :  { %778 = vmatmul.mubr.bf16.vlgmr.msra.gmra.mxu1 %v6734_v50  ;;  %787 = vmatpush1.bf16.msra.mxu0 %v470_v38  ;;  %v559_v38 = vunpack.c.h.s8.bf16 %v371_v33 }
 0x155   :  { %828 = vmatpush1.bf16.msra.mxu1 %v534_v39  ;;  %788 = vmatprep.subr.bf16.mxu0 %v467_v40  ;;  %v338_v39 = vld [vmem:[#allocation3 + $0x1d0] sm:$0xff] }
 0x156   :  { %829 = vmatprep.subr.bf16.mxu1 %v531_v41  ;;  %818 = vmatprep.mubr.bf16.mxu0 %v6720_v53  ;;  %v370_v40 = vld [vmem:[#allocation3 + $0x2d0] sm:$0xff]  ;;  %v494_v41 = vunpack.c.h.s8.bf16 %v338_v39 }
 0x157   :  { %859 = vmatprep.mubr.bf16.mxu1 %v6743_v2  ;;  %v558_v43 = vunpack.c.h.s8.bf16 %v370_v40  ;;  %v554_v49 = vunpack.c.l.s8.bf16 %v370_v40 }
 0x158   :  { %789 = vmatpush1.bf16.msra.mxu0 %v466_v45  ;;  %v555_v45 = vunpack.c.l.s8.bf16 %v371_v33  ;;  %v976_v33 = vld [vmem:[#allocation8 + $0x160] sm:$0xff] }
 0x159   :  { %830 = vmatpush1.bf16.msra.mxu1 %v530_v46  ;;  %790 = vmatprep.subr.bf16.mxu0 %v463_v47  ;;  %v335_v46 = vld [vmem:[#allocation3 + $0x1b8] sm:$0xff] }
 0x15a   :  { %831 = vmatprep.subr.bf16.mxu1 %v527_v48  ;;  %v367_v47 = vld [vmem:[#allocation3 + $0x2b8] sm:$0xff]  ;;  %v490_v48 = vunpack.c.l.s8.bf16 %v338_v39  ;;  %v487_v51 = vunpack.c.h.s8.bf16 %v335_v46  ;;  %v483_v59 = vunpack.c.l.s8.bf16 %v335_v46 }
 0x15c   :  { %791 = vmatpush1.bf16.msra.mxu0 %v462_v54  ;;  %v551_v54 = vunpack.c.h.s8.bf16 %v367_v47 }
 0x15d   :  { %832 = vmatpush1.bf16.msra.mxu1 %v526_v55  ;;  %792 = vmatprep.subr.bf16.mxu0 %v459_v56  ;;  %v334_v55 = vld [vmem:[#allocation3 + $0x1b0] sm:$0xff] }
 0x15e   :  { %833 = vmatprep.subr.bf16.mxu1 %v523_v57  ;;  %v366_v56 = vld [vmem:[#allocation3 + $0x2b0] sm:$0xff]  ;;  %v486_v57 = vunpack.c.h.s8.bf16 %v334_v55 }
 0x15f   :  { %v550_v58 = vunpack.c.h.s8.bf16 %v366_v56  ;;  %v546_v0 = vunpack.c.l.s8.bf16 %v366_v56 }
 0x160   :  { %793 = vmatpush1.bf16.msra.mxu0 %v458_v42  ;;  %v547_v42 = vunpack.c.l.s8.bf16 %v367_v47  ;;  %v972_v47 = vld [vmem:[#allocation8 + $0x140] sm:$0xff] }
 0x161   :  { %834 = vmatpush1.bf16.msra.mxu1 %v522_v61  ;;  %794 = vmatprep.subr.bf16.mxu0 %v455_v62  ;;  %v331_v61 = vld [vmem:[#allocation3 + $0x198] sm:$0xff] }
 0x162   :  { %835 = vmatprep.subr.bf16.mxu1 %v519_v63  ;;  %v363_v62 = vld [vmem:[#allocation3 + $0x298] sm:$0xff]  ;;  %v482_v63 = vunpack.c.l.s8.bf16 %v334_v55  ;;  %v479_v1 = vunpack.c.h.s8.bf16 %v331_v61  ;;  %v475_v8 = vunpack.c.l.s8.bf16 %v331_v61 }
 0x164   :  { %795 = vmatpush1.bf16.msra.mxu0 %v454_v3  ;;  %v543_v3 = vunpack.c.h.s8.bf16 %v363_v62 }
 0x165   :  { %836 = vmatpush1.bf16.msra.mxu1 %v518_v4  ;;  %796 = vmatprep.subr.bf16.mxu0 %v451_v5  ;;  %v330_v4 = vld [vmem:[#allocation3 + $0x190] sm:$0xff] }
 0x166   :  { %837 = vmatprep.subr.bf16.mxu1 %v515_v6  ;;  %v362_v5 = vld [vmem:[#allocation3 + $0x290] sm:$0xff]  ;;  %v478_v6 = vunpack.c.h.s8.bf16 %v330_v4 }
 0x167   :  { %v542_v7 = vunpack.c.h.s8.bf16 %v362_v5 }
 0x168   :  { %797 = vmatpush1.bf16.msra.mxu0 %v450_v36  ;;  %v539_v36 = vunpack.c.l.s8.bf16 %v363_v62  ;;  %v968_v62 = vld [vmem:[#allocation8 + $0x120] sm:$0xff] }
 0x169   :  { %838 = vmatpush1.bf16.msra.mxu1 %v514_v9  ;;  %798 = vmatprep.subr.bf16.mxu0 %v447_v10  ;;  %v945_v9 = vld [vmem:[#allocation8 + $0x68] sm:$0xff]  ;;  %v474_v10 = vunpack.c.l.s8.bf16 %v330_v4 }
 0x16a   :  { %839 = vmatprep.subr.bf16.mxu1 %v511_v11  ;;  %v538_v11 = vunpack.c.l.s8.bf16 %v362_v5  ;;  %v1025_v12 = vunpack.c.h.s8.bf16 %v945_v9 }
 0x16c   :  { %799 = vmatpush1.bf16.msra.mxu0 %v446_v14  ;;  %v1024_v14 = vunpack.c.h.s8.bf16 %v944_v13 }
 0x16d   :  { %840 = vmatpush1.bf16.msra.mxu1 %v510_v15  ;;  %800 = vmatprep.subr.bf16.mxu0 %v443_v17  ;;  %v1021_v15 = vunpack.c.l.s8.bf16 %v945_v9  ;;  %v941_v17 = vld [vmem:[#allocation8 + $0x48] sm:$0xff] }
 0x16e   :  { %841 = vmatprep.subr.bf16.mxu1 %v507_v18  ;;  %v1020_v18 = vunpack.c.l.s8.bf16 %v944_v13  ;;  %v1017_v19 = vunpack.c.h.s8.bf16 %v941_v17 }
 0x170   :  { %801 = vmatpush1.bf16.msra.mxu0 %v442_v21  ;;  %v1016_v21 = vunpack.c.h.s8.bf16 %v940_v20 }
 0x171   :  { %842 = vmatpush1.bf16.msra.mxu1 %v506_v22  ;;  %802 = vmatprep.subr.bf16.mxu0 %v503_v23  ;;  %v1013_v22 = vunpack.c.l.s8.bf16 %v941_v17  ;;  %v937_v23 = vld [vmem:[#allocation8 + $0x28] sm:$0xff] }
 0x172   :  { %843 = vmatprep.subr.bf16.mxu1 %v567_v24  ;;  %v1012_v24 = vunpack.c.l.s8.bf16 %v940_v20  ;;  %v1009_v25 = vunpack.c.h.s8.bf16 %v937_v23  ;;  %v949_v20 = vld [vmem:[#allocation8 + $0x88] sm:$0xff] }
 0x174   :  { %803 = vmatpush2.bf16.msra.mxu0 %v502_v28  ;;  %v1008_v28 = vunpack.c.h.s8.bf16 %v936_v26 }
 0x175   :  { %844 = vmatpush2.bf16.msra.mxu1 %v566_v29  ;;  %804 = vmatprep.subr.bf16.mxu0 %v499_v30  ;;  %v1005_v29 = vunpack.c.l.s8.bf16 %v937_v23  ;;  %v933_v30 = vld [vmem:[#allocation8 + $0x8] sm:$0xff]  ;;  %v992_v23 = vld [vmem:[#allocation8 + $0x1e0] sm:$0xff] }
 0x176   :  { %845 = vmatprep.subr.bf16.mxu1 %v563_v31  ;;  %v977_v31 = vld [vmem:[#allocation8 + $0x168] sm:$0xff] }
 0x177   :  { %v1089_v32 = vunpack.c.h.s8.bf16 %v977_v31  ;;  %v1085_v39 = vunpack.c.l.s8.bf16 %v977_v31  ;;  %v1116_v31 = vunpack.c.l.s8.bf16 %v992_v23 }
 0x178   :  { %805 = vmatpush2.bf16.msra.mxu0 %v498_v34  ;;  %v1004_v34 = vunpack.c.l.s8.bf16 %v936_v26  ;;  %v1033_v26 = vunpack.c.h.s8.bf16 %v949_v20 }
 0x179   :  { %846 = vmatpush2.bf16.msra.mxu1 %v562_v35  ;;  %806 = vmatprep.subr.bf16.mxu0 %v495_v37  ;;  %v1088_v35 = vunpack.c.h.s8.bf16 %v976_v33  ;;  %v1001_v37 = vunpack.c.h.s8.bf16 %v933_v30 }
 0x17a   :  { %847 = vmatprep.subr.bf16.mxu1 %v559_v38  ;;  %v932_v38 = vld [vmem:[#allocation8] sm:$0xff] }
 0x17b   :  { %v1000_v40 = vunpack.c.h.s8.bf16 %v932_v38 }
 0x17c   :  { %807 = vmatpush2.bf16.msra.mxu0 %v494_v41  ;;  %v1084_v41 = vunpack.c.l.s8.bf16 %v976_v33  ;;  %v6755_v33 = vld [vmem:[#allocation8 + $0x78] sm:$0xff] }
 0x17d   :  { %848 = vmatpush2.bf16.msra.mxu1 %v558_v43  ;;  %808 = vmatprep.subr.bf16.mxu0 %v491_v44  ;;  %v997_v43 = vunpack.c.l.s8.bf16 %v933_v30  ;;  %v961_v44 = vld [vmem:[#allocation8 + $0xe8] sm:$0xff] }
 0x17e   :  { %849 = vmatprep.subr.bf16.mxu1 %v555_v45  ;;  %v973_v45 = vld [vmem:[#allocation8 + $0x148] sm:$0xff] }
 0x17f   :  { %v1081_v46 = vunpack.c.h.s8.bf16 %v973_v45  ;;  %v1077_v55 = vunpack.c.l.s8.bf16 %v973_v45 }
 0x180   :  { %809 = vmatpush2.bf16.msra.mxu0 %v490_v48  ;;  %v996_v48 = vunpack.c.l.s8.bf16 %v932_v38 }
 0x181   :  { %850 = vmatpush2.bf16.msra.mxu1 %v554_v49  ;;  %810 = vmatprep.subr.bf16.mxu0 %v487_v51  ;;  %v1080_v49 = vunpack.c.h.s8.bf16 %v972_v47  ;;  %v1057_v51 = vunpack.c.h.s8.bf16 %v961_v44 }
 0x182   :  { %851 = vmatprep.subr.bf16.mxu1 %v551_v54  ;;  %v960_v54 = vld [vmem:[#allocation8 + $0xe0] sm:$0xff] }
 0x183   :  { %v1056_v56 = vunpack.c.h.s8.bf16 %v960_v54 }
 0x184   :  { %811 = vmatpush2.bf16.msra.mxu0 %v486_v57  ;;  %v1076_v57 = vunpack.c.l.s8.bf16 %v972_v47 }
 0x185   :  { %852 = vmatpush2.bf16.msra.mxu1 %v550_v58  ;;  %812 = vmatprep.subr.bf16.mxu0 %v483_v59  ;;  %v1053_v58 = vunpack.c.l.s8.bf16 %v961_v44  ;;  %v957_v59 = vld [vmem:[#allocation8 + $0xc8] sm:$0xff] }
 0x186   :  { %853 = vmatprep.subr.bf16.mxu1 %v547_v42  ;;  %v969_v42 = vld [vmem:[#allocation8 + $0x128] sm:$0xff] }
 0x187   :  { %v1073_v61 = vunpack.c.h.s8.bf16 %v969_v42  ;;  %v1069_v4 = vunpack.c.l.s8.bf16 %v969_v42  ;;  %v985_v44 = vld [vmem:[#allocation8 + $0x1a8] sm:$0xff] }
 0x188   :  { %813 = vmatpush2.bf16.msra.mxu0 %v482_v63  ;;  %v1052_v63 = vunpack.c.l.s8.bf16 %v960_v54  ;;  %v1105_v47 = vunpack.c.h.s8.bf16 %v985_v44 }
 0x189   :  { %854 = vmatpush2.bf16.msra.mxu1 %v546_v0  ;;  %814 = vmatprep.subr.bf16.mxu0 %v479_v1  ;;  %v1072_v0 = vunpack.c.h.s8.bf16 %v968_v62  ;;  %v1049_v1 = vunpack.c.h.s8.bf16 %v957_v59 }
 0x18a   :  { %855 = vmatprep.subr.bf16.mxu1 %v543_v3  ;;  %v956_v3 = vld [vmem:[#allocation8 + $0xc0] sm:$0xff] }
 0x18b   :  { %v1048_v5 = vunpack.c.h.s8.bf16 %v956_v3 }
 0x18c   :  { %815 = vmatpush2.bf16.msra.mxu0 %v478_v6  ;;  %v1068_v6 = vunpack.c.l.s8.bf16 %v968_v62  ;;  %v981_v62 = vld [vmem:[#allocation8 + $0x188] sm:$0xff] }
 0x18d   :  { %856 = vmatpush2.bf16.msra.mxu1 %v542_v7  ;;  %816 = vmatprep.subr.bf16.mxu0 %v475_v8  ;;  %v1045_v7 = vunpack.c.l.s8.bf16 %v957_v59  ;;  %v953_v8 = vld [vmem:[#allocation8 + $0xa8] sm:$0xff] }
 0x18e   :  { %857 = vmatprep.subr.bf16.mxu1 %v539_v36  ;;  %v965_v36 = vld [vmem:[#allocation8 + $0x108] sm:$0xff]  ;;  %v1041_v13 = vunpack.c.h.s8.bf16 %v953_v8 }
 0x18f   :  { %v1065_v9 = vunpack.c.h.s8.bf16 %v965_v36 }
 0x190   :  { %817 = vmatpush2.bf16.msra.mxu0 %v474_v10  ;;  %v964_v10 = vld [vmem:[#allocation8 + $0x100] sm:$0xff] }
 0x191   :  { %858 = vmatpush2.bf16.msra.mxu1 %v538_v11  ;;  %1124 = vmatprep.subr.bf16.mxu0 %v1025_v12  ;;  %v1044_v11 = vunpack.c.l.s8.bf16 %v956_v3  ;;  %v1064_v12 = vunpack.c.h.s8.bf16 %v964_v10  ;;  %v1093_v3 = vunpack.c.l.s8.bf16 %v981_v62 }
 0x192   :  { %1165 = vmatprep.subr.bf16.mxu1 %v1089_v32  ;;  %v1029_v32 = vunpack.c.l.s8.bf16 %v949_v20 }
 0x193   :  { %819 = vmatmul.mubr.bf16.vlgmr.msra.gmra.mxu0 %v6740_v60 }
 0x194   :  { %860 = vmatmul.mubr.bf16.vlgmr.msra.gmra.mxu1 %v6730_v16  ;;  %1125 = vmatpush1.bf16.msra.mxu0 %v1024_v14  ;;  %v952_v14 = vld [vmem:[#allocation8 + $0xa0] sm:$0xff] }
 0x195   :  { %1126 = vmatprep.subr.bf16.mxu0 %v1021_v15  ;;  %1166 = vmatpush1.bf16.msra.mxu1 %v1088_v35  ;;  %v1061_v15 = vunpack.c.l.s8.bf16 %v965_v36  ;;  %v1040_v17 = vunpack.c.h.s8.bf16 %v952_v14  ;;  %v6767_v36 = vsub.s32 1, %v6698_v27 }
 0x196   :  { %1167 = vmatprep.subr.bf16.mxu1 %v1085_v39 }
 0x198   :  { %1127 = vmatpush1.bf16.msra.mxu0 %v1020_v18  ;;  %v1060_v18 = vunpack.c.l.s8.bf16 %v964_v10 }
 0x199   :  { %1128 = vmatprep.subr.bf16.mxu0 %v1017_v19  ;;  %1168 = vmatpush1.bf16.msra.mxu1 %v1084_v41  ;;  %v1037_v19 = vunpack.c.l.s8.bf16 %v953_v8  ;;  %v6764_v8 = vld [vmem:[#allocation5] sm:$0xf] }
 0x19a   :  { %1169 = vmatprep.subr.bf16.mxu1 %v1081_v46 }
 0x19c   :  { %1129 = vmatpush1.bf16.msra.mxu0 %v1016_v21  ;;  %v993_v21 = vld [vmem:[#allocation8 + $0x1e8] sm:$0xff] }
 0x19d   :  { %1130 = vmatprep.subr.bf16.mxu0 %v1013_v22  ;;  %1170 = vmatpush1.bf16.msra.mxu1 %v1080_v49  ;;  %v1121_v22 = vunpack.c.h.s8.bf16 %v993_v21 }
 0x19e   :  { %1171 = vmatprep.subr.bf16.mxu1 %v1077_v55 }
 0x1a0   :  { %1131 = vmatpush1.bf16.msra.mxu0 %v1012_v24  ;;  %v1036_v24 = vunpack.c.l.s8.bf16 %v952_v14 }
 0x1a1   :  { %1132 = vmatprep.subr.bf16.mxu0 %v1009_v25  ;;  %1172 = vmatpush1.bf16.msra.mxu1 %v1076_v57  ;;  %v1120_v25 = vunpack.c.h.s8.bf16 %v992_v23 }
 0x1a2   :  { %1173 = vmatprep.subr.bf16.mxu1 %v1073_v61 }
 0x1a4   :  { %1133 = vmatpush1.bf16.msra.mxu0 %v1008_v28  ;;  %v948_v28 = vld [vmem:[#allocation8 + $0x80] sm:$0xff] }
 0x1a5   :  { %1134 = vmatprep.subr.bf16.mxu0 %v1005_v29  ;;  %1174 = vmatpush1.bf16.msra.mxu1 %v1072_v0  ;;  %v1117_v29 = vunpack.c.l.s8.bf16 %v993_v21  ;;  %v1032_v30 = vunpack.c.h.s8.bf16 %v948_v28  ;;  %v1028_v38 = vunpack.c.l.s8.bf16 %v948_v28  ;;  %v980_v0 = vld [vmem:[#allocation8 + $0x180] sm:$0xff] }
 0x1a6   :  { %1175 = vmatprep.subr.bf16.mxu1 %v1069_v4  ;;  %v1092_v4 = vunpack.c.l.s8.bf16 %v980_v0 }
 0x1a8   :  { %1135 = vmatpush1.bf16.msra.mxu0 %v1004_v34  ;;  %v989_v34 = vld [vmem:[#allocation8 + $0x1c8] sm:$0xff] }
 0x1a9   :  { %1136 = vmatprep.subr.bf16.mxu0 %v1001_v37  ;;  %1176 = vmatpush1.bf16.msra.mxu1 %v1068_v6  ;;  %v1113_v35 = vunpack.c.h.s8.bf16 %v989_v34  ;;  %v988_v37 = vld [vmem:[#allocation8 + $0x1c0] sm:$0xff]  ;;  %v1109_v41 = vunpack.c.l.s8.bf16 %v989_v34 }
 0x1aa   :  { %1177 = vmatprep.subr.bf16.mxu1 %v1065_v9  ;;  %v1112_v39 = vunpack.c.h.s8.bf16 %v988_v37  ;;  %v6769_v9 = vld [vmem:[#allocation7] sm:$0xf] }
 0x1ac   :  { %1137 = vmatpush1.bf16.msra.mxu0 %v1000_v40  ;;  %v1027_v40 = vunpack.c.h.s8.bf16 %v6755_v33 }
 0x1ad   :  { %1138 = vmatprep.subr.bf16.mxu0 %v997_v43  ;;  %1178 = vmatpush1.bf16.msra.mxu1 %v1064_v12  ;;  %v1108_v43 = vunpack.c.l.s8.bf16 %v988_v37 }
 0x1ae   :  { %1179 = vmatprep.subr.bf16.mxu1 %v1061_v15 }
 0x1b0   :  { %1139 = vmatpush1.bf16.msra.mxu0 %v996_v48  ;;  %v984_v48 = vld [vmem:[#allocation8 + $0x1a0] sm:$0xff] }
 0x1b1   :  { %1140 = vmatprep.subr.bf16.mxu0 %v1057_v51  ;;  %1180 = vmatpush1.bf16.msra.mxu1 %v1060_v18  ;;  %v1104_v51 = vunpack.c.h.s8.bf16 %v984_v48  ;;  %v1100_v59 = vunpack.c.l.s8.bf16 %v984_v48 }
 0x1b2   :  { %1181 = vmatprep.subr.bf16.mxu1 %v1121_v22  ;;  %v903_v22 = vrot.slane %v6769_v9, %v6767_v36 }
 0x1b4   :  { %1141 = vmatpush2.bf16.msra.mxu0 %v1056_v56 }
 0x1b5   :  { %1142 = vmatprep.subr.bf16.mxu0 %v1053_v58  ;;  %1182 = vmatpush2.bf16.msra.mxu1 %v1120_v25  ;;  %v1101_v58 = vunpack.c.l.s8.bf16 %v985_v44 }
 0x1b6   :  { %1183 = vmatprep.subr.bf16.mxu1 %v1117_v29 }
 0x1b8   :  { %1143 = vmatpush2.bf16.msra.mxu0 %v1052_v63  ;;  %v1097_v63 = vunpack.c.h.s8.bf16 %v981_v62 }
 0x1b9   :  { %1144 = vmatprep.subr.bf16.mxu0 %v1049_v1  ;;  %1184 = vmatpush2.bf16.msra.mxu1 %v1116_v31  ;;  %v1096_v1 = vunpack.c.h.s8.bf16 %v980_v0 }
 0x1ba   :  { %1185 = vmatprep.subr.bf16.mxu1 %v1113_v35  ;;  %v946_v35 = vld [vmem:[#allocation8 + $0x70] sm:$0xff] }
 0x1bb   :  { %v1022_v44 = vunpack.c.l.s8.bf16 %v946_v35 }
 0x1bc   :  { %1145 = vmatpush2.bf16.msra.mxu0 %v1048_v5  ;;  %v6758_v5 = vld [vmem:[#allocation8 + $0x178] sm:$0xff] }
 0x1bd   :  { %1146 = vmatprep.subr.bf16.mxu0 %v1045_v7  ;;  %1186 = vmatpush2.bf16.msra.mxu1 %v1112_v39  ;;  %v1091_v6 = vunpack.c.h.s8.bf16 %v6758_v5  ;;  %v6762_v7 = vsub.s32 0, %v6698_v27  ;;  %v1026_v39 = vunpack.c.h.s8.bf16 %v946_v35 }
 0x1be   :  { %1187 = vmatprep.subr.bf16.mxu1 %v1109_v41  ;;  %v1023_v41 = vunpack.c.l.s8.bf16 %v6755_v33  ;;  %v938_v33 = vld [vmem:[#allocation8 + $0x30] sm:$0xff] }
 0x1bf   :  { %v873_v10 = vrot.slane %v6764_v8, %v6762_v7  ;;  %v899_v15 = vrot.slane %v6769_v9, %v6762_v7 }
 0x1c0   :  { %1147 = vmatpush2.bf16.msra.mxu0 %v1044_v11 }
 0x1c1   :  { %1148 = vmatprep.subr.bf16.mxu0 %v1041_v13  ;;  %1188 = vmatpush2.bf16.msra.mxu1 %v1108_v43  ;;  %v943_v43 = vld [vmem:[#allocation8 + $0x58] sm:$0xff] }
 0x1c2   :  { %1189 = vmatprep.subr.bf16.mxu1 %v1105_v47  ;;  %v1015_v48 = vunpack.c.l.s8.bf16 %v943_v43 }
 0x1c4   :  { %1149 = vmatpush2.bf16.msra.mxu0 %v1040_v17  ;;  %v877_v17 = vrot.slane %v6764_v8, %v6767_v36 }
 0x1c5   :  { %1150 = vmatprep.subr.bf16.mxu0 %v1037_v19  ;;  %1190 = vmatpush2.bf16.msra.mxu1 %v1104_v51 }
 0x1c6   :  { %1191 = vmatprep.subr.bf16.mxu1 %v1101_v58  ;;  %v1006_v58 = vunpack.c.l.s8.bf16 %v938_v33 }
 0x1c8   :  { %1151 = vmatpush2.bf16.msra.mxu0 %v1036_v24 }
 0x1c9   :  { %1152 = vmatprep.subr.bf16.mxu0 %v1033_v26  ;;  %1192 = vmatpush2.bf16.msra.mxu1 %v1100_v59 }
 0x1ca   :  { %1193 = vmatprep.subr.bf16.mxu1 %v1097_v63  ;;  %v963_v63 = vld [vmem:[#allocation8 + $0xf8] sm:$0xff] }
 0x1cc   :  { %1153 = vmatpush2.bf16.msra.mxu0 %v1032_v30 }
 0x1cd   :  { %1154 = vmatprep.subr.bf16.mxu0 %v1029_v32  ;;  %1194 = vmatpush2.bf16.msra.mxu1 %v1096_v1  ;;  %v1059_v1 = vunpack.c.h.s8.bf16 %v963_v63 }
 0x1ce   :  { %1195 = vmatprep.subr.bf16.mxu1 %v1093_v3  ;;  %v962_v3 = vld [vmem:[#allocation8 + $0xf0] sm:$0xff] }
 0x1d0   :  { %1155 = vmatpush2.bf16.msra.mxu0 %v1028_v38 }
 0x1d1   :  { %1206 = vmatprep.subr.bf16.mxu0 %v1027_v40  ;;  %1196 = vmatpush2.bf16.msra.mxu1 %v1092_v4  ;;  %v1058_v4 = vunpack.c.h.s8.bf16 %v962_v3 }
 0x1d2   :  { %1247 = vmatprep.subr.bf16.mxu1 %v1091_v6  ;;  %v1055_v6 = vunpack.c.l.s8.bf16 %v963_v63 }
 0x1d3   :  { %v656_v45 = vpop.f32.mrf.mxu0 }
 0x1d4   :  { %v697_v46 = vpop.f32.mrf.mxu1 }
 0x1d5   :  { %v698_v49 = vadd.f32 %v697_v46, %v656_v45  ;;  %v658_v54 = vpop.f32.mrf.mxu0  ;;  %v1019_v45 = vunpack.c.h.s8.bf16 %v943_v43  ;;  %v942_v46 = vld [vmem:[#allocation8 + $0x50] sm:$0xff] }
 0x1d6   :  { %v699_v55 = vpop.f32.mrf.mxu1  ;;  %v1018_v47 = vunpack.c.h.s8.bf16 %v942_v46  ;;  %v1014_v51 = vunpack.c.l.s8.bf16 %v942_v46 }
 0x1d7   :  { %v660_v56 = vpop.f32.mrf.mxu0  ;;  %v700_v13 = vadd.f32 %v699_v55, %v658_v54  ;;  %v1010_v55 = vunpack.c.h.s8.bf16 %v938_v33 }
 0x1d8   :  { %v701_v57 = vpop.f32.mrf.mxu1 }
 0x1d9   :  { %v661_v42 = vpop.f32.mrf.mxu0  ;;  %v935_v57 = vld [vmem:[#allocation8 + $0x18] sm:$0xff] }
 0x1da   :  { %v702_v61 = vpop.f32.mrf.mxu1  ;;  %v1003_v59 = vunpack.c.h.s8.bf16 %v935_v57  ;;  %v934_v42 = vld [vmem:[#allocation8 + $0x10] sm:$0xff]  ;;  %v999_v62 = vunpack.c.l.s8.bf16 %v935_v57 }
 0x1db   :  { %v1002_v61 = vunpack.c.h.s8.bf16 %v934_v42  ;;  %v998_v0 = vunpack.c.l.s8.bf16 %v934_v42 }
 0x213   :  { %v738_v11 = vpop.f32.mrf.mxu0 }
 0x214   :  { %v6773_v12 = vpop.f32.mrf.mxu1  ;;  %v739_v14 = vadd.f32 %v738_v11, %v698_v49  ;;  %v939_v49 = vld [vmem:[#allocation8 + $0x38] sm:$0xff]  ;;  %v1054_v11 = vunpack.c.l.s8.bf16 %v962_v3 }
 0x215   :  { %v740_v18 = vpop.f32.mrf.mxu0  ;;  %v1011_v54 = vunpack.c.h.s8.bf16 %v939_v49  ;;  %v1007_v56 = vunpack.c.l.s8.bf16 %v939_v49  ;;  %v975_v3 = vld [vmem:[#allocation8 + $0x158] sm:$0xff] }
 0x216   :  { %v6779_v19 = vpop.f32.mrf.mxu1  ;;  %v890_v20 = vmul.f32 %v873_v10, %v739_v14  ;;  %v741_v21 = vadd.f32 %v740_v18, %v700_v13  ;;  %v959_v10 = vld [vmem:[#allocation8 + $0xd8] sm:$0xff]  ;;  %v958_v14 = vld [vmem:[#allocation8 + $0xd0] sm:$0xff] }
 0x217   :  { %v742_v23 = vpop.f32.mrf.mxu0  ;;  %v1051_v13 = vunpack.c.h.s8.bf16 %v959_v10  ;;  %v955_v18 = vld [vmem:[#allocation8 + $0xb8] sm:$0xff] }
 0x218   :  { %v783_v24 = vpop.f32.mrf.mxu1  ;;  %v916_v25 = vadd.f32 %v899_v15, %v890_v20  ;;  %v891_v26 = vmul.f32 %v877_v17, %v741_v21  ;;  %v1050_v15 = vunpack.c.h.s8.bf16 %v958_v14  ;;  %v1047_v17 = vunpack.c.l.s8.bf16 %v959_v10  ;;  %v974_v10 = vld [vmem:[#allocation8 + $0x150] sm:$0xff] }
 0x219   :  { %v743_v28 = vpop.f32.mrf.mxu0  ;;  %v1046_v20 = vunpack.c.l.s8.bf16 %v958_v14  ;;  %v1043_v21 = vunpack.c.h.s8.bf16 %v955_v18  ;;  %v6788_v23 = vsub.s32 2, %v6698_v27 }
 0x21a   :  { %v784_v29 = vpop.f32.mrf.mxu1  ;;  %v920_v30 = vmul.f32 0.1, %v916_v25  ;;  %v917_v31 = vadd.f32 %v903_v22, %v891_v26  ;;  %v954_v22 = vld [vmem:[#allocation8 + $0xb0] sm:$0xff]  ;;  %v6791_v26 = vsub.s32 3, %v6698_v27  ;;  %v951_v28 = vld [vmem:[#allocation8 + $0x98] sm:$0xff] }
 0x21b   :  { %v1042_v24 = vunpack.c.h.s8.bf16 %v954_v22  ;;  %v907_v43 = vrot.slane %v6769_v9, %v6788_v23 }
 0x21c   :  { %v921_v32 = vmul.f32 0.1, %v917_v31  ;;  %v924_v34 = vmax.f32 %v916_v25, %v920_v30  ;;  %v1039_v25 = vunpack.c.l.s8.bf16 %v955_v18  ;;  %v911_v49 = vrot.slane %v6769_v9, %v6791_v26  ;;  %v1369_v18 = vld [vmem:[%s7861_s9 + $0x88] sm:$0xff] }
 0x21e   :  { %v925_v37 = vmax.f32 %v917_v31, %v921_v32  ;;  %v6783_v40 = vpack.c.bf16 %v924_v34, %v924_v34  ;;  %v881_v32 = vrot.slane %v6764_v8, %v6788_v23  ;;  %v1038_v34 = vunpack.c.l.s8.bf16 %v954_v22 }
 0x21f   :  { %v1078_v22 = vunpack.c.l.s8.bf16 %v974_v10 }
 0x220   :  { %v929_v38 = vpack.c.bf16 %v925_v37, %v925_v37 }
 0x222   :  { %1156 = vmatprep.mubr.bf16.mxu0 %v929_v38 }
 0x223   :  { %1157 = vmatmul.mubr.bf16.vlgmr.msra.gmra.mxu0 %v6783_v40 }
 0x224   :  { %1207 = vmatpush1.bf16.msra.mxu0 %v1026_v39  ;;  %1238 = vmatprep.mubr.bf16.mxu0 %v929_v38  ;;  %v1035_v38 = vunpack.c.h.s8.bf16 %v951_v28  ;;  %v950_v39 = vld [vmem:[#allocation8 + $0x90] sm:$0xff] }
 0x225   :  { %1208 = vmatprep.subr.bf16.mxu0 %v1023_v41 }
 0x228   :  { %1209 = vmatpush1.bf16.msra.mxu0 %v1022_v44 }
 0x229   :  { %1210 = vmatprep.subr.bf16.mxu0 %v1019_v45  ;;  %v885_v45 = vrot.slane %v6764_v8, %v6791_v26 }
 0x22c   :  { %1211 = vmatpush1.bf16.msra.mxu0 %v1018_v47 }
 0x22d   :  { %1212 = vmatprep.subr.bf16.mxu0 %v1015_v48 }
 0x230   :  { %1213 = vmatpush1.bf16.msra.mxu0 %v1014_v51  ;;  %v1034_v51 = vunpack.c.h.s8.bf16 %v950_v39 }
 0x231   :  { %1214 = vmatprep.subr.bf16.mxu0 %v1011_v54 }
 0x234   :  { %1215 = vmatpush1.bf16.msra.mxu0 %v1010_v55  ;;  %v1031_v55 = vunpack.c.l.s8.bf16 %v951_v28 }
 0x235   :  { %1216 = vmatprep.subr.bf16.mxu0 %v1007_v56 }
 0x238   :  { %1217 = vmatpush1.bf16.msra.mxu0 %v1006_v58 }
 0x239   :  { %1218 = vmatprep.subr.bf16.mxu0 %v1003_v59  ;;  %v1030_v59 = vunpack.c.l.s8.bf16 %v950_v39 }
 0x23c   :  { %1219 = vmatpush1.bf16.msra.mxu0 %v1002_v61  ;;  %v978_v61 = vld [vmem:[#allocation8 + $0x170] sm:$0xff] }
 0x23d   :  { %1220 = vmatprep.subr.bf16.mxu0 %v999_v62  ;;  %v1090_v9 = vunpack.c.h.s8.bf16 %v978_v61 }
 0x240   :  { %1221 = vmatpush1.bf16.msra.mxu0 %v998_v0 }
 0x241   :  { %1222 = vmatprep.subr.bf16.mxu0 %v1059_v1  ;;  %v1087_v1 = vunpack.c.l.s8.bf16 %v6758_v5  ;;  %v1082_v5 = vunpack.c.h.s8.bf16 %v974_v10 }
 0x244   :  { %1223 = vmatpush2.bf16.msra.mxu0 %v1058_v4  ;;  %v1086_v4 = vunpack.c.l.s8.bf16 %v978_v61  ;;  %v1409_v61 = vld [vmem:[%s7861_s9 + $0x1c8] sm:$0xff] }
 0x245   :  { %1224 = vmatprep.subr.bf16.mxu0 %v1055_v6  ;;  %v1083_v6 = vunpack.c.h.s8.bf16 %v975_v3 }
 0x248   :  { %1225 = vmatpush2.bf16.msra.mxu0 %v1054_v11  ;;  %v1377_v11 = vld [vmem:[%s7861_s9 + $0xc8] sm:$0xff] }
 0x249   :  { %1226 = vmatprep.subr.bf16.mxu0 %v1051_v13  ;;  %v1537_v13 = vunpack.c.h.s8.bf16 %v1377_v11 }
 0x24c   :  { %1227 = vmatpush2.bf16.msra.mxu0 %v1050_v15  ;;  %v1529_v15 = vunpack.c.l.s8.bf16 %v1377_v11 }
 0x24d   :  { %1228 = vmatprep.subr.bf16.mxu0 %v1047_v17  ;;  %v1079_v17 = vunpack.c.l.s8.bf16 %v975_v3  ;;  %v1408_v3 = vld [vmem:[%s7861_s9 + $0x1c0] sm:$0xff] }
 0x24e   :  { %v1600_v10 = vunpack.c.h.s8.bf16 %v1408_v3 }
 0x250   :  { %1229 = vmatpush2.bf16.msra.mxu0 %v1046_v20  ;;  %v971_v20 = vld [vmem:[#allocation8 + $0x138] sm:$0xff] }
 0x251   :  { %1230 = vmatprep.subr.bf16.mxu0 %v1043_v21  ;;  %v1075_v28 = vunpack.c.h.s8.bf16 %v971_v20 }
 0x253   :  { %v820_v29 = vpop.f32.mrf.mxu0 }
 0x254   :  { %v861_v30 = vpop.f32.mrf.mxu1  ;;  %v821_v31 = vadd.f32 %v820_v29, %v6773_v12  ;;  %1231 = vmatpush2.bf16.msra.mxu0 %v1042_v24  ;;  %v1521_v24 = vunpack.c.h.s8.bf16 %v1369_v18  ;;  %v970_v29 = vld [vmem:[#allocation8 + $0x130] sm:$0xff] }
 0x255   :  { %v822_v35 = vpop.f32.mrf.mxu0  ;;  %1232 = vmatprep.subr.bf16.mxu0 %v1039_v25  ;;  %v1368_v25 = vld [vmem:[%s7861_s9 + $0x80] sm:$0xff]  ;;  %v1070_v39 = vunpack.c.l.s8.bf16 %v970_v29 }
 0x256   :  { %v863_v37 = vpop.f32.mrf.mxu1  ;;  %v862_v41 = vadd.f32 %v861_v30, %v821_v31  ;;  %v823_v44 = vadd.f32 %v822_v35, %v6779_v19  ;;  %v1520_v30 = vunpack.c.h.s8.bf16 %v1368_v25  ;;  %v1074_v31 = vunpack.c.h.s8.bf16 %v970_v29  ;;  %v1361_v35 = vld [vmem:[%s7861_s9 + $0x48] sm:$0xff] }
 0x257   :  { %v824_v12 = vpop.f32.mrf.mxu0 }
 0x258   :  { %v865_v46 = vpop.f32.mrf.mxu1  ;;  %v892_v47 = vmul.f32 %v881_v32, %v862_v41  ;;  %v864_v48 = vadd.f32 %v863_v37, %v823_v44  ;;  %1233 = vmatpush2.bf16.msra.mxu0 %v1038_v34  ;;  %v1513_v32 = vunpack.c.l.s8.bf16 %v1369_v18  ;;  %v1071_v34 = vunpack.c.l.s8.bf16 %v971_v20  ;;  %v967_v37 = vld [vmem:[#allocation8 + $0x118] sm:$0xff] }
 0x259   :  { %v825_v54 = vpop.f32.mrf.mxu0  ;;  %1234 = vmatprep.subr.bf16.mxu0 %v1035_v38  ;;  %v1512_v38 = vunpack.c.l.s8.bf16 %v1368_v25  ;;  %v1505_v41 = vunpack.c.h.s8.bf16 %v1361_v35  ;;  %v1067_v44 = vunpack.c.h.s8.bf16 %v967_v37  ;;  %v1400_v20 = vld [vmem:[%s7861_s9 + $0x180] sm:$0xff] }
 0x25a   :  { %v866_v33 = vpop.f32.mrf.mxu1  ;;  %v918_v56 = vadd.f32 %v907_v43, %v892_v47  ;;  %v893_v57 = vmul.f32 %v885_v45, %v864_v48  ;;  %v1360_v43 = vld [vmem:[%s7861_s9 + $0x40] sm:$0xff]  ;;  %v1497_v47 = vunpack.c.l.s8.bf16 %v1361_v35  ;;  %v1063_v48 = vunpack.c.l.s8.bf16 %v967_v37 }
 0x25b   :  { %v966_v45 = vld [vmem:[#allocation8 + $0x110] sm:$0xff]  ;;  %v1504_v12 = vunpack.c.h.s8.bf16 %v1360_v43  ;;  %v1496_v54 = vunpack.c.l.s8.bf16 %v1360_v43 }
 0x25c   :  { %v922_v58 = vmul.f32 0.1, %v918_v56  ;;  %v919_v19 = vadd.f32 %v911_v49, %v893_v57  ;;  %1235 = vmatpush2.bf16.msra.mxu0 %v1034_v51  ;;  %v1066_v46 = vunpack.c.h.s8.bf16 %v966_v45  ;;  %v1353_v49 = vld [vmem:[%s7861_s9 + $0x8] sm:$0xff]  ;;  %v1062_v33 = vunpack.c.l.s8.bf16 %v966_v45  ;;  %v982_v35 = vld [vmem:[#allocation8 + $0x190] sm:$0xff] }
 0x25d   :  { %1236 = vmatprep.subr.bf16.mxu0 %v1031_v55  ;;  %v995_v51 = vld [vmem:[#allocation8 + $0x1f8] sm:$0xff]  ;;  %v1489_v55 = vunpack.c.h.s8.bf16 %v1353_v49  ;;  %v1098_v37 = vunpack.c.h.s8.bf16 %v982_v35 }
 0x25e   :  { %v923_v8 = vmul.f32 0.1, %v919_v19  ;;  %v926_v42 = vmax.f32 %v918_v56, %v922_v58  ;;  %v1352_v56 = vld [vmem:[%s7861_s9] sm:$0xff]  ;;  %v1123_v57 = vunpack.c.h.s8.bf16 %v995_v51 }
 0x25f   :  { %v994_v58 = vld [vmem:[#allocation8 + $0x1f0] sm:$0xff] }
 0x260   :  { %1237 = vmatpush2.bf16.msra.mxu0 %v1030_v59  ;;  %v927_v62 = vmax.f32 %v919_v19, %v923_v8  ;;  %v6803_v0 = vpack.c.bf16 %v926_v42, %v926_v42  ;;  %v1488_v19 = vunpack.c.h.s8.bf16 %v1352_v56  ;;  %v1122_v59 = vunpack.c.h.s8.bf16 %v994_v58 }
 0x261   :  { %1736 = vmatprep.subr.bf16.mxu0 %v1537_v13  ;;  %v1481_v8 = vunpack.c.l.s8.bf16 %v1353_v49  ;;  %v1119_v42 = vunpack.c.l.s8.bf16 %v995_v51  ;;  %v1401_v13 = vld [vmem:[%s7861_s9 + $0x188] sm:$0xff]  ;;  %v1384_v49 = vld [vmem:[%s7861_s9 + $0x100] sm:$0xff] }
 0x262   :  { %v931_v63 = vpack.c.bf16 %v927_v62, %v927_v62  ;;  %v991_v62 = vld [vmem:[#allocation8 + $0x1d8] sm:$0xff]  ;;  %v1585_v18 = vunpack.c.h.s8.bf16 %v1401_v13  ;;  %v1552_v51 = vunpack.c.h.s8.bf16 %v1384_v49 }
 0x263   :  { %1239 = vmatmul.mubr.bf16.vlgmr.msra.gmra.mxu0 %v6783_v40  ;;  %v1376_v40 = vld [vmem:[%s7861_s9 + $0xc0] sm:$0xff] }
 0x264   :  { %1197 = vmatprep.mubr.bf16.mxu1 %v931_v63  ;;  %v1536_v14 = vunpack.c.h.s8.bf16 %v1376_v40  ;;  %v1528_v21 = vunpack.c.l.s8.bf16 %v1376_v40  ;;  %v1593_v40 = vunpack.c.l.s8.bf16 %v1409_v61 }
 0x265   :  { %1198 = vmatmul.mubr.bf16.vlgmr.msra.gmra.mxu1 %v6803_v0 }
 0x266   :  { %1248 = vmatpush1.bf16.msra.mxu1 %v1090_v9  ;;  %1279 = vmatprep.mubr.bf16.mxu1 %v931_v63  ;;  %v1480_v63 = vunpack.c.l.s8.bf16 %v1352_v56  ;;  %v1118_v9 = vunpack.c.l.s8.bf16 %v994_v58  ;;  %v1440_v56 = vld [vmem:[%s7861_s9 + $0x2c0] sm:$0xff] }
 0x267   :  { %1249 = vmatprep.subr.bf16.mxu1 %v1087_v1  ;;  %1737 = vmatpush1.bf16.msra.mxu0 %v1536_v14  ;;  %v1601_v1 = vunpack.c.h.s8.bf16 %v1409_v61  ;;  %v987_v14 = vld [vmem:[#allocation8 + $0x1b8] sm:$0xff]  ;;  %v1664_v58 = vunpack.c.h.s8.bf16 %v1440_v56 }
 0x268   :  { %1738 = vmatprep.subr.bf16.mxu0 %v1529_v15  ;;  %v1592_v15 = vunpack.c.l.s8.bf16 %v1408_v3  ;;  %v1103_v29 = vunpack.c.l.s8.bf16 %v987_v14  ;;  %v1425_v3 = vld [vmem:[%s7861_s9 + $0x248] sm:$0xff] }
 0x26a   :  { %1250 = vmatpush1.bf16.msra.mxu1 %v1086_v4  ;;  %v1115_v4 = vunpack.c.h.s8.bf16 %v991_v62 }
 0x26b   :  { %1251 = vmatprep.subr.bf16.mxu1 %v1083_v6  ;;  %1739 = vmatpush1.bf16.msra.mxu0 %v1528_v21  ;;  %v990_v6 = vld [vmem:[#allocation8 + $0x1d0] sm:$0xff]  ;;  %v1107_v21 = vunpack.c.h.s8.bf16 %v987_v14 }
 0x26c   :  { %1740 = vmatprep.subr.bf16.mxu0 %v1521_v24  ;;  %v1114_v11 = vunpack.c.h.s8.bf16 %v990_v6  ;;  %v1584_v24 = vunpack.c.h.s8.bf16 %v1400_v20  ;;  %v1416_v14 = vld [vmem:[%s7861_s9 + $0x200] sm:$0xff] }
 0x26e   :  { %1252 = vmatpush1.bf16.msra.mxu1 %v1082_v5  ;;  %v1111_v5 = vunpack.c.l.s8.bf16 %v991_v62  ;;  %v1432_v62 = vld [vmem:[%s7861_s9 + $0x280] sm:$0xff] }
 0x26f   :  { %1253 = vmatprep.subr.bf16.mxu1 %v1079_v17  ;;  %1741 = vmatpush1.bf16.msra.mxu0 %v1520_v30  ;;  %v1110_v17 = vunpack.c.l.s8.bf16 %v990_v6  ;;  %v983_v30 = vld [vmem:[#allocation8 + $0x198] sm:$0xff] }
 0x270   :  { %1742 = vmatprep.subr.bf16.mxu0 %v1513_v32  ;;  %v1424_v6 = vld [vmem:[%s7861_s9 + $0x240] sm:$0xff] }
 0x272   :  { %1254 = vmatpush1.bf16.msra.mxu1 %v1078_v22  ;;  %v986_v22 = vld [vmem:[#allocation8 + $0x1b0] sm:$0xff] }
 0x273   :  { %1255 = vmatprep.subr.bf16.mxu1 %v1075_v28  ;;  %1743 = vmatpush1.bf16.msra.mxu0 %v1512_v38  ;;  %v1106_v25 = vunpack.c.h.s8.bf16 %v986_v22  ;;  %v1577_v28 = vunpack.c.l.s8.bf16 %v1401_v13  ;;  %v1102_v32 = vunpack.c.l.s8.bf16 %v986_v22  ;;  %v1095_v38 = vunpack.c.l.s8.bf16 %v983_v30  ;;  %v1472_v22 = vld [vmem:[%s7861_s9 + $0x3c0] sm:$0xff] }
 0x274   :  { %1744 = vmatprep.subr.bf16.mxu0 %v1505_v41  ;;  %v1393_v41 = vld [vmem:[%s7861_s9 + $0x148] sm:$0xff] }
 0x275   :  { %v1569_v43 = vunpack.c.h.s8.bf16 %v1393_v41 }
 0x276   :  { %1256 = vmatpush1.bf16.msra.mxu1 %v1074_v31  ;;  %v1576_v31 = vunpack.c.l.s8.bf16 %v1400_v20  ;;  %v1473_v20 = vld [vmem:[%s7861_s9 + $0x3c8] sm:$0xff] }
 0x277   :  { %1257 = vmatprep.subr.bf16.mxu1 %v1071_v34  ;;  %1745 = vmatpush1.bf16.msra.mxu0 %v1504_v12  ;;  %v1099_v34 = vunpack.c.h.s8.bf16 %v983_v30  ;;  %v1561_v12 = vunpack.c.l.s8.bf16 %v1393_v41 }
 0x278   :  { %1746 = vmatprep.subr.bf16.mxu0 %v1497_v47  ;;  %v1385_v47 = vld [vmem:[%s7861_s9 + $0x108] sm:$0xff] }
 0x27a   :  { %1258 = vmatpush1.bf16.msra.mxu1 %v1070_v39  ;;  %v1094_v39 = vunpack.c.l.s8.bf16 %v982_v35 }
 0x27b   :  { %1259 = vmatprep.subr.bf16.mxu1 %v1067_v44  ;;  %1747 = vmatpush1.bf16.msra.mxu0 %v1496_v54  ;;  %v1392_v44 = vld [vmem:[%s7861_s9 + $0x140] sm:$0xff]  ;;  %v1545_v54 = vunpack.c.l.s8.bf16 %v1385_v47 }
 0x27c   :  { %1748 = vmatprep.subr.bf16.mxu0 %v1489_v55  ;;  %v1568_v45 = vunpack.c.h.s8.bf16 %v1392_v44 }
 0x27e   :  { %1260 = vmatpush1.bf16.msra.mxu1 %v1066_v46  ;;  %v1560_v46 = vunpack.c.l.s8.bf16 %v1392_v44 }
 0x27f   :  { %1261 = vmatprep.subr.bf16.mxu1 %v1063_v48  ;;  %1749 = vmatpush1.bf16.msra.mxu0 %v1488_v19  ;;  %v1553_v48 = vunpack.c.h.s8.bf16 %v1385_v47 }
 0x280   :  { %1750 = vmatprep.subr.bf16.mxu0 %v1481_v8  ;;  %v1656_v8 = vunpack.c.l.s8.bf16 %v1440_v56 }
 0x282   :  { %1262 = vmatpush1.bf16.msra.mxu1 %v1062_v33  ;;  %v1441_v33 = vld [vmem:[%s7861_s9 + $0x2c8] sm:$0xff] }
 0x283   :  { %1263 = vmatprep.subr.bf16.mxu1 %v1123_v57  ;;  %1751 = vmatpush1.bf16.msra.mxu0 %v1480_v63  ;;  %v1665_v55 = vunpack.c.h.s8.bf16 %v1441_v33  ;;  %v6866_v57 = vld [vmem:[%s7861_s9 + $0xd8] sm:$0xff]  ;;  %v1648_v63 = vunpack.c.h.s8.bf16 %v1432_v62 }
 0x284   :  { %1752 = vmatprep.subr.bf16.mxu0 %v1601_v1  ;;  %v1539_v19 = vunpack.c.h.s8.bf16 %v6866_v57  ;;  %v1640_v1 = vunpack.c.l.s8.bf16 %v1432_v62 }
 0x286   :  { %1264 = vmatpush2.bf16.msra.mxu1 %v1122_v59  ;;  %v1657_v59 = vunpack.c.l.s8.bf16 %v1441_v33 }
 0x287   :  { %1265 = vmatprep.subr.bf16.mxu1 %v1119_v42  ;;  %1753 = vmatpush2.bf16.msra.mxu0 %v1600_v10  ;;  %v1433_v42 = vld [vmem:[%s7861_s9 + $0x288] sm:$0xff]  ;;  %v1632_v10 = vunpack.c.h.s8.bf16 %v1424_v6 }
 0x288   :  { %1754 = vmatprep.subr.bf16.mxu0 %v1593_v40  ;;  %v1649_v61 = vunpack.c.h.s8.bf16 %v1433_v42  ;;  %v1624_v40 = vunpack.c.l.s8.bf16 %v1424_v6 }
 0x28a   :  { %1266 = vmatpush2.bf16.msra.mxu1 %v1118_v9  ;;  %v1641_v9 = vunpack.c.l.s8.bf16 %v1433_v42 }
 0x28b   :  { %1267 = vmatprep.subr.bf16.mxu1 %v1115_v4  ;;  %1755 = vmatpush2.bf16.msra.mxu0 %v1592_v15  ;;  %v1633_v4 = vunpack.c.h.s8.bf16 %v1425_v3  ;;  %v1616_v15 = vunpack.c.h.s8.bf16 %v1416_v14 }
 0x28c   :  { %1756 = vmatprep.subr.bf16.mxu0 %v1585_v18  ;;  %v1608_v18 = vunpack.c.l.s8.bf16 %v1416_v14 }
 0x28e   :  { %1268 = vmatpush2.bf16.msra.mxu1 %v1114_v11  ;;  %v1625_v11 = vunpack.c.l.s8.bf16 %v1425_v3 }
 0x28f   :  { %1269 = vmatprep.subr.bf16.mxu1 %v1111_v5  ;;  %1757 = vmatpush2.bf16.msra.mxu0 %v1584_v24  ;;  %v1417_v5 = vld [vmem:[%s7861_s9 + $0x208] sm:$0xff]  ;;  %v1728_v24 = vunpack.c.h.s8.bf16 %v1472_v22 }
 0x290   :  { %1758 = vmatprep.subr.bf16.mxu0 %v1577_v28  ;;  %v1617_v13 = vunpack.c.h.s8.bf16 %v1417_v5  ;;  %v1720_v28 = vunpack.c.l.s8.bf16 %v1472_v22 }
 0x292   :  { %1270 = vmatpush2.bf16.msra.mxu1 %v1110_v17  ;;  %v1609_v17 = vunpack.c.l.s8.bf16 %v1417_v5 }
 0x293   :  { %1271 = vmatprep.subr.bf16.mxu1 %v1107_v21  ;;  %1759 = vmatpush2.bf16.msra.mxu0 %v1576_v31  ;;  %v1729_v21 = vunpack.c.h.s8.bf16 %v1473_v20  ;;  %v1464_v31 = vld [vmem:[%s7861_s9 + $0x380] sm:$0xff] }
 0x294   :  { %1760 = vmatprep.subr.bf16.mxu0 %v1569_v43  ;;  %v1704_v35 = vunpack.c.l.s8.bf16 %v1464_v31 }
 0x296   :  { %1272 = vmatpush2.bf16.msra.mxu1 %v1106_v25  ;;  %v1721_v25 = vunpack.c.l.s8.bf16 %v1473_v20 }
 0x297   :  { %1273 = vmatprep.subr.bf16.mxu1 %v1103_v29  ;;  %1761 = vmatpush2.bf16.msra.mxu0 %v1568_v45  ;;  %v1465_v29 = vld [vmem:[%s7861_s9 + $0x388] sm:$0xff] }
 0x298   :  { %1762 = vmatprep.subr.bf16.mxu0 %v1561_v12  ;;  %v1713_v30 = vunpack.c.h.s8.bf16 %v1465_v29 }
 0x29a   :  { %1274 = vmatpush2.bf16.msra.mxu1 %v1102_v32  ;;  %v1712_v32 = vunpack.c.h.s8.bf16 %v1464_v31 }
 0x29b   :  { %1275 = vmatprep.subr.bf16.mxu1 %v1099_v34  ;;  %1763 = vmatpush2.bf16.msra.mxu0 %v1560_v46  ;;  %v1705_v34 = vunpack.c.l.s8.bf16 %v1465_v29  ;;  %v1531_v29 = vunpack.c.l.s8.bf16 %v6866_v57 }
 0x29c   :  { %1764 = vmatprep.subr.bf16.mxu0 %v1553_v48  ;;  %v1449_v48 = vld [vmem:[%s7861_s9 + $0x308] sm:$0xff] }
 0x29e   :  { %1276 = vmatpush2.bf16.msra.mxu1 %v1098_v37  ;;  %v1457_v37 = vld [vmem:[%s7861_s9 + $0x348] sm:$0xff] }
 0x29f   :  { %1277 = vmatprep.subr.bf16.mxu1 %v1095_v38  ;;  %1765 = vmatpush2.bf16.msra.mxu0 %v1552_v51  ;;  %v1697_v38 = vunpack.c.h.s8.bf16 %v1457_v37  ;;  %v1689_v45 = vunpack.c.l.s8.bf16 %v1457_v37  ;;  %v1448_v51 = vld [vmem:[%s7861_s9 + $0x300] sm:$0xff]  ;;  %v1363_v37 = vld [vmem:[%s7861_s9 + $0x58] sm:$0xff] }
 0x2a0   :  { %1766 = vmatprep.subr.bf16.mxu0 %v1545_v54  ;;  %v1680_v54 = vunpack.c.h.s8.bf16 %v1448_v51  ;;  %v1672_v33 = vunpack.c.l.s8.bf16 %v1448_v51  ;;  %v1411_v51 = vld [vmem:[%s7861_s9 + $0x1d8] sm:$0xff] }
 0x2a2   :  { %1278 = vmatpush2.bf16.msra.mxu1 %v1094_v39  ;;  %v1456_v39 = vld [vmem:[%s7861_s9 + $0x340] sm:$0xff] }
 0x2a3   :  { %1777 = vmatprep.subr.bf16.mxu1 %v1665_v55  ;;  %v1696_v43 = vunpack.c.h.s8.bf16 %v1456_v39  ;;  %v1688_v46 = vunpack.c.l.s8.bf16 %v1456_v39  ;;  %v6914_v55 = vld [vmem:[%s7861_s9 + $0x2d8] sm:$0xff]  ;;  %v1507_v39 = vunpack.c.h.s8.bf16 %v1363_v37 }
 0x2a4   :  { %v1667_v56 = vunpack.c.h.s8.bf16 %v6914_v55 }
 0x2a5   :  { %1280 = vmatmul.mubr.bf16.vlgmr.msra.gmra.mxu1 %v6803_v0  ;;  %v1544_v0 = vunpack.c.l.s8.bf16 %v1384_v49  ;;  %v1681_v49 = vunpack.c.h.s8.bf16 %v1449_v48 }
 0x2a6   :  { %1778 = vmatpush1.bf16.msra.mxu1 %v1664_v58  ;;  %v6917_v58 = vld [vmem:[#allocation10] sm:$0xf] }
 0x2a7   :  { %1767 = vmatpush2.bf16.msra.mxu0 %v1544_v0  ;;  %1779 = vmatprep.subr.bf16.mxu1 %v1657_v59  ;;  %v1673_v0 = vunpack.c.l.s8.bf16 %v1449_v48  ;;  %v6921_v59 = vld [vmem:[#allocation11] sm:$0xf] }
 0x2a8   :  { %1818 = vmatprep.subr.bf16.mxu0 %v1539_v19 }
 0x2aa   :  { %1780 = vmatpush1.bf16.msra.mxu1 %v1656_v8  ;;  %v1293_v8 = vrot.slane %v6917_v58, %v6762_v7 }
 0x2ab   :  { %1781 = vmatprep.subr.bf16.mxu1 %v1649_v61 }
 0x2ae   :  { %1782 = vmatpush1.bf16.msra.mxu1 %v1648_v63  ;;  %v1319_v63 = vrot.slane %v6921_v59, %v6762_v7 }
 0x2af   :  { %1783 = vmatprep.subr.bf16.mxu1 %v1641_v9  ;;  %v1297_v9 = vrot.slane %v6917_v58, %v6767_v36 }
 0x2b2   :  { %1784 = vmatpush1.bf16.msra.mxu1 %v1640_v1 }
 0x2b3   :  { %1785 = vmatprep.subr.bf16.mxu1 %v1633_v4 }
 0x2b6   :  { %1786 = vmatpush1.bf16.msra.mxu1 %v1632_v10  ;;  %v1323_v10 = vrot.slane %v6921_v59, %v6767_v36 }
 0x2b7   :  { %1787 = vmatprep.subr.bf16.mxu1 %v1625_v11 }
 0x2ba   :  { %1788 = vmatpush1.bf16.msra.mxu1 %v1624_v40 }
 0x2bb   :  { %1789 = vmatprep.subr.bf16.mxu1 %v1617_v13 }
 0x2be   :  { %1790 = vmatpush1.bf16.msra.mxu1 %v1616_v15 }
 0x2bf   :  { %1791 = vmatprep.subr.bf16.mxu1 %v1609_v17 }
 0x2c2   :  { %1792 = vmatpush1.bf16.msra.mxu1 %v1608_v18 }
 0x2c3   :  { %1793 = vmatprep.subr.bf16.mxu1 %v1729_v21  ;;  %v1378_v21 = vld [vmem:[%s7861_s9 + $0xd0] sm:$0xff] }
 0x2c4   :  { %v1530_v31 = vunpack.c.l.s8.bf16 %v1378_v21 }
 0x2c6   :  { %1794 = vmatpush2.bf16.msra.mxu1 %v1728_v24 }
 0x2c7   :  { %1795 = vmatprep.subr.bf16.mxu1 %v1721_v25  ;;  %v1538_v25 = vunpack.c.h.s8.bf16 %v1378_v21 }
 0x2ca   :  { %1796 = vmatpush2.bf16.msra.mxu1 %v1720_v28 }
 0x2cb   :  { %1797 = vmatprep.subr.bf16.mxu1 %v1713_v30  ;;  %v1371_v30 = vld [vmem:[%s7861_s9 + $0x98] sm:$0xff] }
 0x2ce   :  { %1798 = vmatpush2.bf16.msra.mxu1 %v1712_v32  ;;  %v1523_v32 = vunpack.c.h.s8.bf16 %v1371_v30 }
 0x2cf   :  { %1799 = vmatprep.subr.bf16.mxu1 %v1705_v34  ;;  %v1370_v34 = vld [vmem:[%s7861_s9 + $0x90] sm:$0xff] }
 0x2d0   :  { %v1522_v57 = vunpack.c.h.s8.bf16 %v1370_v34 }
 0x2d2   :  { %1800 = vmatpush2.bf16.msra.mxu1 %v1704_v35  ;;  %v1515_v35 = vunpack.c.l.s8.bf16 %v1371_v30 }
 0x2d3   :  { %1801 = vmatprep.subr.bf16.mxu1 %v1697_v38  ;;  %v1514_v38 = vunpack.c.l.s8.bf16 %v1370_v34 }
 0x2d6   :  { %1802 = vmatpush2.bf16.msra.mxu1 %v1696_v43 }
 0x2d7   :  { %1803 = vmatprep.subr.bf16.mxu1 %v1689_v45  ;;  %v1355_v45 = vld [vmem:[%s7861_s9 + $0x18] sm:$0xff] }
 0x2da   :  { %1804 = vmatpush2.bf16.msra.mxu1 %v1688_v46  ;;  %v1491_v46 = vunpack.c.h.s8.bf16 %v1355_v45 }
 0x2db   :  { %1805 = vmatprep.subr.bf16.mxu1 %v1681_v49  ;;  %v1483_v49 = vunpack.c.l.s8.bf16 %v1355_v45 }
 0x2de   :  { %1806 = vmatpush2.bf16.msra.mxu1 %v1680_v54 }
 0x2df   :  { %1807 = vmatprep.subr.bf16.mxu1 %v1673_v0  ;;  %v1603_v0 = vunpack.c.h.s8.bf16 %v1411_v51 }
 0x2e2   :  { %1808 = vmatpush2.bf16.msra.mxu1 %v1672_v33  ;;  %v1410_v33 = vld [vmem:[%s7861_s9 + $0x1d0] sm:$0xff] }
 0x2e3   :  { %v1158_v41 = vpop.f32.mrf.mxu0  ;;  %1859 = vmatprep.subr.bf16.mxu1 %v1667_v56  ;;  %v1602_v56 = vunpack.c.h.s8.bf16 %v1410_v33 }
 0x2e5   :  { %v1160_v44 = vpop.f32.mrf.mxu0 }
 0x2e7   :  { %v1162_v12 = vpop.f32.mrf.mxu0 }
 0x2e9   :  { %v1163_v47 = vpop.f32.mrf.mxu0 }
 0x2ea   :  { %v1354_v47 = vld [vmem:[%s7861_s9 + $0x10] sm:$0xff] }
 0x2eb   :  { %v1490_v48 = vunpack.c.h.s8.bf16 %v1354_v47  ;;  %v1482_v54 = vunpack.c.l.s8.bf16 %v1354_v47 }
 0x323   :  { %v6919_v19 = vpop.f32.mrf.mxu0 }
 0x325   :  { %v6925_v42 = vpop.f32.mrf.mxu0  ;;  %v1199_v61 = vpop.f32.mrf.mxu1 }
 0x326   :  { %v1200_v62 = vadd.f32 %v1199_v61, %v1158_v41  ;;  %v1362_v41 = vld [vmem:[%s7861_s9 + $0x50] sm:$0xff]  ;;  %v1403_v61 = vld [vmem:[%s7861_s9 + $0x198] sm:$0xff] }
 0x327   :  { %v1244_v1 = vpop.f32.mrf.mxu0  ;;  %v1201_v3 = vpop.f32.mrf.mxu1  ;;  %v1506_v43 = vunpack.c.h.s8.bf16 %v1362_v41  ;;  %v1498_v12 = vunpack.c.l.s8.bf16 %v1362_v41  ;;  %v1381_v41 = vld [vmem:[%s7861_s9 + $0xe8] sm:$0xff] }
 0x328   :  { %v1310_v4 = vmul.f32 %v1293_v8, %v1200_v62  ;;  %v1202_v6 = vadd.f32 %v1201_v3, %v1160_v44  ;;  %v1499_v44 = vunpack.c.l.s8.bf16 %v1363_v37  ;;  %v1595_v8 = vunpack.c.l.s8.bf16 %v1411_v51 }
 0x329   :  { %v1245_v11 = vpop.f32.mrf.mxu0  ;;  %v1203_v40 = vpop.f32.mrf.mxu1  ;;  %v1594_v62 = vunpack.c.l.s8.bf16 %v1410_v33  ;;  %v1579_v3 = vunpack.c.l.s8.bf16 %v1403_v61  ;;  %v1541_v45 = vunpack.c.h.s8.bf16 %v1381_v41  ;;  %v1435_v33 = vld [vmem:[%s7861_s9 + $0x298] sm:$0xff] }
 0x32a   :  { %v1336_v5 = vadd.f32 %v1319_v63, %v1310_v4  ;;  %v1311_v13 = vmul.f32 %v1297_v9, %v1202_v6  ;;  %v1587_v63 = vunpack.c.h.s8.bf16 %v1403_v61  ;;  %v1402_v9 = vld [vmem:[%s7861_s9 + $0x190] sm:$0xff]  ;;  %v1395_v4 = vld [vmem:[%s7861_s9 + $0x158] sm:$0xff]  ;;  %v1651_v61 = vunpack.c.h.s8.bf16 %v1435_v33 }
 0x32b   :  { %v1204_v14 = vpop.f32.mrf.mxu1  ;;  %v1586_v1 = vunpack.c.h.s8.bf16 %v1402_v9  ;;  %v1578_v6 = vunpack.c.l.s8.bf16 %v1402_v9  ;;  %v1394_v11 = vld [vmem:[%s7861_s9 + $0x150] sm:$0xff]  ;;  %v1372_v9 = vld [vmem:[%s7861_s9 + $0xa0] sm:$0xff] }
 0x32c   :  { %v1340_v15 = vmul.f32 0.1, %v1336_v5  ;;  %v1337_v17 = vadd.f32 %v1323_v10, %v1311_v13  ;;  %v1571_v10 = vunpack.c.h.s8.bf16 %v1395_v4  ;;  %v1570_v40 = vunpack.c.h.s8.bf16 %v1394_v11  ;;  %v1387_v14 = vld [vmem:[%s7861_s9 + $0x118] sm:$0xff] }
 0x32d   :  { %v1301_v13 = vrot.slane %v6917_v58, %v6788_v23  ;;  %v1562_v21 = vunpack.c.l.s8.bf16 %v1394_v11  ;;  %v1547_v37 = vunpack.c.l.s8.bf16 %v1387_v14  ;;  %v1365_v11 = vld [vmem:[%s7861_s9 + $0x68] sm:$0xff] }
 0x32e   :  { %v1341_v18 = vmul.f32 0.1, %v1337_v17  ;;  %v1344_v20 = vmax.f32 %v1336_v5, %v1340_v15  ;;  %v1563_v5 = vunpack.c.l.s8.bf16 %v1395_v4  ;;  %v1643_v4 = vunpack.c.l.s8.bf16 %v1435_v33  ;;  %v1405_v33 = vld [vmem:[%s7861_s9 + $0x1a8] sm:$0xff] }
 0x330   :  { %v1345_v22 = vmax.f32 %v1337_v17, %v1341_v18  ;;  %v6938_v28 = vpack.c.bf16 %v1344_v20, %v1344_v20  ;;  %v1327_v18 = vrot.slane %v6921_v59, %v6788_v23  ;;  %v1305_v20 = vrot.slane %v6917_v58, %v6791_v26 }
 0x332   :  { %v6936_v24 = vpack.c.bf16 %v1345_v22, %v1345_v22 }
 0x334   :  { %1768 = vmatprep.mubr.bf16.mxu0 %v6936_v24 }
 0x335   :  { %1769 = vmatmul.mubr.bf16.vlgmr.msra.gmra.mxu0 %v6938_v28 }
 0x336   :  { %1819 = vmatpush1.bf16.msra.mxu0 %v1538_v25  ;;  %1850 = vmatprep.mubr.bf16.mxu0 %v6936_v24  ;;  %v1555_v25 = vunpack.c.h.s8.bf16 %v1387_v14  ;;  %v1426_v14 = vld [vmem:[%s7861_s9 + $0x250] sm:$0xff] }
 0x337   :  { %1820 = vmatprep.subr.bf16.mxu0 %v1531_v29  ;;  %v1386_v29 = vld [vmem:[%s7861_s9 + $0x110] sm:$0xff] }
 0x33a   :  { %1821 = vmatpush1.bf16.msra.mxu0 %v1530_v31 }
 0x33b   :  { %1822 = vmatprep.subr.bf16.mxu0 %v1523_v32 }
 0x33e   :  { %1823 = vmatpush1.bf16.msra.mxu0 %v1522_v57 }
 0x33f   :  { %1824 = vmatprep.subr.bf16.mxu0 %v1515_v35  ;;  %v1554_v35 = vunpack.c.h.s8.bf16 %v1386_v29 }
 0x342   :  { %1825 = vmatpush1.bf16.msra.mxu0 %v1514_v38 }
 0x343   :  { %1826 = vmatprep.subr.bf16.mxu0 %v1507_v39 }
 0x346   :  { %1827 = vmatpush1.bf16.msra.mxu0 %v1506_v43 }
 0x347   :  { %1828 = vmatprep.subr.bf16.mxu0 %v1499_v44 }
 0x34a   :  { %1829 = vmatpush1.bf16.msra.mxu0 %v1498_v12 }
 0x34b   :  { %1830 = vmatprep.subr.bf16.mxu0 %v1491_v46  ;;  %v1380_v46 = vld [vmem:[%s7861_s9 + $0xe0] sm:$0xff] }
 0x34c   :  { %v1540_v51 = vunpack.c.h.s8.bf16 %v1380_v46 }
 0x34e   :  { %1831 = vmatpush1.bf16.msra.mxu0 %v1490_v48 }
 0x34f   :  { %1832 = vmatprep.subr.bf16.mxu0 %v1483_v49 }
 0x352   :  { %1833 = vmatpush1.bf16.msra.mxu0 %v1482_v54  ;;  %v1659_v54 = vunpack.c.l.s8.bf16 %v6914_v55  ;;  %v1532_v55 = vunpack.c.l.s8.bf16 %v1380_v46 }
 0x353   :  { %1834 = vmatprep.subr.bf16.mxu0 %v1603_v0  ;;  %v1533_v0 = vunpack.c.l.s8.bf16 %v1381_v41  ;;  %v1413_v41 = vld [vmem:[%s7861_s9 + $0x1e8] sm:$0xff] }
 0x356   :  { %1835 = vmatpush2.bf16.msra.mxu0 %v1602_v56  ;;  %v1373_v56 = vld [vmem:[%s7861_s9 + $0xa8] sm:$0xff] }
 0x357   :  { %1836 = vmatprep.subr.bf16.mxu0 %v1595_v8 }
 0x35a   :  { %1837 = vmatpush2.bf16.msra.mxu0 %v1594_v62  ;;  %v1434_v62 = vld [vmem:[%s7861_s9 + $0x290] sm:$0xff] }
 0x35b   :  { %1838 = vmatprep.subr.bf16.mxu0 %v1587_v63  ;;  %v1525_v63 = vunpack.c.h.s8.bf16 %v1373_v56 }
 0x35e   :  { %1839 = vmatpush2.bf16.msra.mxu0 %v1586_v1  ;;  %v1650_v1 = vunpack.c.h.s8.bf16 %v1434_v62 }
 0x35f   :  { %1840 = vmatprep.subr.bf16.mxu0 %v1579_v3  ;;  %v1524_v3 = vunpack.c.h.s8.bf16 %v1372_v9 }
 0x362   :  { %1841 = vmatpush2.bf16.msra.mxu0 %v1578_v6  ;;  %v1517_v6 = vunpack.c.l.s8.bf16 %v1373_v56 }
 0x363   :  { %1842 = vmatprep.subr.bf16.mxu0 %v1571_v10  ;;  %v1427_v10 = vld [vmem:[%s7861_s9 + $0x258] sm:$0xff] }
 0x365   :  { %v1281_v15 = vpop.f32.mrf.mxu1 }
 0x366   :  { %v1282_v17 = vadd.f32 %v1281_v15, %v6919_v19  ;;  %1843 = vmatpush2.bf16.msra.mxu0 %v1570_v40  ;;  %v1331_v19 = vrot.slane %v6921_v59, %v6791_v26  ;;  %v1442_v59 = vld [vmem:[%s7861_s9 + $0x2d0] sm:$0xff]  ;;  %v1642_v40 = vunpack.c.l.s8.bf16 %v1434_v62  ;;  %v1509_v15 = vunpack.c.h.s8.bf16 %v1365_v11 }
 0x367   :  { %v1283_v22 = vpop.f32.mrf.mxu1  ;;  %1844 = vmatprep.subr.bf16.mxu0 %v1563_v5  ;;  %v1666_v48 = vunpack.c.h.s8.bf16 %v1442_v59  ;;  %v1658_v8 = vunpack.c.l.s8.bf16 %v1442_v59  ;;  %v1516_v5 = vunpack.c.l.s8.bf16 %v1372_v9  ;;  %v1474_v59 = vld [vmem:[%s7861_s9 + $0x3d0] sm:$0xff]  ;;  %v1589_v62 = vunpack.c.h.s8.bf16 %v1405_v33 }
 0x368   :  { %v1312_v30 = vmul.f32 %v1301_v13, %v1282_v17  ;;  %v1284_v31 = vadd.f32 %v1283_v22, %v6925_v42  ;;  %v1546_v42 = vunpack.c.l.s8.bf16 %v1386_v29  ;;  %v1635_v13 = vunpack.c.h.s8.bf16 %v1427_v10  ;;  %v1364_v17 = vld [vmem:[%s7861_s9 + $0x60] sm:$0xff]  ;;  %v1357_v29 = vld [vmem:[%s7861_s9 + $0x28] sm:$0xff] }
 0x369   :  { %v1285_v32 = vpop.f32.mrf.mxu1  ;;  %v1501_v22 = vunpack.c.l.s8.bf16 %v1365_v11  ;;  %v1730_v46 = vunpack.c.h.s8.bf16 %v1474_v59  ;;  %v1722_v56 = vunpack.c.l.s8.bf16 %v1474_v59 }
 0x36a   :  { %v1338_v34 = vadd.f32 %v1327_v18, %v1312_v30  ;;  %v1313_v57 = vmul.f32 %v1305_v20, %v1284_v31  ;;  %1845 = vmatpush2.bf16.msra.mxu0 %v1562_v21  ;;  %v1634_v18 = vunpack.c.h.s8.bf16 %v1426_v14  ;;  %v1508_v20 = vunpack.c.h.s8.bf16 %v1364_v17  ;;  %v1418_v32 = vld [vmem:[%s7861_s9 + $0x210] sm:$0xff] }
 0x36b   :  { %v1286_v58 = vpop.f32.mrf.mxu1  ;;  %1846 = vmatprep.subr.bf16.mxu0 %v1555_v25  ;;  %v1627_v21 = vunpack.c.l.s8.bf16 %v1427_v10  ;;  %v1419_v25 = vld [vmem:[%s7861_s9 + $0x218] sm:$0xff]  ;;  %v1626_v30 = vunpack.c.l.s8.bf16 %v1426_v14  ;;  %v1500_v31 = vunpack.c.l.s8.bf16 %v1364_v17  ;;  %v1397_v10 = vld [vmem:[%s7861_s9 + $0x168] sm:$0xff] }
 0x36c   :  { %v1342_v38 = vmul.f32 0.1, %v1338_v34  ;;  %v1339_v39 = vadd.f32 %v1331_v19, %v1313_v57  ;;  %v1619_v19 = vunpack.c.h.s8.bf16 %v1419_v25  ;;  %v1356_v57 = vld [vmem:[%s7861_s9 + $0x20] sm:$0xff]  ;;  %v1573_v14 = vunpack.c.h.s8.bf16 %v1397_v10 }
 0x36d   :  { %v1492_v58 = vunpack.c.h.s8.bf16 %v1356_v57 }
 0x36e   :  { %v1343_v43 = vmul.f32 0.1, %v1339_v39  ;;  %1847 = vmatpush2.bf16.msra.mxu0 %v1554_v35  ;;  %v1346_v44 = vmax.f32 %v1338_v34, %v1342_v38  ;;  %v1493_v34 = vunpack.c.h.s8.bf16 %v1357_v29  ;;  %v1618_v35 = vunpack.c.h.s8.bf16 %v1418_v32 }
 0x36f   :  { %1848 = vmatprep.subr.bf16.mxu0 %v1547_v37  ;;  %v1611_v37 = vunpack.c.l.s8.bf16 %v1419_v25  ;;  %v1485_v38 = vunpack.c.l.s8.bf16 %v1357_v29  ;;  %v1389_v25 = vld [vmem:[%s7861_s9 + $0x128] sm:$0xff] }
 0x370   :  { %v1347_v12 = vmax.f32 %v1339_v39, %v1343_v43  ;;  %v7007_v49 = vpack.c.bf16 %v1346_v44, %v1346_v44  ;;  %v1475_v39 = vld [vmem:[%s7861_s9 + $0x3d8] sm:$0xff]  ;;  %v1610_v43 = vunpack.c.l.s8.bf16 %v1418_v32  ;;  %v1557_v32 = vunpack.c.h.s8.bf16 %v1389_v25 }
 0x371   :  { %v1731_v44 = vunpack.c.h.s8.bf16 %v1475_v39 }
 0x372   :  { %v7005_v47 = vpack.c.bf16 %v1347_v12, %v1347_v12  ;;  %1849 = vmatpush2.bf16.msra.mxu0 %v1546_v42  ;;  %v1484_v42 = vunpack.c.l.s8.bf16 %v1356_v57  ;;  %v1412_v12 = vld [vmem:[%s7861_s9 + $0x1e0] sm:$0xff] }
 0x373   :  { %1900 = vmatprep.subr.bf16.mxu0 %v1541_v45  ;;  %v1605_v45 = vunpack.c.h.s8.bf16 %v1413_v41 }
 0x374   :  { %1809 = vmatprep.mubr.bf16.mxu1 %v7005_v47 }
 0x375   :  { %1810 = vmatmul.mubr.bf16.vlgmr.msra.gmra.mxu1 %v7007_v49  ;;  %1851 = vmatmul.mubr.bf16.vlgmr.msra.gmra.mxu0 %v6938_v28 }
 0x376   :  { %1860 = vmatpush1.bf16.msra.mxu1 %v1666_v48  ;;  %1891 = vmatprep.mubr.bf16.mxu1 %v7005_v47  ;;  %v1604_v48 = vunpack.c.h.s8.bf16 %v1412_v12 }
 0x377   :  { %1901 = vmatpush1.bf16.msra.mxu0 %v1540_v51  ;;  %1932 = vmatprep.mubr.bf16.mxu0 %v6936_v24  ;;  %v1723_v51 = vunpack.c.l.s8.bf16 %v1475_v39  ;;  %v1383_v39 = vld [vmem:[%s7861_s9 + $0xf8] sm:$0xff] }
 0x378   :  { %1861 = vmatprep.subr.bf16.mxu1 %v1659_v54  ;;  %1902 = vmatprep.subr.bf16.mxu0 %v1533_v0  ;;  %v1597_v54 = vunpack.c.l.s8.bf16 %v1413_v41  ;;  %v1467_v0 = vld [vmem:[%s7861_s9 + $0x398] sm:$0xff]  ;;  %v1543_v59 = vunpack.c.h.s8.bf16 %v1383_v39 }
 0x37a   :  { %1862 = vmatpush1.bf16.msra.mxu1 %v1658_v8  ;;  %v1596_v8 = vunpack.c.l.s8.bf16 %v1412_v12 }
 0x37b   :  { %1903 = vmatpush1.bf16.msra.mxu0 %v1532_v55  ;;  %1863 = vmatprep.subr.bf16.mxu1 %v1651_v61  ;;  %v1715_v55 = vunpack.c.h.s8.bf16 %v1467_v0  ;;  %v1466_v61 = vld [vmem:[%s7861_s9 + $0x390] sm:$0xff] }
 0x37c   :  { %1904 = vmatprep.subr.bf16.mxu0 %v1525_v63  ;;  %v1404_v63 = vld [vmem:[%s7861_s9 + $0x1a0] sm:$0xff]  ;;  %v1714_v9 = vunpack.c.h.s8.bf16 %v1466_v61  ;;  %v1706_v11 = vunpack.c.l.s8.bf16 %v1466_v61 }
 0x37e   :  { %1864 = vmatpush1.bf16.msra.mxu1 %v1650_v1  ;;  %v1588_v1 = vunpack.c.h.s8.bf16 %v1404_v63 }
 0x37f   :  { %1905 = vmatpush1.bf16.msra.mxu0 %v1524_v3  ;;  %1865 = vmatprep.subr.bf16.mxu1 %v1643_v4  ;;  %v1707_v3 = vunpack.c.l.s8.bf16 %v1467_v0  ;;  %v1581_v4 = vunpack.c.l.s8.bf16 %v1405_v33  ;;  %v1375_v0 = vld [vmem:[%s7861_s9 + $0xb8] sm:$0xff] }
 0x380   :  { %1906 = vmatprep.subr.bf16.mxu0 %v1517_v6  ;;  %v1459_v6 = vld [vmem:[%s7861_s9 + $0x358] sm:$0xff]  ;;  %v1527_v61 = vunpack.c.h.s8.bf16 %v1375_v0 }
 0x382   :  { %1866 = vmatpush1.bf16.msra.mxu1 %v1642_v40  ;;  %v1580_v40 = vunpack.c.l.s8.bf16 %v1404_v63 }
 0x383   :  { %1907 = vmatpush1.bf16.msra.mxu0 %v1516_v5  ;;  %1867 = vmatprep.subr.bf16.mxu1 %v1635_v13  ;;  %v1699_v5 = vunpack.c.h.s8.bf16 %v1459_v6  ;;  %v1458_v13 = vld [vmem:[%s7861_s9 + $0x350] sm:$0xff] }
 0x384   :  { %1908 = vmatprep.subr.bf16.mxu0 %v1509_v15  ;;  %v1396_v15 = vld [vmem:[%s7861_s9 + $0x160] sm:$0xff]  ;;  %v1698_v17 = vunpack.c.h.s8.bf16 %v1458_v13  ;;  %v1690_v29 = vunpack.c.l.s8.bf16 %v1458_v13  ;;  %v1366_v13 = vld [vmem:[%s7861_s9 + $0x70] sm:$0xff] }
 0x386   :  { %1868 = vmatpush1.bf16.msra.mxu1 %v1634_v18  ;;  %v1572_v18 = vunpack.c.h.s8.bf16 %v1396_v15 }
 0x387   :  { %1909 = vmatpush1.bf16.msra.mxu0 %v1508_v20  ;;  %1869 = vmatprep.subr.bf16.mxu1 %v1627_v21  ;;  %v1691_v20 = vunpack.c.l.s8.bf16 %v1459_v6  ;;  %v1565_v21 = vunpack.c.l.s8.bf16 %v1397_v10 }
 0x388   :  { %1910 = vmatprep.subr.bf16.mxu0 %v1501_v22  ;;  %v1451_v22 = vld [vmem:[%s7861_s9 + $0x318] sm:$0xff] }
 0x38a   :  { %1870 = vmatpush1.bf16.msra.mxu1 %v1626_v30  ;;  %v1564_v30 = vunpack.c.l.s8.bf16 %v1396_v15  ;;  %v1510_v15 = vunpack.c.h.s8.bf16 %v1366_v13 }
 0x38b   :  { %1911 = vmatpush1.bf16.msra.mxu0 %v1500_v31  ;;  %1871 = vmatprep.subr.bf16.mxu1 %v1619_v19  ;;  %v1683_v31 = vunpack.c.h.s8.bf16 %v1451_v22  ;;  %v1450_v19 = vld [vmem:[%s7861_s9 + $0x310] sm:$0xff] }
 0x38c   :  { %1912 = vmatprep.subr.bf16.mxu0 %v1493_v34  ;;  %v1388_v34 = vld [vmem:[%s7861_s9 + $0x120] sm:$0xff]  ;;  %v1682_v57 = vunpack.c.h.s8.bf16 %v1450_v19  ;;  %v1674_v41 = vunpack.c.l.s8.bf16 %v1450_v19  ;;  %v1358_v19 = vld [vmem:[%s7861_s9 + $0x30] sm:$0xff] }
 0x38e   :  { %1872 = vmatpush1.bf16.msra.mxu1 %v1618_v35  ;;  %v1556_v35 = vunpack.c.h.s8.bf16 %v1388_v34 }
 0x38f   :  { %1913 = vmatpush1.bf16.msra.mxu0 %v1492_v58  ;;  %1873 = vmatprep.subr.bf16.mxu1 %v1611_v37  ;;  %v1675_v58 = vunpack.c.l.s8.bf16 %v1451_v22  ;;  %v1549_v37 = vunpack.c.l.s8.bf16 %v1389_v25  ;;  %v1502_v25 = vunpack.c.l.s8.bf16 %v1366_v13 }
 0x390   :  { %1914 = vmatprep.subr.bf16.mxu0 %v1485_v38  ;;  %v1445_v38 = vld [vmem:[%s7861_s9 + $0x2e8] sm:$0xff] }
 0x392   :  { %1874 = vmatpush1.bf16.msra.mxu1 %v1610_v43  ;;  %v1548_v43 = vunpack.c.l.s8.bf16 %v1388_v34  ;;  %v1494_v34 = vunpack.c.h.s8.bf16 %v1358_v19 }
 0x393   :  { %1915 = vmatpush1.bf16.msra.mxu0 %v1484_v42  ;;  %1875 = vmatprep.subr.bf16.mxu1 %v1731_v44  ;;  %v1669_v42 = vunpack.c.h.s8.bf16 %v1445_v38  ;;  %v1444_v44 = vld [vmem:[%s7861_s9 + $0x2e0] sm:$0xff] }
 0x394   :  { %1916 = vmatprep.subr.bf16.mxu0 %v1605_v45  ;;  %v1382_v45 = vld [vmem:[%s7861_s9 + $0xf0] sm:$0xff]  ;;  %v1668_v12 = vunpack.c.h.s8.bf16 %v1444_v44  ;;  %v1660_v33 = vunpack.c.l.s8.bf16 %v1444_v44 }
 0x395   :  { %v1414_v44 = vld [vmem:[%s7861_s9 + $0x1f0] sm:$0xff] }
 0x396   :  { %1876 = vmatpush2.bf16.msra.mxu1 %v1730_v46  ;;  %v1542_v46 = vunpack.c.h.s8.bf16 %v1382_v45 }
 0x397   :  { %1917 = vmatpush2.bf16.msra.mxu0 %v1604_v48  ;;  %1877 = vmatprep.subr.bf16.mxu1 %v1723_v51  ;;  %v1661_v48 = vunpack.c.l.s8.bf16 %v1445_v38  ;;  %v1437_v51 = vld [vmem:[%s7861_s9 + $0x2a8] sm:$0xff] }
 0x398   :  { %1918 = vmatprep.subr.bf16.mxu0 %v1597_v54  ;;  %v1535_v54 = vunpack.c.l.s8.bf16 %v1383_v39  ;;  %v1486_v39 = vunpack.c.l.s8.bf16 %v1358_v19 }
 0x39a   :  { %1878 = vmatpush2.bf16.msra.mxu1 %v1722_v56  ;;  %v1534_v56 = vunpack.c.l.s8.bf16 %v1382_v45  ;;  %v1606_v45 = vunpack.c.h.s8.bf16 %v1414_v44 }
 0x39b   :  { %1919 = vmatpush2.bf16.msra.mxu0 %v1596_v8  ;;  %1879 = vmatprep.subr.bf16.mxu1 %v1715_v55  ;;  %v1653_v8 = vunpack.c.h.s8.bf16 %v1437_v51  ;;  %v1436_v55 = vld [vmem:[%s7861_s9 + $0x2a0] sm:$0xff] }
 0x39c   :  { %1920 = vmatprep.subr.bf16.mxu0 %v1589_v62  ;;  %v1374_v62 = vld [vmem:[%s7861_s9 + $0xb0] sm:$0xff]  ;;  %v1652_v63 = vunpack.c.h.s8.bf16 %v1436_v55  ;;  %v1644_v6 = vunpack.c.l.s8.bf16 %v1436_v55 }
 0x39d   :  { %v1518_v10 = vunpack.c.l.s8.bf16 %v1374_v62  ;;  %v1406_v55 = vld [vmem:[%s7861_s9 + $0x1b0] sm:$0xff] }
 0x39e   :  { %1880 = vmatpush2.bf16.msra.mxu1 %v1714_v9  ;;  %v1526_v9 = vunpack.c.h.s8.bf16 %v1374_v62  ;;  %v1590_v62 = vunpack.c.h.s8.bf16 %v1406_v55 }
 0x39f   :  { %1921 = vmatpush2.bf16.msra.mxu0 %v1588_v1  ;;  %1881 = vmatprep.subr.bf16.mxu1 %v1707_v3  ;;  %v1645_v1 = vunpack.c.l.s8.bf16 %v1437_v51  ;;  %v1519_v3 = vunpack.c.l.s8.bf16 %v1375_v0  ;;  %v1407_v51 = vld [vmem:[%s7861_s9 + $0x1b8] sm:$0xff]  ;;  %v1598_v0 = vunpack.c.l.s8.bf16 %v1414_v44 }
 0x3a0   :  { %1922 = vmatprep.subr.bf16.mxu0 %v1581_v4  ;;  %v1429_v4 = vld [vmem:[%s7861_s9 + $0x268] sm:$0xff] }
 0x3a2   :  { %1882 = vmatpush2.bf16.msra.mxu1 %v1706_v11  ;;  %v1637_v11 = vunpack.c.h.s8.bf16 %v1429_v4 }
 0x3a3   :  { %1923 = vmatpush2.bf16.msra.mxu0 %v1580_v40  ;;  %1883 = vmatprep.subr.bf16.mxu1 %v1699_v5  ;;  %v1428_v40 = vld [vmem:[%s7861_s9 + $0x260] sm:$0xff] }
 0x3a4   :  { %1924 = vmatprep.subr.bf16.mxu0 %v1573_v14  ;;  %v1636_v14 = vunpack.c.h.s8.bf16 %v1428_v40  ;;  %v1628_v22 = vunpack.c.l.s8.bf16 %v1428_v40  ;;  %v1398_v40 = vld [vmem:[%s7861_s9 + $0x170] sm:$0xff] }
 0x3a5   :  { %v1574_v13 = vunpack.c.h.s8.bf16 %v1398_v40 }
 0x3a6   :  { %1884 = vmatpush2.bf16.msra.mxu1 %v1698_v17  ;;  %v1629_v17 = vunpack.c.l.s8.bf16 %v1429_v4 }
 0x3a7   :  { %1925 = vmatpush2.bf16.msra.mxu0 %v1572_v18  ;;  %1885 = vmatprep.subr.bf16.mxu1 %v1691_v20  ;;  %v1421_v20 = vld [vmem:[%s7861_s9 + $0x228] sm:$0xff] }
 0x3a8   :  { %1926 = vmatprep.subr.bf16.mxu0 %v1565_v21  ;;  %v1359_v21 = vld [vmem:[%s7861_s9 + $0x38] sm:$0xff] }
 0x3aa   :  { %1886 = vmatpush2.bf16.msra.mxu1 %v1690_v29  ;;  %v1621_v29 = vunpack.c.h.s8.bf16 %v1421_v20 }
 0x3ab   :  { %1927 = vmatpush2.bf16.msra.mxu0 %v1564_v30  ;;  %1887 = vmatprep.subr.bf16.mxu1 %v1683_v31  ;;  %v1420_v30 = vld [vmem:[%s7861_s9 + $0x220] sm:$0xff]  ;;  %v1495_v31 = vunpack.c.h.s8.bf16 %v1359_v21 }
 0x3ac   :  { %1928 = vmatprep.subr.bf16.mxu0 %v1557_v32  ;;  %v1620_v32 = vunpack.c.h.s8.bf16 %v1420_v30  ;;  %v1612_v38 = vunpack.c.l.s8.bf16 %v1420_v30  ;;  %v1390_v30 = vld [vmem:[%s7861_s9 + $0x130] sm:$0xff] }
 0x3ad   :  { %v1558_v19 = vunpack.c.h.s8.bf16 %v1390_v30 }
 0x3ae   :  { %1888 = vmatpush2.bf16.msra.mxu1 %v1682_v57  ;;  %v1613_v57 = vunpack.c.l.s8.bf16 %v1421_v20 }
 0x3af   :  { %1929 = vmatpush2.bf16.msra.mxu0 %v1556_v35  ;;  %1889 = vmatprep.subr.bf16.mxu1 %v1675_v58  ;;  %v1487_v35 = vunpack.c.l.s8.bf16 %v1359_v21  ;;  %v1477_v58 = vld [vmem:[%s7861_s9 + $0x3e8] sm:$0xff]  ;;  %v1566_v21 = vunpack.c.l.s8.bf16 %v1398_v40  ;;  %v2196_v40 = vld [vmem:[#allocation13 + $0x40] sm:$0xff] }
 0x3b0   :  { %1930 = vmatprep.subr.bf16.mxu0 %v1549_v37  ;;  %v1415_v37 = vld [vmem:[%s7861_s9 + $0x1f8] sm:$0xff] }
 0x3b2   :  { %1890 = vmatpush2.bf16.msra.mxu1 %v1674_v41  ;;  %v1733_v41 = vunpack.c.h.s8.bf16 %v1477_v58 }
 0x3b3   :  { %1931 = vmatpush2.bf16.msra.mxu0 %v1548_v43  ;;  %1941 = vmatprep.subr.bf16.mxu1 %v1669_v42  ;;  %v1476_v43 = vld [vmem:[%s7861_s9 + $0x3e0] sm:$0xff]  ;;  %v1607_v42 = vunpack.c.h.s8.bf16 %v1415_v37 }
 0x3b4   :  { %1982 = vmatprep.subr.bf16.mxu0 %v1543_v59  ;;  %v1732_v59 = vunpack.c.h.s8.bf16 %v1476_v43 }
 0x3b5   :  { %1892 = vmatmul.mubr.bf16.vlgmr.msra.gmra.mxu1 %v7007_v49 }
 0x3b6   :  { %1933 = vmatmul.mubr.bf16.vlgmr.msra.gmra.mxu0 %v6938_v28  ;;  %1942 = vmatpush1.bf16.msra.mxu1 %v1668_v12  ;;  %v1725_v12 = vunpack.c.l.s8.bf16 %v1477_v58 }
 0x3b7   :  { %1973 = vmatprep.mubr.bf16.mxu1 %v7005_v47  ;;  %1983 = vmatpush1.bf16.msra.mxu0 %v1542_v46  ;;  %v1599_v46 = vunpack.c.l.s8.bf16 %v1415_v37  ;;  %v1550_v37 = vunpack.c.l.s8.bf16 %v1390_v30  ;;  %v2188_v30 = vld [vmem:[#allocation13] sm:$0xff] }
 0x3b8   :  { %2014 = vmatprep.mubr.bf16.mxu0 %v6936_v24  ;;  %1943 = vmatprep.subr.bf16.mxu1 %v1661_v48  ;;  %v1367_v24 = vld [vmem:[%s7861_s9 + $0x78] sm:$0xff]  ;;  %v1469_v48 = vld [vmem:[%s7861_s9 + $0x3a8] sm:$0xff] }
 0x3b9   :  { %1984 = vmatprep.subr.bf16.mxu0 %v1535_v54  ;;  %v1511_v5 = vunpack.c.h.s8.bf16 %v1367_v24  ;;  %v1503_v18 = vunpack.c.l.s8.bf16 %v1367_v24  ;;  %v1724_v54 = vunpack.c.l.s8.bf16 %v1476_v43  ;;  %v1582_v24 = vunpack.c.l.s8.bf16 %v1406_v55  ;;  %v2212_v43 = vld [vmem:[#allocation13 + $0xc0] sm:$0xff] }
 0x3ba   :  { %1944 = vmatpush1.bf16.msra.mxu1 %v1660_v33  ;;  %v1717_v33 = vunpack.c.h.s8.bf16 %v1469_v48 }
 0x3bb   :  { %1985 = vmatpush1.bf16.msra.mxu0 %v1534_v56  ;;  %1945 = vmatprep.subr.bf16.mxu1 %v1653_v8  ;;  %v1468_v56 = vld [vmem:[%s7861_s9 + $0x3a0] sm:$0xff]  ;;  %v1591_v8 = vunpack.c.h.s8.bf16 %v1407_v51 }
 0x3bc   :  { %1986 = vmatprep.subr.bf16.mxu0 %v1527_v61  ;;  %v1716_v61 = vunpack.c.h.s8.bf16 %v1468_v56  ;;  %v1708_v4 = vunpack.c.l.s8.bf16 %v1468_v56  ;;  %v2492_v56 = vunpack.c.l.s8.bf16 %v2212_v43 }
 0x3be   :  { %1946 = vmatpush1.bf16.msra.mxu1 %v1652_v63  ;;  %v1709_v63 = vunpack.c.l.s8.bf16 %v1469_v48 }
 0x3bf   :  { %1987 = vmatpush1.bf16.msra.mxu0 %v1526_v9  ;;  %1947 = vmatprep.subr.bf16.mxu1 %v1645_v1  ;;  %v1583_v9 = vunpack.c.l.s8.bf16 %v1407_v51  ;;  %v1461_v1 = vld [vmem:[%s7861_s9 + $0x368] sm:$0xff]  ;;  %v2205_v51 = vld [vmem:[#allocation13 + $0x88] sm:$0xff] }
 0x3c0   :  { %1988 = vmatprep.subr.bf16.mxu0 %v1519_v3  ;;  %v1399_v3 = vld [vmem:[%s7861_s9 + $0x178] sm:$0xff]  ;;  %v2485_v55 = vunpack.c.h.s8.bf16 %v2205_v51 }
 0x3c2   :  { %1948 = vmatpush1.bf16.msra.mxu1 %v1644_v6  ;;  %v1701_v6 = vunpack.c.h.s8.bf16 %v1461_v1 }
 0x3c3   :  { %1989 = vmatpush1.bf16.msra.mxu0 %v1518_v10  ;;  %1949 = vmatprep.subr.bf16.mxu1 %v1637_v11  ;;  %v1460_v10 = vld [vmem:[%s7861_s9 + $0x360] sm:$0xff]  ;;  %v1575_v11 = vunpack.c.h.s8.bf16 %v1399_v3 }
 0x3c4   :  { %1990 = vmatprep.subr.bf16.mxu0 %v1511_v5  ;;  %v1700_v5 = vunpack.c.h.s8.bf16 %v1460_v10  ;;  %v1692_v20 = vunpack.c.l.s8.bf16 %v1460_v10 }
 0x3c6   :  { %1950 = vmatpush1.bf16.msra.mxu1 %v1636_v14  ;;  %v1693_v14 = vunpack.c.l.s8.bf16 %v1461_v1  ;;  %v2477_v1 = vunpack.c.l.s8.bf16 %v2205_v51  ;;  %v2237_v51 = vld [vmem:[#allocation13 + $0x188] sm:$0xff] }
 0x3c7   :  { %1991 = vmatpush1.bf16.msra.mxu0 %v1510_v15  ;;  %1951 = vmatprep.subr.bf16.mxu1 %v1629_v17  ;;  %v1567_v15 = vunpack.c.l.s8.bf16 %v1399_v3  ;;  %v1453_v17 = vld [vmem:[%s7861_s9 + $0x328] sm:$0xff] }
 0x3c8   :  { %1992 = vmatprep.subr.bf16.mxu0 %v1503_v18  ;;  %v1391_v18 = vld [vmem:[%s7861_s9 + $0x138] sm:$0xff] }
 0x3ca   :  { %1952 = vmatpush1.bf16.msra.mxu1 %v1628_v22  ;;  %v1685_v22 = vunpack.c.h.s8.bf16 %v1453_v17 }
 0x3cb   :  { %1993 = vmatpush1.bf16.msra.mxu0 %v1502_v25  ;;  %1953 = vmatprep.subr.bf16.mxu1 %v1621_v29  ;;  %v1452_v25 = vld [vmem:[%s7861_s9 + $0x320] sm:$0xff]  ;;  %v1559_v29 = vunpack.c.h.s8.bf16 %v1391_v18 }
 0x3cc   :  { %1994 = vmatprep.subr.bf16.mxu0 %v1495_v31  ;;  %v1684_v31 = vunpack.c.h.s8.bf16 %v1452_v25  ;;  %v1676_v58 = vunpack.c.l.s8.bf16 %v1452_v25  ;;  %v2460_v25 = vunpack.c.l.s8.bf16 %v2196_v40 }
 0x3ce   :  { %1954 = vmatpush1.bf16.msra.mxu1 %v1620_v32  ;;  %v1677_v32 = vunpack.c.l.s8.bf16 %v1453_v17 }
 0x3cf   :  { %1995 = vmatpush1.bf16.msra.mxu0 %v1494_v34  ;;  %1955 = vmatprep.subr.bf16.mxu1 %v1613_v57  ;;  %v1551_v34 = vunpack.c.l.s8.bf16 %v1391_v18  ;;  %v1447_v57 = vld [vmem:[%s7861_s9 + $0x2f8] sm:$0xff] }
 0x3d0   :  { %1996 = vmatprep.subr.bf16.mxu0 %v1487_v35  ;;  %v2213_v35 = vld [vmem:[#allocation13 + $0xc8] sm:$0xff]  ;;  %v1663_v44 = vunpack.c.l.s8.bf16 %v1447_v57 }
 0x3d2   :  { %1956 = vmatpush1.bf16.msra.mxu1 %v1612_v38  ;;  %v1671_v38 = vunpack.c.h.s8.bf16 %v1447_v57 }
 0x3d3   :  { %1997 = vmatpush1.bf16.msra.mxu0 %v1486_v39  ;;  %1957 = vmatprep.subr.bf16.mxu1 %v1733_v41  ;;  %v1446_v39 = vld [vmem:[%s7861_s9 + $0x2f0] sm:$0xff]  ;;  %v2501_v41 = vunpack.c.h.s8.bf16 %v2213_v35 }
 0x3d4   :  { %1998 = vmatprep.subr.bf16.mxu0 %v1607_v42  ;;  %v1670_v42 = vunpack.c.h.s8.bf16 %v1446_v39  ;;  %v1662_v48 = vunpack.c.l.s8.bf16 %v1446_v39  ;;  %v2444_v39 = vunpack.c.l.s8.bf16 %v2188_v30 }
 0x3d6   :  { %1958 = vmatpush2.bf16.msra.mxu1 %v1732_v59  ;;  %v1439_v59 = vld [vmem:[%s7861_s9 + $0x2b8] sm:$0xff] }
 0x3d7   :  { %1999 = vmatpush2.bf16.msra.mxu0 %v1606_v45  ;;  %1959 = vmatprep.subr.bf16.mxu1 %v1725_v12  ;;  %v2500_v45 = vunpack.c.h.s8.bf16 %v2212_v43  ;;  %v2244_v43 = vld [vmem:[#allocation13 + $0x1c0] sm:$0xff] }
 0x3d8   :  { %2000 = vmatprep.subr.bf16.mxu0 %v1599_v46  ;;  %v2493_v46 = vunpack.c.l.s8.bf16 %v2213_v35 }
 0x3da   :  { %1960 = vmatpush2.bf16.msra.mxu1 %v1724_v54 }
 0x3db   :  { %2001 = vmatpush2.bf16.msra.mxu0 %v1598_v0  ;;  %1961 = vmatprep.subr.bf16.mxu1 %v1717_v33  ;;  %v1655_v0 = vunpack.c.h.s8.bf16 %v1439_v59  ;;  %v1438_v33 = vld [vmem:[%s7861_s9 + $0x2b0] sm:$0xff] }
 0x3dc   :  { %2002 = vmatprep.subr.bf16.mxu0 %v1591_v8  ;;  %v1646_v3 = vunpack.c.l.s8.bf16 %v1438_v33 }
 0x3de   :  { %1962 = vmatpush2.bf16.msra.mxu1 %v1716_v61  ;;  %v2204_v61 = vld [vmem:[#allocation13 + $0x80] sm:$0xff] }
 0x3df   :  { %2003 = vmatpush2.bf16.msra.mxu0 %v1590_v62  ;;  %1963 = vmatprep.subr.bf16.mxu1 %v1709_v63  ;;  %v1647_v63 = vunpack.c.l.s8.bf16 %v1439_v59  ;;  %v2476_v10 = vunpack.c.l.s8.bf16 %v2204_v61  ;;  %v1471_v59 = vld [vmem:[%s7861_s9 + $0x3b8] sm:$0xff] }
 0x3e0   :  { %2004 = vmatprep.subr.bf16.mxu0 %v1583_v9  ;;  %v2484_v9 = vunpack.c.h.s8.bf16 %v2204_v61 }
 0x3e2   :  { %1964 = vmatpush2.bf16.msra.mxu1 %v1708_v4  ;;  %v2197_v4 = vld [vmem:[#allocation13 + $0x48] sm:$0xff] }
 0x3e3   :  { %2005 = vmatpush2.bf16.msra.mxu0 %v1582_v24  ;;  %1965 = vmatprep.subr.bf16.mxu1 %v1701_v6  ;;  %v1430_v6 = vld [vmem:[%s7861_s9 + $0x270] sm:$0xff]  ;;  %v2461_v17 = vunpack.c.l.s8.bf16 %v2197_v4 }
 0x3e4   :  { %2006 = vmatprep.subr.bf16.mxu0 %v1575_v11  ;;  %v2469_v11 = vunpack.c.h.s8.bf16 %v2197_v4  ;;  %v1630_v18 = vunpack.c.l.s8.bf16 %v1430_v6  ;;  %v1462_v4 = vld [vmem:[%s7861_s9 + $0x370] sm:$0xff] }
 0x3e6   :  { %1966 = vmatpush2.bf16.msra.mxu1 %v1700_v5  ;;  %v1638_v5 = vunpack.c.h.s8.bf16 %v1430_v6 }
 0x3e7   :  { %2007 = vmatpush2.bf16.msra.mxu0 %v1574_v13  ;;  %1967 = vmatprep.subr.bf16.mxu1 %v1693_v14  ;;  %v1423_v14 = vld [vmem:[%s7861_s9 + $0x238] sm:$0xff] }
 0x3e8   :  { %2008 = vmatprep.subr.bf16.mxu0 %v1567_v15  ;;  %v2468_v15 = vunpack.c.h.s8.bf16 %v2196_v40 }
 0x3ea   :  { %1968 = vmatpush2.bf16.msra.mxu1 %v1692_v20  ;;  %v2189_v20 = vld [vmem:[#allocation13 + $0x8] sm:$0xff] }
 0x3eb   :  { %2009 = vmatpush2.bf16.msra.mxu0 %v1566_v21  ;;  %1969 = vmatprep.subr.bf16.mxu1 %v1685_v22  ;;  %v1623_v21 = vunpack.c.h.s8.bf16 %v1423_v14  ;;  %v1422_v22 = vld [vmem:[%s7861_s9 + $0x230] sm:$0xff]  ;;  %v2445_v57 = vunpack.c.l.s8.bf16 %v2189_v20 }
 0x3ec   :  { %2010 = vmatprep.subr.bf16.mxu0 %v1559_v29  ;;  %v2453_v29 = vunpack.c.h.s8.bf16 %v2189_v20  ;;  %v1614_v35 = vunpack.c.l.s8.bf16 %v1422_v22  ;;  %v1454_v20 = vld [vmem:[%s7861_s9 + $0x330] sm:$0xff] }
 0x3ee   :  { %1970 = vmatpush2.bf16.msra.mxu1 %v1684_v31  ;;  %v1622_v31 = vunpack.c.h.s8.bf16 %v1422_v22 }
 0x3ef   :  { %2011 = vmatpush2.bf16.msra.mxu0 %v1558_v19  ;;  %1971 = vmatprep.subr.bf16.mxu1 %v1677_v32  ;;  %v1615_v19 = vunpack.c.l.s8.bf16 %v1423_v14  ;;  %v1479_v32 = vld [vmem:[%s7861_s9 + $0x3f8] sm:$0xff] }
 0x3f0   :  { %2012 = vmatprep.subr.bf16.mxu0 %v1551_v34  ;;  %v2452_v34 = vunpack.c.h.s8.bf16 %v2188_v30 }
 0x3f2   :  { %1972 = vmatpush2.bf16.msra.mxu1 %v1676_v58  ;;  %v2245_v58 = vld [vmem:[#allocation13 + $0x1c8] sm:$0xff] }
 0x3f3   :  { %2013 = vmatpush2.bf16.msra.mxu0 %v1550_v37  ;;  %2023 = vmatprep.subr.bf16.mxu1 %v1671_v38  ;;  %v1735_v37 = vunpack.c.h.s8.bf16 %v1479_v32  ;;  %v1478_v38 = vld [vmem:[%s7861_s9 + $0x3f0] sm:$0xff] }
 0x3f4   :  { %2956 = vmatprep.subr.bf16.mxu0 %v2501_v41  ;;  %v2565_v41 = vunpack.c.h.s8.bf16 %v2245_v58 }
 0x3f5   :  { %1974 = vmatmul.mubr.bf16.vlgmr.msra.gmra.mxu1 %v7007_v49  ;;  %v7209_v12 = vpop.f32.mrf.mxu0 }
 0x3f6   :  { %2015 = vmatmul.mubr.bf16.vlgmr.msra.gmra.mxu0 %v6938_v28  ;;  %2024 = vmatpush1.bf16.msra.mxu1 %v1670_v42  ;;  %v1654_v28 = vunpack.c.h.s8.bf16 %v1438_v33  ;;  %v1734_v42 = vunpack.c.h.s8.bf16 %v1478_v38  ;;  %v1470_v33 = vld [vmem:[%s7861_s9 + $0x3b0] sm:$0xff] }
 0x3f7   :  { %2055 = vmatprep.mubr.bf16.mxu1 %v7005_v47  ;;  %v7213_v54 = vpop.f32.mrf.mxu0  ;;  %2025 = vmatprep.subr.bf16.mxu1 %v1663_v44  ;;  %v1431_v47 = vld [vmem:[%s7861_s9 + $0x278] sm:$0xff]  ;;  %v1727_v44 = vunpack.c.l.s8.bf16 %v1479_v32  ;;  %v1718_v61 = vunpack.c.h.s8.bf16 %v1470_v33 }
 0x3f8   :  { %2957 = vmatpush1.bf16.msra.mxu0 %v2500_v45  ;;  %v1639_v24 = vunpack.c.h.s8.bf16 %v1431_v47  ;;  %v1631_v13 = vunpack.c.l.s8.bf16 %v1431_v47  ;;  %v2564_v45 = vunpack.c.h.s8.bf16 %v2244_v43  ;;  %v2541_v47 = vunpack.c.l.s8.bf16 %v2237_v51 }
 0x3f9   :  { %v1774_v8 = vpop.f32.mrf.mxu0  ;;  %2958 = vmatprep.subr.bf16.mxu0 %v2493_v46  ;;  %v2557_v46 = vunpack.c.l.s8.bf16 %v2245_v58  ;;  %v2276_v58 = vld [vmem:[#allocation13 + $0x2c0] sm:$0xff] }
 0x3fa   :  { %2026 = vmatpush1.bf16.msra.mxu1 %v1662_v48  ;;  %v1726_v48 = vunpack.c.l.s8.bf16 %v1478_v38  ;;  %v2549_v8 = vunpack.c.h.s8.bf16 %v2237_v51  ;;  %v7259_v38 = vld [vmem:[%s7862_s28] sm:$0xff] }
 0x3fb   :  { %v1775_v62 = vpop.f32.mrf.mxu0  ;;  %2027 = vmatprep.subr.bf16.mxu1 %v1655_v0  ;;  %v1719_v0 = vunpack.c.h.s8.bf16 %v1471_v59 }
 0x3fc   :  { %2959 = vmatpush1.bf16.msra.mxu0 %v2492_v56  ;;  %v2556_v56 = vunpack.c.l.s8.bf16 %v2244_v43  ;;  %v1463_v62 = vld [vmem:[%s7861_s9 + $0x378] sm:$0xff]  ;;  %v7265_v43 = vld [vmem:[%s7863_s6] sm:$0xff] }
 0x3fd   :  { %2960 = vmatprep.subr.bf16.mxu0 %v2485_v55  ;;  %v2236_v55 = vld [vmem:[#allocation13 + $0x180] sm:$0xff]  ;;  %v1695_v40 = vunpack.c.l.s8.bf16 %v1463_v62  ;;  %v2119_v51 = vrot.slane %v7265_v43, %v6762_v7 }
 0x3fe   :  { %2028 = vmatpush1.bf16.msra.mxu1 %v1654_v28  ;;  %v1711_v28 = vunpack.c.l.s8.bf16 %v1471_v59  ;;  %v2269_v59 = vld [vmem:[#allocation13 + $0x288] sm:$0xff] }
 0x3ff   :  { %2029 = vmatprep.subr.bf16.mxu1 %v1647_v63  ;;  %v2548_v63 = vunpack.c.h.s8.bf16 %v2236_v55 }
 0x400   :  { %2961 = vmatpush1.bf16.msra.mxu0 %v2484_v9  ;;  %v1710_v9 = vunpack.c.l.s8.bf16 %v1470_v33  ;;  %v2620_v33 = vunpack.c.l.s8.bf16 %v2276_v58 }
 0x401   :  { %2962 = vmatprep.subr.bf16.mxu0 %v2477_v1  ;;  %v2229_v1 = vld [vmem:[#allocation13 + $0x148] sm:$0xff] }
 0x402   :  { %2030 = vmatpush1.bf16.msra.mxu1 %v1646_v3  ;;  %v1703_v3 = vunpack.c.h.s8.bf16 %v1463_v62  ;;  %v2533_v6 = vunpack.c.h.s8.bf16 %v2229_v1  ;;  %v2525_v14 = vunpack.c.l.s8.bf16 %v2229_v1 }
 0x403   :  { %2031 = vmatprep.subr.bf16.mxu1 %v1639_v24  ;;  %v2540_v24 = vunpack.c.l.s8.bf16 %v2236_v55  ;;  %v2613_v55 = vunpack.c.h.s8.bf16 %v2269_v59 }
 0x404   :  { %2963 = vmatpush1.bf16.msra.mxu0 %v2476_v10  ;;  %v2228_v10 = vld [vmem:[#allocation13 + $0x140] sm:$0xff] }
 0x405   :  { %2964 = vmatprep.subr.bf16.mxu0 %v2469_v11  ;;  %v1702_v11 = vunpack.c.h.s8.bf16 %v1462_v4 }
 0x406   :  { %2032 = vmatpush1.bf16.msra.mxu1 %v1638_v5  ;;  %v1455_v5 = vld [vmem:[%s7861_s9 + $0x338] sm:$0xff] }
 0x407   :  { %2033 = vmatprep.subr.bf16.mxu1 %v1631_v13  ;;  %v2532_v13 = vunpack.c.h.s8.bf16 %v2228_v10  ;;  %v1679_v30 = vunpack.c.l.s8.bf16 %v1455_v5 }
 0x408   :  { %2965 = vmatpush1.bf16.msra.mxu0 %v2468_v15  ;;  %v1694_v15 = vunpack.c.l.s8.bf16 %v1462_v4 }
 0x409   :  { %2966 = vmatprep.subr.bf16.mxu0 %v2461_v17  ;;  %v2221_v17 = vld [vmem:[#allocation13 + $0x108] sm:$0xff] }
 0x40a   :  { %2034 = vmatpush1.bf16.msra.mxu1 %v1630_v18  ;;  %v1687_v18 = vunpack.c.h.s8.bf16 %v1455_v5  ;;  %v2517_v22 = vunpack.c.h.s8.bf16 %v2221_v17  ;;  %v2509_v32 = vunpack.c.l.s8.bf16 %v2221_v17 }
 0x40b   :  { %2035 = vmatprep.subr.bf16.mxu1 %v1623_v21  ;;  %v2524_v21 = vunpack.c.l.s8.bf16 %v2228_v10 }
 0x40c   :  { %2967 = vmatpush1.bf16.msra.mxu0 %v2460_v25  ;;  %v2220_v25 = vld [vmem:[#allocation13 + $0x100] sm:$0xff] }
 0x40d   :  { %2968 = vmatprep.subr.bf16.mxu0 %v2453_v29  ;;  %v1686_v29 = vunpack.c.h.s8.bf16 %v1454_v20 }
 0x40e   :  { %2036 = vmatpush1.bf16.msra.mxu1 %v1622_v31  ;;  %v2516_v31 = vunpack.c.h.s8.bf16 %v2220_v25 }
 0x40f   :  { %2037 = vmatprep.subr.bf16.mxu1 %v1615_v19  ;;  %v2277_v19 = vld [vmem:[#allocation13 + $0x2c8] sm:$0xff] }
 0x410   :  { %2969 = vmatpush1.bf16.msra.mxu0 %v2452_v34  ;;  %v1678_v34 = vunpack.c.l.s8.bf16 %v1454_v20 }
 0x411   :  { %2970 = vmatprep.subr.bf16.mxu0 %v2445_v57  ;;  %v7254_v57 = vld [vmem:[#allocation13 + $0x4c8] sm:$0xff] }
 0x412   :  { %2038 = vmatpush1.bf16.msra.mxu1 %v1614_v35  ;;  %v2629_v35 = vunpack.c.h.s8.bf16 %v2277_v19 }
 0x413   :  { %2039 = vmatprep.subr.bf16.mxu1 %v1735_v37  ;;  %v2508_v37 = vunpack.c.l.s8.bf16 %v2220_v25 }
 0x414   :  { %2971 = vmatpush1.bf16.msra.mxu0 %v2444_v39  ;;  %v2757_v39 = vunpack.c.h.s8.bf16 %v7254_v57 }
 0x415   :  { %2972 = vmatprep.subr.bf16.mxu0 %v2565_v41  ;;  %v2628_v41 = vunpack.c.h.s8.bf16 %v2276_v58 }
 0x416   :  { %2040 = vmatpush2.bf16.msra.mxu1 %v1734_v42  ;;  %v2621_v42 = vunpack.c.l.s8.bf16 %v2277_v19 }
 0x417   :  { %2041 = vmatprep.subr.bf16.mxu1 %v1727_v44  ;;  %v2069_v44 = vrot.slane %v7259_v38, %v6762_v7 }
 0x418   :  { %2973 = vmatpush2.bf16.msra.mxu0 %v2564_v45 }
 0x419   :  { %2974 = vmatprep.subr.bf16.mxu0 %v2557_v46 }
 0x41a   :  { %2042 = vmatpush2.bf16.msra.mxu1 %v1726_v48 }
 0x41b   :  { %2043 = vmatprep.subr.bf16.mxu1 %v1719_v0  ;;  %v2073_v0 = vrot.slane %v7259_v38, %v6767_v36 }
 0x41c   :  { %2975 = vmatpush2.bf16.msra.mxu0 %v2556_v56 }
 0x41d   :  { %2976 = vmatprep.subr.bf16.mxu0 %v2549_v8 }
 0x41e   :  { %2044 = vmatpush2.bf16.msra.mxu1 %v1718_v61 }
 0x41f   :  { %2045 = vmatprep.subr.bf16.mxu1 %v1711_v28 }
 0x420   :  { %2977 = vmatpush2.bf16.msra.mxu0 %v2548_v63 }
 0x421   :  { %2978 = vmatprep.subr.bf16.mxu0 %v2541_v47 }
 0x422   :  { %2046 = vmatpush2.bf16.msra.mxu1 %v1710_v9 }
 0x423   :  { %2047 = vmatprep.subr.bf16.mxu1 %v1703_v3 }
 0x424   :  { %2979 = vmatpush2.bf16.msra.mxu0 %v2540_v24  ;;  %v2605_v24 = vunpack.c.l.s8.bf16 %v2269_v59  ;;  %v2325_v59 = vld [vmem:[#allocation13 + $0x448] sm:$0xff] }
 0x425   :  { %2980 = vmatprep.subr.bf16.mxu0 %v2533_v6 }
 0x426   :  { %2048 = vmatpush2.bf16.msra.mxu1 %v1702_v11  ;;  %v2261_v11 = vld [vmem:[#allocation13 + $0x248] sm:$0xff] }
 0x427   :  { %2049 = vmatprep.subr.bf16.mxu1 %v1695_v40  ;;  %v2589_v25 = vunpack.c.l.s8.bf16 %v2261_v11 }
 0x428   :  { %2981 = vmatpush2.bf16.msra.mxu0 %v2532_v13  ;;  %v2597_v13 = vunpack.c.h.s8.bf16 %v2261_v11 }
 0x429   :  { %2982 = vmatprep.subr.bf16.mxu0 %v2525_v14  ;;  %v2260_v14 = vld [vmem:[#allocation13 + $0x240] sm:$0xff] }
 0x42a   :  { %2050 = vmatpush2.bf16.msra.mxu1 %v1694_v15  ;;  %v2340_v15 = vld [vmem:[#allocation13 + $0x4c0] sm:$0xff]  ;;  %v2596_v20 = vunpack.c.h.s8.bf16 %v2260_v14  ;;  %v2588_v19 = vunpack.c.l.s8.bf16 %v2260_v14 }
 0x42b   :  { %2051 = vmatprep.subr.bf16.mxu1 %v1687_v18 }
 0x42c   :  { %2983 = vmatpush2.bf16.msra.mxu0 %v2524_v21  ;;  %v2756_v21 = vunpack.c.h.s8.bf16 %v2340_v15 }
 0x42d   :  { %2984 = vmatprep.subr.bf16.mxu0 %v2517_v22 }
 0x42e   :  { %2052 = vmatpush2.bf16.msra.mxu1 %v1686_v29  ;;  %v2749_v29 = vunpack.c.l.s8.bf16 %v7254_v57 }
 0x42f   :  { %2053 = vmatprep.subr.bf16.mxu1 %v1679_v30  ;;  %v2253_v30 = vld [vmem:[#allocation13 + $0x208] sm:$0xff] }
 0x430   :  { %2985 = vmatpush2.bf16.msra.mxu0 %v2516_v31  ;;  %v2333_v31 = vld [vmem:[#allocation13 + $0x488] sm:$0xff] }
 0x431   :  { %2986 = vmatprep.subr.bf16.mxu0 %v2509_v32  ;;  %v2748_v32 = vunpack.c.l.s8.bf16 %v2340_v15  ;;  %v2741_v58 = vunpack.c.h.s8.bf16 %v2333_v31  ;;  %v2292_v15 = vld [vmem:[#allocation13 + $0x340] sm:$0xff] }
 0x432   :  { %2054 = vmatpush2.bf16.msra.mxu1 %v1678_v34  ;;  %v2581_v34 = vunpack.c.h.s8.bf16 %v2253_v30 }
 0x433   :  { %2997 = vmatprep.subr.bf16.mxu1 %v2629_v35  ;;  %v2252_v35 = vld [vmem:[#allocation13 + $0x200] sm:$0xff] }
 0x434   :  { %2987 = vmatpush2.bf16.msra.mxu0 %v2508_v37  ;;  %v2332_v37 = vld [vmem:[#allocation13 + $0x480] sm:$0xff] }
 0x435   :  { %2056 = vmatmul.mubr.bf16.vlgmr.msra.gmra.mxu1 %v7007_v49  ;;  %v1811_v45 = vpop.f32.mrf.mxu1  ;;  %v7270_v46 = vpop.f32.mrf.mxu0  ;;  %3038 = vmatprep.subr.bf16.mxu0 %v2757_v39  ;;  %v2268_v49 = vld [vmem:[#allocation13 + $0x280] sm:$0xff]  ;;  %v2580_v39 = vunpack.c.h.s8.bf16 %v2252_v35  ;;  %v2740_v57 = vunpack.c.h.s8.bf16 %v2332_v37 }
 0x436   :  { %v1812_v48 = vadd.f32 %v1811_v45, %v7209_v12  ;;  %2998 = vmatpush1.bf16.msra.mxu1 %v2628_v41  ;;  %v2123_v12 = vrot.slane %v7265_v43, %v6767_v36  ;;  %v2612_v1 = vunpack.c.h.s8.bf16 %v2268_v49  ;;  %v2604_v5 = vunpack.c.l.s8.bf16 %v2268_v49 }
 0x437   :  { %v1813_v56 = vpop.f32.mrf.mxu1  ;;  %v7277_v8 = vpop.f32.mrf.mxu0  ;;  %2999 = vmatprep.subr.bf16.mxu1 %v2621_v42  ;;  %v2573_v41 = vunpack.c.l.s8.bf16 %v2253_v30  ;;  %v2733_v42 = vunpack.c.l.s8.bf16 %v2333_v31  ;;  %v2572_v45 = vunpack.c.l.s8.bf16 %v2252_v35  ;;  %v2285_v31 = vld [vmem:[#allocation13 + $0x308] sm:$0xff] }
 0x438   :  { %v2106_v61 = vmul.f32 %v2069_v44, %v1812_v48  ;;  %v1814_v28 = vadd.f32 %v1813_v56, %v7213_v54  ;;  %v2309_v44 = vld [vmem:[#allocation13 + $0x3c8] sm:$0xff]  ;;  %v2732_v48 = vunpack.c.l.s8.bf16 %v2332_v37  ;;  %v2324_v56 = vld [vmem:[#allocation13 + $0x440] sm:$0xff]  ;;  %v2645_v35 = vunpack.c.h.s8.bf16 %v2285_v31 }
 0x439   :  { %v1815_v62 = vpop.f32.mrf.mxu1  ;;  %v1856_v63 = vpop.f32.mrf.mxu0  ;;  %v2724_v49 = vunpack.c.h.s8.bf16 %v2324_v56 }
 0x43a   :  { %v2156_v47 = vadd.f32 %v2119_v51, %v2106_v61  ;;  %v2107_v9 = vmul.f32 %v2073_v0, %v1814_v28  ;;  %3000 = vmatpush1.bf16.msra.mxu1 %v2620_v33  ;;  %v2693_v51 = vunpack.c.h.s8.bf16 %v2309_v44  ;;  %v2308_v0 = vld [vmem:[#allocation13 + $0x3c0] sm:$0xff]  ;;  %v2725_v33 = vunpack.c.h.s8.bf16 %v2325_v59  ;;  %v2317_v62 = vld [vmem:[#allocation13 + $0x408] sm:$0xff] }
 0x43b   :  { %v1816_v3 = vpop.f32.mrf.mxu1  ;;  %v1857_v4 = vpop.f32.mrf.mxu0  ;;  %3001 = vmatprep.subr.bf16.mxu1 %v2613_v55  ;;  %v2692_v55 = vunpack.c.h.s8.bf16 %v2308_v0  ;;  %v2685_v61 = vunpack.c.l.s8.bf16 %v2309_v44  ;;  %v2717_v28 = vunpack.c.l.s8.bf16 %v2325_v59  ;;  %v2684_v63 = vunpack.c.l.s8.bf16 %v2308_v0  ;;  %v2357_v59 = vld [vmem:[#allocation13 + $0x548] sm:$0xff] }
 0x43c   :  { %v2164_v6 = vmul.f32 0.1, %v2156_v47  ;;  %v2157_v10 = vadd.f32 %v2123_v12, %v2107_v9  ;;  %v2301_v12 = vld [vmem:[#allocation13 + $0x388] sm:$0xff]  ;;  %v2709_v3 = vunpack.c.h.s8.bf16 %v2317_v62  ;;  %v2316_v4 = vld [vmem:[#allocation13 + $0x400] sm:$0xff]  ;;  %v2701_v11 = vunpack.c.l.s8.bf16 %v2317_v62 }
 0x43d   :  { %v2677_v9 = vunpack.c.h.s8.bf16 %v2301_v12  ;;  %v2789_v0 = vunpack.c.h.s8.bf16 %v2357_v59 }
 0x43e   :  { %v2165_v40 = vmul.f32 0.1, %v2157_v10  ;;  %3002 = vmatpush1.bf16.msra.mxu1 %v2612_v1  ;;  %v2172_v54 = vmax.f32 %v2156_v47, %v2164_v6  ;;  %v2716_v47 = vunpack.c.l.s8.bf16 %v2324_v56  ;;  %v2300_v1 = vld [vmem:[#allocation13 + $0x380] sm:$0xff]  ;;  %v2708_v6 = vunpack.c.h.s8.bf16 %v2316_v4 }
 0x43f   :  { %3003 = vmatprep.subr.bf16.mxu1 %v2605_v24  ;;  %v2676_v24 = vunpack.c.h.s8.bf16 %v2300_v1 }
 0x440   :  { %v2173_v17 = vmax.f32 %v2157_v10, %v2165_v40  ;;  %v7284_v22 = vpack.c.bf16 %v2172_v54, %v2172_v54  ;;  %v2669_v10 = vunpack.c.l.s8.bf16 %v2301_v12  ;;  %v2293_v40 = vld [vmem:[#allocation13 + $0x348] sm:$0xff]  ;;  %v2668_v54 = vunpack.c.l.s8.bf16 %v2300_v1 }
 0x441   :  { %v2661_v14 = vunpack.c.h.s8.bf16 %v2293_v40 }
 0x442   :  { %v7282_v18 = vpack.c.bf16 %v2173_v17, %v2173_v17  ;;  %3004 = vmatpush1.bf16.msra.mxu1 %v2604_v5  ;;  %v2373_v5 = vld [vmem:[#allocation13 + $0x5c8] sm:$0xff] }
 0x443   :  { %3005 = vmatprep.subr.bf16.mxu1 %v2597_v13  ;;  %v2700_v13 = vunpack.c.l.s8.bf16 %v2316_v4  ;;  %v2821_v17 = vunpack.c.h.s8.bf16 %v2373_v5  ;;  %v2813_v30 = vunpack.c.l.s8.bf16 %v2373_v5 }
 0x444   :  { %2988 = vmatprep.mubr.bf16.mxu0 %v7282_v18 }
 0x445   :  { %2989 = vmatmul.mubr.bf16.vlgmr.msra.gmra.mxu0 %v7284_v22 }
 0x446   :  { %3006 = vmatpush1.bf16.msra.mxu1 %v2596_v20  ;;  %3039 = vmatpush1.bf16.msra.mxu0 %v2756_v21  ;;  %v2372_v20 = vld [vmem:[#allocation13 + $0x5c0] sm:$0xff]  ;;  %v2660_v21 = vunpack.c.h.s8.bf16 %v2292_v15 }
 0x447   :  { %3007 = vmatprep.subr.bf16.mxu1 %v2589_v25  ;;  %3040 = vmatprep.subr.bf16.mxu0 %v2749_v29  ;;  %v2820_v25 = vunpack.c.h.s8.bf16 %v2372_v20  ;;  %v2653_v29 = vunpack.c.l.s8.bf16 %v2293_v40 }
 0x44a   :  { %3008 = vmatpush1.bf16.msra.mxu1 %v2588_v19  ;;  %3041 = vmatpush1.bf16.msra.mxu0 %v2748_v32  ;;  %v2365_v19 = vld [vmem:[#allocation13 + $0x588] sm:$0xff]  ;;  %v2652_v32 = vunpack.c.l.s8.bf16 %v2292_v15 }
 0x44b   :  { %3009 = vmatprep.subr.bf16.mxu1 %v2581_v34  ;;  %3042 = vmatprep.subr.bf16.mxu0 %v2741_v58  ;;  %v2812_v34 = vunpack.c.l.s8.bf16 %v2372_v20  ;;  %v2284_v58 = vld [vmem:[#allocation13 + $0x300] sm:$0xff]  ;;  %v2805_v37 = vunpack.c.h.s8.bf16 %v2365_v19  ;;  %v2797_v44 = vunpack.c.l.s8.bf16 %v2365_v19 }
 0x44e   :  { %3010 = vmatpush1.bf16.msra.mxu1 %v2580_v39  ;;  %3043 = vmatpush1.bf16.msra.mxu0 %v2740_v57  ;;  %v2364_v39 = vld [vmem:[#allocation13 + $0x580] sm:$0xff]  ;;  %v2644_v57 = vunpack.c.h.s8.bf16 %v2284_v58 }
 0x44f   :  { %3011 = vmatprep.subr.bf16.mxu1 %v2573_v41  ;;  %3044 = vmatprep.subr.bf16.mxu0 %v2733_v42  ;;  %v2804_v41 = vunpack.c.h.s8.bf16 %v2364_v39  ;;  %v2637_v42 = vunpack.c.l.s8.bf16 %v2285_v31 }
 0x452   :  { %3012 = vmatpush1.bf16.msra.mxu1 %v2572_v45  ;;  %3045 = vmatpush1.bf16.msra.mxu0 %v2732_v48  ;;  %v7289_v45 = vld [vmem:[#allocation13 + $0x6c8] sm:$0xff]  ;;  %v2636_v48 = vunpack.c.l.s8.bf16 %v2284_v58 }
 0x453   :  { %3013 = vmatprep.subr.bf16.mxu1 %v2693_v51  ;;  %3046 = vmatprep.subr.bf16.mxu0 %v2725_v33  ;;  %v2796_v51 = vunpack.c.l.s8.bf16 %v2364_v39  ;;  %v2356_v33 = vld [vmem:[#allocation13 + $0x540] sm:$0xff]  ;;  %v2885_v56 = vunpack.c.h.s8.bf16 %v7289_v45  ;;  %v2877_v39 = vunpack.c.l.s8.bf16 %v7289_v45 }
 0x454   :  { %v2780_v1 = vunpack.c.l.s8.bf16 %v2356_v33  ;;  %v2388_v45 = vld [vmem:[#allocation13 + $0x640] sm:$0xff] }
 0x456   :  { %3014 = vmatpush2.bf16.msra.mxu1 %v2692_v55  ;;  %3047 = vmatpush1.bf16.msra.mxu0 %v2724_v49  ;;  %v2788_v55 = vunpack.c.h.s8.bf16 %v2356_v33  ;;  %v2781_v49 = vunpack.c.l.s8.bf16 %v2357_v59 }
 0x457   :  { %3015 = vmatprep.subr.bf16.mxu1 %v2685_v61  ;;  %3048 = vmatprep.subr.bf16.mxu0 %v2717_v28  ;;  %v2077_v61 = vrot.slane %v7259_v38, %v6788_v23  ;;  %v2349_v28 = vld [vmem:[#allocation13 + $0x508] sm:$0xff] }
 0x458   :  { %v2773_v4 = vunpack.c.h.s8.bf16 %v2349_v28 }
 0x45a   :  { %3016 = vmatpush2.bf16.msra.mxu1 %v2684_v63  ;;  %3049 = vmatpush1.bf16.msra.mxu0 %v2716_v47  ;;  %v2127_v63 = vrot.slane %v7265_v43, %v6788_v23 }
 0x45b   :  { %3017 = vmatprep.subr.bf16.mxu1 %v2677_v9  ;;  %3050 = vmatprep.subr.bf16.mxu0 %v2709_v3  ;;  %v2081_v9 = vrot.slane %v7259_v38, %v6791_v26 }
 0x45e   :  { %3018 = vmatpush2.bf16.msra.mxu1 %v2676_v24  ;;  %3051 = vmatpush1.bf16.msra.mxu0 %v2708_v6  ;;  %v2348_v24 = vld [vmem:[#allocation13 + $0x500] sm:$0xff] }
 0x45f   :  { %3019 = vmatprep.subr.bf16.mxu1 %v2669_v10  ;;  %3052 = vmatprep.subr.bf16.mxu0 %v2701_v11 }
 0x462   :  { %3020 = vmatpush2.bf16.msra.mxu1 %v2668_v54  ;;  %3053 = vmatpush1.bf16.msra.mxu0 %v2700_v13 }
 0x463   :  { %3021 = vmatprep.subr.bf16.mxu1 %v2661_v14  ;;  %3054 = vmatprep.subr.bf16.mxu0 %v2821_v17  ;;  %v2772_v14 = vunpack.c.h.s8.bf16 %v2348_v24  ;;  %v2765_v17 = vunpack.c.l.s8.bf16 %v2349_v28 }
 0x466   :  { %3022 = vmatpush2.bf16.msra.mxu1 %v2660_v21  ;;  %3055 = vmatpush2.bf16.msra.mxu0 %v2820_v25 }
 0x467   :  { %3023 = vmatprep.subr.bf16.mxu1 %v2653_v29  ;;  %3056 = vmatprep.subr.bf16.mxu0 %v2813_v30  ;;  %v7306_v29 = vld [vmem:[#allocation13 + $0xd8] sm:$0xff]  ;;  %v2764_v30 = vunpack.c.l.s8.bf16 %v2348_v24 }
 0x468   :  { %v2503_v19 = vunpack.c.h.s8.bf16 %v7306_v29 }
 0x46a   :  { %3024 = vmatpush2.bf16.msra.mxu1 %v2652_v32  ;;  %3057 = vmatpush2.bf16.msra.mxu0 %v2812_v34  ;;  %v2404_v32 = vld [vmem:[#allocation13 + $0x6c0] sm:$0xff] }
 0x46b   :  { %3025 = vmatprep.subr.bf16.mxu1 %v2645_v35  ;;  %3058 = vmatprep.subr.bf16.mxu0 %v2805_v37  ;;  %v2884_v58 = vunpack.c.h.s8.bf16 %v2404_v32 }
 0x46e   :  { %3026 = vmatpush2.bf16.msra.mxu1 %v2644_v57  ;;  %3059 = vmatpush2.bf16.msra.mxu0 %v2804_v41  ;;  %v2397_v57 = vld [vmem:[#allocation13 + $0x688] sm:$0xff]  ;;  %v2876_v41 = vunpack.c.l.s8.bf16 %v2404_v32 }
 0x46f   :  { %3027 = vmatprep.subr.bf16.mxu1 %v2637_v42  ;;  %3060 = vmatprep.subr.bf16.mxu0 %v2797_v44  ;;  %v2869_v42 = vunpack.c.h.s8.bf16 %v2397_v57  ;;  %v2396_v44 = vld [vmem:[#allocation13 + $0x680] sm:$0xff] }
 0x470   :  { %v2868_v59 = vunpack.c.h.s8.bf16 %v2396_v44 }
 0x472   :  { %3028 = vmatpush2.bf16.msra.mxu1 %v2636_v48  ;;  %3061 = vmatpush2.bf16.msra.mxu0 %v2796_v51  ;;  %v2861_v48 = vunpack.c.l.s8.bf16 %v2397_v57  ;;  %v2389_v51 = vld [vmem:[#allocation13 + $0x648] sm:$0xff] }
 0x473   :  { %3062 = vmatprep.subr.bf16.mxu0 %v2789_v0  ;;  %3079 = vmatprep.subr.bf16.mxu1 %v2885_v56  ;;  %v2860_v0 = vunpack.c.l.s8.bf16 %v2396_v44  ;;  %v2853_v33 = vunpack.c.h.s8.bf16 %v2389_v51  ;;  %v2852_v56 = vunpack.c.h.s8.bf16 %v2388_v45 }
 0x475   :  { %v1893_v12 = vpop.f32.mrf.mxu1 }
 0x476   :  { %v1894_v62 = vadd.f32 %v1893_v12, %v7270_v46  ;;  %v7297_v47 = vpop.f32.mrf.mxu0  ;;  %3063 = vmatpush2.bf16.msra.mxu0 %v2788_v55  ;;  %v2131_v46 = vrot.slane %v7265_v43, %v6791_v26  ;;  %v2845_v55 = vunpack.c.l.s8.bf16 %v2389_v51  ;;  %v2380_v12 = vld [vmem:[#allocation13 + $0x600] sm:$0xff] }
 0x477   :  { %v1895_v3 = vpop.f32.mrf.mxu1  ;;  %3064 = vmatprep.subr.bf16.mxu0 %v2781_v49  ;;  %v2381_v49 = vld [vmem:[#allocation13 + $0x608] sm:$0xff] }
 0x478   :  { %v2108_v6 = vmul.f32 %v2077_v61, %v1894_v62  ;;  %v1896_v10 = vadd.f32 %v1895_v3, %v7277_v8  ;;  %v7304_v11 = vpop.f32.mrf.mxu0  ;;  %v2844_v61 = vunpack.c.l.s8.bf16 %v2388_v45  ;;  %v2837_v28 = vunpack.c.h.s8.bf16 %v2381_v49 }
 0x479   :  { %v1897_v40 = vpop.f32.mrf.mxu1  ;;  %v2836_v62 = vunpack.c.h.s8.bf16 %v2380_v12 }
 0x47a   :  { %v2158_v5 = vadd.f32 %v2127_v63, %v2108_v6  ;;  %v2109_v54 = vmul.f32 %v2081_v9, %v1896_v10  ;;  %v1938_v13 = vpop.f32.mrf.mxu0  ;;  %3065 = vmatpush2.bf16.msra.mxu0 %v2780_v1  ;;  %v2829_v63 = vunpack.c.l.s8.bf16 %v2381_v49  ;;  %v2437_v9 = vld [vmem:[#allocation13 + $0x7c8] sm:$0xff]  ;;  %v2828_v1 = vunpack.c.l.s8.bf16 %v2380_v12 }
 0x47b   :  { %v1898_v15 = vpop.f32.mrf.mxu1  ;;  %3066 = vmatprep.subr.bf16.mxu0 %v2773_v4  ;;  %v2949_v3 = vunpack.c.h.s8.bf16 %v2437_v9  ;;  %v2436_v4 = vld [vmem:[#allocation13 + $0x7c0] sm:$0xff]  ;;  %v2941_v6 = vunpack.c.l.s8.bf16 %v2437_v9  ;;  %v2429_v10 = vld [vmem:[#allocation13 + $0x788] sm:$0xff]  ;;  %v7336_v9 = vld [vmem:[#allocation13 + $0x2d8] sm:$0xff] }
 0x47c   :  { %v2166_v20 = vmul.f32 0.1, %v2158_v5  ;;  %v2159_v21 = vadd.f32 %v2131_v46, %v2109_v54  ;;  %v1939_v25 = vpop.f32.mrf.mxu0  ;;  %v2948_v24 = vunpack.c.h.s8.bf16 %v2436_v4  ;;  %v2940_v46 = vunpack.c.l.s8.bf16 %v2436_v4  ;;  %v2214_v4 = vld [vmem:[#allocation13 + $0xd0] sm:$0xff] }
 0x47d   :  { %v2933_v40 = vunpack.c.h.s8.bf16 %v2429_v10  ;;  %v2925_v13 = vunpack.c.l.s8.bf16 %v2429_v10  ;;  %v7320_v25 = vsub.s32 5, %v6698_v27 }
 0x47e   :  { %v2167_v8 = vmul.f32 0.1, %v2159_v21  ;;  %3067 = vmatpush2.bf16.msra.mxu0 %v2772_v14  ;;  %v2174_v31 = vmax.f32 %v2158_v5, %v2166_v20  ;;  %v2428_v5 = vld [vmem:[#allocation13 + $0x780] sm:$0xff]  ;;  %v2421_v14 = vld [vmem:[#allocation13 + $0x748] sm:$0xff] }
 0x47f   :  { %3068 = vmatprep.subr.bf16.mxu0 %v2765_v17  ;;  %v2932_v54 = vunpack.c.h.s8.bf16 %v2428_v5  ;;  %v2924_v15 = vunpack.c.l.s8.bf16 %v2428_v5  ;;  %v2917_v17 = vunpack.c.h.s8.bf16 %v2421_v14  ;;  %v2420_v20 = vld [vmem:[#allocation13 + $0x740] sm:$0xff]  ;;  %v2089_v57 = vrot.slane %v7259_v38, %v7320_v25 }
 0x480   :  { %v2175_v34 = vmax.f32 %v2159_v21, %v2167_v8  ;;  %v7311_v37 = vpack.c.bf16 %v2174_v31, %v2174_v31  ;;  %v7317_v21 = vsub.s32 4, %v6698_v27  ;;  %v2916_v8 = vunpack.c.h.s8.bf16 %v2420_v20 }
 0x481   :  { %v2495_v5 = vunpack.c.l.s8.bf16 %v7306_v29 }
 0x482   :  { %v7309_v35 = vpack.c.bf16 %v2175_v34, %v2175_v34  ;;  %3069 = vmatpush2.bf16.msra.mxu0 %v2764_v30  ;;  %v2909_v30 = vunpack.c.l.s8.bf16 %v2421_v14  ;;  %v2085_v31 = vrot.slane %v7259_v38, %v7317_v21 }
 0x483   :  { %3120 = vmatprep.subr.bf16.mxu0 %v2503_v19  ;;  %v2413_v19 = vld [vmem:[#allocation13 + $0x708] sm:$0xff] }
 0x484   :  { %3029 = vmatprep.mubr.bf16.mxu1 %v7309_v35  ;;  %v2901_v44 = vunpack.c.h.s8.bf16 %v2413_v19 }
 0x485   :  { %3030 = vmatmul.mubr.bf16.vlgmr.msra.gmra.mxu1 %v7311_v37 }
 0x486   :  { %3080 = vmatpush1.bf16.msra.mxu1 %v2884_v58  ;;  %v2135_v58 = vrot.slane %v7265_v43, %v7317_v21 }
 0x487   :  { %3081 = vmatprep.subr.bf16.mxu1 %v2877_v39 }
 0x48a   :  { %3082 = vmatpush1.bf16.msra.mxu1 %v2876_v41  ;;  %v2908_v41 = vunpack.c.l.s8.bf16 %v2420_v20 }
 0x48b   :  { %3083 = vmatprep.subr.bf16.mxu1 %v2869_v42 }
 0x48e   :  { %3084 = vmatpush1.bf16.msra.mxu1 %v2868_v59  ;;  %v2412_v59 = vld [vmem:[#allocation13 + $0x700] sm:$0xff] }
 0x48f   :  { %3085 = vmatprep.subr.bf16.mxu1 %v2861_v48  ;;  %v2900_v49 = vunpack.c.h.s8.bf16 %v2412_v59 }
 0x492   :  { %3086 = vmatpush1.bf16.msra.mxu1 %v2860_v0 }
 0x493   :  { %3087 = vmatprep.subr.bf16.mxu1 %v2853_v33 }
 0x496   :  { %3088 = vmatpush1.bf16.msra.mxu1 %v2852_v56 }
 0x497   :  { %3089 = vmatprep.subr.bf16.mxu1 %v2845_v55 }
 0x49a   :  { %3090 = vmatpush1.bf16.msra.mxu1 %v2844_v61 }
 0x49b   :  { %3091 = vmatprep.subr.bf16.mxu1 %v2837_v28  ;;  %v2893_v28 = vunpack.c.l.s8.bf16 %v2413_v19 }
 0x49e   :  { %3092 = vmatpush1.bf16.msra.mxu1 %v2836_v62 }
 0x49f   :  { %3093 = vmatprep.subr.bf16.mxu1 %v2829_v63 }
 0x4a2   :  { %3094 = vmatpush1.bf16.msra.mxu1 %v2828_v1  ;;  %v2892_v1 = vunpack.c.l.s8.bf16 %v2412_v59  ;;  %v2247_v59 = vld [vmem:[#allocation13 + $0x1d8] sm:$0xff] }
 0x4a3   :  { %3095 = vmatprep.subr.bf16.mxu1 %v2949_v3 }
 0x4a6   :  { %3096 = vmatpush2.bf16.msra.mxu1 %v2948_v24  ;;  %v2631_v24 = vunpack.c.h.s8.bf16 %v7336_v9 }
 0x4a7   :  { %3097 = vmatprep.subr.bf16.mxu1 %v2941_v6 }
 0x4aa   :  { %3098 = vmatpush2.bf16.msra.mxu1 %v2940_v46  ;;  %v2502_v46 = vunpack.c.h.s8.bf16 %v2214_v4 }
 0x4ab   :  { %3099 = vmatprep.subr.bf16.mxu1 %v2933_v40 }
 0x4ae   :  { %3100 = vmatpush2.bf16.msra.mxu1 %v2932_v54  ;;  %v2207_v54 = vld [vmem:[#allocation13 + $0x98] sm:$0xff] }
 0x4af   :  { %3101 = vmatprep.subr.bf16.mxu1 %v2925_v13  ;;  %v2494_v13 = vunpack.c.l.s8.bf16 %v2214_v4  ;;  %v2487_v14 = vunpack.c.h.s8.bf16 %v2207_v54  ;;  %v2479_v20 = vunpack.c.l.s8.bf16 %v2207_v54 }
 0x4b2   :  { %3102 = vmatpush2.bf16.msra.mxu1 %v2924_v15  ;;  %v2206_v15 = vld [vmem:[#allocation13 + $0x90] sm:$0xff] }
 0x4b3   :  { %3103 = vmatprep.subr.bf16.mxu1 %v2917_v17  ;;  %v2486_v17 = vunpack.c.h.s8.bf16 %v2206_v15  ;;  %v2478_v29 = vunpack.c.l.s8.bf16 %v2206_v15 }
 0x4b5   :  { %v1975_v32 = vpop.f32.mrf.mxu1 }
 0x4b6   :  { %v1976_v34 = vadd.f32 %v1975_v32, %v7297_v47  ;;  %v7327_v39 = vpop.f32.mrf.mxu0  ;;  %3104 = vmatpush2.bf16.msra.mxu1 %v2916_v8  ;;  %v2139_v47 = vrot.slane %v7265_v43, %v7320_v25  ;;  %v2199_v8 = vld [vmem:[#allocation13 + $0x58] sm:$0xff] }
 0x4b7   :  { %v1977_v42 = vpop.f32.mrf.mxu1  ;;  %3105 = vmatprep.subr.bf16.mxu1 %v2909_v30  ;;  %v2471_v30 = vunpack.c.h.s8.bf16 %v2199_v8  ;;  %v2463_v32 = vunpack.c.l.s8.bf16 %v2199_v8  ;;  %v2222_v8 = vld [vmem:[#allocation13 + $0x110] sm:$0xff] }
 0x4b8   :  { %v2110_v48 = vmul.f32 %v2085_v31, %v1976_v34  ;;  %v1978_v51 = vadd.f32 %v1977_v42, %v7304_v11  ;;  %v7334_v0 = vpop.f32.mrf.mxu0  ;;  %v2198_v31 = vld [vmem:[#allocation13 + $0x50] sm:$0xff]  ;;  %v2191_v34 = vld [vmem:[#allocation13 + $0x18] sm:$0xff] }
 0x4b9   :  { %v1979_v33 = vpop.f32.mrf.mxu1  ;;  %v2470_v19 = vunpack.c.h.s8.bf16 %v2198_v31 }
 0x4ba   :  { %v2160_v45 = vadd.f32 %v2135_v58, %v2110_v48  ;;  %v2111_v56 = vmul.f32 %v2089_v57, %v1978_v51  ;;  %v2020_v55 = vpop.f32.mrf.mxu0  ;;  %3106 = vmatpush2.bf16.msra.mxu1 %v2908_v41  ;;  %v2462_v58 = vunpack.c.l.s8.bf16 %v2198_v31  ;;  %v2455_v57 = vunpack.c.h.s8.bf16 %v2191_v34  ;;  %v2190_v41 = vld [vmem:[#allocation13 + $0x10] sm:$0xff] }
 0x4bb   :  { %v1980_v61 = vpop.f32.mrf.mxu1  ;;  %3107 = vmatprep.subr.bf16.mxu1 %v2901_v44  ;;  %v2454_v42 = vunpack.c.h.s8.bf16 %v2190_v41  ;;  %v2447_v44 = vunpack.c.l.s8.bf16 %v2191_v34  ;;  %v2446_v48 = vunpack.c.l.s8.bf16 %v2190_v41  ;;  %v2567_v51 = vunpack.c.h.s8.bf16 %v2247_v59 }
 0x4bc   :  { %v2168_v12 = vmul.f32 0.1, %v2160_v45  ;;  %v2161_v62 = vadd.f32 %v2139_v47, %v2111_v56  ;;  %v2021_v63 = vpop.f32.mrf.mxu0  ;;  %v2246_v47 = vld [vmem:[#allocation13 + $0x1d0] sm:$0xff]  ;;  %v2239_v56 = vld [vmem:[#allocation13 + $0x198] sm:$0xff]  ;;  %v2518_v34 = vunpack.c.h.s8.bf16 %v2222_v8 }
 0x4bd   :  { %v2566_v33 = vunpack.c.h.s8.bf16 %v2246_v47  ;;  %v2558_v55 = vunpack.c.l.s8.bf16 %v2246_v47  ;;  %v2238_v61 = vld [vmem:[#allocation13 + $0x190] sm:$0xff] }
 0x4be   :  { %v2169_v11 = vmul.f32 0.1, %v2161_v62  ;;  %3108 = vmatpush2.bf16.msra.mxu1 %v2900_v49  ;;  %v2176_v3 = vmax.f32 %v2160_v45, %v2168_v12  ;;  %v2559_v45 = vunpack.c.l.s8.bf16 %v2247_v59  ;;  %v2551_v49 = vunpack.c.h.s8.bf16 %v2239_v56  ;;  %v2342_v47 = vld [vmem:[#allocation13 + $0x4d0] sm:$0xff] }
 0x4bf   :  { %3109 = vmatprep.subr.bf16.mxu1 %v2893_v28  ;;  %v2550_v28 = vunpack.c.h.s8.bf16 %v2238_v61  ;;  %v2543_v12 = vunpack.c.l.s8.bf16 %v2239_v56  ;;  %v2542_v63 = vunpack.c.l.s8.bf16 %v2238_v61  ;;  %v2510_v59 = vunpack.c.l.s8.bf16 %v2222_v8 }
 0x4c0   :  { %v2177_v6 = vmax.f32 %v2161_v62, %v2169_v11  ;;  %v7341_v40 = vpack.c.bf16 %v2176_v3, %v2176_v3  ;;  %v2231_v62 = vld [vmem:[#allocation13 + $0x158] sm:$0xff]  ;;  %v7348_v3 = vsub.s32 6, %v6698_v27  ;;  %v2758_v56 = vunpack.c.h.s8.bf16 %v2342_v47 }
 0x4c1   :  { %v2535_v11 = vunpack.c.h.s8.bf16 %v2231_v62 }
 0x4c2   :  { %v7339_v10 = vpack.c.bf16 %v2177_v6, %v2177_v6  ;;  %3110 = vmatpush2.bf16.msra.mxu1 %v2892_v1  ;;  %v2230_v1 = vld [vmem:[#allocation13 + $0x150] sm:$0xff]  ;;  %v2527_v6 = vunpack.c.l.s8.bf16 %v2231_v62 }
 0x4c3   :  { %3161 = vmatprep.subr.bf16.mxu1 %v2631_v24  ;;  %v2534_v4 = vunpack.c.h.s8.bf16 %v2230_v1  ;;  %v7351_v24 = vsub.s32 7, %v6698_v27 }
 0x4c4   :  { %3070 = vmatprep.mubr.bf16.mxu0 %v7339_v10 }
 0x4c5   :  { %3071 = vmatmul.mubr.bf16.vlgmr.msra.gmra.mxu0 %v7341_v40  ;;  %v2097_v15 = vrot.slane %v7259_v38, %v7351_v24  ;;  %v2147_v31 = vrot.slane %v7265_v43, %v7351_v24 }
 0x4c6   :  { %3121 = vmatpush1.bf16.msra.mxu0 %v2502_v46  ;;  %3152 = vmatprep.mubr.bf16.mxu0 %v7282_v18  ;;  %v2093_v46 = vrot.slane %v7259_v38, %v7348_v3 }
 0x4c7   :  { %3122 = vmatprep.subr.bf16.mxu0 %v2495_v5  ;;  %v2223_v5 = vld [vmem:[#allocation13 + $0x118] sm:$0xff] }
 0x4c8   :  { %v2519_v27 = vunpack.c.h.s8.bf16 %v2223_v5 }
 0x4ca   :  { %3123 = vmatpush1.bf16.msra.mxu0 %v2494_v13 }
 0x4cb   :  { %3124 = vmatprep.subr.bf16.mxu0 %v2487_v14  ;;  %v2143_v14 = vrot.slane %v7265_v43, %v7348_v3 }
 0x4ce   :  { %3125 = vmatpush1.bf16.msra.mxu0 %v2486_v17  ;;  %v2526_v17 = vunpack.c.l.s8.bf16 %v2230_v1 }
 0x4cf   :  { %3126 = vmatprep.subr.bf16.mxu0 %v2479_v20 }
 0x4d2   :  { %3127 = vmatpush1.bf16.msra.mxu0 %v2478_v29 }
 0x4d3   :  { %3128 = vmatprep.subr.bf16.mxu0 %v2471_v30 }
 0x4d6   :  { %3129 = vmatpush1.bf16.msra.mxu0 %v2470_v19 }
 0x4d7   :  { %3130 = vmatprep.subr.bf16.mxu0 %v2463_v32 }
 0x4da   :  { %3131 = vmatpush1.bf16.msra.mxu0 %v2462_v58 }
 0x4db   :  { %3132 = vmatprep.subr.bf16.mxu0 %v2455_v57  ;;  %v2511_v57 = vunpack.c.l.s8.bf16 %v2223_v5 }
 0x4de   :  { %3133 = vmatpush1.bf16.msra.mxu0 %v2454_v42  ;;  %v2343_v42 = vld [vmem:[#allocation13 + $0x4d8] sm:$0xff] }
 0x4df   :  { %3134 = vmatprep.subr.bf16.mxu0 %v2447_v44  ;;  %v2751_v61 = vunpack.c.l.s8.bf16 %v2343_v42 }
 0x4e2   :  { %3135 = vmatpush1.bf16.msra.mxu0 %v2446_v48 }
 0x4e3   :  { %3136 = vmatprep.subr.bf16.mxu0 %v2567_v51  ;;  %v2278_v51 = vld [vmem:[#allocation13 + $0x2d0] sm:$0xff] }
 0x4e6   :  { %3137 = vmatpush2.bf16.msra.mxu0 %v2566_v33 }
 0x4e7   :  { %3138 = vmatprep.subr.bf16.mxu0 %v2559_v45  ;;  %v2630_v45 = vunpack.c.h.s8.bf16 %v2278_v51 }
 0x4ea   :  { %3139 = vmatpush2.bf16.msra.mxu0 %v2558_v55 }
 0x4eb   :  { %3140 = vmatprep.subr.bf16.mxu0 %v2551_v49  ;;  %v2623_v49 = vunpack.c.l.s8.bf16 %v7336_v9 }
 0x4ee   :  { %3141 = vmatpush2.bf16.msra.mxu0 %v2550_v28  ;;  %v2271_v28 = vld [vmem:[#allocation13 + $0x298] sm:$0xff] }
 0x4ef   :  { %3142 = vmatprep.subr.bf16.mxu0 %v2543_v12  ;;  %v2335_v12 = vld [vmem:[#allocation13 + $0x498] sm:$0xff]  ;;  %v2615_v9 = vunpack.c.h.s8.bf16 %v2271_v28 }
 0x4f2   :  { %3143 = vmatpush2.bf16.msra.mxu0 %v2542_v63  ;;  %v2622_v63 = vunpack.c.l.s8.bf16 %v2278_v51  ;;  %v2318_v51 = vld [vmem:[#allocation13 + $0x410] sm:$0xff] }
 0x4f3   :  { %3144 = vmatprep.subr.bf16.mxu0 %v2535_v11  ;;  %v2750_v11 = vunpack.c.l.s8.bf16 %v2342_v47 }
 0x4f5   :  { %v2057_v54 = vpop.f32.mrf.mxu1 }
 0x4f6   :  { %v2058_v13 = vadd.f32 %v2057_v54, %v7327_v39  ;;  %3145 = vmatpush2.bf16.msra.mxu0 %v2534_v4  ;;  %v2743_v4 = vunpack.c.h.s8.bf16 %v2335_v12 }
 0x4f7   :  { %v2059_v20 = vpop.f32.mrf.mxu1  ;;  %3146 = vmatprep.subr.bf16.mxu0 %v2527_v6  ;;  %v2270_v6 = vld [vmem:[#allocation13 + $0x290] sm:$0xff] }
 0x4f8   :  { %v2112_v29 = vmul.f32 %v2093_v46, %v2058_v13  ;;  %v2060_v30 = vadd.f32 %v2059_v20, %v7334_v0  ;;  %v2759_v0 = vunpack.c.h.s8.bf16 %v2343_v42  ;;  %v2334_v46 = vld [vmem:[#allocation13 + $0x490] sm:$0xff]  ;;  %v2614_v54 = vunpack.c.h.s8.bf16 %v2270_v6  ;;  %v2263_v20 = vld [vmem:[#allocation13 + $0x258] sm:$0xff] }
 0x4f9   :  { %v2061_v19 = vpop.f32.mrf.mxu1  ;;  %v2742_v13 = vunpack.c.h.s8.bf16 %v2334_v46  ;;  %v2606_v8 = vunpack.c.l.s8.bf16 %v2270_v6 }
 0x4fa   :  { %v2162_v39 = vadd.f32 %v2143_v14, %v2112_v29  ;;  %v2113_v32 = vmul.f32 %v2097_v15, %v2060_v30  ;;  %3147 = vmatpush2.bf16.msra.mxu0 %v2526_v17  ;;  %v2607_v15 = vunpack.c.l.s8.bf16 %v2271_v28  ;;  %v2735_v17 = vunpack.c.l.s8.bf16 %v2335_v12  ;;  %v2262_v19 = vld [vmem:[#allocation13 + $0x250] sm:$0xff] }
 0x4fb   :  { %v2062_v58 = vpop.f32.mrf.mxu1  ;;  %3148 = vmatprep.subr.bf16.mxu0 %v2519_v27  ;;  %v2327_v27 = vld [vmem:[#allocation13 + $0x458] sm:$0xff]  ;;  %v2734_v29 = vunpack.c.l.s8.bf16 %v2334_v46  ;;  %v2599_v30 = vunpack.c.h.s8.bf16 %v2263_v20  ;;  %v2590_v42 = vunpack.c.l.s8.bf16 %v2262_v19  ;;  %v2702_v12 = vunpack.c.l.s8.bf16 %v2318_v51 }
 0x4fc   :  { %v2170_v38 = vmul.f32 0.1, %v2162_v39  ;;  %v2163_v41 = vadd.f32 %v2147_v31, %v2113_v32  ;;  %v2727_v31 = vunpack.c.h.s8.bf16 %v2327_v27  ;;  %v2598_v32 = vunpack.c.h.s8.bf16 %v2262_v19 }
 0x4fd   :  { %v2591_v58 = vunpack.c.l.s8.bf16 %v2263_v20 }
 0x4fe   :  { %v2171_v44 = vmul.f32 0.1, %v2163_v41  ;;  %3149 = vmatpush2.bf16.msra.mxu0 %v2518_v34  ;;  %v2178_v48 = vmax.f32 %v2162_v39, %v2170_v38  ;;  %v2326_v39 = vld [vmem:[#allocation13 + $0x450] sm:$0xff]  ;;  %v2255_v38 = vld [vmem:[#allocation13 + $0x218] sm:$0xff] }
 0x4ff   :  { %3150 = vmatprep.subr.bf16.mxu0 %v2511_v57  ;;  %v2726_v34 = vunpack.c.h.s8.bf16 %v2326_v39  ;;  %v2719_v57 = vunpack.c.l.s8.bf16 %v2327_v27 }
 0x500   :  { %v2179_v43 = vmax.f32 %v2163_v41, %v2171_v44  ;;  %v7365_v55 = vpack.c.bf16 %v2178_v48, %v2178_v48  ;;  %v2319_v41 = vld [vmem:[#allocation13 + $0x418] sm:$0xff]  ;;  %v2718_v44 = vunpack.c.l.s8.bf16 %v2326_v39 }
 0x501   :  { %v2711_v48 = vunpack.c.h.s8.bf16 %v2319_v41 }
 0x502   :  { %v7363_v33 = vpack.c.bf16 %v2179_v43, %v2179_v43  ;;  %3151 = vmatpush2.bf16.msra.mxu0 %v2510_v59  ;;  %v2583_v59 = vunpack.c.h.s8.bf16 %v2255_v38  ;;  %v2710_v43 = vunpack.c.h.s8.bf16 %v2318_v51 }
 0x503   :  { %3202 = vmatprep.subr.bf16.mxu0 %v2759_v0  ;;  %v2254_v0 = vld [vmem:[#allocation13 + $0x210] sm:$0xff] }
 0x504   :  { %3111 = vmatprep.mubr.bf16.mxu1 %v7363_v33  ;;  %v2582_v47 = vunpack.c.h.s8.bf16 %v2254_v0  ;;  %v2574_v28 = vunpack.c.l.s8.bf16 %v2254_v0 }
 0x505   :  { %3153 = vmatmul.mubr.bf16.vlgmr.msra.gmra.mxu0 %v7284_v22  ;;  %3112 = vmatmul.mubr.bf16.vlgmr.msra.gmra.mxu1 %v7365_v55  ;;  %v7371_v62 = vpop.f32.mrf.mxu0 }
 0x506   :  { %3162 = vmatpush1.bf16.msra.mxu1 %v2630_v45  ;;  %3203 = vmatpush1.bf16.msra.mxu0 %v2758_v56  ;;  %v2575_v45 = vunpack.c.l.s8.bf16 %v2255_v38  ;;  %v2703_v56 = vunpack.c.l.s8.bf16 %v2319_v41 }
 0x507   :  { %3234 = vmatprep.mubr.bf16.mxu0 %v7339_v10  ;;  %3193 = vmatprep.mubr.bf16.mxu1 %v7309_v35  ;;  %v7375_v1 = vpop.f32.mrf.mxu0 }
 0x508   :  { %3163 = vmatprep.subr.bf16.mxu1 %v2623_v49  ;;  %3204 = vmatprep.subr.bf16.mxu0 %v2751_v61  ;;  %v2311_v49 = vld [vmem:[#allocation13 + $0x3d8] sm:$0xff] }
 0x509   :  { %v2994_v5 = vpop.f32.mrf.mxu0  ;;  %v2375_v61 = vld [vmem:[#allocation13 + $0x5d8] sm:$0xff] }
 0x50a   :  { %3164 = vmatpush1.bf16.msra.mxu1 %v2622_v63  ;;  %3205 = vmatpush1.bf16.msra.mxu0 %v2750_v11  ;;  %v2695_v63 = vunpack.c.h.s8.bf16 %v2311_v49  ;;  %v2823_v11 = vunpack.c.h.s8.bf16 %v2375_v61  ;;  %v2687_v5 = vunpack.c.l.s8.bf16 %v2311_v49 }
 0x50b   :  { %v2995_v14 = vpop.f32.mrf.mxu0  ;;  %3165 = vmatprep.subr.bf16.mxu1 %v2615_v9  ;;  %3206 = vmatprep.subr.bf16.mxu0 %v2743_v4  ;;  %v2310_v9 = vld [vmem:[#allocation13 + $0x3d0] sm:$0xff] }
 0x50c   :  { %v2374_v4 = vld [vmem:[#allocation13 + $0x5d0] sm:$0xff]  ;;  %v2694_v6 = vunpack.c.h.s8.bf16 %v2310_v9  ;;  %v2367_v14 = vld [vmem:[#allocation13 + $0x598] sm:$0xff] }
 0x50d   :  { %v2822_v46 = vunpack.c.h.s8.bf16 %v2374_v4  ;;  %v2807_v27 = vunpack.c.h.s8.bf16 %v2367_v14  ;;  %v2799_v39 = vunpack.c.l.s8.bf16 %v2367_v14 }
 0x50e   :  { %3166 = vmatpush1.bf16.msra.mxu1 %v2614_v54  ;;  %3207 = vmatpush1.bf16.msra.mxu0 %v2742_v13  ;;  %v2815_v54 = vunpack.c.l.s8.bf16 %v2375_v61  ;;  %v2303_v13 = vld [vmem:[#allocation13 + $0x398] sm:$0xff] }
 0x50f   :  { %3167 = vmatprep.subr.bf16.mxu1 %v2607_v15  ;;  %3208 = vmatprep.subr.bf16.mxu0 %v2735_v17  ;;  %v2686_v15 = vunpack.c.l.s8.bf16 %v2310_v9  ;;  %v2814_v17 = vunpack.c.l.s8.bf16 %v2374_v4  ;;  %v2679_v20 = vunpack.c.h.s8.bf16 %v2303_v13  ;;  %v2671_v19 = vunpack.c.l.s8.bf16 %v2303_v13 }
 0x512   :  { %3168 = vmatpush1.bf16.msra.mxu1 %v2606_v8  ;;  %3209 = vmatpush1.bf16.msra.mxu0 %v2734_v29  ;;  %v2302_v8 = vld [vmem:[#allocation13 + $0x390] sm:$0xff] }
 0x513   :  { %3169 = vmatprep.subr.bf16.mxu1 %v2599_v30  ;;  %3210 = vmatprep.subr.bf16.mxu0 %v2727_v31  ;;  %v2366_v29 = vld [vmem:[#allocation13 + $0x590] sm:$0xff]  ;;  %v2678_v30 = vunpack.c.h.s8.bf16 %v2302_v8 }
 0x514   :  { %v2806_v31 = vunpack.c.h.s8.bf16 %v2366_v29 }
 0x516   :  { %3170 = vmatpush1.bf16.msra.mxu1 %v2598_v32  ;;  %3211 = vmatpush1.bf16.msra.mxu0 %v2726_v34  ;;  %v2295_v32 = vld [vmem:[#allocation13 + $0x358] sm:$0xff] }
 0x517   :  { %3171 = vmatprep.subr.bf16.mxu1 %v2591_v58  ;;  %3212 = vmatprep.subr.bf16.mxu0 %v2719_v57  ;;  %v2359_v34 = vld [vmem:[#allocation13 + $0x558] sm:$0xff]  ;;  %v2670_v58 = vunpack.c.l.s8.bf16 %v2302_v8  ;;  %v2798_v57 = vunpack.c.l.s8.bf16 %v2366_v29  ;;  %v2663_v38 = vunpack.c.h.s8.bf16 %v2295_v32  ;;  %v2655_v0 = vunpack.c.l.s8.bf16 %v2295_v32 }
 0x518   :  { %v2791_v41 = vunpack.c.h.s8.bf16 %v2359_v34  ;;  %v2783_v51 = vunpack.c.l.s8.bf16 %v2359_v34 }
 0x51a   :  { %3172 = vmatpush1.bf16.msra.mxu1 %v2590_v42  ;;  %3213 = vmatpush1.bf16.msra.mxu0 %v2718_v44  ;;  %v2294_v42 = vld [vmem:[#allocation13 + $0x350] sm:$0xff] }
 0x51b   :  { %3173 = vmatprep.subr.bf16.mxu1 %v2583_v59  ;;  %3214 = vmatprep.subr.bf16.mxu0 %v2711_v48  ;;  %v2358_v44 = vld [vmem:[#allocation13 + $0x550] sm:$0xff]  ;;  %v2662_v59 = vunpack.c.h.s8.bf16 %v2294_v42 }
 0x51c   :  { %v2790_v48 = vunpack.c.h.s8.bf16 %v2358_v44 }
 0x51e   :  { %3174 = vmatpush1.bf16.msra.mxu1 %v2582_v47  ;;  %3215 = vmatpush1.bf16.msra.mxu0 %v2710_v43  ;;  %v2287_v47 = vld [vmem:[#allocation13 + $0x318] sm:$0xff] }
 0x51f   :  { %3175 = vmatprep.subr.bf16.mxu1 %v2575_v45  ;;  %3216 = vmatprep.subr.bf16.mxu0 %v2703_v56  ;;  %v2351_v43 = vld [vmem:[#allocation13 + $0x518] sm:$0xff]  ;;  %v2654_v45 = vunpack.c.l.s8.bf16 %v2294_v42  ;;  %v2782_v56 = vunpack.c.l.s8.bf16 %v2358_v44  ;;  %v2647_v49 = vunpack.c.h.s8.bf16 %v2287_v47  ;;  %v2639_v9 = vunpack.c.l.s8.bf16 %v2287_v47  ;;  %v2208_v44 = vld [vmem:[#allocation13 + $0xa0] sm:$0xff] }
 0x520   :  { %v2775_v61 = vunpack.c.h.s8.bf16 %v2351_v43  ;;  %v2767_v4 = vunpack.c.l.s8.bf16 %v2351_v43  ;;  %v2391_v43 = vld [vmem:[#allocation13 + $0x658] sm:$0xff] }
 0x522   :  { %3176 = vmatpush1.bf16.msra.mxu1 %v2574_v28  ;;  %3217 = vmatpush1.bf16.msra.mxu0 %v2702_v12  ;;  %v2286_v28 = vld [vmem:[#allocation13 + $0x310] sm:$0xff] }
 0x523   :  { %3177 = vmatprep.subr.bf16.mxu1 %v2695_v63  ;;  %3218 = vmatprep.subr.bf16.mxu0 %v2823_v11  ;;  %v2350_v12 = vld [vmem:[#allocation13 + $0x510] sm:$0xff]  ;;  %v2646_v63 = vunpack.c.h.s8.bf16 %v2286_v28 }
 0x524   :  { %v2774_v11 = vunpack.c.h.s8.bf16 %v2350_v12 }
 0x526   :  { %3178 = vmatpush2.bf16.msra.mxu1 %v2694_v6  ;;  %3219 = vmatpush2.bf16.msra.mxu0 %v2822_v46  ;;  %v2407_v6 = vld [vmem:[#allocation13 + $0x6d8] sm:$0xff]  ;;  %v2217_v46 = vld [vmem:[#allocation13 + $0xe8] sm:$0xff] }
 0x527   :  { %3179 = vmatprep.subr.bf16.mxu1 %v2687_v5  ;;  %3220 = vmatprep.subr.bf16.mxu0 %v2815_v54  ;;  %v2638_v5 = vunpack.c.l.s8.bf16 %v2286_v28  ;;  %v2766_v54 = vunpack.c.l.s8.bf16 %v2350_v12  ;;  %v2887_v13 = vunpack.c.h.s8.bf16 %v2407_v6  ;;  %v2505_v14 = vunpack.c.h.s8.bf16 %v2217_v46  ;;  %v2200_v12 = vld [vmem:[#allocation13 + $0x60] sm:$0xff] }
 0x528   :  { %v2879_v8 = vunpack.c.l.s8.bf16 %v2407_v6  ;;  %v2497_v29 = vunpack.c.l.s8.bf16 %v2217_v46  ;;  %v2383_v6 = vld [vmem:[#allocation13 + $0x618] sm:$0xff]  ;;  %v2193_v46 = vld [vmem:[#allocation13 + $0x28] sm:$0xff] }
 0x52a   :  { %3180 = vmatpush2.bf16.msra.mxu1 %v2686_v15  ;;  %3221 = vmatpush2.bf16.msra.mxu0 %v2814_v17  ;;  %v2406_v15 = vld [vmem:[#allocation13 + $0x6d0] sm:$0xff]  ;;  %v2216_v17 = vld [vmem:[#allocation13 + $0xe0] sm:$0xff] }
 0x52b   :  { %3181 = vmatprep.subr.bf16.mxu1 %v2679_v20  ;;  %3222 = vmatprep.subr.bf16.mxu0 %v2807_v27  ;;  %v2886_v20 = vunpack.c.h.s8.bf16 %v2406_v15  ;;  %v2504_v27 = vunpack.c.h.s8.bf16 %v2216_v17  ;;  %v2878_v32 = vunpack.c.l.s8.bf16 %v2406_v15  ;;  %v2457_v15 = vunpack.c.h.s8.bf16 %v2193_v46 }
 0x52e   :  { %3182 = vmatpush2.bf16.msra.mxu1 %v2678_v30  ;;  %3223 = vmatpush2.bf16.msra.mxu0 %v2806_v31  ;;  %v2399_v30 = vld [vmem:[#allocation13 + $0x698] sm:$0xff] }
 0x52f   :  { %3183 = vmatprep.subr.bf16.mxu1 %v2671_v19  ;;  %3224 = vmatprep.subr.bf16.mxu0 %v2799_v39  ;;  %v2209_v19 = vld [vmem:[#allocation13 + $0xa8] sm:$0xff] }
 0x530   :  { %v2489_v42 = vunpack.c.h.s8.bf16 %v2209_v19  ;;  %v2481_v47 = vunpack.c.l.s8.bf16 %v2209_v19 }
 0x532   :  { %3184 = vmatpush2.bf16.msra.mxu1 %v2670_v58  ;;  %3225 = vmatpush2.bf16.msra.mxu0 %v2798_v57  ;;  %v2496_v58 = vunpack.c.l.s8.bf16 %v2216_v17  ;;  %v2871_v57 = vunpack.c.h.s8.bf16 %v2399_v30  ;;  %v2192_v17 = vld [vmem:[#allocation13 + $0x20] sm:$0xff] }
 0x533   :  { %3185 = vmatprep.subr.bf16.mxu1 %v2663_v38  ;;  %3226 = vmatprep.subr.bf16.mxu0 %v2791_v41  ;;  %v2398_v38 = vld [vmem:[#allocation13 + $0x690] sm:$0xff] }
 0x536   :  { %3186 = vmatpush2.bf16.msra.mxu1 %v2662_v59  ;;  %3227 = vmatpush2.bf16.msra.mxu0 %v2790_v48  ;;  %v2870_v59 = vunpack.c.h.s8.bf16 %v2398_v38 }
 0x537   :  { %3187 = vmatprep.subr.bf16.mxu1 %v2655_v0  ;;  %3228 = vmatprep.subr.bf16.mxu0 %v2783_v51  ;;  %v2488_v0 = vunpack.c.h.s8.bf16 %v2208_v44  ;;  %v2863_v51 = vunpack.c.l.s8.bf16 %v2399_v30  ;;  %v2439_v30 = vld [vmem:[#allocation13 + $0x7d8] sm:$0xff] }
 0x53a   :  { %3188 = vmatpush2.bf16.msra.mxu1 %v2654_v45  ;;  %3229 = vmatpush2.bf16.msra.mxu0 %v2782_v56  ;;  %v2201_v45 = vld [vmem:[#allocation13 + $0x68] sm:$0xff]  ;;  %v2862_v56 = vunpack.c.l.s8.bf16 %v2398_v38  ;;  %v2248_v38 = vld [vmem:[#allocation13 + $0x1e0] sm:$0xff] }
 0x53b   :  { %3189 = vmatprep.subr.bf16.mxu1 %v2647_v49  ;;  %3230 = vmatprep.subr.bf16.mxu0 %v2775_v61  ;;  %v2855_v49 = vunpack.c.h.s8.bf16 %v2391_v43  ;;  %v2390_v61 = vld [vmem:[#allocation13 + $0x650] sm:$0xff]  ;;  %v2473_v28 = vunpack.c.h.s8.bf16 %v2201_v45 }
 0x53e   :  { %3190 = vmatpush2.bf16.msra.mxu1 %v2646_v63  ;;  %3231 = vmatpush2.bf16.msra.mxu0 %v2774_v11  ;;  %v2854_v63 = vunpack.c.h.s8.bf16 %v2390_v61  ;;  %v2472_v11 = vunpack.c.h.s8.bf16 %v2200_v12 }
 0x53f   :  { %3191 = vmatprep.subr.bf16.mxu1 %v2639_v9  ;;  %3232 = vmatprep.subr.bf16.mxu0 %v2767_v4  ;;  %v2847_v9 = vunpack.c.l.s8.bf16 %v2391_v43  ;;  %v2465_v4 = vunpack.c.l.s8.bf16 %v2201_v45  ;;  %v2430_v45 = vld [vmem:[#allocation13 + $0x790] sm:$0xff] }
 0x542   :  { %3192 = vmatpush2.bf16.msra.mxu1 %v2638_v5  ;;  %3233 = vmatpush2.bf16.msra.mxu0 %v2766_v54  ;;  %v2846_v5 = vunpack.c.l.s8.bf16 %v2390_v61  ;;  %v2464_v54 = vunpack.c.l.s8.bf16 %v2200_v12 }
 0x543   :  { %3243 = vmatprep.subr.bf16.mxu1 %v2887_v13  ;;  %3284 = vmatprep.subr.bf16.mxu0 %v2505_v14  ;;  %v2839_v13 = vunpack.c.h.s8.bf16 %v2383_v6  ;;  %v2382_v14 = vld [vmem:[#allocation13 + $0x610] sm:$0xff] }
 0x544   :  { %v2830_v19 = vunpack.c.l.s8.bf16 %v2382_v14 }
 0x545   :  { %3194 = vmatmul.mubr.bf16.vlgmr.msra.gmra.mxu1 %v7311_v37  ;;  %3235 = vmatmul.mubr.bf16.vlgmr.msra.gmra.mxu0 %v7341_v40  ;;  %v3031_v31 = vpop.f32.mrf.mxu1 }
 0x546   :  { %v7380_v39 = vadd.f32 %v3031_v31, %v7371_v62  ;;  %3244 = vmatpush1.bf16.msra.mxu1 %v2886_v20  ;;  %3275 = vmatprep.mubr.bf16.mxu1 %v7363_v33  ;;  %v2838_v20 = vunpack.c.h.s8.bf16 %v2382_v14  ;;  %v2249_v31 = vld [vmem:[#allocation13 + $0x1e8] sm:$0xff] }
 0x547   :  { %3285 = vmatpush1.bf16.msra.mxu0 %v2504_v27  ;;  %3316 = vmatprep.mubr.bf16.mxu0 %v7282_v18  ;;  %v3033_v34 = vpop.f32.mrf.mxu1  ;;  %v2456_v27 = vunpack.c.h.s8.bf16 %v2192_v17 }
 0x548   :  { %v7385_v41 = vadd.f32 %v3033_v34, %v7375_v1  ;;  %3245 = vmatprep.subr.bf16.mxu1 %v2879_v8  ;;  %3286 = vmatprep.subr.bf16.mxu0 %v2497_v29  ;;  %v2480_v1 = vunpack.c.l.s8.bf16 %v2208_v44  ;;  %v2831_v8 = vunpack.c.l.s8.bf16 %v2383_v6  ;;  %v2449_v29 = vunpack.c.l.s8.bf16 %v2193_v46  ;;  %v2422_v46 = vld [vmem:[#allocation13 + $0x750] sm:$0xff] }
 0x549   :  { %v3035_v62 = vpop.f32.mrf.mxu1  ;;  %v2951_v34 = vunpack.c.h.s8.bf16 %v2439_v30  ;;  %v2568_v44 = vunpack.c.h.s8.bf16 %v2248_v38 }
 0x54a   :  { %3246 = vmatpush1.bf16.msra.mxu1 %v2878_v32  ;;  %v2448_v32 = vunpack.c.l.s8.bf16 %v2192_v17  ;;  %v2943_v62 = vunpack.c.l.s8.bf16 %v2439_v30 }
 0x54b   :  { %3287 = vmatpush1.bf16.msra.mxu0 %v2496_v58  ;;  %v3036_v48 = vpop.f32.mrf.mxu1  ;;  %3247 = vmatprep.subr.bf16.mxu1 %v2871_v57  ;;  %v2438_v58 = vld [vmem:[#allocation13 + $0x7d0] sm:$0xff]  ;;  %v2569_v57 = vunpack.c.h.s8.bf16 %v2249_v31 }
 0x54c   :  { %3288 = vmatprep.subr.bf16.mxu0 %v2489_v42  ;;  %v2950_v42 = vunpack.c.h.s8.bf16 %v2438_v58  ;;  %v2431_v48 = vld [vmem:[#allocation13 + $0x798] sm:$0xff] }
 0x54d   :  { %v2935_v43 = vunpack.c.h.s8.bf16 %v2431_v48 }
 0x54e   :  { %3248 = vmatpush1.bf16.msra.mxu1 %v2870_v59  ;;  %v2561_v59 = vunpack.c.l.s8.bf16 %v2249_v31  ;;  %v2414_v31 = vld [vmem:[#allocation13 + $0x710] sm:$0xff] }
 0x54f   :  { %3289 = vmatpush1.bf16.msra.mxu0 %v2488_v0  ;;  %3249 = vmatprep.subr.bf16.mxu1 %v2863_v51  ;;  %v2241_v0 = vld [vmem:[#allocation13 + $0x1a8] sm:$0xff]  ;;  %v2942_v51 = vunpack.c.l.s8.bf16 %v2438_v58 }
 0x550   :  { %3290 = vmatprep.subr.bf16.mxu0 %v2481_v47  ;;  %v2560_v47 = vunpack.c.l.s8.bf16 %v2248_v38  ;;  %v2545_v12 = vunpack.c.l.s8.bf16 %v2241_v0 }
 0x552   :  { %3250 = vmatpush1.bf16.msra.mxu1 %v2862_v56  ;;  %v2553_v56 = vunpack.c.h.s8.bf16 %v2241_v0  ;;  %v2280_v0 = vld [vmem:[#allocation13 + $0x2e0] sm:$0xff] }
 0x553   :  { %3291 = vmatpush1.bf16.msra.mxu0 %v2480_v1  ;;  %3251 = vmatprep.subr.bf16.mxu1 %v2855_v49  ;;  %v2240_v1 = vld [vmem:[#allocation13 + $0x1a0] sm:$0xff]  ;;  %v2934_v49 = vunpack.c.h.s8.bf16 %v2430_v45 }
 0x554   :  { %3292 = vmatprep.subr.bf16.mxu0 %v2473_v28  ;;  %v2552_v61 = vunpack.c.h.s8.bf16 %v2240_v1  ;;  %v2927_v28 = vunpack.c.l.s8.bf16 %v2431_v48 }
 0x556   :  { %3252 = vmatpush1.bf16.msra.mxu1 %v2854_v63  ;;  %v2423_v63 = vld [vmem:[#allocation13 + $0x758] sm:$0xff] }
 0x557   :  { %3293 = vmatpush1.bf16.msra.mxu0 %v2472_v11  ;;  %3253 = vmatprep.subr.bf16.mxu1 %v2847_v9  ;;  %v2233_v11 = vld [vmem:[#allocation13 + $0x168] sm:$0xff]  ;;  %v2926_v9 = vunpack.c.l.s8.bf16 %v2430_v45  ;;  %v2919_v6 = vunpack.c.h.s8.bf16 %v2423_v63 }
 0x558   :  { %3294 = vmatprep.subr.bf16.mxu0 %v2465_v4  ;;  %v2544_v4 = vunpack.c.l.s8.bf16 %v2240_v1  ;;  %v2529_v17 = vunpack.c.l.s8.bf16 %v2233_v11  ;;  %v2273_v1 = vld [vmem:[#allocation13 + $0x2a8] sm:$0xff] }
 0x55a   :  { %3254 = vmatpush1.bf16.msra.mxu1 %v2846_v5  ;;  %v2537_v5 = vunpack.c.h.s8.bf16 %v2233_v11 }
 0x55b   :  { %3295 = vmatpush1.bf16.msra.mxu0 %v2464_v54  ;;  %3255 = vmatprep.subr.bf16.mxu1 %v2839_v13  ;;  %v2232_v54 = vld [vmem:[#allocation13 + $0x160] sm:$0xff]  ;;  %v2918_v13 = vunpack.c.h.s8.bf16 %v2422_v46 }
 0x55c   :  { %3296 = vmatprep.subr.bf16.mxu0 %v2457_v15  ;;  %v2536_v14 = vunpack.c.h.s8.bf16 %v2232_v54  ;;  %v2911_v15 = vunpack.c.l.s8.bf16 %v2423_v63  ;;  %v2624_v63 = vunpack.c.l.s8.bf16 %v2280_v0 }
 0x55e   :  { %3256 = vmatpush1.bf16.msra.mxu1 %v2838_v20  ;;  %v2415_v20 = vld [vmem:[#allocation13 + $0x718] sm:$0xff] }
 0x55f   :  { %3297 = vmatpush1.bf16.msra.mxu0 %v2456_v27  ;;  %3257 = vmatprep.subr.bf16.mxu1 %v2831_v8  ;;  %v2225_v27 = vld [vmem:[#allocation13 + $0x128] sm:$0xff]  ;;  %v2910_v8 = vunpack.c.l.s8.bf16 %v2422_v46  ;;  %v2903_v30 = vunpack.c.h.s8.bf16 %v2415_v20 }
 0x560   :  { %3298 = vmatprep.subr.bf16.mxu0 %v2449_v29  ;;  %v2528_v29 = vunpack.c.l.s8.bf16 %v2232_v54  ;;  %v2513_v38 = vunpack.c.l.s8.bf16 %v2225_v27  ;;  %v2336_v54 = vld [vmem:[#allocation13 + $0x4a0] sm:$0xff] }
 0x562   :  { %3258 = vmatpush1.bf16.msra.mxu1 %v2830_v19  ;;  %v2521_v19 = vunpack.c.h.s8.bf16 %v2225_v27  ;;  %v2265_v27 = vld [vmem:[#allocation13 + $0x268] sm:$0xff] }
 0x563   :  { %3299 = vmatpush1.bf16.msra.mxu0 %v2448_v32  ;;  %3259 = vmatprep.subr.bf16.mxu1 %v2951_v34  ;;  %v2224_v32 = vld [vmem:[#allocation13 + $0x120] sm:$0xff]  ;;  %v2902_v34 = vunpack.c.h.s8.bf16 %v2414_v31 }
 0x564   :  { %3300 = vmatprep.subr.bf16.mxu0 %v2569_v57  ;;  %v2520_v58 = vunpack.c.h.s8.bf16 %v2224_v32  ;;  %v2895_v57 = vunpack.c.l.s8.bf16 %v2415_v20 }
 0x566   :  { %3260 = vmatpush2.bf16.msra.mxu1 %v2950_v42  ;;  %v2281_v42 = vld [vmem:[#allocation13 + $0x2e8] sm:$0xff] }
 0x567   :  { %3301 = vmatpush2.bf16.msra.mxu0 %v2568_v44  ;;  %3261 = vmatprep.subr.bf16.mxu1 %v2943_v62  ;;  %v2345_v44 = vld [vmem:[#allocation13 + $0x4e8] sm:$0xff]  ;;  %v2894_v62 = vunpack.c.l.s8.bf16 %v2414_v31  ;;  %v2633_v48 = vunpack.c.h.s8.bf16 %v2281_v42  ;;  %v2264_v31 = vld [vmem:[#allocation13 + $0x260] sm:$0xff] }
 0x568   :  { %3302 = vmatprep.subr.bf16.mxu0 %v2561_v59  ;;  %v2512_v59 = vunpack.c.l.s8.bf16 %v2224_v32  ;;  %v2328_v32 = vld [vmem:[#allocation13 + $0x460] sm:$0xff] }
 0x56a   :  { %3262 = vmatpush2.bf16.msra.mxu1 %v2942_v51  ;;  %v2761_v51 = vunpack.c.h.s8.bf16 %v2345_v44 }
 0x56b   :  { %3303 = vmatpush2.bf16.msra.mxu0 %v2560_v47  ;;  %3263 = vmatprep.subr.bf16.mxu1 %v2935_v43  ;;  %v2344_v47 = vld [vmem:[#allocation13 + $0x4e0] sm:$0xff]  ;;  %v2632_v43 = vunpack.c.h.s8.bf16 %v2280_v0 }
 0x56c   :  { %3304 = vmatprep.subr.bf16.mxu0 %v2553_v56  ;;  %v2760_v45 = vunpack.c.h.s8.bf16 %v2344_v47  ;;  %v2625_v56 = vunpack.c.l.s8.bf16 %v2281_v42  ;;  %v2257_v42 = vld [vmem:[#allocation13 + $0x228] sm:$0xff]  ;;  %v2256_v0 = vld [vmem:[#allocation13 + $0x220] sm:$0xff] }
 0x56e   :  { %3264 = vmatpush2.bf16.msra.mxu1 %v2934_v49 }
 0x56f   :  { %3305 = vmatpush2.bf16.msra.mxu0 %v2552_v61  ;;  %3265 = vmatprep.subr.bf16.mxu1 %v2927_v28  ;;  %v2753_v61 = vunpack.c.l.s8.bf16 %v2345_v44  ;;  %v2337_v28 = vld [vmem:[#allocation13 + $0x4a8] sm:$0xff] }
 0x570   :  { %3306 = vmatprep.subr.bf16.mxu0 %v2545_v12  ;;  %v2737_v20 = vunpack.c.l.s8.bf16 %v2337_v28  ;;  %v2321_v44 = vld [vmem:[#allocation13 + $0x428] sm:$0xff] }
 0x572   :  { %3266 = vmatpush2.bf16.msra.mxu1 %v2926_v9  ;;  %v2752_v9 = vunpack.c.l.s8.bf16 %v2344_v47  ;;  %v2320_v47 = vld [vmem:[#allocation13 + $0x420] sm:$0xff] }
 0x573   :  { %3307 = vmatpush2.bf16.msra.mxu0 %v2544_v4  ;;  %3267 = vmatprep.subr.bf16.mxu1 %v2919_v6  ;;  %v2617_v4 = vunpack.c.h.s8.bf16 %v2273_v1  ;;  %v2272_v6 = vld [vmem:[#allocation13 + $0x2a0] sm:$0xff] }
 0x574   :  { %3308 = vmatprep.subr.bf16.mxu0 %v2537_v5  ;;  %v2745_v5 = vunpack.c.h.s8.bf16 %v2337_v28  ;;  %v2576_v28 = vunpack.c.l.s8.bf16 %v2256_v0 }
 0x576   :  { %3268 = vmatpush2.bf16.msra.mxu1 %v2918_v13  ;;  %v2616_v13 = vunpack.c.h.s8.bf16 %v2272_v6 }
 0x577   :  { %3309 = vmatpush2.bf16.msra.mxu0 %v2536_v14  ;;  %3269 = vmatprep.subr.bf16.mxu1 %v2911_v15  ;;  %v2744_v15 = vunpack.c.h.s8.bf16 %v2336_v54 }
 0x578   :  { %3310 = vmatprep.subr.bf16.mxu0 %v2529_v17  ;;  %v2609_v17 = vunpack.c.l.s8.bf16 %v2273_v1  ;;  %v2705_v1 = vunpack.c.l.s8.bf16 %v2321_v44 }
 0x57a   :  { %3270 = vmatpush2.bf16.msra.mxu1 %v2910_v8  ;;  %v2329_v8 = vld [vmem:[#allocation13 + $0x468] sm:$0xff] }
 0x57b   :  { %3311 = vmatpush2.bf16.msra.mxu0 %v2528_v29  ;;  %3271 = vmatprep.subr.bf16.mxu1 %v2903_v30  ;;  %v2608_v29 = vunpack.c.l.s8.bf16 %v2272_v6  ;;  %v2601_v30 = vunpack.c.h.s8.bf16 %v2265_v27  ;;  %v2376_v6 = vld [vmem:[#allocation13 + $0x5e0] sm:$0xff] }
 0x57c   :  { %3312 = vmatprep.subr.bf16.mxu0 %v2521_v19  ;;  %v2729_v19 = vunpack.c.h.s8.bf16 %v2329_v8 }
 0x57e   :  { %3272 = vmatpush2.bf16.msra.mxu1 %v2902_v34  ;;  %v2600_v34 = vunpack.c.h.s8.bf16 %v2264_v31 }
 0x57f   :  { %3313 = vmatpush2.bf16.msra.mxu0 %v2520_v58  ;;  %3273 = vmatprep.subr.bf16.mxu1 %v2895_v57  ;;  %v2728_v58 = vunpack.c.h.s8.bf16 %v2328_v32  ;;  %v2593_v57 = vunpack.c.l.s8.bf16 %v2265_v27 }
 0x580   :  { %3314 = vmatprep.subr.bf16.mxu0 %v2513_v38  ;;  %v2721_v38 = vunpack.c.l.s8.bf16 %v2329_v8  ;;  %v2304_v8 = vld [vmem:[#allocation13 + $0x3a0] sm:$0xff] }
 0x582   :  { %3274 = vmatpush2.bf16.msra.mxu1 %v2894_v62  ;;  %v2592_v62 = vunpack.c.l.s8.bf16 %v2264_v31 }
 0x583   :  { %3315 = vmatpush2.bf16.msra.mxu0 %v2512_v59  ;;  %3325 = vmatprep.subr.bf16.mxu1 %v2633_v48  ;;  %v2720_v59 = vunpack.c.l.s8.bf16 %v2328_v32  ;;  %v2585_v48 = vunpack.c.h.s8.bf16 %v2257_v42 }
 0x584   :  { %3366 = vmatprep.subr.bf16.mxu0 %v2761_v51  ;;  %v2713_v51 = vunpack.c.h.s8.bf16 %v2321_v44  ;;  %v2296_v44 = vld [vmem:[#allocation13 + $0x360] sm:$0xff] }
 0x585   :  { %3276 = vmatmul.mubr.bf16.vlgmr.msra.gmra.mxu1 %v7365_v55  ;;  %v3072_v49 = vpop.f32.mrf.mxu0 }
 0x586   :  { %3317 = vmatmul.mubr.bf16.vlgmr.msra.gmra.mxu0 %v7284_v22  ;;  %v7390_v12 = vadd.f32 %v3072_v49, %v7380_v39  ;;  %3326 = vmatpush1.bf16.msra.mxu1 %v2632_v43  ;;  %v2584_v43 = vunpack.c.h.s8.bf16 %v2256_v0  ;;  %v2313_v49 = vld [vmem:[#allocation13 + $0x3e8] sm:$0xff] }
 0x587   :  { %3357 = vmatprep.mubr.bf16.mxu1 %v7309_v35  ;;  %3367 = vmatpush1.bf16.msra.mxu0 %v2760_v45  ;;  %v3074_v11 = vpop.f32.mrf.mxu0  ;;  %v2712_v45 = vunpack.c.h.s8.bf16 %v2320_v47 }
 0x588   :  { %3398 = vmatprep.mubr.bf16.mxu0 %v7339_v10  ;;  %v7395_v46 = vadd.f32 %v3074_v11, %v7385_v41  ;;  %3327 = vmatprep.subr.bf16.mxu1 %v2625_v56  ;;  %v2736_v41 = vunpack.c.l.s8.bf16 %v2336_v54  ;;  %v2577_v56 = vunpack.c.l.s8.bf16 %v2257_v42  ;;  %v2697_v11 = vunpack.c.h.s8.bf16 %v2313_v49 }
 0x589   :  { %3368 = vmatprep.subr.bf16.mxu0 %v2753_v61  ;;  %v3076_v39 = vpop.f32.mrf.mxu0  ;;  %v2377_v61 = vld [vmem:[#allocation13 + $0x5e8] sm:$0xff]  ;;  %v2824_v54 = vunpack.c.h.s8.bf16 %v2376_v6 }
 0x58a   :  { %3328 = vmatpush1.bf16.msra.mxu1 %v2624_v63  ;;  %v2704_v63 = vunpack.c.l.s8.bf16 %v2320_v47  ;;  %v2689_v39 = vunpack.c.l.s8.bf16 %v2313_v49 }
 0x58b   :  { %3369 = vmatpush1.bf16.msra.mxu0 %v2752_v9  ;;  %v3077_v14 = vpop.f32.mrf.mxu0  ;;  %3329 = vmatprep.subr.bf16.mxu1 %v2617_v4  ;;  %v2312_v9 = vld [vmem:[#allocation13 + $0x3e0] sm:$0xff]  ;;  %v2825_v4 = vunpack.c.h.s8.bf16 %v2377_v61 }
 0x58c   :  { %3370 = vmatprep.subr.bf16.mxu0 %v2745_v5  ;;  %v2696_v5 = vunpack.c.h.s8.bf16 %v2312_v9  ;;  %v2305_v14 = vld [vmem:[#allocation13 + $0x3a8] sm:$0xff] }
 0x58d   :  { %v2681_v27 = vunpack.c.h.s8.bf16 %v2305_v14 }
 0x58e   :  { %3330 = vmatpush1.bf16.msra.mxu1 %v2616_v13  ;;  %v2817_v13 = vunpack.c.l.s8.bf16 %v2377_v61  ;;  %v2288_v61 = vld [vmem:[#allocation13 + $0x320] sm:$0xff] }
 0x58f   :  { %3371 = vmatpush1.bf16.msra.mxu0 %v2744_v15  ;;  %3331 = vmatprep.subr.bf16.mxu1 %v2609_v17  ;;  %v2369_v15 = vld [vmem:[#allocation13 + $0x5a8] sm:$0xff]  ;;  %v2688_v17 = vunpack.c.l.s8.bf16 %v2312_v9 }
 0x590   :  { %3372 = vmatprep.subr.bf16.mxu0 %v2737_v20  ;;  %v2816_v20 = vunpack.c.l.s8.bf16 %v2376_v6  ;;  %v2801_v32 = vunpack.c.l.s8.bf16 %v2369_v15 }
 0x592   :  { %3332 = vmatpush1.bf16.msra.mxu1 %v2608_v29  ;;  %v2809_v29 = vunpack.c.h.s8.bf16 %v2369_v15  ;;  %v2408_v15 = vld [vmem:[#allocation13 + $0x6e0] sm:$0xff] }
 0x593   :  { %3373 = vmatpush1.bf16.msra.mxu0 %v2736_v41  ;;  %3333 = vmatprep.subr.bf16.mxu1 %v2601_v30  ;;  %v2368_v41 = vld [vmem:[#allocation13 + $0x5a0] sm:$0xff]  ;;  %v2680_v30 = vunpack.c.h.s8.bf16 %v2304_v8 }
 0x594   :  { %3374 = vmatprep.subr.bf16.mxu0 %v2729_v19  ;;  %v2808_v31 = vunpack.c.h.s8.bf16 %v2368_v41  ;;  %v2673_v19 = vunpack.c.l.s8.bf16 %v2305_v14 }
 0x596   :  { %3334 = vmatpush1.bf16.msra.mxu1 %v2600_v34  ;;  %v2297_v34 = vld [vmem:[#allocation13 + $0x368] sm:$0xff] }
 0x597   :  { %3375 = vmatpush1.bf16.msra.mxu0 %v2728_v58  ;;  %3335 = vmatprep.subr.bf16.mxu1 %v2593_v57  ;;  %v2361_v58 = vld [vmem:[#allocation13 + $0x568] sm:$0xff]  ;;  %v2672_v57 = vunpack.c.l.s8.bf16 %v2304_v8  ;;  %v2665_v42 = vunpack.c.h.s8.bf16 %v2297_v34 }
 0x598   :  { %3376 = vmatprep.subr.bf16.mxu0 %v2721_v38  ;;  %v2800_v38 = vunpack.c.l.s8.bf16 %v2368_v41  ;;  %v2785_v47 = vunpack.c.l.s8.bf16 %v2361_v58  ;;  %v2401_v41 = vld [vmem:[#allocation13 + $0x6a8] sm:$0xff] }
 0x59a   :  { %3336 = vmatpush1.bf16.msra.mxu1 %v2592_v62  ;;  %v2793_v62 = vunpack.c.h.s8.bf16 %v2361_v58  ;;  %v2880_v58 = vunpack.c.l.s8.bf16 %v2408_v15 }
 0x59b   :  { %3377 = vmatpush1.bf16.msra.mxu0 %v2720_v59  ;;  %3337 = vmatprep.subr.bf16.mxu1 %v2585_v48  ;;  %v2360_v59 = vld [vmem:[#allocation13 + $0x560] sm:$0xff]  ;;  %v2664_v48 = vunpack.c.h.s8.bf16 %v2296_v44 }
 0x59c   :  { %3378 = vmatprep.subr.bf16.mxu0 %v2713_v51  ;;  %v2792_v0 = vunpack.c.h.s8.bf16 %v2360_v59  ;;  %v2657_v51 = vunpack.c.l.s8.bf16 %v2297_v34 }
 0x59e   :  { %3338 = vmatpush1.bf16.msra.mxu1 %v2584_v43  ;;  %v2289_v43 = vld [vmem:[#allocation13 + $0x328] sm:$0xff] }
 0x59f   :  { %3379 = vmatpush1.bf16.msra.mxu0 %v2712_v45  ;;  %3339 = vmatprep.subr.bf16.mxu1 %v2577_v56  ;;  %v2353_v45 = vld [vmem:[#allocation13 + $0x528] sm:$0xff]  ;;  %v2656_v56 = vunpack.c.l.s8.bf16 %v2296_v44  ;;  %v2649_v49 = vunpack.c.h.s8.bf16 %v2289_v43  ;;  %v2873_v44 = vunpack.c.h.s8.bf16 %v2401_v41 }
 0x5a0   :  { %3380 = vmatprep.subr.bf16.mxu0 %v2705_v1  ;;  %v2784_v1 = vunpack.c.l.s8.bf16 %v2360_v59  ;;  %v2769_v6 = vunpack.c.l.s8.bf16 %v2353_v45 }
 0x5a2   :  { %3340 = vmatpush1.bf16.msra.mxu1 %v2576_v28  ;;  %v2777_v28 = vunpack.c.h.s8.bf16 %v2353_v45 }
 0x5a3   :  { %3381 = vmatpush1.bf16.msra.mxu0 %v2704_v63  ;;  %3341 = vmatprep.subr.bf16.mxu1 %v2697_v11  ;;  %v2352_v63 = vld [vmem:[#allocation13 + $0x520] sm:$0xff]  ;;  %v2648_v11 = vunpack.c.h.s8.bf16 %v2288_v61 }
 0x5a4   :  { %3382 = vmatprep.subr.bf16.mxu0 %v2825_v4  ;;  %v2776_v9 = vunpack.c.h.s8.bf16 %v2352_v63  ;;  %v2641_v4 = vunpack.c.l.s8.bf16 %v2289_v43 }
 0x5a6   :  { %3342 = vmatpush2.bf16.msra.mxu1 %v2696_v5  ;;  %v2409_v5 = vld [vmem:[#allocation13 + $0x6e8] sm:$0xff] }
 0x5a7   :  { %3383 = vmatpush2.bf16.msra.mxu0 %v2824_v54  ;;  %3343 = vmatprep.subr.bf16.mxu1 %v2689_v39  ;;  %v2219_v54 = vld [vmem:[#allocation13 + $0xf8] sm:$0xff]  ;;  %v2640_v39 = vunpack.c.l.s8.bf16 %v2288_v61  ;;  %v2889_v14 = vunpack.c.h.s8.bf16 %v2409_v5 }
 0x5a8   :  { %3384 = vmatprep.subr.bf16.mxu0 %v2817_v13  ;;  %v2768_v13 = vunpack.c.l.s8.bf16 %v2352_v63  ;;  %v2203_v61 = vld [vmem:[#allocation13 + $0x78] sm:$0xff] }
 0x5aa   :  { %3344 = vmatpush2.bf16.msra.mxu1 %v2688_v17  ;;  %v2507_v17 = vunpack.c.h.s8.bf16 %v2219_v54 }
 0x5ab   :  { %3385 = vmatpush2.bf16.msra.mxu0 %v2816_v20  ;;  %3345 = vmatprep.subr.bf16.mxu1 %v2681_v27  ;;  %v2218_v20 = vld [vmem:[#allocation13 + $0xf0] sm:$0xff]  ;;  %v2888_v27 = vunpack.c.h.s8.bf16 %v2408_v15 }
 0x5ac   :  { %3386 = vmatprep.subr.bf16.mxu0 %v2809_v29  ;;  %v2506_v8 = vunpack.c.h.s8.bf16 %v2218_v20  ;;  %v2881_v29 = vunpack.c.l.s8.bf16 %v2409_v5 }
 0x5ae   :  { %3346 = vmatpush2.bf16.msra.mxu1 %v2680_v30 }
 0x5af   :  { %3387 = vmatpush2.bf16.msra.mxu0 %v2808_v31  ;;  %3347 = vmatprep.subr.bf16.mxu1 %v2673_v19  ;;  %v2499_v19 = vunpack.c.l.s8.bf16 %v2219_v54 }
 0x5b0   :  { %3388 = vmatprep.subr.bf16.mxu0 %v2801_v32  ;;  %v2211_v32 = vld [vmem:[#allocation13 + $0xb8] sm:$0xff] }
 0x5b2   :  { %3348 = vmatpush2.bf16.msra.mxu1 %v2672_v57 }
 0x5b3   :  { %3389 = vmatpush2.bf16.msra.mxu0 %v2800_v38  ;;  %3349 = vmatprep.subr.bf16.mxu1 %v2665_v42  ;;  %v2498_v42 = vunpack.c.l.s8.bf16 %v2218_v20 }
 0x5b4   :  { %3390 = vmatprep.subr.bf16.mxu0 %v2793_v62  ;;  %v2400_v62 = vld [vmem:[#allocation13 + $0x6a0] sm:$0xff] }
 0x5b6   :  { %3350 = vmatpush2.bf16.msra.mxu1 %v2664_v48  ;;  %v2491_v48 = vunpack.c.h.s8.bf16 %v2211_v32 }
 0x5b7   :  { %3391 = vmatpush2.bf16.msra.mxu0 %v2792_v0  ;;  %3351 = vmatprep.subr.bf16.mxu1 %v2657_v51 }
 0x5b8   :  { %3392 = vmatprep.subr.bf16.mxu0 %v2785_v47  ;;  %v2872_v47 = vunpack.c.h.s8.bf16 %v2400_v62 }
 0x5ba   :  { %3352 = vmatpush2.bf16.msra.mxu1 %v2656_v56 }
 0x5bb   :  { %3393 = vmatpush2.bf16.msra.mxu0 %v2784_v1  ;;  %3353 = vmatprep.subr.bf16.mxu1 %v2649_v49  ;;  %v2865_v1 = vunpack.c.l.s8.bf16 %v2401_v41  ;;  %v2483_v49 = vunpack.c.l.s8.bf16 %v2211_v32 }
 0x5bc   :  { %3394 = vmatprep.subr.bf16.mxu0 %v2777_v28 }
 0x5be   :  { %3354 = vmatpush2.bf16.msra.mxu1 %v2648_v11  ;;  %v2392_v11 = vld [vmem:[#allocation13 + $0x660] sm:$0xff] }
 0x5bf   :  { %3395 = vmatpush2.bf16.msra.mxu0 %v2776_v9  ;;  %3355 = vmatprep.subr.bf16.mxu1 %v2641_v4  ;;  %v2475_v9 = vunpack.c.h.s8.bf16 %v2203_v61  ;;  %v2202_v4 = vld [vmem:[#allocation13 + $0x70] sm:$0xff]  ;;  %v2848_v15 = vunpack.c.l.s8.bf16 %v2392_v11 }
 0x5c0   :  { %3396 = vmatprep.subr.bf16.mxu0 %v2769_v6  ;;  %v2856_v6 = vunpack.c.h.s8.bf16 %v2392_v11  ;;  %v2474_v5 = vunpack.c.h.s8.bf16 %v2202_v4 }
 0x5c2   :  { %3356 = vmatpush2.bf16.msra.mxu1 %v2640_v39  ;;  %v2467_v39 = vunpack.c.l.s8.bf16 %v2203_v61 }
 0x5c3   :  { %3397 = vmatpush2.bf16.msra.mxu0 %v2768_v13  ;;  %3407 = vmatprep.subr.bf16.mxu1 %v2889_v14  ;;  %v2385_v13 = vld [vmem:[#allocation13 + $0x628] sm:$0xff]  ;;  %v2195_v14 = vld [vmem:[#allocation13 + $0x38] sm:$0xff] }
 0x5c4   :  { %3448 = vmatprep.subr.bf16.mxu0 %v2507_v17  ;;  %v2466_v17 = vunpack.c.l.s8.bf16 %v2202_v4  ;;  %v2841_v20 = vunpack.c.h.s8.bf16 %v2385_v13  ;;  %v2451_v32 = vunpack.c.l.s8.bf16 %v2195_v14 }
 0x5c5   :  { %v7397_v30 = vpop.f32.mrf.mxu0  ;;  %3358 = vmatmul.mubr.bf16.vlgmr.msra.gmra.mxu1 %v7311_v37  ;;  %v3113_v31 = vpop.f32.mrf.mxu1 }
 0x5c6   :  { %3399 = vmatmul.mubr.bf16.vlgmr.msra.gmra.mxu0 %v7341_v40  ;;  %v7402_v34 = vadd.f32 %v3113_v31, %v7390_v12  ;;  %3408 = vmatpush1.bf16.msra.mxu1 %v2888_v27  ;;  %v2210_v12 = vld [vmem:[#allocation13 + $0xb0] sm:$0xff]  ;;  %v2384_v27 = vld [vmem:[#allocation13 + $0x620] sm:$0xff] }
 0x5c7   :  { %3439 = vmatprep.mubr.bf16.mxu1 %v7363_v33  ;;  %3449 = vmatpush1.bf16.msra.mxu0 %v2506_v8  ;;  %v7405_v57 = vpop.f32.mrf.mxu0  ;;  %v3115_v38 = vpop.f32.mrf.mxu1  ;;  %v2490_v56 = vunpack.c.h.s8.bf16 %v2210_v12  ;;  %v2482_v28 = vunpack.c.l.s8.bf16 %v2210_v12  ;;  %v2459_v8 = vunpack.c.h.s8.bf16 %v2195_v14  ;;  %v2840_v41 = vunpack.c.h.s8.bf16 %v2384_v27 }
 0x5c8   :  { %3480 = vmatprep.mubr.bf16.mxu0 %v7282_v18  ;;  %v7409_v59 = vadd.f32 %v3115_v38, %v7395_v46  ;;  %3409 = vmatprep.subr.bf16.mxu1 %v2881_v29  ;;  %v2393_v18 = vld [vmem:[#allocation13 + $0x668] sm:$0xff]  ;;  %v2864_v46 = vunpack.c.l.s8.bf16 %v2400_v62  ;;  %v2194_v29 = vld [vmem:[#allocation13 + $0x30] sm:$0xff]  ;;  %v2251_v38 = vld [vmem:[#allocation13 + $0x1f8] sm:$0xff] }
 0x5c9   :  { %v3158_v0 = vpop.f32.mrf.mxu0  ;;  %3450 = vmatprep.subr.bf16.mxu0 %v2499_v19  ;;  %v3117_v51 = vpop.f32.mrf.mxu1  ;;  %v2857_v63 = vunpack.c.h.s8.bf16 %v2393_v18  ;;  %v2849_v54 = vunpack.c.l.s8.bf16 %v2393_v18  ;;  %v2458_v31 = vunpack.c.h.s8.bf16 %v2194_v29  ;;  %v2833_v19 = vunpack.c.l.s8.bf16 %v2385_v13 }
 0x5ca   :  { %3410 = vmatpush1.bf16.msra.mxu1 %v2880_v58  ;;  %v2441_v58 = vld [vmem:[#allocation13 + $0x7e8] sm:$0xff]  ;;  %v2571_v12 = vunpack.c.h.s8.bf16 %v2251_v38  ;;  %v2250_v0 = vld [vmem:[#allocation13 + $0x1f0] sm:$0xff] }
 0x5cb   :  { %3451 = vmatpush1.bf16.msra.mxu0 %v2498_v42  ;;  %v3159_v43 = vpop.f32.mrf.mxu0  ;;  %v3118_v45 = vpop.f32.mrf.mxu1  ;;  %3411 = vmatprep.subr.bf16.mxu1 %v2873_v44  ;;  %v2832_v42 = vunpack.c.l.s8.bf16 %v2384_v27  ;;  %v2450_v44 = vunpack.c.l.s8.bf16 %v2194_v29  ;;  %v2953_v62 = vunpack.c.h.s8.bf16 %v2441_v58  ;;  %v2562_v18 = vunpack.c.l.s8.bf16 %v2250_v0 }
 0x5cc   :  { %3452 = vmatprep.subr.bf16.mxu0 %v2491_v48  ;;  %v2440_v48 = vld [vmem:[#allocation13 + $0x7e0] sm:$0xff]  ;;  %v2945_v43 = vunpack.c.l.s8.bf16 %v2441_v58  ;;  %v2563_v45 = vunpack.c.l.s8.bf16 %v2251_v38 }
 0x5cd   :  { %v2952_v51 = vunpack.c.h.s8.bf16 %v2440_v48 }
 0x5ce   :  { %3412 = vmatpush1.bf16.msra.mxu1 %v2872_v47  ;;  %v2570_v47 = vunpack.c.h.s8.bf16 %v2250_v0 }
 0x5cf   :  { %3453 = vmatpush1.bf16.msra.mxu0 %v2490_v56  ;;  %3413 = vmatprep.subr.bf16.mxu1 %v2865_v1  ;;  %v2433_v56 = vld [vmem:[#allocation13 + $0x7a8] sm:$0xff]  ;;  %v2243_v1 = vld [vmem:[#allocation13 + $0x1b8] sm:$0xff] }
 0x5d0   :  { %3454 = vmatprep.subr.bf16.mxu0 %v2483_v49  ;;  %v2944_v49 = vunpack.c.l.s8.bf16 %v2440_v48  ;;  %v2937_v61 = vunpack.c.h.s8.bf16 %v2433_v56  ;;  %v2929_v4 = vunpack.c.l.s8.bf16 %v2433_v56 }
 0x5d2   :  { %3414 = vmatpush1.bf16.msra.mxu1 %v2864_v46  ;;  %v2432_v46 = vld [vmem:[#allocation13 + $0x7a0] sm:$0xff] }
 0x5d3   :  { %3455 = vmatpush1.bf16.msra.mxu0 %v2482_v28  ;;  %3415 = vmatprep.subr.bf16.mxu1 %v2857_v63  ;;  %v2555_v28 = vunpack.c.h.s8.bf16 %v2243_v1  ;;  %v2242_v63 = vld [vmem:[#allocation13 + $0x1b0] sm:$0xff]  ;;  %v2936_v11 = vunpack.c.h.s8.bf16 %v2432_v46 }
 0x5d4   :  { %3456 = vmatprep.subr.bf16.mxu0 %v2475_v9  ;;  %v2554_v9 = vunpack.c.h.s8.bf16 %v2242_v63  ;;  %v2546_v13 = vunpack.c.l.s8.bf16 %v2242_v63 }
 0x5d6   :  { %3416 = vmatpush1.bf16.msra.mxu1 %v2856_v6  ;;  %v2547_v6 = vunpack.c.l.s8.bf16 %v2243_v1 }
 0x5d7   :  { %3457 = vmatpush1.bf16.msra.mxu0 %v2474_v5  ;;  %3417 = vmatprep.subr.bf16.mxu1 %v2849_v54  ;;  %v2425_v5 = vld [vmem:[#allocation13 + $0x768] sm:$0xff]  ;;  %v2235_v54 = vld [vmem:[#allocation13 + $0x178] sm:$0xff] }
 0x5d8   :  { %3458 = vmatprep.subr.bf16.mxu0 %v2467_v39  ;;  %v2928_v39 = vunpack.c.l.s8.bf16 %v2432_v46  ;;  %v2921_v14 = vunpack.c.h.s8.bf16 %v2425_v5  ;;  %v2913_v29 = vunpack.c.l.s8.bf16 %v2425_v5  ;;  %v2339_v5 = vld [vmem:[#allocation13 + $0x4b8] sm:$0xff] }
 0x5da   :  { %3418 = vmatpush1.bf16.msra.mxu1 %v2848_v15  ;;  %v2424_v15 = vld [vmem:[#allocation13 + $0x760] sm:$0xff] }
 0x5db   :  { %3459 = vmatpush1.bf16.msra.mxu0 %v2466_v17  ;;  %3419 = vmatprep.subr.bf16.mxu1 %v2841_v20  ;;  %v2539_v17 = vunpack.c.h.s8.bf16 %v2235_v54  ;;  %v2234_v20 = vld [vmem:[#allocation13 + $0x170] sm:$0xff]  ;;  %v2920_v27 = vunpack.c.h.s8.bf16 %v2424_v15 }
 0x5dc   :  { %3460 = vmatprep.subr.bf16.mxu0 %v2459_v8  ;;  %v2538_v8 = vunpack.c.h.s8.bf16 %v2234_v20  ;;  %v2530_v58 = vunpack.c.l.s8.bf16 %v2234_v20  ;;  %v2274_v20 = vld [vmem:[#allocation13 + $0x2b0] sm:$0xff] }
 0x5de   :  { %3420 = vmatpush1.bf16.msra.mxu1 %v2840_v41  ;;  %v2531_v41 = vunpack.c.l.s8.bf16 %v2235_v54 }
 0x5df   :  { %3461 = vmatpush1.bf16.msra.mxu0 %v2458_v31  ;;  %3421 = vmatprep.subr.bf16.mxu1 %v2833_v19  ;;  %v2417_v31 = vld [vmem:[#allocation13 + $0x728] sm:$0xff]  ;;  %v2227_v19 = vld [vmem:[#allocation13 + $0x138] sm:$0xff] }
 0x5e0   :  { %3462 = vmatprep.subr.bf16.mxu0 %v2451_v32  ;;  %v2912_v32 = vunpack.c.l.s8.bf16 %v2424_v15  ;;  %v2905_v38 = vunpack.c.h.s8.bf16 %v2417_v31  ;;  %v2897_v0 = vunpack.c.l.s8.bf16 %v2417_v31 }
 0x5e2   :  { %3422 = vmatpush1.bf16.msra.mxu1 %v2832_v42  ;;  %v2416_v42 = vld [vmem:[#allocation13 + $0x720] sm:$0xff] }
 0x5e3   :  { %3463 = vmatpush1.bf16.msra.mxu0 %v2450_v44  ;;  %3423 = vmatprep.subr.bf16.mxu1 %v2953_v62  ;;  %v2523_v44 = vunpack.c.h.s8.bf16 %v2227_v19  ;;  %v2226_v62 = vld [vmem:[#allocation13 + $0x130] sm:$0xff]  ;;  %v2904_v48 = vunpack.c.h.s8.bf16 %v2416_v42 }
 0x5e4   :  { %3464 = vmatprep.subr.bf16.mxu0 %v2571_v12  ;;  %v2522_v12 = vunpack.c.h.s8.bf16 %v2226_v62  ;;  %v2514_v56 = vunpack.c.l.s8.bf16 %v2226_v62 }
 0x5e6   :  { %3424 = vmatpush2.bf16.msra.mxu1 %v2952_v51  ;;  %v2515_v51 = vunpack.c.l.s8.bf16 %v2227_v19 }
 0x5e7   :  { %3465 = vmatpush2.bf16.msra.mxu0 %v2570_v47  ;;  %3425 = vmatprep.subr.bf16.mxu1 %v2945_v43  ;;  %v2283_v47 = vld [vmem:[#allocation13 + $0x2f8] sm:$0xff] }
 0x5e8   :  { %3466 = vmatprep.subr.bf16.mxu0 %v2563_v45  ;;  %v2347_v43 = vld [vmem:[#allocation13 + $0x4f8] sm:$0xff]  ;;  %v2896_v45 = vunpack.c.l.s8.bf16 %v2416_v42  ;;  %v2635_v1 = vunpack.c.h.s8.bf16 %v2283_v47  ;;  %v2627_v63 = vunpack.c.l.s8.bf16 %v2283_v47 }
 0x5e9   :  { %v2267_v42 = vld [vmem:[#allocation13 + $0x278] sm:$0xff] }
 0x5ea   :  { %3426 = vmatpush2.bf16.msra.mxu1 %v2944_v49  ;;  %v2282_v49 = vld [vmem:[#allocation13 + $0x2f0] sm:$0xff] }
 0x5eb   :  { %3467 = vmatpush2.bf16.msra.mxu0 %v2562_v18  ;;  %3427 = vmatprep.subr.bf16.mxu1 %v2937_v61  ;;  %v2763_v18 = vunpack.c.h.s8.bf16 %v2347_v43  ;;  %v2346_v61 = vld [vmem:[#allocation13 + $0x4f0] sm:$0xff]  ;;  %v2634_v46 = vunpack.c.h.s8.bf16 %v2282_v49 }
 0x5ec   :  { %3468 = vmatprep.subr.bf16.mxu0 %v2555_v28  ;;  %v2762_v28 = vunpack.c.h.s8.bf16 %v2346_v61  ;;  %v2754_v15 = vunpack.c.l.s8.bf16 %v2346_v61 }
 0x5ee   :  { %3428 = vmatpush2.bf16.msra.mxu1 %v2936_v11  ;;  %v2275_v11 = vld [vmem:[#allocation13 + $0x2b8] sm:$0xff] }
 0x5ef   :  { %3469 = vmatpush2.bf16.msra.mxu0 %v2554_v9  ;;  %3429 = vmatprep.subr.bf16.mxu1 %v2929_v4 }
 0x5f0   :  { %3470 = vmatprep.subr.bf16.mxu0 %v2547_v6  ;;  %v2755_v6 = vunpack.c.l.s8.bf16 %v2347_v43 }
 0x5f2   :  { %3430 = vmatpush2.bf16.msra.mxu1 %v2928_v39  ;;  %v2626_v39 = vunpack.c.l.s8.bf16 %v2282_v49  ;;  %v2323_v49 = vld [vmem:[#allocation13 + $0x438] sm:$0xff] }
 0x5f3   :  { %3471 = vmatpush2.bf16.msra.mxu0 %v2546_v13  ;;  %3431 = vmatprep.subr.bf16.mxu1 %v2921_v14 }
 0x5f4   :  { %3472 = vmatprep.subr.bf16.mxu0 %v2539_v17  ;;  %v2619_v17 = vunpack.c.h.s8.bf16 %v2275_v11 }
 0x5f6   :  { %3432 = vmatpush2.bf16.msra.mxu1 %v2920_v27 }
 0x5f7   :  { %3473 = vmatpush2.bf16.msra.mxu0 %v2538_v8  ;;  %3433 = vmatprep.subr.bf16.mxu1 %v2913_v29  ;;  %v2338_v29 = vld [vmem:[#allocation13 + $0x4b0] sm:$0xff] }
 0x5f8   :  { %3474 = vmatprep.subr.bf16.mxu0 %v2531_v41  ;;  %v2738_v62 = vunpack.c.l.s8.bf16 %v2338_v29 }
 0x5fa   :  { %3434 = vmatpush2.bf16.msra.mxu1 %v2912_v32 }
 0x5fb   :  { %3475 = vmatpush2.bf16.msra.mxu0 %v2530_v58  ;;  %3435 = vmatprep.subr.bf16.mxu1 %v2905_v38  ;;  %v2746_v58 = vunpack.c.h.s8.bf16 %v2338_v29  ;;  %v2611_v38 = vunpack.c.l.s8.bf16 %v2275_v11  ;;  %v2322_v11 = vld [vmem:[#allocation13 + $0x430] sm:$0xff] }
 0x5fc   :  { %3476 = vmatprep.subr.bf16.mxu0 %v2523_v44  ;;  %v2610_v44 = vunpack.c.l.s8.bf16 %v2274_v20 }
 0x5fe   :  { %3436 = vmatpush2.bf16.msra.mxu1 %v2904_v48  ;;  %v2603_v48 = vunpack.c.h.s8.bf16 %v2267_v42 }
 0x5ff   :  { %3477 = vmatpush2.bf16.msra.mxu0 %v2522_v12  ;;  %3437 = vmatprep.subr.bf16.mxu1 %v2897_v0  ;;  %v2266_v12 = vld [vmem:[#allocation13 + $0x270] sm:$0xff] }
 0x600   :  { %3478 = vmatprep.subr.bf16.mxu0 %v2515_v51  ;;  %v2330_v51 = vld [vmem:[#allocation13 + $0x470] sm:$0xff]  ;;  %v2602_v47 = vunpack.c.h.s8.bf16 %v2266_v12 }
 0x601   :  { %v2730_v43 = vunpack.c.h.s8.bf16 %v2330_v51  ;;  %v2722_v61 = vunpack.c.l.s8.bf16 %v2330_v51  ;;  %v2363_v51 = vld [vmem:[#allocation13 + $0x578] sm:$0xff] }
 0x602   :  { %3438 = vmatpush2.bf16.msra.mxu1 %v2896_v45  ;;  %v2595_v45 = vunpack.c.l.s8.bf16 %v2267_v42 }
 0x603   :  { %3479 = vmatpush2.bf16.msra.mxu0 %v2514_v56  ;;  %3489 = vmatprep.subr.bf16.mxu1 %v2635_v1  ;;  %v2259_v1 = vld [vmem:[#allocation13 + $0x238] sm:$0xff] }
 0x604   :  { %3530 = vmatprep.subr.bf16.mxu0 %v2763_v18  ;;  %v2594_v18 = vunpack.c.l.s8.bf16 %v2266_v12 }
 0x605   :  { %v3195_v9 = vpop.f32.mrf.mxu1  ;;  %v3236_v4 = vpop.f32.mrf.mxu0  ;;  %3440 = vmatmul.mubr.bf16.vlgmr.msra.gmra.mxu1 %v7365_v55 }
 0x606   :  { %v3196_v54 = vadd.f32 %v3195_v9, %v7397_v30  ;;  %3481 = vmatmul.mubr.bf16.vlgmr.msra.gmra.mxu0 %v7284_v22  ;;  %3490 = vmatpush1.bf16.msra.mxu1 %v2634_v46  ;;  %v2747_v30 = vunpack.c.h.s8.bf16 %v2339_v5  ;;  %v2587_v46 = vunpack.c.h.s8.bf16 %v2259_v1 }
 0x607   :  { %3521 = vmatprep.mubr.bf16.mxu1 %v7309_v35  ;;  %3531 = vmatpush1.bf16.msra.mxu0 %v2762_v28  ;;  %v3197_v13 = vpop.f32.mrf.mxu1  ;;  %v3238_v14 = vpop.f32.mrf.mxu0  ;;  %v2618_v35 = vunpack.c.h.s8.bf16 %v2274_v20  ;;  %v2258_v28 = vld [vmem:[#allocation13 + $0x230] sm:$0xff] }
 0x608   :  { %v7415_v27 = vadd.f32 %v3236_v4, %v3196_v54  ;;  %3562 = vmatprep.mubr.bf16.mxu0 %v7339_v10  ;;  %v3198_v8 = vadd.f32 %v3197_v13, %v7405_v57  ;;  %3491 = vmatprep.subr.bf16.mxu1 %v2627_v63  ;;  %v2739_v10 = vunpack.c.l.s8.bf16 %v2339_v5  ;;  %v2331_v57 = vld [vmem:[#allocation13 + $0x478] sm:$0xff]  ;;  %v2715_v63 = vunpack.c.h.s8.bf16 %v2323_v49 }
 0x609   :  { %v3199_v22 = vpop.f32.mrf.mxu1  ;;  %v3240_v41 = vpop.f32.mrf.mxu0  ;;  %3532 = vmatprep.subr.bf16.mxu0 %v2755_v6  ;;  %v2731_v0 = vunpack.c.h.s8.bf16 %v2331_v57  ;;  %v2723_v56 = vunpack.c.l.s8.bf16 %v2331_v57  ;;  %v2586_v9 = vunpack.c.h.s8.bf16 %v2258_v28  ;;  %v2714_v4 = vunpack.c.h.s8.bf16 %v2322_v11  ;;  %v2315_v54 = vld [vmem:[#allocation13 + $0x3f8] sm:$0xff]  ;;  %v2370_v57 = vld [vmem:[#allocation13 + $0x5b0] sm:$0xff] }
 0x60a   :  { %v7419_v31 = vadd.f32 %v3238_v14, %v3198_v8  ;;  %3492 = vmatpush1.bf16.msra.mxu1 %v2626_v39  ;;  %v2579_v6 = vunpack.c.l.s8.bf16 %v2259_v1  ;;  %v2707_v5 = vunpack.c.l.s8.bf16 %v2323_v49  ;;  %v2379_v39 = vld [vmem:[#allocation13 + $0x5f8] sm:$0xff]  ;;  %v2578_v13 = vunpack.c.l.s8.bf16 %v2258_v28  ;;  %v2378_v8 = vld [vmem:[#allocation13 + $0x5f0] sm:$0xff] }
 0x60b   :  { %3533 = vmatpush1.bf16.msra.mxu0 %v2754_v15  ;;  %v3200_v19 = vpop.f32.mrf.mxu1  ;;  %v3241_v32 = vpop.f32.mrf.mxu0  ;;  %3493 = vmatprep.subr.bf16.mxu1 %v2619_v17  ;;  %v2706_v14 = vunpack.c.l.s8.bf16 %v2322_v11  ;;  %v2699_v15 = vunpack.c.h.s8.bf16 %v2315_v54  ;;  %v2314_v17 = vld [vmem:[#allocation13 + $0x3f0] sm:$0xff]  ;;  %v2827_v20 = vunpack.c.h.s8.bf16 %v2379_v39  ;;  %v2826_v29 = vunpack.c.h.s8.bf16 %v2378_v8  ;;  %v2355_v11 = vld [vmem:[#allocation13 + $0x538] sm:$0xff] }
 0x60c   :  { %3534 = vmatprep.subr.bf16.mxu0 %v2747_v30  ;;  %v2698_v30 = vunpack.c.h.s8.bf16 %v2314_v17  ;;  %v2691_v22 = vunpack.c.l.s8.bf16 %v2315_v54  ;;  %v2819_v41 = vunpack.c.l.s8.bf16 %v2379_v39  ;;  %v2371_v19 = vld [vmem:[#allocation13 + $0x5b8] sm:$0xff]  ;;  %v2690_v32 = vunpack.c.l.s8.bf16 %v2314_v17  ;;  %v2362_v49 = vld [vmem:[#allocation13 + $0x570] sm:$0xff] }
 0x60d   :  { %v2811_v42 = vunpack.c.h.s8.bf16 %v2371_v19  ;;  %v2803_v12 = vunpack.c.l.s8.bf16 %v2371_v19  ;;  %v2795_v1 = vunpack.c.h.s8.bf16 %v2363_v51  ;;  %v2787_v28 = vunpack.c.l.s8.bf16 %v2363_v51  ;;  %v2354_v39 = vld [vmem:[#allocation13 + $0x530] sm:$0xff] }
 0x60e   :  { %3494 = vmatpush1.bf16.msra.mxu1 %v2618_v35  ;;  %v2307_v35 = vld [vmem:[#allocation13 + $0x3b8] sm:$0xff]  ;;  %v2779_v54 = vunpack.c.h.s8.bf16 %v2355_v11  ;;  %v2771_v17 = vunpack.c.l.s8.bf16 %v2355_v11  ;;  %v3752_v19 = vld [vmem:[#allocation17 + $0xc0] sm:$0xff] }
 0x60f   :  { %3535 = vmatpush1.bf16.msra.mxu0 %v2746_v58  ;;  %3495 = vmatprep.subr.bf16.mxu1 %v2611_v38  ;;  %v2818_v58 = vunpack.c.l.s8.bf16 %v2378_v8  ;;  %v2683_v38 = vunpack.c.h.s8.bf16 %v2307_v35  ;;  %v3753_v8 = vld [vmem:[#allocation17 + $0xc8] sm:$0xff]  ;;  %v3968_v51 = vunpack.c.l.s8.bf16 %v3752_v19 }
 0x610   :  { %3536 = vmatprep.subr.bf16.mxu0 %v2739_v10  ;;  %v2306_v10 = vld [vmem:[#allocation13 + $0x3b0] sm:$0xff] }
 0x612   :  { %3496 = vmatpush1.bf16.msra.mxu1 %v2610_v44  ;;  %v2682_v44 = vunpack.c.h.s8.bf16 %v2306_v10 }
 0x613   :  { %3537 = vmatpush1.bf16.msra.mxu0 %v2738_v62  ;;  %3497 = vmatprep.subr.bf16.mxu1 %v2603_v48  ;;  %v2810_v62 = vunpack.c.h.s8.bf16 %v2370_v57  ;;  %v2675_v48 = vunpack.c.l.s8.bf16 %v2307_v35  ;;  %v3977_v35 = vunpack.c.h.s8.bf16 %v3753_v8 }
 0x614   :  { %3538 = vmatprep.subr.bf16.mxu0 %v2731_v0  ;;  %v2299_v0 = vld [vmem:[#allocation13 + $0x378] sm:$0xff] }
 0x616   :  { %3498 = vmatpush1.bf16.msra.mxu1 %v2602_v47  ;;  %v2674_v47 = vunpack.c.l.s8.bf16 %v2306_v10  ;;  %v3969_v10 = vunpack.c.l.s8.bf16 %v3753_v8 }
 0x617   :  { %3539 = vmatpush1.bf16.msra.mxu0 %v2730_v43  ;;  %3499 = vmatprep.subr.bf16.mxu1 %v2595_v45  ;;  %v2802_v43 = vunpack.c.l.s8.bf16 %v2370_v57  ;;  %v2667_v45 = vunpack.c.h.s8.bf16 %v2299_v0 }
 0x618   :  { %3540 = vmatprep.subr.bf16.mxu0 %v2723_v56  ;;  %v2298_v56 = vld [vmem:[#allocation13 + $0x370] sm:$0xff] }
 0x61a   :  { %3500 = vmatpush1.bf16.msra.mxu1 %v2594_v18  ;;  %v2666_v18 = vunpack.c.h.s8.bf16 %v2298_v56 }
 0x61b   :  { %3541 = vmatpush1.bf16.msra.mxu0 %v2722_v61  ;;  %3501 = vmatprep.subr.bf16.mxu1 %v2587_v46  ;;  %v2794_v61 = vunpack.c.h.s8.bf16 %v2362_v49  ;;  %v2659_v46 = vunpack.c.l.s8.bf16 %v2299_v0 }
 0x61c   :  { %3542 = vmatprep.subr.bf16.mxu0 %v2715_v63  ;;  %v2291_v63 = vld [vmem:[#allocation13 + $0x338] sm:$0xff] }
 0x61e   :  { %3502 = vmatpush1.bf16.msra.mxu1 %v2586_v9  ;;  %v2658_v9 = vunpack.c.l.s8.bf16 %v2298_v56  ;;  %v3744_v56 = vld [vmem:[#allocation17 + $0x80] sm:$0xff] }
 0x61f   :  { %3543 = vmatpush1.bf16.msra.mxu0 %v2714_v4  ;;  %3503 = vmatprep.subr.bf16.mxu1 %v2579_v6  ;;  %v2786_v4 = vunpack.c.l.s8.bf16 %v2362_v49  ;;  %v2651_v6 = vunpack.c.h.s8.bf16 %v2291_v63 }
 0x620   :  { %3544 = vmatprep.subr.bf16.mxu0 %v2707_v5  ;;  %v2290_v5 = vld [vmem:[#allocation13 + $0x330] sm:$0xff] }
 0x622   :  { %3504 = vmatpush1.bf16.msra.mxu1 %v2578_v13  ;;  %v2650_v13 = vunpack.c.h.s8.bf16 %v2290_v5 }
 0x623   :  { %3545 = vmatpush1.bf16.msra.mxu0 %v2706_v14  ;;  %3505 = vmatprep.subr.bf16.mxu1 %v2699_v15  ;;  %v2778_v14 = vunpack.c.h.s8.bf16 %v2354_v39  ;;  %v2643_v15 = vunpack.c.l.s8.bf16 %v2291_v63  ;;  %v3737_v63 = vld [vmem:[#allocation17 + $0x48] sm:$0xff] }
 0x624   :  { %3546 = vmatprep.subr.bf16.mxu0 %v2827_v20  ;;  %v2411_v20 = vld [vmem:[#allocation13 + $0x6f8] sm:$0xff] }
 0x626   :  { %3506 = vmatpush2.bf16.msra.mxu1 %v2698_v30  ;;  %v2642_v30 = vunpack.c.l.s8.bf16 %v2290_v5  ;;  %v3945_v5 = vunpack.c.h.s8.bf16 %v3737_v63 }
 0x627   :  { %3547 = vmatpush2.bf16.msra.mxu0 %v2826_v29  ;;  %3507 = vmatprep.subr.bf16.mxu1 %v2691_v22  ;;  %v2770_v29 = vunpack.c.l.s8.bf16 %v2354_v39  ;;  %v2891_v22 = vunpack.c.h.s8.bf16 %v2411_v20 }
 0x628   :  { %3548 = vmatprep.subr.bf16.mxu0 %v2819_v41  ;;  %v2410_v41 = vld [vmem:[#allocation13 + $0x6f0] sm:$0xff] }
 0x62a   :  { %3508 = vmatpush2.bf16.msra.mxu1 %v2690_v32  ;;  %v2890_v32 = vunpack.c.h.s8.bf16 %v2410_v41 }
 0x62b   :  { %3549 = vmatpush2.bf16.msra.mxu0 %v2818_v58  ;;  %3509 = vmatprep.subr.bf16.mxu1 %v2683_v38  ;;  %v3976_v58 = vunpack.c.h.s8.bf16 %v3752_v19  ;;  %v2883_v38 = vunpack.c.l.s8.bf16 %v2411_v20  ;;  %v3729_v20 = vld [vmem:[#allocation17 + $0x8] sm:$0xff] }
 0x62c   :  { %3550 = vmatprep.subr.bf16.mxu0 %v2811_v42  ;;  %v2403_v42 = vld [vmem:[#allocation13 + $0x6b8] sm:$0xff] }
 0x62e   :  { %3510 = vmatpush2.bf16.msra.mxu1 %v2682_v44  ;;  %v3745_v44 = vld [vmem:[#allocation17 + $0x88] sm:$0xff] }
 0x62f   :  { %3551 = vmatpush2.bf16.msra.mxu0 %v2810_v62  ;;  %3511 = vmatprep.subr.bf16.mxu1 %v2675_v48 }
 0x630   :  { %3552 = vmatprep.subr.bf16.mxu0 %v2803_v12  ;;  %v2882_v12 = vunpack.c.l.s8.bf16 %v2410_v41  ;;  %v3929_v41 = vunpack.c.h.s8.bf16 %v3729_v20 }
 0x632   :  { %3512 = vmatpush2.bf16.msra.mxu1 %v2674_v47  ;;  %v2875_v47 = vunpack.c.h.s8.bf16 %v2403_v42 }
 0x633   :  { %3553 = vmatpush2.bf16.msra.mxu0 %v2802_v43  ;;  %3513 = vmatprep.subr.bf16.mxu1 %v2667_v45  ;;  %v2402_v43 = vld [vmem:[#allocation13 + $0x6b0] sm:$0xff] }
 0x634   :  { %3554 = vmatprep.subr.bf16.mxu0 %v2795_v1  ;;  %v2866_v11 = vunpack.c.l.s8.bf16 %v2402_v43 }
 0x636   :  { %3514 = vmatpush2.bf16.msra.mxu1 %v2666_v18  ;;  %v3960_v18 = vunpack.c.h.s8.bf16 %v3744_v56 }
 0x637   :  { %3555 = vmatpush2.bf16.msra.mxu0 %v2794_v61  ;;  %3515 = vmatprep.subr.bf16.mxu1 %v2659_v46  ;;  %v2867_v61 = vunpack.c.l.s8.bf16 %v2403_v42  ;;  %v3785_v42 = vld [vmem:[#allocation17 + $0x1c8] sm:$0xff] }
 0x638   :  { %3556 = vmatprep.subr.bf16.mxu0 %v2787_v28  ;;  %v2395_v28 = vld [vmem:[#allocation13 + $0x678] sm:$0xff] }
 0x63a   :  { %3516 = vmatpush2.bf16.msra.mxu1 %v2658_v9  ;;  %v3952_v9 = vunpack.c.l.s8.bf16 %v3744_v56 }
 0x63b   :  { %3557 = vmatpush2.bf16.msra.mxu0 %v2786_v4  ;;  %3517 = vmatprep.subr.bf16.mxu1 %v2651_v6  ;;  %v2859_v4 = vunpack.c.h.s8.bf16 %v2395_v28  ;;  %v2394_v6 = vld [vmem:[#allocation13 + $0x670] sm:$0xff] }
 0x63c   :  { %3558 = vmatprep.subr.bf16.mxu0 %v2779_v54  ;;  %v3736_v54 = vld [vmem:[#allocation17 + $0x40] sm:$0xff]  ;;  %v2858_v39 = vunpack.c.h.s8.bf16 %v2394_v6  ;;  %v2850_v8 = vunpack.c.l.s8.bf16 %v2394_v6  ;;  %v2427_v6 = vld [vmem:[#allocation13 + $0x778] sm:$0xff] }
 0x63e   :  { %3518 = vmatpush2.bf16.msra.mxu1 %v2650_v13  ;;  %v3944_v13 = vunpack.c.h.s8.bf16 %v3736_v54 }
 0x63f   :  { %3559 = vmatpush2.bf16.msra.mxu0 %v2778_v14  ;;  %3519 = vmatprep.subr.bf16.mxu1 %v2643_v15  ;;  %v2851_v14 = vunpack.c.l.s8.bf16 %v2395_v28  ;;  %v3937_v15 = vunpack.c.l.s8.bf16 %v3737_v63  ;;  %v3776_v28 = vld [vmem:[#allocation17 + $0x180] sm:$0xff] }
 0x640   :  { %3560 = vmatprep.subr.bf16.mxu0 %v2771_v17  ;;  %v2387_v17 = vld [vmem:[#allocation13 + $0x638] sm:$0xff] }
 0x642   :  { %3520 = vmatpush2.bf16.msra.mxu1 %v2642_v30  ;;  %v3936_v30 = vunpack.c.l.s8.bf16 %v3736_v54 }
 0x643   :  { %3561 = vmatpush2.bf16.msra.mxu0 %v2770_v29  ;;  %3571 = vmatprep.subr.bf16.mxu1 %v2891_v22  ;;  %v2843_v29 = vunpack.c.h.s8.bf16 %v2387_v17  ;;  %v2386_v22 = vld [vmem:[#allocation13 + $0x630] sm:$0xff] }
 0x644   :  { %4304 = vmatprep.subr.bf16.mxu0 %v3977_v35  ;;  %v3728_v35 = vld [vmem:[#allocation17] sm:$0xff]  ;;  %v2842_v19 = vunpack.c.h.s8.bf16 %v2386_v22 }
 0x645   :  { %v3277_v57 = vpop.f32.mrf.mxu1  ;;  %3522 = vmatmul.mubr.bf16.vlgmr.msra.gmra.mxu1 %v7311_v37 }
 0x646   :  { %v7423_v62 = vadd.f32 %v3277_v57, %v7415_v27  ;;  %v7425_v48 = vpop.f32.mrf.mxu0  ;;  %3563 = vmatmul.mubr.bf16.vlgmr.msra.gmra.mxu0 %v7341_v40  ;;  %3572 = vmatpush1.bf16.msra.mxu1 %v2890_v32  ;;  %v3961_v27 = vunpack.c.h.s8.bf16 %v3745_v44  ;;  %v3928_v32 = vunpack.c.h.s8.bf16 %v3728_v35  ;;  %v2834_v57 = vunpack.c.l.s8.bf16 %v2386_v22  ;;  %v2419_v22 = vld [vmem:[#allocation13 + $0x738] sm:$0xff] }
 0x647   :  { %3603 = vmatprep.mubr.bf16.mxu1 %v7363_v33  ;;  %4305 = vmatpush1.bf16.msra.mxu0 %v3976_v58  ;;  %v3279_v0 = vpop.f32.mrf.mxu1  ;;  %v2874_v33 = vunpack.c.h.s8.bf16 %v2402_v43  ;;  %v2835_v58 = vunpack.c.l.s8.bf16 %v2387_v17  ;;  %v3768_v17 = vld [vmem:[#allocation17 + $0x140] sm:$0xff] }
 0x648   :  { %v7430_v45 = vadd.f32 %v3279_v0, %v7419_v31  ;;  %v7432_v37 = vpop.f32.mrf.mxu0  ;;  %3573 = vmatprep.subr.bf16.mxu1 %v2883_v38  ;;  %4306 = vmatprep.subr.bf16.mxu0 %v3969_v10  ;;  %v3953_v31 = vunpack.c.l.s8.bf16 %v3745_v44  ;;  %v3921_v38 = vunpack.c.l.s8.bf16 %v3729_v20  ;;  %v2443_v10 = vld [vmem:[#allocation13 + $0x7f8] sm:$0xff]  ;;  %v3920_v44 = vunpack.c.l.s8.bf16 %v3728_v35  ;;  %v2442_v0 = vld [vmem:[#allocation13 + $0x7f0] sm:$0xff] }
 0x649   :  { %v3281_v1 = vpop.f32.mrf.mxu1  ;;  %4336 = vmatprep.mubr.bf16.mxu0 %v6715_v52  ;;  %v2954_v43 = vunpack.c.h.s8.bf16 %v2442_v0  ;;  %v2947_v56 = vunpack.c.l.s8.bf16 %v2443_v10 }
 0x64a   :  { %v3322_v40 = vpop.f32.mrf.mxu0  ;;  %3574 = vmatpush1.bf16.msra.mxu1 %v2882_v12  ;;  %v2955_v12 = vunpack.c.h.s8.bf16 %v2443_v10  ;;  %v4033_v1 = vunpack.c.l.s8.bf16 %v3785_v42  ;;  %v3760_v10 = vld [vmem:[#allocation17 + $0x100] sm:$0xff] }
 0x64b   :  { %4307 = vmatpush1.bf16.msra.mxu0 %v3968_v51  ;;  %v3282_v49 = vpop.f32.mrf.mxu1  ;;  %3575 = vmatprep.subr.bf16.mxu1 %v2875_v47  ;;  %v4041_v51 = vunpack.c.h.s8.bf16 %v3785_v42  ;;  %v3784_v47 = vld [vmem:[#allocation17 + $0x1c0] sm:$0xff]  ;;  %v2435_v40 = vld [vmem:[#allocation13 + $0x7b8] sm:$0xff] }
 0x64c   :  { %v3323_v46 = vpop.f32.mrf.mxu0  ;;  %4308 = vmatprep.subr.bf16.mxu0 %v3961_v27  ;;  %v4040_v27 = vunpack.c.h.s8.bf16 %v3784_v47  ;;  %v2946_v49 = vunpack.c.l.s8.bf16 %v2442_v0  ;;  %v3817_v0 = vld [vmem:[#allocation17 + $0x2c8] sm:$0xff] }
 0x64d   :  { %v2434_v46 = vld [vmem:[#allocation13 + $0x7b0] sm:$0xff] }
 0x64e   :  { %3576 = vmatpush1.bf16.msra.mxu1 %v2874_v33  ;;  %v3777_v33 = vld [vmem:[#allocation17 + $0x188] sm:$0xff]  ;;  %v2938_v63 = vunpack.c.h.s8.bf16 %v2434_v46  ;;  %v2930_v54 = vunpack.c.l.s8.bf16 %v2434_v46 }
 0x64f   :  { %4309 = vmatpush1.bf16.msra.mxu0 %v3960_v18  ;;  %3577 = vmatprep.subr.bf16.mxu1 %v2867_v61  ;;  %v4032_v18 = vunpack.c.l.s8.bf16 %v3784_v47  ;;  %v2939_v61 = vunpack.c.h.s8.bf16 %v2435_v40  ;;  %v3809_v46 = vld [vmem:[#allocation17 + $0x288] sm:$0xff] }
 0x650   :  { %4310 = vmatprep.subr.bf16.mxu0 %v3953_v31  ;;  %v4025_v31 = vunpack.c.h.s8.bf16 %v3777_v33 }
 0x652   :  { %3578 = vmatpush1.bf16.msra.mxu1 %v2866_v11  ;;  %v4024_v11 = vunpack.c.h.s8.bf16 %v3776_v28 }
 0x653   :  { %4311 = vmatpush1.bf16.msra.mxu0 %v3952_v9  ;;  %3579 = vmatprep.subr.bf16.mxu1 %v2859_v4  ;;  %v2931_v9 = vunpack.c.l.s8.bf16 %v2435_v40  ;;  %v4017_v4 = vunpack.c.l.s8.bf16 %v3777_v33  ;;  %v3880_v40 = vld [vmem:[#allocation17 + $0x4c0] sm:$0xff] }
 0x654   :  { %4312 = vmatprep.subr.bf16.mxu0 %v3945_v5  ;;  %v3769_v5 = vld [vmem:[#allocation17 + $0x148] sm:$0xff] }
 0x656   :  { %3580 = vmatpush1.bf16.msra.mxu1 %v2858_v39  ;;  %v4016_v39 = vunpack.c.l.s8.bf16 %v3776_v28  ;;  %v3873_v28 = vld [vmem:[#allocation17 + $0x488] sm:$0xff] }
 0x657   :  { %4313 = vmatpush1.bf16.msra.mxu0 %v3944_v13  ;;  %3581 = vmatprep.subr.bf16.mxu1 %v2851_v14  ;;  %v2923_v13 = vunpack.c.h.s8.bf16 %v2427_v6  ;;  %v2426_v14 = vld [vmem:[#allocation13 + $0x770] sm:$0xff] }
 0x658   :  { %4314 = vmatprep.subr.bf16.mxu0 %v3937_v15  ;;  %v4009_v15 = vunpack.c.h.s8.bf16 %v3769_v5  ;;  %v2922_v20 = vunpack.c.h.s8.bf16 %v2426_v14  ;;  %v2914_v35 = vunpack.c.l.s8.bf16 %v2426_v14 }
 0x65a   :  { %3582 = vmatpush1.bf16.msra.mxu1 %v2850_v8  ;;  %v4008_v8 = vunpack.c.h.s8.bf16 %v3768_v17 }
 0x65b   :  { %4315 = vmatpush1.bf16.msra.mxu0 %v3936_v30  ;;  %3583 = vmatprep.subr.bf16.mxu1 %v2843_v29  ;;  %v2915_v30 = vunpack.c.l.s8.bf16 %v2427_v6  ;;  %v4001_v29 = vunpack.c.l.s8.bf16 %v3769_v5  ;;  %v4224_v6 = vunpack.c.l.s8.bf16 %v3880_v40  ;;  %v4089_v5 = vunpack.c.h.s8.bf16 %v3809_v46 }
 0x65c   :  { %4316 = vmatprep.subr.bf16.mxu0 %v3929_v41  ;;  %v3761_v41 = vld [vmem:[#allocation17 + $0x108] sm:$0xff] }
 0x65e   :  { %3584 = vmatpush1.bf16.msra.mxu1 %v2842_v19  ;;  %v4000_v19 = vunpack.c.l.s8.bf16 %v3768_v17 }
 0x65f   :  { %4317 = vmatpush1.bf16.msra.mxu0 %v3928_v32  ;;  %3585 = vmatprep.subr.bf16.mxu1 %v2835_v58  ;;  %v2907_v32 = vunpack.c.h.s8.bf16 %v2419_v22  ;;  %v2418_v58 = vld [vmem:[#allocation13 + $0x730] sm:$0xff] }
 0x660   :  { %4318 = vmatprep.subr.bf16.mxu0 %v3921_v38  ;;  %v3993_v38 = vunpack.c.h.s8.bf16 %v3761_v41  ;;  %v2906_v42 = vunpack.c.h.s8.bf16 %v2418_v58  ;;  %v2898_v47 = vunpack.c.l.s8.bf16 %v2418_v58 }
 0x662   :  { %3586 = vmatpush1.bf16.msra.mxu1 %v2834_v57  ;;  %v3992_v57 = vunpack.c.h.s8.bf16 %v3760_v10 }
 0x663   :  { %4319 = vmatpush1.bf16.msra.mxu0 %v3920_v44  ;;  %3587 = vmatprep.subr.bf16.mxu1 %v2955_v12  ;;  %v2899_v44 = vunpack.c.l.s8.bf16 %v2419_v22  ;;  %v3985_v12 = vunpack.c.l.s8.bf16 %v3761_v41  ;;  %v4081_v22 = vunpack.c.l.s8.bf16 %v3809_v46  ;;  %v4209_v41 = vunpack.c.l.s8.bf16 %v3873_v28 }
 0x664   :  { %4320 = vmatprep.subr.bf16.mxu0 %v4041_v51  ;;  %v3881_v51 = vld [vmem:[#allocation17 + $0x4c8] sm:$0xff] }
 0x666   :  { %3588 = vmatpush2.bf16.msra.mxu1 %v2954_v43  ;;  %v3984_v43 = vunpack.c.l.s8.bf16 %v3760_v10  ;;  %v3800_v10 = vld [vmem:[#allocation17 + $0x240] sm:$0xff] }
 0x667   :  { %4321 = vmatpush2.bf16.msra.mxu0 %v4040_v27  ;;  %3589 = vmatprep.subr.bf16.mxu1 %v2947_v56  ;;  %v4105_v27 = vunpack.c.h.s8.bf16 %v3817_v0  ;;  %v3816_v56 = vld [vmem:[#allocation17 + $0x2c0] sm:$0xff] }
 0x668   :  { %4322 = vmatprep.subr.bf16.mxu0 %v4033_v1  ;;  %v4233_v1 = vunpack.c.h.s8.bf16 %v3881_v51  ;;  %v4104_v33 = vunpack.c.h.s8.bf16 %v3816_v56 }
 0x66a   :  { %3590 = vmatpush2.bf16.msra.mxu1 %v2946_v49  ;;  %v4232_v49 = vunpack.c.h.s8.bf16 %v3880_v40  ;;  %v3792_v40 = vld [vmem:[#allocation17 + $0x200] sm:$0xff] }
 0x66b   :  { %4323 = vmatpush2.bf16.msra.mxu0 %v4032_v18  ;;  %3591 = vmatprep.subr.bf16.mxu1 %v2939_v61  ;;  %v4097_v18 = vunpack.c.l.s8.bf16 %v3817_v0  ;;  %v4225_v61 = vunpack.c.l.s8.bf16 %v3881_v51 }
 0x66c   :  { %4324 = vmatprep.subr.bf16.mxu0 %v4025_v31 }
 0x66e   :  { %3592 = vmatpush2.bf16.msra.mxu1 %v2938_v63 }
 0x66f   :  { %4325 = vmatpush2.bf16.msra.mxu0 %v4024_v11  ;;  %3593 = vmatprep.subr.bf16.mxu1 %v2931_v9  ;;  %v4096_v9 = vunpack.c.l.s8.bf16 %v3816_v56 }
 0x670   :  { %4326 = vmatprep.subr.bf16.mxu0 %v4017_v4 }
 0x672   :  { %3594 = vmatpush2.bf16.msra.mxu1 %v2930_v54  ;;  %v3808_v54 = vld [vmem:[#allocation17 + $0x280] sm:$0xff] }
 0x673   :  { %4327 = vmatpush2.bf16.msra.mxu0 %v4016_v39  ;;  %3595 = vmatprep.subr.bf16.mxu1 %v2923_v13 }
 0x674   :  { %4328 = vmatprep.subr.bf16.mxu0 %v4009_v15  ;;  %v3872_v15 = vld [vmem:[#allocation17 + $0x480] sm:$0xff] }
 0x675   :  { %v4208_v58 = vunpack.c.l.s8.bf16 %v3872_v15 }
 0x676   :  { %3596 = vmatpush2.bf16.msra.mxu1 %v2922_v20 }
 0x677   :  { %4329 = vmatpush2.bf16.msra.mxu0 %v4008_v8  ;;  %3597 = vmatprep.subr.bf16.mxu1 %v2915_v30  ;;  %v4088_v8 = vunpack.c.h.s8.bf16 %v3808_v54 }
 0x678   :  { %4330 = vmatprep.subr.bf16.mxu0 %v4001_v29  ;;  %v4216_v29 = vunpack.c.h.s8.bf16 %v3872_v15 }
 0x67a   :  { %3598 = vmatpush2.bf16.msra.mxu1 %v2914_v35  ;;  %v3801_v35 = vld [vmem:[#allocation17 + $0x248] sm:$0xff] }
 0x67b   :  { %4331 = vmatpush2.bf16.msra.mxu0 %v4000_v19  ;;  %3599 = vmatprep.subr.bf16.mxu1 %v2907_v32  ;;  %v3865_v19 = vld [vmem:[#allocation17 + $0x448] sm:$0xff]  ;;  %v4080_v32 = vunpack.c.l.s8.bf16 %v3808_v54  ;;  %v4065_v0 = vunpack.c.l.s8.bf16 %v3801_v35  ;;  %v3912_v54 = vld [vmem:[#allocation17 + $0x5c0] sm:$0xff] }
 0x67c   :  { %4332 = vmatprep.subr.bf16.mxu0 %v3993_v38  ;;  %v4073_v38 = vunpack.c.h.s8.bf16 %v3801_v35  ;;  %v4193_v51 = vunpack.c.l.s8.bf16 %v3865_v19 }
 0x67e   :  { %3600 = vmatpush2.bf16.msra.mxu1 %v2906_v42  ;;  %v4201_v42 = vunpack.c.h.s8.bf16 %v3865_v19 }
 0x67f   :  { %4333 = vmatpush2.bf16.msra.mxu0 %v3992_v57  ;;  %3601 = vmatprep.subr.bf16.mxu1 %v2899_v44  ;;  %v3864_v57 = vld [vmem:[#allocation17 + $0x440] sm:$0xff]  ;;  %v4072_v44 = vunpack.c.h.s8.bf16 %v3800_v10 }
 0x680   :  { %4334 = vmatprep.subr.bf16.mxu0 %v3985_v12  ;;  %v4200_v12 = vunpack.c.h.s8.bf16 %v3864_v57  ;;  %v4192_v56 = vunpack.c.l.s8.bf16 %v3864_v57 }
 0x682   :  { %3602 = vmatpush2.bf16.msra.mxu1 %v2898_v47  ;;  %v3793_v47 = vld [vmem:[#allocation17 + $0x208] sm:$0xff] }
 0x683   :  { %4335 = vmatpush2.bf16.msra.mxu0 %v3984_v43  ;;  %4345 = vmatprep.subr.bf16.mxu1 %v4105_v27  ;;  %v3857_v43 = vld [vmem:[#allocation17 + $0x408] sm:$0xff]  ;;  %v4064_v27 = vunpack.c.l.s8.bf16 %v3800_v10  ;;  %v4049_v46 = vunpack.c.l.s8.bf16 %v3793_v47 }
 0x684   :  { %4386 = vmatprep.subr.bf16.mxu0 %v4233_v1  ;;  %v4057_v1 = vunpack.c.h.s8.bf16 %v3793_v47  ;;  %v3897_v10 = vld [vmem:[#allocation17 + $0x548] sm:$0xff] }
 0x685   :  { %v3359_v31 = vpop.f32.mrf.mxu1  ;;  %3604 = vmatmul.mubr.bf16.vlgmr.msra.gmra.mxu1 %v7365_v55  ;;  %v4217_v55 = vunpack.c.h.s8.bf16 %v3873_v28  ;;  %v3849_v28 = vld [vmem:[#allocation17 + $0x3c8] sm:$0xff] }
 0x686   :  { %v3360_v63 = vadd.f32 %v3359_v31, %v7425_v48  ;;  %v3400_v11 = vpop.f32.mrf.mxu0  ;;  %4337 = vmatmul.mubr.bf16.vlgmr.msra.gmra.mxu0 %v6734_v50  ;;  %4346 = vmatpush1.bf16.msra.mxu1 %v4104_v33  ;;  %v4185_v33 = vunpack.c.h.s8.bf16 %v3857_v43  ;;  %v4177_v31 = vunpack.c.l.s8.bf16 %v3857_v43 }
 0x687   :  { %4387 = vmatpush1.bf16.msra.mxu0 %v4232_v49  ;;  %v3361_v4 = vpop.f32.mrf.mxu1  ;;  %4347 = vmatprep.subr.bf16.mxu1 %v4097_v18  ;;  %v3856_v49 = vld [vmem:[#allocation17 + $0x400] sm:$0xff]  ;;  %v4056_v18 = vunpack.c.h.s8.bf16 %v3792_v40 }
 0x688   :  { %v7438_v39 = vadd.f32 %v3400_v11, %v3360_v63  ;;  %v3362_v13 = vadd.f32 %v3361_v4, %v7432_v37  ;;  %v3402_v14 = vpop.f32.mrf.mxu0  ;;  %4388 = vmatprep.subr.bf16.mxu0 %v4225_v61  ;;  %4377 = vmatprep.mubr.bf16.mxu1 %v6720_v53  ;;  %v4184_v61 = vunpack.c.h.s8.bf16 %v3856_v49  ;;  %v3913_v63 = vld [vmem:[#allocation17 + $0x5c8] sm:$0xff]  ;;  %v4048_v11 = vunpack.c.l.s8.bf16 %v3792_v40 }
 0x689   :  { %v3363_v48 = vpop.f32.mrf.mxu1  ;;  %4418 = vmatprep.mubr.bf16.mxu0 %v6743_v2  ;;  %v4169_v4 = vunpack.c.h.s8.bf16 %v3849_v28  ;;  %v4289_v15 = vunpack.c.l.s8.bf16 %v3913_v63  ;;  %v3889_v40 = vld [vmem:[#allocation17 + $0x508] sm:$0xff] }
 0x68a   :  { %v7443_v17 = vadd.f32 %v3402_v14, %v3362_v13  ;;  %v3404_v20 = vpop.f32.mrf.mxu0  ;;  %4348 = vmatpush1.bf16.msra.mxu1 %v4096_v9  ;;  %v4176_v9 = vunpack.c.l.s8.bf16 %v3856_v49  ;;  %v4296_v14 = vunpack.c.h.s8.bf16 %v3912_v54  ;;  %v3841_v48 = vld [vmem:[#allocation17 + $0x388] sm:$0xff] }
 0x68b   :  { %4389 = vmatpush1.bf16.msra.mxu0 %v4224_v6  ;;  %v3364_v30 = vpop.f32.mrf.mxu1  ;;  %4349 = vmatprep.subr.bf16.mxu1 %v4089_v5  ;;  %v3848_v6 = vld [vmem:[#allocation17 + $0x3c0] sm:$0xff]  ;;  %v4297_v5 = vunpack.c.h.s8.bf16 %v3913_v63  ;;  %v3905_v20 = vld [vmem:[#allocation17 + $0x588] sm:$0xff] }
 0x68c   :  { %v3405_v37 = vpop.f32.mrf.mxu0  ;;  %4390 = vmatprep.subr.bf16.mxu0 %v4217_v55  ;;  %v4168_v13 = vunpack.c.h.s8.bf16 %v3848_v6  ;;  %v4161_v55 = vunpack.c.l.s8.bf16 %v3849_v28  ;;  %v4288_v30 = vunpack.c.l.s8.bf16 %v3912_v54 }
 0x68d   :  { %v4281_v37 = vunpack.c.h.s8.bf16 %v3905_v20 }
 0x68e   :  { %4350 = vmatpush1.bf16.msra.mxu1 %v4088_v8  ;;  %v4160_v8 = vunpack.c.l.s8.bf16 %v3848_v6  ;;  %v3819_v6 = vld [vmem:[#allocation17 + $0x2d8] sm:$0xff] }
 0x68f   :  { %4391 = vmatpush1.bf16.msra.mxu0 %v4216_v29  ;;  %4351 = vmatprep.subr.bf16.mxu1 %v4081_v22  ;;  %v4153_v29 = vunpack.c.h.s8.bf16 %v3841_v48  ;;  %v3840_v22 = vld [vmem:[#allocation17 + $0x380] sm:$0xff] }
 0x690   :  { %4392 = vmatprep.subr.bf16.mxu0 %v4209_v41  ;;  %v3904_v41 = vld [vmem:[#allocation17 + $0x580] sm:$0xff]  ;;  %v4152_v35 = vunpack.c.h.s8.bf16 %v3840_v22 }
 0x691   :  { %v4280_v19 = vunpack.c.h.s8.bf16 %v3904_v41  ;;  %v4272_v57 = vunpack.c.l.s8.bf16 %v3904_v41 }
 0x692   :  { %4352 = vmatpush1.bf16.msra.mxu1 %v4080_v32  ;;  %v4145_v32 = vunpack.c.l.s8.bf16 %v3841_v48 }
 0x693   :  { %4393 = vmatpush1.bf16.msra.mxu0 %v4208_v58  ;;  %4353 = vmatprep.subr.bf16.mxu1 %v4073_v38  ;;  %v4273_v58 = vunpack.c.l.s8.bf16 %v3905_v20  ;;  %v3833_v38 = vld [vmem:[#allocation17 + $0x348] sm:$0xff] }
 0x694   :  { %4394 = vmatprep.subr.bf16.mxu0 %v4201_v42  ;;  %v4144_v42 = vunpack.c.l.s8.bf16 %v3840_v22 }
 0x696   :  { %4354 = vmatpush1.bf16.msra.mxu1 %v4072_v44  ;;  %v4137_v44 = vunpack.c.h.s8.bf16 %v3833_v38 }
 0x697   :  { %4395 = vmatpush1.bf16.msra.mxu0 %v4200_v12  ;;  %4355 = vmatprep.subr.bf16.mxu1 %v4065_v0  ;;  %v3832_v12 = vld [vmem:[#allocation17 + $0x340] sm:$0xff]  ;;  %v4265_v0 = vunpack.c.h.s8.bf16 %v3897_v10 }
 0x698   :  { %4396 = vmatprep.subr.bf16.mxu0 %v4193_v51  ;;  %v3896_v51 = vld [vmem:[#allocation17 + $0x540] sm:$0xff]  ;;  %v4136_v47 = vunpack.c.h.s8.bf16 %v3832_v12 }
 0x699   :  { %v4264_v43 = vunpack.c.h.s8.bf16 %v3896_v51  ;;  %v4256_v49 = vunpack.c.l.s8.bf16 %v3896_v51 }
 0x69a   :  { %4356 = vmatpush1.bf16.msra.mxu1 %v4064_v27  ;;  %v4129_v27 = vunpack.c.l.s8.bf16 %v3833_v38 }
 0x69b   :  { %4397 = vmatpush1.bf16.msra.mxu0 %v4192_v56  ;;  %4357 = vmatprep.subr.bf16.mxu1 %v4057_v1  ;;  %v4257_v56 = vunpack.c.l.s8.bf16 %v3897_v10  ;;  %v3825_v1 = vld [vmem:[#allocation17 + $0x308] sm:$0xff]  ;;  %v3746_v10 = vld [vmem:[#allocation17 + $0x90] sm:$0xff] }
 0x69c   :  { %4398 = vmatprep.subr.bf16.mxu0 %v4185_v33  ;;  %v4128_v33 = vunpack.c.l.s8.bf16 %v3832_v12  ;;  %v3962_v51 = vunpack.c.h.s8.bf16 %v3746_v10 }
 0x69e   :  { %4358 = vmatpush1.bf16.msra.mxu1 %v4056_v18  ;;  %v4121_v18 = vunpack.c.h.s8.bf16 %v3825_v1 }
 0x69f   :  { %4399 = vmatpush1.bf16.msra.mxu0 %v4184_v61  ;;  %4359 = vmatprep.subr.bf16.mxu1 %v4049_v46  ;;  %v3824_v61 = vld [vmem:[#allocation17 + $0x300] sm:$0xff]  ;;  %v4249_v46 = vunpack.c.h.s8.bf16 %v3889_v40 }
 0x6a0   :  { %4400 = vmatprep.subr.bf16.mxu0 %v4177_v31  ;;  %v3888_v31 = vld [vmem:[#allocation17 + $0x500] sm:$0xff]  ;;  %v4120_v28 = vunpack.c.h.s8.bf16 %v3824_v61 }
 0x6a1   :  { %v4248_v63 = vunpack.c.h.s8.bf16 %v3888_v31  ;;  %v4240_v54 = vunpack.c.l.s8.bf16 %v3888_v31  ;;  %v3802_v31 = vld [vmem:[#allocation17 + $0x250] sm:$0xff] }
 0x6a2   :  { %4360 = vmatpush1.bf16.msra.mxu1 %v4048_v11  ;;  %v4113_v11 = vunpack.c.l.s8.bf16 %v3825_v1  ;;  %v3739_v1 = vld [vmem:[#allocation17 + $0x58] sm:$0xff] }
 0x6a3   :  { %4401 = vmatpush1.bf16.msra.mxu0 %v4176_v9  ;;  %4361 = vmatprep.subr.bf16.mxu1 %v4169_v4  ;;  %v4241_v9 = vunpack.c.l.s8.bf16 %v3889_v40  ;;  %v3755_v4 = vld [vmem:[#allocation17 + $0xd8] sm:$0xff] }
 0x6a4   :  { %4402 = vmatprep.subr.bf16.mxu0 %v4297_v5  ;;  %v4112_v5 = vunpack.c.l.s8.bf16 %v3824_v61  ;;  %v3803_v40 = vld [vmem:[#allocation17 + $0x258] sm:$0xff]  ;;  %v3738_v61 = vld [vmem:[#allocation17 + $0x50] sm:$0xff] }
 0x6a6   :  { %4362 = vmatpush2.bf16.msra.mxu1 %v4168_v13  ;;  %v3979_v13 = vunpack.c.h.s8.bf16 %v3755_v4 }
 0x6a7   :  { %4403 = vmatpush2.bf16.msra.mxu0 %v4296_v14  ;;  %4363 = vmatprep.subr.bf16.mxu1 %v4161_v55  ;;  %v3754_v14 = vld [vmem:[#allocation17 + $0xd0] sm:$0xff]  ;;  %v4107_v55 = vunpack.c.h.s8.bf16 %v3819_v6 }
 0x6a8   :  { %4404 = vmatprep.subr.bf16.mxu0 %v4289_v15  ;;  %v3818_v15 = vld [vmem:[#allocation17 + $0x2d0] sm:$0xff]  ;;  %v3978_v48 = vunpack.c.h.s8.bf16 %v3754_v14 }
 0x6a9   :  { %v4106_v20 = vunpack.c.h.s8.bf16 %v3818_v15 }
 0x6aa   :  { %4364 = vmatpush2.bf16.msra.mxu1 %v4160_v8  ;;  %v3971_v8 = vunpack.c.l.s8.bf16 %v3755_v4  ;;  %v3731_v4 = vld [vmem:[#allocation17 + $0x18] sm:$0xff] }
 0x6ab   :  { %4405 = vmatpush2.bf16.msra.mxu0 %v4288_v30  ;;  %4365 = vmatprep.subr.bf16.mxu1 %v4153_v29  ;;  %v4099_v30 = vunpack.c.l.s8.bf16 %v3819_v6  ;;  %v3747_v29 = vld [vmem:[#allocation17 + $0x98] sm:$0xff] }
 0x6ac   :  { %4406 = vmatprep.subr.bf16.mxu0 %v4281_v37  ;;  %v3811_v37 = vld [vmem:[#allocation17 + $0x298] sm:$0xff]  ;;  %v3963_v38 = vunpack.c.h.s8.bf16 %v3747_v29 }
 0x6ad   :  { %v3795_v6 = vld [vmem:[#allocation17 + $0x218] sm:$0xff] }
 0x6ae   :  { %4366 = vmatpush2.bf16.msra.mxu1 %v4152_v35 }
 0x6af   :  { %4407 = vmatpush2.bf16.msra.mxu0 %v4280_v19  ;;  %4367 = vmatprep.subr.bf16.mxu1 %v4145_v32  ;;  %v3970_v19 = vunpack.c.l.s8.bf16 %v3754_v14  ;;  %v3730_v14 = vld [vmem:[#allocation17 + $0x10] sm:$0xff] }
 0x6b0   :  { %4408 = vmatprep.subr.bf16.mxu0 %v4273_v58  ;;  %v4098_v58 = vunpack.c.l.s8.bf16 %v3818_v15  ;;  %v3794_v15 = vld [vmem:[#allocation17 + $0x210] sm:$0xff] }
 0x6b2   :  { %4368 = vmatpush2.bf16.msra.mxu1 %v4144_v42 }
 0x6b3   :  { %4409 = vmatpush2.bf16.msra.mxu0 %v4272_v57  ;;  %4369 = vmatprep.subr.bf16.mxu1 %v4137_v44  ;;  %v3810_v44 = vld [vmem:[#allocation17 + $0x290] sm:$0xff] }
 0x6b4   :  { %4410 = vmatprep.subr.bf16.mxu0 %v4265_v0 }
 0x6b6   :  { %4370 = vmatpush2.bf16.msra.mxu1 %v4136_v47 }
 0x6b7   :  { %4411 = vmatpush2.bf16.msra.mxu0 %v4264_v43  ;;  %4371 = vmatprep.subr.bf16.mxu1 %v4129_v27  ;;  %v4090_v43 = vunpack.c.h.s8.bf16 %v3810_v44  ;;  %v3955_v27 = vunpack.c.l.s8.bf16 %v3747_v29  ;;  %v3787_v29 = vld [vmem:[#allocation17 + $0x1d8] sm:$0xff] }
 0x6b8   :  { %4412 = vmatprep.subr.bf16.mxu0 %v4257_v56  ;;  %v4083_v56 = vunpack.c.l.s8.bf16 %v3811_v37 }
 0x6ba   :  { %4372 = vmatpush2.bf16.msra.mxu1 %v4128_v33  ;;  %v3954_v33 = vunpack.c.l.s8.bf16 %v3746_v10  ;;  %v3850_v10 = vld [vmem:[#allocation17 + $0x3d0] sm:$0xff] }
 0x6bb   :  { %4413 = vmatpush2.bf16.msra.mxu0 %v4256_v49  ;;  %4373 = vmatprep.subr.bf16.mxu1 %v4121_v18  ;;  %v4082_v49 = vunpack.c.l.s8.bf16 %v3810_v44  ;;  %v3947_v18 = vunpack.c.h.s8.bf16 %v3739_v1  ;;  %v4170_v44 = vunpack.c.h.s8.bf16 %v3850_v10 }
 0x6bc   :  { %4414 = vmatprep.subr.bf16.mxu0 %v4249_v46  ;;  %v4075_v46 = vunpack.c.h.s8.bf16 %v3803_v40 }
 0x6be   :  { %4374 = vmatpush2.bf16.msra.mxu1 %v4120_v28  ;;  %v3946_v28 = vunpack.c.h.s8.bf16 %v3738_v61 }
 0x6bf   :  { %4415 = vmatpush2.bf16.msra.mxu0 %v4248_v63  ;;  %4375 = vmatprep.subr.bf16.mxu1 %v4113_v11  ;;  %v4074_v63 = vunpack.c.h.s8.bf16 %v3802_v31  ;;  %v3939_v11 = vunpack.c.l.s8.bf16 %v3739_v1 }
 0x6c0   :  { %4416 = vmatprep.subr.bf16.mxu0 %v4241_v9  ;;  %v4067_v9 = vunpack.c.l.s8.bf16 %v3803_v40  ;;  %v3842_v40 = vld [vmem:[#allocation17 + $0x390] sm:$0xff] }
 0x6c2   :  { %4376 = vmatpush2.bf16.msra.mxu1 %v4112_v5  ;;  %v3938_v5 = vunpack.c.l.s8.bf16 %v3738_v61 }
 0x6c3   :  { %4417 = vmatpush2.bf16.msra.mxu0 %v4240_v54  ;;  %4427 = vmatprep.subr.bf16.mxu1 %v3979_v13  ;;  %v4066_v54 = vunpack.c.l.s8.bf16 %v3802_v31  ;;  %v3931_v13 = vunpack.c.h.s8.bf16 %v3731_v4  ;;  %v3835_v31 = vld [vmem:[#allocation17 + $0x358] sm:$0xff] }
 0x6c4   :  { %4468 = vmatprep.subr.bf16.mxu0 %v4107_v55  ;;  %v4059_v55 = vunpack.c.h.s8.bf16 %v3795_v6 }
 0x6c5   :  { %v3441_v22 = vpop.f32.mrf.mxu1  ;;  %4378 = vmatmul.mubr.bf16.vlgmr.msra.gmra.mxu1 %v6740_v60 }
 0x6c6   :  { %v7447_v41 = vadd.f32 %v3441_v22, %v7438_v39  ;;  %v7449_v35 = vpop.f32.mrf.mxu0  ;;  %4419 = vmatmul.mubr.bf16.vlgmr.msra.gmra.mxu0 %v6730_v16  ;;  %4428 = vmatpush1.bf16.msra.mxu1 %v3978_v48  ;;  %v4091_v39 = vunpack.c.h.s8.bf16 %v3811_v37  ;;  %v3930_v48 = vunpack.c.h.s8.bf16 %v3730_v14  ;;  %v3851_v22 = vld [vmem:[#allocation17 + $0x3d8] sm:$0xff]  ;;  %v3922_v37 = vunpack.c.l.s8.bf16 %v3730_v14 }
 0x6c7   :  { %4469 = vmatpush1.bf16.msra.mxu0 %v4106_v20  ;;  %v3443_v32 = vpop.f32.mrf.mxu1  ;;  %4429 = vmatprep.subr.bf16.mxu1 %v3971_v8  ;;  %v4058_v20 = vunpack.c.h.s8.bf16 %v3794_v15  ;;  %v3923_v8 = vunpack.c.l.s8.bf16 %v3731_v4  ;;  %v4139_v4 = vunpack.c.h.s8.bf16 %v3835_v31  ;;  %v4131_v14 = vunpack.c.l.s8.bf16 %v3835_v31 }
 0x6c8   :  { %v7453_v42 = vadd.f32 %v3443_v32, %v7443_v17  ;;  %v7455_v57 = vpop.f32.mrf.mxu0  ;;  %4470 = vmatprep.subr.bf16.mxu0 %v4099_v30  ;;  %4459 = vmatprep.mubr.bf16.mxu1 %v6715_v52  ;;  %v4051_v30 = vunpack.c.l.s8.bf16 %v3795_v6  ;;  %v4043_v32 = vunpack.c.h.s8.bf16 %v3787_v29  ;;  %v3834_v6 = vld [vmem:[#allocation17 + $0x350] sm:$0xff] }
 0x6c9   :  { %v3445_v12 = vpop.f32.mrf.mxu1  ;;  %4500 = vmatprep.mubr.bf16.mxu0 %v6720_v53 }
 0x6ca   :  { %v3486_v0 = vpop.f32.mrf.mxu0  ;;  %4430 = vmatpush1.bf16.msra.mxu1 %v3970_v19  ;;  %v4050_v19 = vunpack.c.l.s8.bf16 %v3794_v15  ;;  %v4035_v12 = vunpack.c.l.s8.bf16 %v3787_v29  ;;  %v3827_v15 = vld [vmem:[#allocation17 + $0x318] sm:$0xff] }
 0x6cb   :  { %4471 = vmatpush1.bf16.msra.mxu0 %v4098_v58  ;;  %v3446_v47 = vpop.f32.mrf.mxu1  ;;  %4431 = vmatprep.subr.bf16.mxu1 %v3963_v38  ;;  %v3786_v58 = vld [vmem:[#allocation17 + $0x1d0] sm:$0xff]  ;;  %v4171_v38 = vunpack.c.h.s8.bf16 %v3851_v22  ;;  %v4163_v0 = vunpack.c.l.s8.bf16 %v3851_v22  ;;  %v4123_v29 = vunpack.c.h.s8.bf16 %v3827_v15 }
 0x6cc   :  { %v3487_v17 = vpop.f32.mrf.mxu0  ;;  %4472 = vmatprep.subr.bf16.mxu0 %v4091_v39  ;;  %v4042_v39 = vunpack.c.h.s8.bf16 %v3786_v58  ;;  %v3843_v47 = vld [vmem:[#allocation17 + $0x398] sm:$0xff]  ;;  %v3826_v22 = vld [vmem:[#allocation17 + $0x310] sm:$0xff] }
 0x6cd   :  { %v4155_v1 = vunpack.c.h.s8.bf16 %v3843_v47  ;;  %v4147_v61 = vunpack.c.l.s8.bf16 %v3843_v47  ;;  %v3756_v47 = vld [vmem:[#allocation17 + $0xe0] sm:$0xff] }
 0x6ce   :  { %4432 = vmatpush1.bf16.msra.mxu1 %v3962_v51  ;;  %v3779_v51 = vld [vmem:[#allocation17 + $0x198] sm:$0xff]  ;;  %v3972_v31 = vunpack.c.l.s8.bf16 %v3756_v47 }
 0x6cf   :  { %4473 = vmatpush1.bf16.msra.mxu0 %v4090_v43  ;;  %4433 = vmatprep.subr.bf16.mxu1 %v3955_v27  ;;  %v4034_v43 = vunpack.c.l.s8.bf16 %v3786_v58  ;;  %v4162_v27 = vunpack.c.l.s8.bf16 %v3850_v10  ;;  %v4027_v17 = vunpack.c.h.s8.bf16 %v3779_v51  ;;  %v4115_v58 = vunpack.c.l.s8.bf16 %v3827_v15  ;;  %v3757_v10 = vld [vmem:[#allocation17 + $0xe8] sm:$0xff] }
 0x6d0   :  { %4474 = vmatprep.subr.bf16.mxu0 %v4083_v56  ;;  %v3778_v56 = vld [vmem:[#allocation17 + $0x190] sm:$0xff] }
 0x6d2   :  { %4434 = vmatpush1.bf16.msra.mxu1 %v3954_v33  ;;  %v4026_v33 = vunpack.c.h.s8.bf16 %v3778_v56 }
 0x6d3   :  { %4475 = vmatpush1.bf16.msra.mxu0 %v4082_v49  ;;  %4435 = vmatprep.subr.bf16.mxu1 %v3947_v18  ;;  %v4154_v49 = vunpack.c.h.s8.bf16 %v3842_v40  ;;  %v4019_v18 = vunpack.c.l.s8.bf16 %v3779_v51  ;;  %v3981_v51 = vunpack.c.h.s8.bf16 %v3757_v10 }
 0x6d4   :  { %4476 = vmatprep.subr.bf16.mxu0 %v4075_v46  ;;  %v3771_v46 = vld [vmem:[#allocation17 + $0x158] sm:$0xff] }
 0x6d6   :  { %4436 = vmatpush1.bf16.msra.mxu1 %v3946_v28  ;;  %v4018_v28 = vunpack.c.l.s8.bf16 %v3778_v56  ;;  %v3973_v56 = vunpack.c.l.s8.bf16 %v3757_v10 }
 0x6d7   :  { %4477 = vmatpush1.bf16.msra.mxu0 %v4074_v63  ;;  %4437 = vmatprep.subr.bf16.mxu1 %v3939_v11  ;;  %v4146_v63 = vunpack.c.l.s8.bf16 %v3842_v40  ;;  %v4011_v11 = vunpack.c.h.s8.bf16 %v3771_v46 }
 0x6d8   :  { %4478 = vmatprep.subr.bf16.mxu0 %v4067_v9  ;;  %v3770_v9 = vld [vmem:[#allocation17 + $0x150] sm:$0xff] }
 0x6da   :  { %4438 = vmatpush1.bf16.msra.mxu1 %v3938_v5  ;;  %v4010_v5 = vunpack.c.h.s8.bf16 %v3770_v9 }
 0x6db   :  { %4479 = vmatpush1.bf16.msra.mxu0 %v4066_v54  ;;  %4439 = vmatprep.subr.bf16.mxu1 %v3931_v13  ;;  %v4138_v54 = vunpack.c.h.s8.bf16 %v3834_v6  ;;  %v4003_v13 = vunpack.c.l.s8.bf16 %v3771_v46 }
 0x6dc   :  { %4480 = vmatprep.subr.bf16.mxu0 %v4059_v55  ;;  %v3763_v55 = vld [vmem:[#allocation17 + $0x118] sm:$0xff] }
 0x6de   :  { %4440 = vmatpush1.bf16.msra.mxu1 %v3930_v48  ;;  %v4002_v48 = vunpack.c.l.s8.bf16 %v3770_v9 }
 0x6df   :  { %4481 = vmatpush1.bf16.msra.mxu0 %v4058_v20  ;;  %4441 = vmatprep.subr.bf16.mxu1 %v3923_v8  ;;  %v4130_v20 = vunpack.c.l.s8.bf16 %v3834_v6  ;;  %v3995_v8 = vunpack.c.h.s8.bf16 %v3763_v55 }
 0x6e0   :  { %4482 = vmatprep.subr.bf16.mxu0 %v4051_v30  ;;  %v3762_v30 = vld [vmem:[#allocation17 + $0x110] sm:$0xff] }
 0x6e2   :  { %4442 = vmatpush1.bf16.msra.mxu1 %v3922_v37  ;;  %v3994_v37 = vunpack.c.h.s8.bf16 %v3762_v30 }
 0x6e3   :  { %4483 = vmatpush1.bf16.msra.mxu0 %v4050_v19  ;;  %4443 = vmatprep.subr.bf16.mxu1 %v4043_v32  ;;  %v4122_v19 = vunpack.c.h.s8.bf16 %v3826_v22  ;;  %v3987_v32 = vunpack.c.l.s8.bf16 %v3763_v55 }
 0x6e4   :  { %4484 = vmatprep.subr.bf16.mxu0 %v4171_v38  ;;  %v3883_v38 = vld [vmem:[#allocation17 + $0x4d8] sm:$0xff] }
 0x6e6   :  { %4444 = vmatpush2.bf16.msra.mxu1 %v4042_v39  ;;  %v3986_v39 = vunpack.c.l.s8.bf16 %v3762_v30  ;;  %v3741_v30 = vld [vmem:[#allocation17 + $0x68] sm:$0xff] }
 0x6e7   :  { %4485 = vmatpush2.bf16.msra.mxu0 %v4170_v44  ;;  %4445 = vmatprep.subr.bf16.mxu1 %v4035_v12  ;;  %v4114_v44 = vunpack.c.l.s8.bf16 %v3826_v22  ;;  %v4235_v12 = vunpack.c.h.s8.bf16 %v3883_v38 }
 0x6e8   :  { %4486 = vmatprep.subr.bf16.mxu0 %v4163_v0  ;;  %v3882_v0 = vld [vmem:[#allocation17 + $0x4d0] sm:$0xff] }
 0x6ea   :  { %4446 = vmatpush2.bf16.msra.mxu1 %v4034_v43  ;;  %v4234_v43 = vunpack.c.h.s8.bf16 %v3882_v0 }
 0x6eb   :  { %4487 = vmatpush2.bf16.msra.mxu0 %v4162_v27  ;;  %4447 = vmatprep.subr.bf16.mxu1 %v4027_v17  ;;  %v3980_v27 = vunpack.c.h.s8.bf16 %v3756_v47  ;;  %v4227_v17 = vunpack.c.l.s8.bf16 %v3883_v38 }
 0x6ec   :  { %4488 = vmatprep.subr.bf16.mxu0 %v4155_v1  ;;  %v3875_v1 = vld [vmem:[#allocation17 + $0x498] sm:$0xff] }
 0x6ee   :  { %4448 = vmatpush2.bf16.msra.mxu1 %v4026_v33  ;;  %v3749_v33 = vld [vmem:[#allocation17 + $0xa8] sm:$0xff] }
 0x6ef   :  { %4489 = vmatpush2.bf16.msra.mxu0 %v4154_v49  ;;  %4449 = vmatprep.subr.bf16.mxu1 %v4019_v18  ;;  %v3965_v6 = vunpack.c.h.s8.bf16 %v3749_v33 }
 0x6f0   :  { %4490 = vmatprep.subr.bf16.mxu0 %v4147_v61  ;;  %v4226_v61 = vunpack.c.l.s8.bf16 %v3882_v0  ;;  %v3733_v0 = vld [vmem:[#allocation17 + $0x28] sm:$0xff] }
 0x6f2   :  { %4450 = vmatpush2.bf16.msra.mxu1 %v4018_v28  ;;  %v4219_v28 = vunpack.c.h.s8.bf16 %v3875_v1 }
 0x6f3   :  { %4491 = vmatpush2.bf16.msra.mxu0 %v4146_v63  ;;  %4451 = vmatprep.subr.bf16.mxu1 %v4011_v11  ;;  %v3874_v63 = vld [vmem:[#allocation17 + $0x490] sm:$0xff] }
 0x6f4   :  { %4492 = vmatprep.subr.bf16.mxu0 %v4139_v4 }
 0x6f6   :  { %4452 = vmatpush2.bf16.msra.mxu1 %v4010_v5  ;;  %v3748_v5 = vld [vmem:[#allocation17 + $0xa0] sm:$0xff] }
 0x6f7   :  { %4493 = vmatpush2.bf16.msra.mxu0 %v4138_v54  ;;  %4453 = vmatprep.subr.bf16.mxu1 %v4003_v13  ;;  %v3964_v15 = vunpack.c.h.s8.bf16 %v3748_v5  ;;  %v3956_v22 = vunpack.c.l.s8.bf16 %v3748_v5 }
 0x6f8   :  { %4494 = vmatprep.subr.bf16.mxu0 %v4131_v14  ;;  %v4218_v14 = vunpack.c.h.s8.bf16 %v3874_v63 }
 0x6fa   :  { %4454 = vmatpush2.bf16.msra.mxu1 %v4002_v48  ;;  %v4211_v48 = vunpack.c.l.s8.bf16 %v3875_v1 }
 0x6fb   :  { %4495 = vmatpush2.bf16.msra.mxu0 %v4130_v20  ;;  %4455 = vmatprep.subr.bf16.mxu1 %v3995_v8  ;;  %v3957_v20 = vunpack.c.l.s8.bf16 %v3749_v33  ;;  %v3867_v8 = vld [vmem:[#allocation17 + $0x458] sm:$0xff] }
 0x6fc   :  { %4496 = vmatprep.subr.bf16.mxu0 %v4123_v29  ;;  %v4210_v29 = vunpack.c.l.s8.bf16 %v3874_v63  ;;  %v3914_v63 = vld [vmem:[#allocation17 + $0x5d0] sm:$0xff] }
 0x6fe   :  { %4456 = vmatpush2.bf16.msra.mxu1 %v3994_v37  ;;  %v4203_v37 = vunpack.c.h.s8.bf16 %v3867_v8 }
 0x6ff   :  { %4497 = vmatpush2.bf16.msra.mxu0 %v4122_v19  ;;  %4457 = vmatprep.subr.bf16.mxu1 %v3987_v32  ;;  %v3866_v19 = vld [vmem:[#allocation17 + $0x450] sm:$0xff]  ;;  %v3949_v32 = vunpack.c.h.s8.bf16 %v3741_v30 }
 0x700   :  { %4498 = vmatprep.subr.bf16.mxu0 %v4115_v58  ;;  %v3740_v58 = vld [vmem:[#allocation17 + $0x60] sm:$0xff]  ;;  %v4202_v38 = vunpack.c.h.s8.bf16 %v3866_v19 }
 0x701   :  { %v3948_v10 = vunpack.c.h.s8.bf16 %v3740_v58  ;;  %v3940_v47 = vunpack.c.l.s8.bf16 %v3740_v58  ;;  %v3773_v58 = vld [vmem:[#allocation17 + $0x168] sm:$0xff] }
 0x702   :  { %4458 = vmatpush2.bf16.msra.mxu1 %v3986_v39  ;;  %v4195_v39 = vunpack.c.l.s8.bf16 %v3867_v8 }
 0x703   :  { %4499 = vmatpush2.bf16.msra.mxu0 %v4114_v44  ;;  %4509 = vmatprep.subr.bf16.mxu1 %v4235_v12  ;;  %v3941_v44 = vunpack.c.l.s8.bf16 %v3741_v30  ;;  %v3859_v12 = vld [vmem:[#allocation17 + $0x418] sm:$0xff]  ;;  %v3780_v30 = vld [vmem:[#allocation17 + $0x1a0] sm:$0xff] }
 0x704   :  { %4550 = vmatprep.subr.bf16.mxu0 %v3981_v51  ;;  %v4194_v51 = vunpack.c.l.s8.bf16 %v3866_v19  ;;  %v4179_v33 = vunpack.c.l.s8.bf16 %v3859_v12 }
 0x705   :  { %v3523_v40 = vpop.f32.mrf.mxu1  ;;  %4460 = vmatmul.mubr.bf16.vlgmr.msra.gmra.mxu1 %v6734_v50 }
 0x706   :  { %v3524_v49 = vadd.f32 %v3523_v40, %v7449_v35  ;;  %v3564_v18 = vpop.f32.mrf.mxu0  ;;  %4501 = vmatmul.mubr.bf16.vlgmr.msra.gmra.mxu0 %v6740_v60  ;;  %4510 = vmatpush1.bf16.msra.mxu1 %v4234_v43  ;;  %v4187_v43 = vunpack.c.h.s8.bf16 %v3859_v12  ;;  %v4013_v12 = vunpack.c.h.s8.bf16 %v3773_v58 }
 0x707   :  { %4551 = vmatpush1.bf16.msra.mxu0 %v3980_v27  ;;  %v3525_v46 = vpop.f32.mrf.mxu1  ;;  %4511 = vmatprep.subr.bf16.mxu1 %v4227_v17  ;;  %v3858_v27 = vld [vmem:[#allocation17 + $0x410] sm:$0xff]  ;;  %v3933_v17 = vunpack.c.h.s8.bf16 %v3733_v0 }
 0x708   :  { %v7462_v11 = vadd.f32 %v3564_v18, %v3524_v49  ;;  %v3526_v9 = vadd.f32 %v3525_v46, %v7455_v57  ;;  %v3566_v4 = vpop.f32.mrf.mxu0  ;;  %4552 = vmatprep.subr.bf16.mxu0 %v3973_v56  ;;  %4541 = vmatprep.mubr.bf16.mxu1 %v6743_v2  ;;  %v3732_v56 = vld [vmem:[#allocation17 + $0x20] sm:$0xff]  ;;  %v4186_v1 = vunpack.c.h.s8.bf16 %v3858_v27  ;;  %v3925_v49 = vunpack.c.l.s8.bf16 %v3733_v0  ;;  %v3915_v18 = vld [vmem:[#allocation17 + $0x5d8] sm:$0xff] }
 0x709   :  { %v3527_v35 = vpop.f32.mrf.mxu1  ;;  %4582 = vmatprep.mubr.bf16.mxu0 %v6715_v52  ;;  %v3932_v40 = vunpack.c.h.s8.bf16 %v3732_v56  ;;  %v4178_v46 = vunpack.c.l.s8.bf16 %v3858_v27  ;;  %v3772_v0 = vld [vmem:[#allocation17 + $0x160] sm:$0xff]  ;;  %v4005_v27 = vunpack.c.l.s8.bf16 %v3773_v58 }
 0x70a   :  { %v7467_v54 = vadd.f32 %v3566_v4, %v3526_v9  ;;  %v3568_v13 = vpop.f32.mrf.mxu0  ;;  %4512 = vmatpush1.bf16.msra.mxu1 %v4226_v61  ;;  %v3789_v61 = vld [vmem:[#allocation17 + $0x1e8] sm:$0xff]  ;;  %v3788_v4 = vld [vmem:[#allocation17 + $0x1e0] sm:$0xff]  ;;  %v4291_v35 = vunpack.c.l.s8.bf16 %v3915_v18 }
 0x70b   :  { %4553 = vmatpush1.bf16.msra.mxu0 %v3972_v31  ;;  %v3528_v55 = vpop.f32.mrf.mxu1  ;;  %4513 = vmatprep.subr.bf16.mxu1 %v4219_v28  ;;  %v3924_v31 = vunpack.c.l.s8.bf16 %v3732_v56  ;;  %v4299_v28 = vunpack.c.h.s8.bf16 %v3915_v18  ;;  %v4045_v9 = vunpack.c.h.s8.bf16 %v3789_v61  ;;  %v4044_v5 = vunpack.c.h.s8.bf16 %v3788_v4  ;;  %v3765_v56 = vld [vmem:[#allocation17 + $0x128] sm:$0xff] }
 0x70c   :  { %v3569_v57 = vpop.f32.mrf.mxu0  ;;  %4554 = vmatprep.subr.bf16.mxu0 %v3965_v6  ;;  %v4298_v6 = vunpack.c.h.s8.bf16 %v3914_v63  ;;  %v4037_v13 = vunpack.c.l.s8.bf16 %v3789_v61  ;;  %v3781_v55 = vld [vmem:[#allocation17 + $0x1a8] sm:$0xff]  ;;  %v3997_v18 = vunpack.c.h.s8.bf16 %v3765_v56  ;;  %v3764_v61 = vld [vmem:[#allocation17 + $0x120] sm:$0xff] }
 0x70d   :  { %v4029_v8 = vunpack.c.h.s8.bf16 %v3781_v55  ;;  %v4021_v19 = vunpack.c.l.s8.bf16 %v3781_v55  ;;  %v3884_v55 = vld [vmem:[#allocation17 + $0x4e0] sm:$0xff] }
 0x70e   :  { %4514 = vmatpush1.bf16.msra.mxu1 %v4218_v14  ;;  %v3907_v14 = vld [vmem:[#allocation17 + $0x598] sm:$0xff]  ;;  %v4228_v58 = vunpack.c.l.s8.bf16 %v3884_v55 }
 0x70f   :  { %4555 = vmatpush1.bf16.msra.mxu0 %v3964_v15  ;;  %4515 = vmatprep.subr.bf16.mxu1 %v4211_v48  ;;  %v4290_v15 = vunpack.c.l.s8.bf16 %v3914_v63  ;;  %v4036_v48 = vunpack.c.l.s8.bf16 %v3788_v4  ;;  %v4283_v57 = vunpack.c.h.s8.bf16 %v3907_v14  ;;  %v3989_v63 = vunpack.c.l.s8.bf16 %v3765_v56  ;;  %v3885_v4 = vld [vmem:[#allocation17 + $0x4e8] sm:$0xff] }
 0x710   :  { %4556 = vmatprep.subr.bf16.mxu0 %v3957_v20  ;;  %v3906_v20 = vld [vmem:[#allocation17 + $0x590] sm:$0xff]  ;;  %v3805_v56 = vld [vmem:[#allocation17 + $0x268] sm:$0xff] }
 0x712   :  { %4516 = vmatpush1.bf16.msra.mxu1 %v4210_v29  ;;  %v4282_v29 = vunpack.c.h.s8.bf16 %v3906_v20 }
 0x713   :  { %4557 = vmatpush1.bf16.msra.mxu0 %v3956_v22  ;;  %4517 = vmatprep.subr.bf16.mxu1 %v4203_v37  ;;  %v4028_v22 = vunpack.c.h.s8.bf16 %v3780_v30  ;;  %v4275_v37 = vunpack.c.l.s8.bf16 %v3907_v14  ;;  %v4237_v14 = vunpack.c.h.s8.bf16 %v3885_v4 }
 0x714   :  { %4558 = vmatprep.subr.bf16.mxu0 %v3949_v32  ;;  %v3899_v32 = vld [vmem:[#allocation17 + $0x558] sm:$0xff] }
 0x716   :  { %4518 = vmatpush1.bf16.msra.mxu1 %v4202_v38  ;;  %v4274_v38 = vunpack.c.l.s8.bf16 %v3906_v20  ;;  %v4229_v20 = vunpack.c.l.s8.bf16 %v3885_v4 }
 0x717   :  { %4559 = vmatpush1.bf16.msra.mxu0 %v3948_v10  ;;  %4519 = vmatprep.subr.bf16.mxu1 %v4195_v39  ;;  %v4020_v10 = vunpack.c.l.s8.bf16 %v3780_v30  ;;  %v4267_v39 = vunpack.c.h.s8.bf16 %v3899_v32 }
 0x718   :  { %4560 = vmatprep.subr.bf16.mxu0 %v3941_v44  ;;  %v3898_v44 = vld [vmem:[#allocation17 + $0x550] sm:$0xff] }
 0x71a   :  { %4520 = vmatpush1.bf16.msra.mxu1 %v4194_v51  ;;  %v4266_v51 = vunpack.c.h.s8.bf16 %v3898_v44 }
 0x71b   :  { %4561 = vmatpush1.bf16.msra.mxu0 %v3940_v47  ;;  %4521 = vmatprep.subr.bf16.mxu1 %v4187_v43  ;;  %v4012_v47 = vunpack.c.h.s8.bf16 %v3772_v0  ;;  %v4259_v43 = vunpack.c.l.s8.bf16 %v3899_v32 }
 0x71c   :  { %4562 = vmatprep.subr.bf16.mxu0 %v3933_v17  ;;  %v3891_v17 = vld [vmem:[#allocation17 + $0x518] sm:$0xff] }
 0x71e   :  { %4522 = vmatpush1.bf16.msra.mxu1 %v4186_v1  ;;  %v4258_v1 = vunpack.c.l.s8.bf16 %v3898_v44 }
 0x71f   :  { %4563 = vmatpush1.bf16.msra.mxu0 %v3932_v40  ;;  %4523 = vmatprep.subr.bf16.mxu1 %v4179_v33  ;;  %v4004_v40 = vunpack.c.l.s8.bf16 %v3772_v0  ;;  %v4251_v33 = vunpack.c.h.s8.bf16 %v3891_v17 }
 0x720   :  { %4564 = vmatprep.subr.bf16.mxu0 %v3925_v49  ;;  %v3890_v49 = vld [vmem:[#allocation17 + $0x510] sm:$0xff] }
 0x722   :  { %4524 = vmatpush1.bf16.msra.mxu1 %v4178_v46  ;;  %v4250_v46 = vunpack.c.h.s8.bf16 %v3890_v49 }
 0x723   :  { %4565 = vmatpush1.bf16.msra.mxu0 %v3924_v31  ;;  %4525 = vmatprep.subr.bf16.mxu1 %v4299_v28  ;;  %v3996_v31 = vunpack.c.h.s8.bf16 %v3764_v61  ;;  %v4243_v28 = vunpack.c.l.s8.bf16 %v3891_v17 }
 0x724   :  { %4566 = vmatprep.subr.bf16.mxu0 %v4045_v9  ;;  %v3821_v9 = vld [vmem:[#allocation17 + $0x2e8] sm:$0xff] }
 0x726   :  { %4526 = vmatpush2.bf16.msra.mxu1 %v4298_v6  ;;  %v4242_v6 = vunpack.c.l.s8.bf16 %v3890_v49 }
 0x727   :  { %4567 = vmatpush2.bf16.msra.mxu0 %v4044_v5  ;;  %4527 = vmatprep.subr.bf16.mxu1 %v4291_v35  ;;  %v3988_v5 = vunpack.c.l.s8.bf16 %v3764_v61  ;;  %v4109_v35 = vunpack.c.h.s8.bf16 %v3821_v9  ;;  %v3804_v61 = vld [vmem:[#allocation17 + $0x260] sm:$0xff] }
 0x728   :  { %4568 = vmatprep.subr.bf16.mxu0 %v4037_v13  ;;  %v3820_v13 = vld [vmem:[#allocation17 + $0x2e0] sm:$0xff] }
 0x72a   :  { %4528 = vmatpush2.bf16.msra.mxu1 %v4290_v15  ;;  %v4108_v15 = vunpack.c.h.s8.bf16 %v3820_v13 }
 0x72b   :  { %4569 = vmatpush2.bf16.msra.mxu0 %v4036_v48  ;;  %4529 = vmatprep.subr.bf16.mxu1 %v4283_v57  ;;  %v4236_v48 = vunpack.c.h.s8.bf16 %v3884_v55  ;;  %v4101_v57 = vunpack.c.l.s8.bf16 %v3821_v9  ;;  %v4069_v9 = vunpack.c.l.s8.bf16 %v3805_v56  ;;  %v3796_v55 = vld [vmem:[#allocation17 + $0x220] sm:$0xff] }
 0x72c   :  { %4570 = vmatprep.subr.bf16.mxu0 %v4029_v8  ;;  %v3813_v8 = vld [vmem:[#allocation17 + $0x2a8] sm:$0xff] }
 0x72d   :  { %v4085_v17 = vunpack.c.l.s8.bf16 %v3813_v8 }
 0x72e   :  { %4530 = vmatpush2.bf16.msra.mxu1 %v4282_v29  ;;  %v3877_v29 = vld [vmem:[#allocation17 + $0x4a8] sm:$0xff] }
 0x72f   :  { %4571 = vmatpush2.bf16.msra.mxu0 %v4028_v22  ;;  %4531 = vmatprep.subr.bf16.mxu1 %v4275_v37  ;;  %v4100_v37 = vunpack.c.l.s8.bf16 %v3820_v13  ;;  %v4221_v44 = vunpack.c.h.s8.bf16 %v3877_v29 }
 0x730   :  { %4572 = vmatprep.subr.bf16.mxu0 %v4021_v19 }
 0x732   :  { %4532 = vmatpush2.bf16.msra.mxu1 %v4274_v38  ;;  %v4093_v38 = vunpack.c.h.s8.bf16 %v3813_v8 }
 0x733   :  { %4573 = vmatpush2.bf16.msra.mxu0 %v4020_v10  ;;  %4533 = vmatprep.subr.bf16.mxu1 %v4267_v39  ;;  %v3812_v10 = vld [vmem:[#allocation17 + $0x2a0] sm:$0xff] }
 0x734   :  { %4574 = vmatprep.subr.bf16.mxu0 %v4013_v12  ;;  %v3876_v12 = vld [vmem:[#allocation17 + $0x4a0] sm:$0xff] }
 0x735   :  { %v4212_v49 = vunpack.c.l.s8.bf16 %v3876_v12 }
 0x736   :  { %4534 = vmatpush2.bf16.msra.mxu1 %v4266_v51  ;;  %v4092_v51 = vunpack.c.h.s8.bf16 %v3812_v10 }
 0x737   :  { %4575 = vmatpush2.bf16.msra.mxu0 %v4012_v47  ;;  %4535 = vmatprep.subr.bf16.mxu1 %v4259_v43 }
 0x738   :  { %4576 = vmatprep.subr.bf16.mxu0 %v4005_v27  ;;  %v4220_v27 = vunpack.c.h.s8.bf16 %v3876_v12  ;;  %v3916_v12 = vld [vmem:[#allocation17 + $0x5e0] sm:$0xff] }
 0x73a   :  { %4536 = vmatpush2.bf16.msra.mxu1 %v4258_v1 }
 0x73b   :  { %4577 = vmatpush2.bf16.msra.mxu0 %v4004_v40  ;;  %4537 = vmatprep.subr.bf16.mxu1 %v4251_v33  ;;  %v3869_v40 = vld [vmem:[#allocation17 + $0x468] sm:$0xff]  ;;  %v4084_v33 = vunpack.c.l.s8.bf16 %v3812_v10  ;;  %v3852_v10 = vld [vmem:[#allocation17 + $0x3e0] sm:$0xff] }
 0x73c   :  { %4578 = vmatprep.subr.bf16.mxu0 %v3997_v18  ;;  %v4077_v18 = vunpack.c.h.s8.bf16 %v3805_v56  ;;  %v4197_v4 = vunpack.c.l.s8.bf16 %v3869_v40  ;;  %v4292_v56 = vunpack.c.l.s8.bf16 %v3916_v12 }
 0x73e   :  { %4538 = vmatpush2.bf16.msra.mxu1 %v4250_v46  ;;  %v4205_v46 = vunpack.c.h.s8.bf16 %v3869_v40  ;;  %v3844_v40 = vld [vmem:[#allocation17 + $0x3a0] sm:$0xff] }
 0x73f   :  { %4579 = vmatpush2.bf16.msra.mxu0 %v3996_v31  ;;  %4539 = vmatprep.subr.bf16.mxu1 %v4243_v28  ;;  %v3868_v31 = vld [vmem:[#allocation17 + $0x460] sm:$0xff]  ;;  %v4076_v28 = vunpack.c.h.s8.bf16 %v3804_v61 }
 0x740   :  { %4580 = vmatprep.subr.bf16.mxu0 %v3989_v63  ;;  %v4204_v63 = vunpack.c.h.s8.bf16 %v3868_v31  ;;  %v4196_v13 = vunpack.c.l.s8.bf16 %v3868_v31 }
 0x742   :  { %4540 = vmatpush2.bf16.msra.mxu1 %v4242_v6  ;;  %v3797_v6 = vld [vmem:[#allocation17 + $0x228] sm:$0xff] }
 0x743   :  { %4581 = vmatpush2.bf16.msra.mxu0 %v3988_v5  ;;  %4591 = vmatprep.subr.bf16.mxu1 %v4109_v35  ;;  %v3861_v5 = vld [vmem:[#allocation17 + $0x428] sm:$0xff]  ;;  %v4068_v35 = vunpack.c.l.s8.bf16 %v3804_v61  ;;  %v4053_v8 = vunpack.c.l.s8.bf16 %v3797_v6 }
 0x744   :  { %4632 = vmatprep.subr.bf16.mxu0 %v4237_v14  ;;  %v4061_v14 = vunpack.c.h.s8.bf16 %v3797_v6 }
 0x745   :  { %v3605_v30 = vpop.f32.mrf.mxu1  ;;  %4542 = vmatmul.mubr.bf16.vlgmr.msra.gmra.mxu1 %v6730_v16 }
 0x746   :  { %v7471_v22 = vadd.f32 %v3605_v30, %v7462_v11  ;;  %4583 = vmatmul.mubr.bf16.vlgmr.msra.gmra.mxu0 %v6734_v50  ;;  %4592 = vmatpush1.bf16.msra.mxu1 %v4108_v15  ;;  %v7474_v19 = vpop.f32.mrf.mxu0  ;;  %v4189_v15 = vunpack.c.h.s8.bf16 %v3861_v5  ;;  %v4181_v30 = vunpack.c.l.s8.bf16 %v3861_v5  ;;  %v3836_v5 = vld [vmem:[#allocation17 + $0x360] sm:$0xff] }
 0x747   :  { %4633 = vmatpush1.bf16.msra.mxu0 %v4236_v48  ;;  %v3607_v32 = vpop.f32.mrf.mxu1  ;;  %4593 = vmatprep.subr.bf16.mxu1 %v4101_v57  ;;  %v3860_v48 = vld [vmem:[#allocation17 + $0x420] sm:$0xff]  ;;  %v4060_v57 = vunpack.c.h.s8.bf16 %v3796_v55 }
 0x748   :  { %v7477_v39 = vadd.f32 %v3607_v32, %v7467_v54  ;;  %4634 = vmatprep.subr.bf16.mxu0 %v4229_v20  ;;  %v7479_v11 = vpop.f32.mrf.mxu0  ;;  %4623 = vmatprep.mubr.bf16.mxu1 %v6720_v53  ;;  %v4213_v54 = vunpack.c.l.s8.bf16 %v3877_v29  ;;  %v4188_v20 = vunpack.c.h.s8.bf16 %v3860_v48  ;;  %v3853_v29 = vld [vmem:[#allocation17 + $0x3e8] sm:$0xff]  ;;  %v4052_v32 = vunpack.c.l.s8.bf16 %v3796_v55 }
 0x749   :  { %v3609_v0 = vpop.f32.mrf.mxu1  ;;  %4664 = vmatprep.mubr.bf16.mxu0 %v6743_v2 }
 0x74a   :  { %4594 = vmatpush1.bf16.msra.mxu1 %v4100_v37  ;;  %v4342_v47 = vpop.f32.mrf.mxu0  ;;  %v3917_v37 = vld [vmem:[#allocation17 + $0x5e8] sm:$0xff]  ;;  %v4172_v0 = vunpack.c.h.s8.bf16 %v3852_v10 }
 0x74b   :  { %4635 = vmatpush1.bf16.msra.mxu0 %v4228_v58  ;;  %v3610_v43 = vpop.f32.mrf.mxu1  ;;  %4595 = vmatprep.subr.bf16.mxu1 %v4093_v38  ;;  %v4180_v58 = vunpack.c.l.s8.bf16 %v3860_v48  ;;  %v4173_v38 = vunpack.c.h.s8.bf16 %v3853_v29  ;;  %v4165_v47 = vunpack.c.l.s8.bf16 %v3853_v29 }
 0x74c   :  { %4636 = vmatprep.subr.bf16.mxu0 %v4221_v44  ;;  %v4343_v1 = vpop.f32.mrf.mxu0  ;;  %v4301_v44 = vunpack.c.h.s8.bf16 %v3917_v37  ;;  %v4293_v43 = vunpack.c.l.s8.bf16 %v3917_v37  ;;  %v3828_v37 = vld [vmem:[#allocation17 + $0x320] sm:$0xff] }
 0x74e   :  { %4596 = vmatpush1.bf16.msra.mxu1 %v4092_v51  ;;  %v4300_v51 = vunpack.c.h.s8.bf16 %v3916_v12 }
 0x74f   :  { %4637 = vmatpush1.bf16.msra.mxu0 %v4220_v27  ;;  %4597 = vmatprep.subr.bf16.mxu1 %v4085_v17  ;;  %v3845_v27 = vld [vmem:[#allocation17 + $0x3a8] sm:$0xff] }
 0x750   :  { %4638 = vmatprep.subr.bf16.mxu0 %v4213_v54  ;;  %v3909_v17 = vld [vmem:[#allocation17 + $0x5a8] sm:$0xff]  ;;  %v4164_v54 = vunpack.c.l.s8.bf16 %v3852_v10  ;;  %v4157_v1 = vunpack.c.h.s8.bf16 %v3845_v27  ;;  %v4124_v10 = vunpack.c.h.s8.bf16 %v3828_v37 }
 0x751   :  { %v4277_v31 = vunpack.c.l.s8.bf16 %v3909_v17 }
 0x752   :  { %4598 = vmatpush1.bf16.msra.mxu1 %v4084_v33  ;;  %v4285_v33 = vunpack.c.h.s8.bf16 %v3909_v17  ;;  %v3823_v17 = vld [vmem:[#allocation17 + $0x2f8] sm:$0xff] }
 0x753   :  { %4639 = vmatpush1.bf16.msra.mxu0 %v4212_v49  ;;  %4599 = vmatprep.subr.bf16.mxu1 %v4077_v18  ;;  %v3908_v49 = vld [vmem:[#allocation17 + $0x5a0] sm:$0xff]  ;;  %v4156_v18 = vunpack.c.h.s8.bf16 %v3844_v40 }
 0x754   :  { %4640 = vmatprep.subr.bf16.mxu0 %v4205_v46  ;;  %v4284_v61 = vunpack.c.h.s8.bf16 %v3908_v49  ;;  %v4149_v46 = vunpack.c.l.s8.bf16 %v3845_v27 }
 0x756   :  { %4600 = vmatpush1.bf16.msra.mxu1 %v4076_v28  ;;  %v3837_v28 = vld [vmem:[#allocation17 + $0x368] sm:$0xff] }
 0x757   :  { %4641 = vmatpush1.bf16.msra.mxu0 %v4204_v63  ;;  %4601 = vmatprep.subr.bf16.mxu1 %v4069_v9  ;;  %v3901_v63 = vld [vmem:[#allocation17 + $0x568] sm:$0xff]  ;;  %v4148_v9 = vunpack.c.l.s8.bf16 %v3844_v40  ;;  %v4141_v6 = vunpack.c.h.s8.bf16 %v3837_v28 }
 0x758   :  { %4642 = vmatprep.subr.bf16.mxu0 %v4197_v4  ;;  %v4276_v4 = vunpack.c.l.s8.bf16 %v3908_v49  ;;  %v4261_v48 = vunpack.c.l.s8.bf16 %v3901_v63  ;;  %v3758_v49 = vld [vmem:[#allocation17 + $0xf0] sm:$0xff] }
 0x75a   :  { %4602 = vmatpush1.bf16.msra.mxu1 %v4068_v35  ;;  %v4269_v35 = vunpack.c.h.s8.bf16 %v3901_v63 }
 0x75b   :  { %4643 = vmatpush1.bf16.msra.mxu0 %v4196_v13  ;;  %4603 = vmatprep.subr.bf16.mxu1 %v4061_v14  ;;  %v3900_v13 = vld [vmem:[#allocation17 + $0x560] sm:$0xff]  ;;  %v4140_v14 = vunpack.c.h.s8.bf16 %v3836_v5 }
 0x75c   :  { %4644 = vmatprep.subr.bf16.mxu0 %v4189_v15  ;;  %v4268_v55 = vunpack.c.h.s8.bf16 %v3900_v13  ;;  %v4133_v15 = vunpack.c.l.s8.bf16 %v3837_v28  ;;  %v3982_v28 = vunpack.c.h.s8.bf16 %v3758_v49 }
 0x75e   :  { %4604 = vmatpush1.bf16.msra.mxu1 %v4060_v57  ;;  %v3829_v57 = vld [vmem:[#allocation17 + $0x328] sm:$0xff] }
 0x75f   :  { %4645 = vmatpush1.bf16.msra.mxu0 %v4188_v20  ;;  %4605 = vmatprep.subr.bf16.mxu1 %v4053_v8  ;;  %v3893_v20 = vld [vmem:[#allocation17 + $0x528] sm:$0xff]  ;;  %v4132_v8 = vunpack.c.l.s8.bf16 %v3836_v5  ;;  %v4125_v29 = vunpack.c.h.s8.bf16 %v3829_v57  ;;  %v4103_v5 = vunpack.c.l.s8.bf16 %v3823_v17 }
 0x760   :  { %4646 = vmatprep.subr.bf16.mxu0 %v4181_v30  ;;  %v4260_v30 = vunpack.c.l.s8.bf16 %v3900_v13 }
 0x762   :  { %4606 = vmatpush1.bf16.msra.mxu1 %v4052_v32  ;;  %v7483_v32 = vld [vmem:[#allocation14] sm:$0xff] }
 0x763   :  { %4647 = vmatpush1.bf16.msra.mxu0 %v4180_v58  ;;  %4607 = vmatprep.subr.bf16.mxu1 %v4173_v38  ;;  %v4253_v58 = vunpack.c.h.s8.bf16 %v3893_v20  ;;  %v3892_v38 = vld [vmem:[#allocation17 + $0x520] sm:$0xff]  ;;  %v3621_v27 = vrot.slane %v7483_v32, %v6767_v36 }
 0x764   :  { %4648 = vmatprep.subr.bf16.mxu0 %v4301_v44  ;;  %v3617_v44 = vrot.slane %v7483_v32, %v6762_v7  ;;  %v4252_v12 = vunpack.c.h.s8.bf16 %v3892_v38  ;;  %v4244_v40 = vunpack.c.l.s8.bf16 %v3892_v38 }
 0x766   :  { %4608 = vmatpush2.bf16.msra.mxu1 %v4172_v0  ;;  %v4117_v0 = vunpack.c.l.s8.bf16 %v3829_v57  ;;  %v3974_v57 = vunpack.c.l.s8.bf16 %v3758_v49 }
 0x767   :  { %4649 = vmatpush2.bf16.msra.mxu0 %v4300_v51  ;;  %4609 = vmatprep.subr.bf16.mxu1 %v4165_v47  ;;  %v7487_v51 = vld [vmem:[#allocation16] sm:$0xff]  ;;  %v4245_v47 = vunpack.c.l.s8.bf16 %v3893_v20 }
 0x768   :  { %4650 = vmatprep.subr.bf16.mxu0 %v4293_v43  ;;  %v3759_v43 = vld [vmem:[#allocation17 + $0xf8] sm:$0xff] }
 0x76a   :  { %4610 = vmatpush2.bf16.msra.mxu1 %v4164_v54  ;;  %v4116_v54 = vunpack.c.l.s8.bf16 %v3828_v37 }
 0x76b   :  { %4651 = vmatpush2.bf16.msra.mxu0 %v4292_v56  ;;  %4611 = vmatprep.subr.bf16.mxu1 %v4157_v1  ;;  %v3654_v56 = vmul.f32 %v3617_v44, %v7402_v34  ;;  %v3667_v1 = vrot.slane %v7487_v51, %v6762_v7 }
 0x76c   :  { %4652 = vmatprep.subr.bf16.mxu0 %v4285_v33  ;;  %v3983_v33 = vunpack.c.h.s8.bf16 %v3759_v43 }
 0x76d   :  { %v3704_v63 = vadd.f32 %v3667_v1, %v3654_v56 }
 0x76e   :  { %4612 = vmatpush2.bf16.msra.mxu1 %v4156_v18  ;;  %v4111_v18 = vunpack.c.h.s8.bf16 %v3823_v17 }
 0x76f   :  { %4653 = vmatpush2.bf16.msra.mxu0 %v4284_v61  ;;  %4613 = vmatprep.subr.bf16.mxu1 %v4149_v46  ;;  %v3822_v61 = vld [vmem:[#allocation17 + $0x2f0] sm:$0xff]  ;;  %v3655_v46 = vmul.f32 %v3621_v27, %v7409_v59  ;;  %v3815_v59 = vld [vmem:[#allocation17 + $0x2b8] sm:$0xff]  ;;  %v3712_v20 = vmul.f32 0.1, %v3704_v63 }
 0x770   :  { %4654 = vmatprep.subr.bf16.mxu0 %v4277_v31  ;;  %v3671_v31 = vrot.slane %v7487_v51, %v6767_v36  ;;  %v4110_v34 = vunpack.c.h.s8.bf16 %v3822_v61 }
 0x772   :  { %4614 = vmatpush2.bf16.msra.mxu1 %v4148_v9  ;;  %v7497_v9 = vld [vmem:[#allocation19] sm:$0xff]  ;;  %v3705_v13 = vadd.f32 %v3671_v31, %v3655_v46  ;;  %v3807_v46 = vld [vmem:[#allocation17 + $0x278] sm:$0xff] }
 0x773   :  { %4655 = vmatpush2.bf16.msra.mxu0 %v4276_v4  ;;  %4615 = vmatprep.subr.bf16.mxu1 %v4141_v6  ;;  %v3975_v4 = vunpack.c.l.s8.bf16 %v3759_v43  ;;  %v7499_v6 = vld [vmem:[#allocation20] sm:$0xff]  ;;  %v4805_v44 = vrot.slane %v7497_v9, %v6767_v36 }
 0x774   :  { %4656 = vmatprep.subr.bf16.mxu0 %v4269_v35  ;;  %v3751_v35 = vld [vmem:[#allocation17 + $0xb8] sm:$0xff]  ;;  %v4855_v17 = vrot.slane %v7499_v6, %v6767_v36 }
 0x775   :  { %v3967_v37 = vunpack.c.h.s8.bf16 %v3751_v35 }
 0x776   :  { %4616 = vmatpush2.bf16.msra.mxu1 %v4140_v14 }
 0x777   :  { %4657 = vmatpush2.bf16.msra.mxu0 %v4268_v55  ;;  %4617 = vmatprep.subr.bf16.mxu1 %v4133_v15 }
 0x778   :  { %4658 = vmatprep.subr.bf16.mxu0 %v4261_v48  ;;  %v4801_v48 = vrot.slane %v7497_v9, %v6762_v7 }
 0x77a   :  { %4618 = vmatpush2.bf16.msra.mxu1 %v4132_v8 }
 0x77b   :  { %4659 = vmatpush2.bf16.msra.mxu0 %v4260_v30  ;;  %4619 = vmatprep.subr.bf16.mxu1 %v4125_v29  ;;  %v4851_v30 = vrot.slane %v7499_v6, %v6762_v7  ;;  %v4102_v29 = vunpack.c.l.s8.bf16 %v3822_v61  ;;  %v3743_v61 = vld [vmem:[#allocation17 + $0x78] sm:$0xff] }
 0x77c   :  { %4660 = vmatprep.subr.bf16.mxu0 %v4253_v58  ;;  %v3750_v58 = vld [vmem:[#allocation17 + $0xb0] sm:$0xff] }
 0x77d   :  { %v3958_v36 = vunpack.c.l.s8.bf16 %v3750_v58 }
 0x77e   :  { %4620 = vmatpush2.bf16.msra.mxu1 %v4124_v10 }
 0x77f   :  { %4661 = vmatpush2.bf16.msra.mxu0 %v4252_v12  ;;  %4621 = vmatprep.subr.bf16.mxu1 %v4117_v0  ;;  %v4095_v12 = vunpack.c.h.s8.bf16 %v3815_v59  ;;  %v3814_v0 = vld [vmem:[#allocation17 + $0x2b0] sm:$0xff] }
 0x780   :  { %4662 = vmatprep.subr.bf16.mxu0 %v4245_v47  ;;  %v3713_v47 = vmul.f32 0.1, %v3705_v13  ;;  %v4094_v1 = vunpack.c.h.s8.bf16 %v3814_v0 }
 0x782   :  { %4622 = vmatpush2.bf16.msra.mxu1 %v4116_v54 }
 0x783   :  { %4663 = vmatpush2.bf16.msra.mxu0 %v4244_v40  ;;  %4673 = vmatprep.subr.bf16.mxu1 %v3983_v33  ;;  %v3959_v40 = vunpack.c.l.s8.bf16 %v3751_v35  ;;  %v3720_v33 = vmax.f32 %v3704_v63, %v3712_v20  ;;  %v4079_v63 = vunpack.c.h.s8.bf16 %v3807_v46  ;;  %v3806_v35 = vld [vmem:[#allocation17 + $0x270] sm:$0xff]  ;;  %v3735_v20 = vld [vmem:[#allocation17 + $0x38] sm:$0xff] }
 0x784   :  { %4714 = vmatprep.subr.bf16.mxu0 %v4111_v18  ;;  %v4087_v18 = vunpack.c.l.s8.bf16 %v3815_v59 }
 0x785   :  { %v4379_v14 = vpop.f32.mrf.mxu1  ;;  %4624 = vmatmul.mubr.bf16.vlgmr.msra.gmra.mxu1 %v6740_v60 }
 0x786   :  { %v4380_v55 = vadd.f32 %v4379_v14, %v7474_v19  ;;  %4665 = vmatmul.mubr.bf16.vlgmr.msra.gmra.mxu0 %v6730_v16  ;;  %4674 = vmatpush1.bf16.msra.mxu1 %v3982_v28  ;;  %v4420_v15 = vpop.f32.mrf.mxu0  ;;  %v3742_v14 = vld [vmem:[#allocation17 + $0x70] sm:$0xff] }
 0x787   :  { %4715 = vmatpush1.bf16.msra.mxu0 %v4110_v34  ;;  %v4381_v8 = vpop.f32.mrf.mxu1  ;;  %4675 = vmatprep.subr.bf16.mxu1 %v3975_v4  ;;  %v3721_v34 = vmax.f32 %v3705_v13, %v3713_v47  ;;  %v4086_v4 = vunpack.c.l.s8.bf16 %v3814_v0  ;;  %v3950_v59 = vunpack.c.h.s8.bf16 %v3742_v14  ;;  %v3799_v13 = vld [vmem:[#allocation17 + $0x238] sm:$0xff] }
 0x788   :  { %v4382_v19 = vadd.f32 %v4381_v8, %v7479_v11  ;;  %v4421_v38 = vadd.f32 %v4420_v15, %v4380_v55  ;;  %v4422_v10 = vpop.f32.mrf.mxu0  ;;  %4716 = vmatprep.subr.bf16.mxu0 %v4103_v5  ;;  %4705 = vmatprep.mubr.bf16.mxu1 %v6715_v52  ;;  %v3966_v11 = vunpack.c.h.s8.bf16 %v3750_v58  ;;  %v3951_v5 = vunpack.c.h.s8.bf16 %v3743_v61  ;;  %v3791_v0 = vld [vmem:[#allocation17 + $0x1f8] sm:$0xff] }
 0x789   :  { %v4383_v43 = vpop.f32.mrf.mxu1  ;;  %4746 = vmatprep.mubr.bf16.mxu0 %v6720_v53  ;;  %v4078_v15 = vunpack.c.h.s8.bf16 %v3806_v35  ;;  %v3942_v8 = vunpack.c.l.s8.bf16 %v3742_v14  ;;  %v4063_v58 = vunpack.c.h.s8.bf16 %v3799_v13  ;;  %v3855_v47 = vld [vmem:[#allocation17 + $0x3f8] sm:$0xff] }
 0x78a   :  { %v4838_v7 = vmul.f32 %v4801_v48, %v4421_v38  ;;  %v4423_v27 = vadd.f32 %v4422_v10, %v4382_v19  ;;  %4676 = vmatpush1.bf16.msra.mxu1 %v3974_v57  ;;  %v4424_v54 = vpop.f32.mrf.mxu0  ;;  %v3943_v48 = vunpack.c.l.s8.bf16 %v3743_v61  ;;  %v4071_v57 = vunpack.c.l.s8.bf16 %v3807_v46  ;;  %v3798_v19 = vld [vmem:[#allocation17 + $0x230] sm:$0xff] }
 0x78b   :  { %4717 = vmatpush1.bf16.msra.mxu0 %v4102_v29  ;;  %v4384_v56 = vpop.f32.mrf.mxu1  ;;  %4677 = vmatprep.subr.bf16.mxu1 %v3967_v37  ;;  %v3935_v29 = vunpack.c.h.s8.bf16 %v3735_v20  ;;  %v3734_v37 = vld [vmem:[#allocation17 + $0x30] sm:$0xff]  ;;  %v4062_v10 = vunpack.c.h.s8.bf16 %v3798_v19 }
 0x78c   :  { %v4888_v49 = vadd.f32 %v4851_v30, %v4838_v7  ;;  %v4839_v52 = vmul.f32 %v4805_v44, %v4423_v27  ;;  %4718 = vmatprep.subr.bf16.mxu0 %v4095_v12  ;;  %v4425_v53 = vpop.f32.mrf.mxu0  ;;  %v4070_v30 = vunpack.c.l.s8.bf16 %v3806_v35  ;;  %v3934_v38 = vunpack.c.h.s8.bf16 %v3734_v37  ;;  %v3854_v54 = vld [vmem:[#allocation17 + $0x3f0] sm:$0xff]  ;;  %v3839_v35 = vld [vmem:[#allocation17 + $0x378] sm:$0xff] }
 0x78d   :  { %v3927_v44 = vunpack.c.l.s8.bf16 %v3735_v20  ;;  %v4055_v12 = vunpack.c.l.s8.bf16 %v3799_v13  ;;  %v3926_v43 = vunpack.c.l.s8.bf16 %v3734_v37  ;;  %v4054_v7 = vunpack.c.l.s8.bf16 %v3798_v19  ;;  %v3782_v46 = vld [vmem:[#allocation17 + $0x1b0] sm:$0xff]  ;;  %v3831_v19 = vld [vmem:[#allocation17 + $0x338] sm:$0xff] }
 0x78e   :  { %v7515_v31 = vadd.f32 %v4888_v49, %v3720_v33  ;;  %v4889_v28 = vadd.f32 %v4855_v17, %v4839_v52  ;;  %4678 = vmatpush1.bf16.msra.mxu1 %v3966_v11  ;;  %v4047_v27 = vunpack.c.h.s8.bf16 %v3791_v0  ;;  %v3790_v17 = vld [vmem:[#allocation17 + $0x1f0] sm:$0xff]  ;;  %v4175_v11 = vunpack.c.h.s8.bf16 %v3855_v47  ;;  %v3783_v49 = vld [vmem:[#allocation17 + $0x1b8] sm:$0xff] }
 0x78f   :  { %4719 = vmatpush1.bf16.msra.mxu0 %v4094_v1  ;;  %4679 = vmatprep.subr.bf16.mxu1 %v3959_v40  ;;  %v4046_v56 = vunpack.c.h.s8.bf16 %v3790_v17  ;;  %v4174_v1 = vunpack.c.h.s8.bf16 %v3854_v54  ;;  %v4039_v40 = vunpack.c.l.s8.bf16 %v3791_v0  ;;  %v4167_v33 = vunpack.c.l.s8.bf16 %v3855_v47  ;;  %v3847_v52 = vld [vmem:[#allocation17 + $0x3b8] sm:$0xff]  ;;  %v3838_v13 = vld [vmem:[#allocation17 + $0x370] sm:$0xff] }
 0x790   :  { %4720 = vmatprep.subr.bf16.mxu0 %v4087_v18  ;;  %v7517_v55 = vadd.f32 %v4889_v28, %v3721_v34  ;;  %v4038_v18 = vunpack.c.l.s8.bf16 %v3790_v17  ;;  %v4166_v61 = vunpack.c.l.s8.bf16 %v3854_v54  ;;  %v4031_v53 = vunpack.c.h.s8.bf16 %v3783_v49  ;;  %v3830_v47 = vld [vmem:[#allocation17 + $0x330] sm:$0xff] }
 0x791   :  { %v4159_v28 = vunpack.c.h.s8.bf16 %v3847_v52  ;;  %v4030_v34 = vunpack.c.h.s8.bf16 %v3782_v46  ;;  %v4151_v14 = vunpack.c.l.s8.bf16 %v3847_v52  ;;  %v4143_v20 = vunpack.c.h.s8.bf16 %v3839_v35 }
 0x792   :  { %4680 = vmatpush1.bf16.msra.mxu1 %v3958_v36  ;;  %v3846_v36 = vld [vmem:[#allocation17 + $0x3b0] sm:$0xff]  ;;  %v4135_v37 = vunpack.c.l.s8.bf16 %v3839_v35  ;;  %v4127_v0 = vunpack.c.h.s8.bf16 %v3831_v19  ;;  %v4119_v17 = vunpack.c.l.s8.bf16 %v3831_v19  ;;  %v6072_v19 = vld [vmem:[%s7832_s17 + $0xe8] sm:$0xff]  }
 0x793   :  { %4721 = vmatpush1.bf16.msra.mxu0 %v4086_v4  ;;  %4681 = vmatprep.subr.bf16.mxu1 %v3951_v5  ;;  %v4158_v4 = vunpack.c.h.s8.bf16 %v3846_v36  ;;  %v4023_v5 = vunpack.c.l.s8.bf16 %v3783_v49 }
 0x794   :  { %4722 = vmatprep.subr.bf16.mxu0 %v4079_v63  ;;  %v3775_v63 = vld [vmem:[#allocation17 + $0x178] sm:$0xff] }
 0x796   :  { %4682 = vmatpush1.bf16.msra.mxu1 %v3950_v59  ;;  %v4022_v59 = vunpack.c.l.s8.bf16 %v3782_v46  ;;  %v6068_v46 = vld [vmem:[%s7832_s17 + $0xf8] sm:$0xff]  }
 0x797   :  { %4723 = vmatpush1.bf16.msra.mxu0 %v4078_v15  ;;  %4683 = vmatprep.subr.bf16.mxu1 %v3943_v48  ;;  %v4150_v15 = vunpack.c.l.s8.bf16 %v3846_v36  ;;  %v4015_v48 = vunpack.c.h.s8.bf16 %v3775_v63 }
 0x798   :  { %4724 = vmatprep.subr.bf16.mxu0 %v4071_v57  ;;  %v3774_v57 = vld [vmem:[#allocation17 + $0x170] sm:$0xff] }
 0x79a   :  { %4684 = vmatpush1.bf16.msra.mxu1 %v3942_v8  ;;  %v4014_v8 = vunpack.c.h.s8.bf16 %v3774_v57 }
 0x79b   :  { %4725 = vmatpush1.bf16.msra.mxu0 %v4070_v30  ;;  %4685 = vmatprep.subr.bf16.mxu1 %v3935_v29  ;;  %v4142_v30 = vunpack.c.h.s8.bf16 %v3838_v13  ;;  %v4007_v29 = vunpack.c.l.s8.bf16 %v3775_v63  ;;  %v3878_v63 = vld [vmem:[#allocation17 + $0x4b0] sm:$0xff] }
 0x79c   :  { %4726 = vmatprep.subr.bf16.mxu0 %v4063_v58  ;;  %v3767_v58 = vld [vmem:[#allocation17 + $0x138] sm:$0xff] }
 0x79e   :  { %4686 = vmatpush1.bf16.msra.mxu1 %v3934_v38  ;;  %v4006_v38 = vunpack.c.l.s8.bf16 %v3774_v57  ;;  %v5040_v57 = vld [vmem:[%s7864_s15] sm:$0x1] }
 0x79f   :  { %4727 = vmatpush1.bf16.msra.mxu0 %v4062_v10  ;;  %4687 = vmatprep.subr.bf16.mxu1 %v3927_v44  ;;  %v4134_v10 = vunpack.c.l.s8.bf16 %v3838_v13  ;;  %v3999_v44 = vunpack.c.h.s8.bf16 %v3767_v58  ;;  %v3871_v13 = vld [vmem:[#allocation17 + $0x478] sm:$0xff] }
 0x7a0   :  { %4728 = vmatprep.subr.bf16.mxu0 %v4055_v12  ;;  %v3766_v12 = vld [vmem:[#allocation17 + $0x130] sm:$0xff] }
 0x7a1   :  { %v3990_v54 = vunpack.c.l.s8.bf16 %v3766_v12 }
 0x7a2   :  { %4688 = vmatpush1.bf16.msra.mxu1 %v3926_v43  ;;  %v3998_v43 = vunpack.c.h.s8.bf16 %v3766_v12  ;;  %v3863_v12 = vld [vmem:[#allocation17 + $0x438] sm:$0xff] }
 0x7a3   :  { %4729 = vmatpush1.bf16.msra.mxu0 %v4054_v7  ;;  %4689 = vmatprep.subr.bf16.mxu1 %v4047_v27  ;;  %v4126_v7 = vunpack.c.h.s8.bf16 %v3830_v47  ;;  %v3991_v27 = vunpack.c.l.s8.bf16 %v3767_v58  ;;  %v6071_v58 = vld [vmem:[%s7832_s17 + $0xb0] sm:$0xff]  }
 0x7a4   :  { %4730 = vmatprep.subr.bf16.mxu0 %v4175_v11  ;;  %v3887_v11 = vld [vmem:[#allocation17 + $0x4f8] sm:$0xff] }
 0x7a5   :  { %v4231_v52 = vunpack.c.l.s8.bf16 %v3887_v11 }
 0x7a6   :  { %4690 = vmatpush2.bf16.msra.mxu1 %v4046_v56  ;;  %v4118_v56 = vunpack.c.l.s8.bf16 %v3830_v47 }
 0x7a7   :  { %4731 = vmatpush2.bf16.msra.mxu0 %v4174_v1  ;;  %4691 = vmatprep.subr.bf16.mxu1 %v4039_v40  ;;  %v4239_v1 = vunpack.c.h.s8.bf16 %v3887_v11  ;;  %v3886_v40 = vld [vmem:[#allocation17 + $0x4f0] sm:$0xff] }
 0x7a8   :  { %4732 = vmatprep.subr.bf16.mxu0 %v4167_v33  ;;  %v5041_v33 = vld [vmem:[#allocation22] sm:$0xf]  ;;  %v4238_v49 = vunpack.c.h.s8.bf16 %v3886_v40 }
 0x7aa   :  { %4692 = vmatpush2.bf16.msra.mxu1 %v4038_v18  ;;  %v3879_v18 = vld [vmem:[#allocation17 + $0x4b8] sm:$0xff] }
 0x7ab   :  { %4733 = vmatpush2.bf16.msra.mxu0 %v4166_v61  ;;  %4693 = vmatprep.subr.bf16.mxu1 %v4031_v53  ;;  %v6498_v61 = vmov 0.0   ;;  %v5048_v53 = vsel %vm5046_vm0, %v5041_v33, 0 }
 0x7ac   :  { %4734 = vmatprep.subr.bf16.mxu0 %v4159_v28 }
 0x7ae   :  { %4694 = vmatpush2.bf16.msra.mxu1 %v4030_v34  ;;  %v4230_v34 = vunpack.c.l.s8.bf16 %v3886_v40  ;;  %v6080_v40 = vld [vmem:[%s7832_s17 + $0xd0] sm:$0xff]  }
 0x7af   :  { %4735 = vmatpush2.bf16.msra.mxu0 %v4158_v4  ;;  %4695 = vmatprep.subr.bf16.mxu1 %v4023_v5 }
 0x7b0   :  { %4736 = vmatprep.subr.bf16.mxu0 %v4151_v14  ;;  %v4223_v14 = vunpack.c.h.s8.bf16 %v3879_v18 }
 0x7b2   :  { %4696 = vmatpush2.bf16.msra.mxu1 %v4022_v59 }
 0x7b3   :  { %4737 = vmatpush2.bf16.msra.mxu0 %v4150_v15  ;;  %4697 = vmatprep.subr.bf16.mxu1 %v4015_v48  ;;  %v4215_v48 = vunpack.c.l.s8.bf16 %v3879_v18  ;;  %v6081_v18 = vld [vmem:[%s7832_s17 + $0x90] sm:$0xff]  }
 0x7b4   :  { %4738 = vmatprep.subr.bf16.mxu0 %v4143_v20  ;;  %v6069_v20 = vld [vmem:[%s7832_s17 + $0xb8] sm:$0xff]  }
 0x7b6   :  { %4698 = vmatpush2.bf16.msra.mxu1 %v4014_v8 }
 0x7b7   :  { %4739 = vmatpush2.bf16.msra.mxu0 %v4142_v30  ;;  %4699 = vmatprep.subr.bf16.mxu1 %v4007_v29  ;;  %v4214_v30 = vunpack.c.l.s8.bf16 %v3878_v63  ;;  %v4207_v29 = vunpack.c.h.s8.bf16 %v3871_v13 }
 0x7b8   :  { %4740 = vmatprep.subr.bf16.mxu0 %v4135_v37  ;;  %v3870_v37 = vld [vmem:[#allocation17 + $0x470] sm:$0xff] }
 0x7b9   :  { %v4198_v47 = vunpack.c.l.s8.bf16 %v3870_v37 }
 0x7ba   :  { %4700 = vmatpush2.bf16.msra.mxu1 %v4006_v38  ;;  %v4206_v38 = vunpack.c.h.s8.bf16 %v3870_v37 }
 0x7bb   :  { %4741 = vmatpush2.bf16.msra.mxu0 %v4134_v10  ;;  %4701 = vmatprep.subr.bf16.mxu1 %v3999_v44  ;;  %v4199_v10 = vunpack.c.l.s8.bf16 %v3871_v13  ;;  %v6073_v44 = vld [vmem:[%s7832_s17 + $0xa8] sm:$0xff]  }
 0x7bc   :  { %4742 = vmatprep.subr.bf16.mxu0 %v4127_v0  ;;  %v6074_v0 = vld [vmem:[%s7832_s17 + $0xe0] sm:$0xff]  }
 0x7be   :  { %4702 = vmatpush2.bf16.msra.mxu1 %v3998_v43  ;;  %v4191_v43 = vunpack.c.h.s8.bf16 %v3863_v12 }
 0x7bf   :  { %4743 = vmatpush2.bf16.msra.mxu0 %v4126_v7  ;;  %4703 = vmatprep.subr.bf16.mxu1 %v3991_v27  ;;  %v3862_v7 = vld [vmem:[#allocation17 + $0x430] sm:$0xff]  ;;  %v6075_v27 = vld [vmem:[%s7832_s17 + $0xa0] sm:$0xff]  }
 0x7c0   :  { %4744 = vmatprep.subr.bf16.mxu0 %v4119_v17  ;;  %v6076_v17 = vld [vmem:[%s7832_s17 + $0xd8] sm:$0xff]   ;;  %v4190_v11 = vunpack.c.h.s8.bf16 %v3862_v7  ;;  %v4182_v33 = vunpack.c.l.s8.bf16 %v3862_v7 }
 0x7c1   :  { %v6078_v7 = vld [vmem:[%s7832_s17 + $0x78] sm:$0xff]  }
 0x7c2   :  { %4704 = vmatpush2.bf16.msra.mxu1 %v3990_v54  ;;  %v4183_v54 = vunpack.c.l.s8.bf16 %v3863_v12  ;;  %v3629_v12 = vrot.slane %v7483_v32, %v6791_v26 }
 0x7c3   :  { %4745 = vmatpush2.bf16.msra.mxu0 %v4118_v56  ;;  %4755 = vmatprep.subr.bf16.mxu1 %v4239_v1  ;;  %v6077_v56 = vld [vmem:[%s7832_s17 + $0x98] sm:$0xff]  }
 0x7c4   :  { %6018 = vmatprep.subr.bf16.mxu0 %v6498_v61  ;;  %v3919_v1 = vld [vmem:[#allocation17 + $0x5f8] sm:$0xff] }
 0x7c5   :  { %v4461_v28 = vpop.f32.mrf.mxu1  ;;  %4706 = vmatmul.mubr.bf16.vlgmr.msra.gmra.mxu1 %v6734_v50 }
 0x7c6   :  { %v4502_v36 = vpop.f32.mrf.mxu0  ;;  %4747 = vmatmul.mubr.bf16.vlgmr.msra.gmra.mxu0 %v6740_v60  ;;  %4756 = vmatpush1.bf16.msra.mxu1 %v4238_v49  ;;  %v4222_v60 = vunpack.c.h.s8.bf16 %v3878_v63  ;;  %v4303_v49 = vunpack.c.h.s8.bf16 %v3919_v1 }
 0x7c7   :  { %v7526_v4 = vadd.f32 %v4502_v36, %v4461_v28  ;;  %v7528_v5 = vpop.f32.mrf.mxu1  ;;  %4757 = vmatprep.subr.bf16.mxu1 %v4231_v52  ;;  %6019 = vmatpush3.bf16.msra.mxu0 %v5048_v53  ;;  %v3918_v52 = vld [vmem:[#allocation17 + $0x5f0] sm:$0xff]  ;;  %v6084_v53 = vld [vmem:[%s7832_s17 + $0xc8] sm:$0xff]   ;;  %v4295_v28 = vunpack.c.l.s8.bf16 %v3919_v1  ;;  %v4809_v1 = vrot.slane %v7497_v9, %v6788_v23 }
 0x7c8   :  { %v7530_v35 = vpop.f32.mrf.mxu0  ;;  %6020 = vmatprep.mubr.msk.bf16.mxu0 %vm6499_vm1, %v6498_v61  ;;  %5945 = vmatprep.subr.bf16.mxu0 %v6068_v46  ;;  %v4302_v46 = vunpack.c.h.s8.bf16 %v3918_v52  ;;  %v6085_v36 = vld [vmem:[%s7832_s17 + $0x88] sm:$0xff]   ;;  %v4294_v63 = vunpack.c.l.s8.bf16 %v3918_v52 }
 0x7c9   :  { %v4465_v50 = vpop.f32.mrf.mxu1  ;;  %4787 = vmatprep.mubr.bf16.mxu1 %v6743_v2  ;;  %v6070_v2 = vld [vmem:[%s7832_s17 + $0xf0] sm:$0xff]   ;;  %v4505_v52 = vadd.f32 %v7530_v35, %v7528_v5 }
 0x7ca   :  { %4758 = vmatpush1.bf16.msra.mxu1 %v4230_v34  ;;  %v4506_v59 = vpop.f32.mrf.mxu0  ;;  %v3911_v34 = vld [vmem:[#allocation17 + $0x5b8] sm:$0xff] }
 0x7cb   :  { %v4466_v15 = vpop.f32.mrf.mxu1  ;;  %4759 = vmatprep.subr.bf16.mxu1 %v4223_v14  ;;  %v6088_v14 = vld [vmem:[%s7832_s17 + $0xc0] sm:$0xff]   ;;  %v4287_v50 = vunpack.c.h.s8.bf16 %v3911_v34 }
 0x7cc   :  { %v4507_v8 = vpop.f32.mrf.mxu0  ;;  %v6089_v59 = vld [vmem:[%s7832_s17 + $0x80] sm:$0xff]  }
 0x7ce   :  { %4760 = vmatpush1.bf16.msra.mxu1 %v4222_v60  ;;  %6021 = vmatmul.mubr.msk.bf16.vlgmr.msra.gmra.mxu0 %vm5042_vm2, %v5040_v57  ;;  %v3910_v60 = vld [vmem:[#allocation17 + $0x5b0] sm:$0xff]  ;;  %v3903_v57 = vld [vmem:[#allocation17 + $0x578] sm:$0xff] }
 0x7cf   :  { %4761 = vmatprep.subr.bf16.mxu1 %v4215_v48  ;;  %5946 = vmatpush3.bf16.msra.mxu0 %v6069_v20  ;;  %v4286_v15 = vunpack.c.h.s8.bf16 %v3910_v60  ;;  %v4279_v48 = vunpack.c.l.s8.bf16 %v3911_v34  ;;  %v4278_v20 = vunpack.c.l.s8.bf16 %v3910_v60  ;;  %v4271_v13 = vunpack.c.h.s8.bf16 %v3903_v57  ;;  %v6087_v60 = vld [vmem:[%s7832_s17 + $0x28] sm:$0xff]  }
 0x7d0   :  { %5947 = vmatprep.subr.bf16.mxu0 %v6070_v2  ;;  %v3902_v2 = vld [vmem:[#allocation17 + $0x570] sm:$0xff] }
 0x7d1   :  { %v4270_v8 = vunpack.c.h.s8.bf16 %v3902_v2  ;;  %v4262_v37 = vunpack.c.l.s8.bf16 %v3902_v2 }
 0x7d2   :  { %4762 = vmatpush1.bf16.msra.mxu1 %v4214_v30  ;;  %v4263_v30 = vunpack.c.l.s8.bf16 %v3903_v57 }
 0x7d3   :  { %4763 = vmatprep.subr.bf16.mxu1 %v4207_v29  ;;  %5948 = vmatpush3.bf16.msra.mxu0 %v6071_v58  ;;  %v3895_v29 = vld [vmem:[#allocation17 + $0x538] sm:$0xff] }
 0x7d4   :  { %5949 = vmatprep.subr.bf16.mxu0 %v6072_v19  ;;  %v4255_v58 = vunpack.c.h.s8.bf16 %v3895_v29  ;;  %v3894_v19 = vld [vmem:[#allocation17 + $0x530] sm:$0xff] }
 0x7d6   :  { %4764 = vmatpush1.bf16.msra.mxu1 %v4206_v38  ;;  %v3625_v38 = vrot.slane %v7483_v32, %v6788_v23 }
 0x7d7   :  { %4765 = vmatprep.subr.bf16.mxu1 %v4199_v10  ;;  %5950 = vmatpush3.bf16.msra.mxu0 %v6073_v44  ;;  %v4254_v10 = vunpack.c.h.s8.bf16 %v3894_v19  ;;  %v4247_v44 = vunpack.c.l.s8.bf16 %v3895_v29  ;;  %v6092_v29 = vld [vmem:[%s7832_s17 + $0x58] sm:$0xff]  }
 0x7d8   :  { %5951 = vmatprep.subr.bf16.mxu0 %v6074_v0  ;;  %v3656_v0 = vmul.f32 %v3625_v38, %v7423_v62  ;;  %v6079_v62 = vld [vmem:[%s7832_s17 + $0x38] sm:$0xff]   ;;  %v6118_v38 = vld [vmem:[%s7832_s17 + $0x1f0] sm:$0xff]  }
 0x7da   :  { %4766 = vmatpush1.bf16.msra.mxu1 %v4198_v47  ;;  %v3675_v47 = vrot.slane %v7487_v51, %v6788_v23 }
 0x7db   :  { %4767 = vmatprep.subr.bf16.mxu1 %v4191_v43  ;;  %5952 = vmatpush3.bf16.msra.mxu0 %v6075_v27  ;;  %v4246_v43 = vunpack.c.l.s8.bf16 %v3894_v19  ;;  %v3657_v27 = vmul.f32 %v3629_v12, %v7430_v45  ;;  %v4905_v45 = vpack.c.bf16 %v7517_v55, %v7517_v55  ;;  %v6083_v55 = vld [vmem:[%s7832_s17 + $0x30] sm:$0xff]  }
 0x7dc   :  { %5953 = vmatprep.subr.bf16.mxu0 %v6076_v17  ;;  %v3679_v17 = vrot.slane %v7487_v51, %v6791_v26  ;;  %v6119_v12 = vld [vmem:[%s7832_s17 + $0x1b0] sm:$0xff]  }
 0x7de   :  { %4768 = vmatpush1.bf16.msra.mxu1 %v4190_v11  ;;  %v3706_v11 = vadd.f32 %v3675_v47, %v3656_v0  ;;  %v6120_v0 = vld [vmem:[%s7832_s17 + $0x1e8] sm:$0xff]   ;;  %v6095_v47 = vld [vmem:[%s7832_s17 + $0x10] sm:$0xff]  }
 0x7df   :  { %4769 = vmatprep.subr.bf16.mxu1 %v4183_v54  ;;  %5954 = vmatpush3.bf16.msra.mxu0 %v6077_v56  ;;  %v6082_v54 = vld [vmem:[%s7832_s17 + $0x70] sm:$0xff]   ;;  %v3707_v56 = vadd.f32 %v3679_v17, %v3657_v27  ;;  %v6122_v27 = vld [vmem:[%s7832_s17 + $0x1e0] sm:$0xff]   ;;  %v6097_v17 = vld [vmem:[%s7832_s17 + $0x8] sm:$0xff]  }
 0x7e0   :  { %5955 = vmatprep.subr.bf16.mxu0 %v6080_v40 }
 0x7e1   :  { %v3715_v5 = vmul.f32 0.1, %v3707_v56 }
 0x7e2   :  { %4770 = vmatpush1.bf16.msra.mxu1 %v4182_v33  ;;  %v4859_v33 = vrot.slane %v7499_v6, %v6788_v23 }
 0x7e3   :  { %4771 = vmatprep.subr.bf16.mxu1 %v4303_v49  ;;  %5956 = vmatpush3.bf16.msra.mxu0 %v6081_v18  ;;  %v3714_v49 = vmul.f32 0.1, %v3706_v11 }
 0x7e4   :  { %5957 = vmatprep.subr.bf16.mxu0 %v6084_v53  ;;  %v4813_v53 = vrot.slane %v7497_v9, %v6791_v26 }
 0x7e6   :  { %4772 = vmatpush2.bf16.msra.mxu1 %v4302_v46 }
 0x7e7   :  { %4773 = vmatprep.subr.bf16.mxu1 %v4295_v28  ;;  %5958 = vmatpush3.bf16.msra.mxu0 %v6085_v36  ;;  %v4863_v28 = vrot.slane %v7499_v6, %v6791_v26  ;;  %v6116_v26 = vld [vmem:[%s7832_s17 + $0x1f8] sm:$0xff]  }
 0x7e8   :  { %5959 = vmatprep.subr.bf16.mxu0 %v6088_v14  ;;  %v3722_v14 = vmax.f32 %v3706_v11, %v3714_v49  ;;  %v6098_v11 = vld [vmem:[%s7832_s17 + $0x40] sm:$0xff]   ;;  %v6102_v49 = vld [vmem:[%s7832_s17 + $0x170] sm:$0xff]  }
 0x7ea   :  { %4774 = vmatpush2.bf16.msra.mxu1 %v4294_v63 }
 0x7eb   :  { %4775 = vmatprep.subr.bf16.mxu1 %v4287_v50  ;;  %5960 = vmatpush3.bf16.msra.mxu0 %v6089_v59 }
 0x7ec   :  { %5989 = vmatprep.subr.bf16.mxu0 %v6116_v26 }
 0x7ee   :  { %4776 = vmatpush2.bf16.msra.mxu1 %v4286_v15 }
 0x7ef   :  { %4777 = vmatprep.subr.bf16.mxu1 %v4279_v48  ;;  %v6090_v48 = vld [vmem:[%s7832_s17 + $0x60] sm:$0xff]  }
 0x7f2   :  { %4778 = vmatpush2.bf16.msra.mxu1 %v4278_v20 }
 0x7f3   :  { %4779 = vmatprep.subr.bf16.mxu1 %v4271_v13  ;;  %v3723_v13 = vmax.f32 %v3707_v56, %v3715_v5  ;;  %v6099_v56 = vld [vmem:[%s7832_s17] sm:$0xff]   ;;  %v6110_v5 = vld [vmem:[%s7832_s17 + $0x150] sm:$0xff]  }
 0x7f6   :  { %4780 = vmatpush2.bf16.msra.mxu1 %v4270_v8  ;;  %v6091_v8 = vld [vmem:[%s7832_s17 + $0x20] sm:$0xff]  }
 0x7f7   :  { %4781 = vmatprep.subr.bf16.mxu1 %v4263_v30 }
 0x7fa   :  { %4782 = vmatpush2.bf16.msra.mxu1 %v4262_v37 }
 0x7fb   :  { %4783 = vmatprep.subr.bf16.mxu1 %v4255_v58  ;;  %v6117_v58 = vld [vmem:[%s7832_s17 + $0x1b8] sm:$0xff]  }
 0x7fe   :  { %4784 = vmatpush2.bf16.msra.mxu1 %v4254_v10  ;;  %v6093_v10 = vld [vmem:[%s7832_s17 + $0x18] sm:$0xff]  }
 0x7ff   :  { %4785 = vmatprep.subr.bf16.mxu1 %v4247_v44  ;;  %v6094_v44 = vld [vmem:[%s7832_s17 + $0x50] sm:$0xff]  }
 0x802   :  { %4786 = vmatpush2.bf16.msra.mxu1 %v4246_v43  ;;  %v6096_v43 = vld [vmem:[%s7832_s17 + $0x48] sm:$0xff]  }
 0x803   :  { %5923 = vmatprep.subr.bf16.mxu1 %v6078_v7  ;;  %v6121_v7 = vld [vmem:[%s7832_s17 + $0x1a8] sm:$0xff]  }
 0x805   :  { %v4543_v40 = vpop.f32.mrf.mxu1  ;;  %4788 = vmatmul.mubr.bf16.vlgmr.msra.gmra.mxu1 %v6730_v16  ;;  %v6086_v16 = vld [vmem:[%s7832_s17 + $0x68] sm:$0xff]  }
 0x806   :  { %v4544_v18 = vadd.f32 %v4543_v40, %v7526_v4  ;;  %5924 = vmatpush3.bf16.msra.mxu1 %v6079_v62  ;;  %5506 = vmatprep.mubr.bf16.mxu1 %v4905_v45  ;;  %v7618_v46 = vpop.f32.mrf.mxu0  ;;  %v6123_v62 = vld [vmem:[%s7832_s17 + $0x1a0] sm:$0xff]   ;;  %v6125_v45 = vld [vmem:[%s7832_s17 + $0x198] sm:$0xff]  }
 0x807   :  { %v4545_v23 = vpop.f32.mrf.mxu1  ;;  %5925 = vmatprep.subr.bf16.mxu1 %v6082_v54  ;;  %v6124_v54 = vld [vmem:[%s7832_s17 + $0x1d8] sm:$0xff]  }
 0x808   :  { %v4840_v35 = vmul.f32 %v4809_v1, %v4544_v18  ;;  %v4546_v4 = vadd.f32 %v4545_v23, %v4505_v52  ;;  %v7625_v36 = vpop.f32.mrf.mxu0  ;;  %v6100_v1 = vld [vmem:[%s7832_s17 + $0x178] sm:$0xff]   ;;  %v6103_v52 = vld [vmem:[%s7832_s17 + $0x130] sm:$0xff]   ;;  %v6104_v18 = vld [vmem:[%s7832_s17 + $0x168] sm:$0xff]  }
 0x809   :  { %v4547_v34 = vpop.f32.mrf.mxu1  ;;  %v6101_v40 = vld [vmem:[%s7832_s17 + $0x138] sm:$0xff]  }
 0x80a   :  { %v4890_v63 = vadd.f32 %v4859_v33, %v4840_v35  ;;  %v4841_v50 = vmul.f32 %v4813_v53, %v4546_v4  ;;  %5926 = vmatpush3.bf16.msra.mxu1 %v6083_v55  ;;  %v4588_v59 = vpop.f32.mrf.mxu0  ;;  %v4904_v33 = vpack.c.bf16 %v7515_v31, %v7515_v31  ;;  %v6105_v31 = vld [vmem:[%s7832_s17 + $0x128] sm:$0xff]   ;;  %v6106_v53 = vld [vmem:[%s7832_s17 + $0x160] sm:$0xff]   ;;  %v6108_v23 = vld [vmem:[%s7832_s17 + $0x158] sm:$0xff]   ;;  %v3633_v34 = vrot.slane %v7483_v32, %v7317_v21 }
 0x80b   :  { %v4548_v15 = vpop.f32.mrf.mxu1  ;;  %5927 = vmatprep.subr.bf16.mxu1 %v6086_v16  ;;  %v6107_v55 = vld [vmem:[%s7832_s17 + $0x120] sm:$0xff]   ;;  %v6109_v16 = vld [vmem:[%s7832_s17 + $0x118] sm:$0xff]   ;;  %v6111_v35 = vld [vmem:[%s7832_s17 + $0x110] sm:$0xff]   ;;  %v3683_v59 = vrot.slane %v7487_v51, %v7317_v21 }
 0x80c   :  { %v4898_v57 = vadd.f32 %v4890_v63, %v3722_v14  ;;  %v4891_v20 = vadd.f32 %v4863_v28, %v4841_v50  ;;  %v4589_v2 = vpop.f32.mrf.mxu0  ;;  %v6112_v4 = vld [vmem:[%s7832_s17 + $0x148] sm:$0xff]   ;;  %v6114_v14 = vld [vmem:[%s7832_s17 + $0x140] sm:$0xff]   ;;  %v3637_v63 = vrot.slane %v7483_v32, %v7320_v25 }
 0x80d   :  { %v6113_v28 = vld [vmem:[%s7832_s17 + $0x108] sm:$0xff]   ;;  %v6115_v50 = vld [vmem:[%s7832_s17 + $0x100] sm:$0xff]  }
 0x80e   :  { %5928 = vmatpush3.bf16.msra.mxu1 %v6087_v60  ;;  %v4899_v30 = vadd.f32 %v4891_v20, %v3723_v13  ;;  %v4906_v19 = vpack.c.bf16 %v4898_v57, %v4898_v57  ;;  %v3658_v60 = vmul.f32 %v3633_v34, %v7447_v41  ;;  %v3659_v15 = vmul.f32 %v3637_v63, %v7453_v42  ;;  %v6126_v42 = vld [vmem:[%s7832_s17 + $0x1d0] sm:$0xff]   ;;  %v6136_v63 = vld [vmem:[#allocation16] sm:$0xff] }
 0x80f   :  { %5929 = vmatprep.subr.bf16.mxu1 %v6090_v48  ;;  %v3687_v48 = vrot.slane %v7487_v51, %v7320_v25  ;;  %v4817_v41 = vrot.slane %v7497_v9, %v7317_v21 }
 0x810   :  { %v4907_v37 = vpack.c.bf16 %v4899_v30, %v4899_v30  ;;  %v3708_v26 = vadd.f32 %v3683_v59, %v3658_v60  ;;  %v3695_v59 = vrot.slane %v6136_v63, %v7351_v24 }
 0x811   :  { %v3709_v57 = vadd.f32 %v3687_v48, %v3659_v15 }
 0x812   :  { %5930 = vmatpush3.bf16.msra.mxu1 %v6091_v8  ;;  %5546 = vmatprep.mubr.bf16.mxu0 %v4907_v37  ;;  %v3716_v2 = vmul.f32 0.1, %v3708_v26 }
 0x813   :  { %5547 = vmatmul.mubr.bf16.vlgmr.msra.gmra.mxu0 %v4906_v19  ;;  %5931 = vmatprep.subr.bf16.mxu1 %v6092_v29  ;;  %v4867_v29 = vrot.slane %v7499_v6, %v7317_v21  ;;  %v6128_v21 = vld [vmem:[%s7832_s17 + $0x1c8] sm:$0xff]  }
 0x814   :  { %5990 = vmatpush3.bf16.msra.mxu0 %v6117_v58  ;;  %v6127_v58 = vld [vmem:[%s7832_s17 + $0x190] sm:$0xff]  }
 0x815   :  { %5991 = vmatprep.subr.bf16.mxu0 %v6118_v38  ;;  %v3717_v38 = vmul.f32 0.1, %v3709_v57 }
 0x816   :  { %5932 = vmatpush3.bf16.msra.mxu1 %v6093_v10 }
 0x817   :  { %5933 = vmatprep.subr.bf16.mxu1 %v6094_v44 }
 0x818   :  { %5992 = vmatpush3.bf16.msra.mxu0 %v6119_v12 }
 0x819   :  { %5993 = vmatprep.subr.bf16.mxu0 %v6120_v0 }
 0x81a   :  { %5934 = vmatpush3.bf16.msra.mxu1 %v6095_v47 }
 0x81b   :  { %5935 = vmatprep.subr.bf16.mxu1 %v6096_v43 }
 0x81c   :  { %5994 = vmatpush3.bf16.msra.mxu0 %v6121_v7 }
 0x81d   :  { %5995 = vmatprep.subr.bf16.mxu0 %v6122_v27  ;;  %v6129_v27 = vld [vmem:[%s7832_s17 + $0x188] sm:$0xff]  }
 0x81e   :  { %5936 = vmatpush3.bf16.msra.mxu1 %v6097_v17 }
 0x81f   :  { %5937 = vmatprep.subr.bf16.mxu1 %v6098_v11 }
 0x820   :  { %5996 = vmatpush3.bf16.msra.mxu0 %v6123_v62  ;;  %v3725_v62 = vmax.f32 %v3709_v57, %v3717_v38 }
 0x821   :  { %5997 = vmatprep.subr.bf16.mxu0 %v6124_v54 }
 0x822   :  { %5938 = vmatpush3.bf16.msra.mxu1 %v6099_v56 }
 0x823   :  { %5967 = vmatprep.subr.bf16.mxu1 %v6100_v1 }
 0x824   :  { %5998 = vmatpush3.bf16.msra.mxu0 %v6125_v45 }
 0x825   :  { %5507 = vmatmul.mubr.bf16.vlgmr.msra.gmra.mxu1 %v4904_v33  ;;  %5999 = vmatprep.subr.bf16.mxu0 %v6126_v42 }
 0x826   :  { %5968 = vmatpush3.bf16.msra.mxu1 %v6101_v40 }
 0x827   :  { %5969 = vmatprep.subr.bf16.mxu1 %v6102_v49 }
 0x828   :  { %6000 = vmatpush3.bf16.msra.mxu0 %v6127_v58 }
 0x829   :  { %6001 = vmatprep.subr.bf16.mxu0 %v6128_v21 }
 0x82a   :  { %5970 = vmatpush3.bf16.msra.mxu1 %v6103_v52 }
 0x82b   :  { %5971 = vmatprep.subr.bf16.mxu1 %v6104_v18 }
 0x82c   :  { %6002 = vmatpush3.bf16.msra.mxu0 %v6129_v27 }
 0x82e   :  { %5972 = vmatpush3.bf16.msra.mxu1 %v6105_v31 }
 0x82f   :  { %5973 = vmatprep.subr.bf16.mxu1 %v6106_v53 }
 0x832   :  { %5974 = vmatpush3.bf16.msra.mxu1 %v6107_v55 }
 0x833   :  { %5975 = vmatprep.subr.bf16.mxu1 %v6108_v23 }
 0x836   :  { %5976 = vmatpush3.bf16.msra.mxu1 %v6109_v16 }
 0x837   :  { %5977 = vmatprep.subr.bf16.mxu1 %v6110_v5 }
 0x83a   :  { %5978 = vmatpush3.bf16.msra.mxu1 %v6111_v35 }
 0x83b   :  { %5979 = vmatprep.subr.bf16.mxu1 %v6112_v4  ;;  %v6135_v4 = vld [vmem:[#allocation14] sm:$0xff] }
 0x83c   :  { %v3645_v34 = vrot.slane %v6135_v4, %v7351_v24 }
 0x83e   :  { %5980 = vmatpush3.bf16.msra.mxu1 %v6113_v28  ;;  %v3641_v28 = vrot.slane %v6135_v4, %v7348_v3  ;;  %v3661_v60 = vmul.f32 %v3645_v34, %v7477_v39 }
 0x83f   :  { %5981 = vmatprep.subr.bf16.mxu1 %v6114_v14 }
 0x840   :  { %v3660_v14 = vmul.f32 %v3641_v28, %v7471_v22  ;;  %v3711_v48 = vadd.f32 %v3695_v59, %v3661_v60 }
 0x842   :  { %5982 = vmatpush3.bf16.msra.mxu1 %v6115_v50  ;;  %v3691_v50 = vrot.slane %v6136_v63, %v7348_v3  ;;  %v5912_v63 = vld [vmem:[#allocation25] ss:$0 sm:$0xff] }
 0x843   :  { %6024 = vmatprep.subr.bf16.mxu1 %v6498_v61 }
 0x844   :  { %v3710_v15 = vadd.f32 %v3691_v50, %v3660_v14  ;;  %v6134_v14 = vld [vmem:[%s7837_s22] sm:$0xff]  }
 0x845   :  { %v4625_v32 = vpop.f32.mrf.mxu1 }
 0x846   :  { %v4626_v20 = vadd.f32 %v4625_v32, %v7618_v46  ;;  %v4666_v13 = vpop.f32.mrf.mxu0  ;;  %v4821_v46 = vrot.slane %v7497_v9, %v7320_v25  ;;  %v3724_v9 = vmax.f32 %v3708_v26, %v3716_v2  ;;  %v6137_v26 = vld [vmem:[#allocation19] sm:$0xff]  ;;  %v3718_v57 = vmul.f32 0.1, %v3710_v15  ;;  %v6138_v2 = vld [vmem:[#allocation20] sm:$0xff] }
 0x847   :  { %v4627_v8 = vpop.f32.mrf.mxu1  ;;  %v4825_v32 = vrot.slane %v6137_v26, %v7348_v3  ;;  %v4829_v22 = vrot.slane %v6137_v26, %v7351_v24 }
 0x848   :  { %v4628_v51 = vadd.f32 %v4627_v8, %v7625_v36  ;;  %v4667_v30 = vadd.f32 %v4666_v13, %v4626_v20  ;;  %v4668_v37 = vpop.f32.mrf.mxu0  ;;  %v4871_v36 = vrot.slane %v7499_v6, %v7320_v25  ;;  %v6130_v25 = vld [vmem:[%s7832_s17 + $0x1c0] sm:$0xff]   ;;  %v4875_v8 = vrot.slane %v6138_v2, %v7348_v3 }
 0x849   :  { %v4629_v19 = vpop.f32.mrf.mxu1  ;;  %v6131_v6 = vld [vmem:[%s7832_s17 + $0x180] sm:$0xff]   ;;  %6003 = vmatprep.subr.bf16.mxu0 %v6130_v25 }
 0x84a   :  { %v4842_v10 = vmul.f32 %v4817_v41, %v4667_v30  ;;  %v4669_v44 = vadd.f32 %v4668_v37, %v4628_v51  ;;  %v4670_v12 = vpop.f32.mrf.mxu0  ;;  %6004 = vmatpush3.bf16.msra.mxu0 %v6131_v6  ;;  %v3719_v51 = vmul.f32 0.1, %v3711_v48 }
 0x84b   :  { %v4630_v0 = vpop.f32.mrf.mxu1  ;;  %6032 = vmatprep.subr.bf16.mxu0 %v6498_v61 }
 0x84c   :  { %v4892_v47 = vadd.f32 %v4867_v29, %v4842_v10  ;;  %v4843_v43 = vmul.f32 %v4821_v46, %v4669_v44  ;;  %v4671_v7 = vpop.f32.mrf.mxu0  ;;  %v4879_v29 = vrot.slane %v6138_v2, %v7351_v24  ;;  %v3726_v46 = vmax.f32 %v3710_v15, %v3718_v57 }
 0x84e   :  { %v4900_v17 = vadd.f32 %v4892_v47, %v3724_v9  ;;  %v4893_v11 = vadd.f32 %v4871_v36, %v4843_v43  ;;  %v3727_v36 = vmax.f32 %v3711_v48, %v3719_v51 }
 0x850   :  { %v4901_v54 = vadd.f32 %v4893_v11, %v3725_v62  ;;  %v4908_v1 = vpack.c.bf16 %v4900_v17, %v4900_v17 }
 0x852   :  { %v4909_v56 = vpack.c.bf16 %v4901_v54, %v4901_v54 }
 0x854   :  { %5586 = vmatprep.mubr.bf16.mxu1 %v4909_v56 }
 0x855   :  { %5587 = vmatmul.mubr.bf16.vlgmr.msra.gmra.mxu1 %v4908_v1 }
 0x856   :  { %6028 = vmatprep.mubr.msk.bf16.mxu1 %vm6499_vm1, %v6498_v61 }
 0x885   :  { %v4707_v45 = vpop.f32.mrf.mxu1 }
 0x886   :  { %v4748_v40 = vpop.f32.mrf.mxu0 }
 0x887   :  { %v4749_v33 = vadd.f32 %v4748_v40, %v4707_v45  ;;  %v4709_v49 = vpop.f32.mrf.mxu1 }
 0x888   :  { %v4750_v52 = vpop.f32.mrf.mxu0 }
 0x889   :  { %v4711_v18 = vpop.f32.mrf.mxu1  ;;  %v4751_v13 = vadd.f32 %v4750_v52, %v4709_v49  ;;  %v6132_v49 = vld [vmem:[%s7835_s20 + $0x8] sm:$0xff]   ;;  %v6133_v52 = vld [vmem:[%s7835_s20] sm:$0xff]  }
 0x88a   :  { %v4752_v31 = vpop.f32.mrf.mxu0  ;;  %6025 = vmatpush3.bf16.msra.mxu1 %v6132_v49 }
 0x88b   :  { %v4712_v53 = vpop.f32.mrf.mxu1  ;;  %6026 = vmatprep.subr.bf16.mxu1 %v6498_v61 }
 0x88c   :  { %v4753_v55 = vpop.f32.mrf.mxu0 }
 0x88d   :  { %v5911_v55 = vld [vmem:[#allocation23] ss:$0 sm:$0xff] }
 0x88e   :  { %v5084_v23 = vpop.f32.mrf.mxu0  ;;  %6027 = vmatpush3.bf16.msra.mxu1 %v6133_v52 }
 0x88f   :  { %6038 = vmatprep.subr.bf16.mxu1 %v6498_v61 }
 0x890   :  { %v6022_v16 = vpop.f32.mrf.mxu0 }
 0x892   :  { %v5087_v5 = vpop.f32.mrf.mxu0 }
 0x894   :  { %v6023_v35 = vpop.f32.mrf.mxu0 }
 0x8c5   :  { %v4789_v20 = vpop.f32.mrf.mxu1 }
 0x8c6   :  { %v4790_v41 = vadd.f32 %v4789_v20, %v4749_v33 }
 0x8c7   :  { %v4791_v42 = vpop.f32.mrf.mxu1 }
 0x8c8   :  { %v4844_v30 = vmul.f32 %v4825_v32, %v4790_v41  ;;  %v4792_v39 = vadd.f32 %v4791_v42, %v4751_v13  ;;  %v5916_v13 = vld [vmem:[#allocation26] ss:$0 sm:$0xff] }
 0x8c9   :  { %v4793_v37 = vpop.f32.mrf.mxu1 }
 0x8ca   :  { %v4894_v58 = vadd.f32 %v4875_v8, %v4844_v30  ;;  %v4845_v19 = vmul.f32 %v4829_v22, %v4792_v39 }
 0x8cb   :  { %v4794_v38 = vpop.f32.mrf.mxu1 }
 0x8cc   :  { %v4902_v10 = vadd.f32 %v4894_v58, %v3726_v46  ;;  %v4895_v44 = vadd.f32 %v4879_v29, %v4845_v19  ;;  %v5919_v29 = vld [vmem:[#allocation2] ss:$0 sm:$0xff] }
 0x8ce   :  { %v4903_v12 = vadd.f32 %v4895_v44, %v3727_v36  ;;  %v4910_v21 = vpack.c.bf16 %v4902_v10, %v4902_v10 }
 0x8d0   :  { %v4911_v0 = vpack.c.bf16 %v4903_v12, %v4903_v12 }
 0x8d2   :  { %5626 = vmatprep.mubr.bf16.mxu0 %v4911_v0 }
 0x8d3   :  { %v5961_v3 = vpop.f32.mrf.mxu0  ;;  %5627 = vmatmul.mubr.bf16.vlgmr.msra.gmra.mxu0 %v4910_v21 }
 0x8d4   :  { %6034 = vmatprep.mubr.msk.bf16.mxu0 %vm6499_vm1, %v6498_v61  ;;  %6033 = vmatpush3.bf16.msra.mxu0 %v6134_v14 }
 0x8d5   :  { %v5962_v9 = vpop.f32.mrf.mxu0 }
 0x8d6   :  { %v5963_v47 = vadd.f32 %v5962_v9, %v5961_v3 }
 0x8d7   :  { %v5964_v24 = vpop.f32.mrf.mxu0 }
 0x8d9   :  { %v5965_v43 = vpop.f32.mrf.mxu0 }
 0x8e5   :  { %v5939_v7 = vpop.f32.mrf.mxu1 }
 0x8e7   :  { %v5940_v27 = vpop.f32.mrf.mxu1 }
 0x8e8   :  { %v5941_v17 = vadd.f32 %v5940_v27, %v5939_v7 }
 0x8e9   :  { %v5942_v11 = vpop.f32.mrf.mxu1 }
 0x8ea   :  { %v5509_v62 = vadd.f32 %v5941_v17, %v5084_v23 }
 0x8eb   :  { %v5943_v25 = vpop.f32.mrf.mxu1 }
 0x8ec   :  { %v5549_v6 = vadd.f32 %v5963_v47, %v5509_v62 }
 0x915   :  { %v5983_v54 = vpop.f32.mrf.mxu1 }
 0x917   :  { %v5984_v56 = vpop.f32.mrf.mxu1 }
 0x918   :  { %v5985_v1 = vadd.f32 %v5984_v56, %v5983_v54 }
 0x919   :  { %v5986_v45 = vpop.f32.mrf.mxu1 }
 0x91a   :  { %v5589_v40 = vadd.f32 %v5985_v1, %v5549_v6 }
 0x91b   :  { %v5987_v33 = vpop.f32.mrf.mxu1 }
 0x993   :  { %v6005_v18 = vpop.f32.mrf.mxu0 }
 0x995   :  { %v6006_v31 = vpop.f32.mrf.mxu0 }
 0x996   :  { %v6007_v53 = vadd.f32 %v6006_v31, %v6005_v18 }
 0x997   :  { %v6008_v23 = vpop.f32.mrf.mxu0 }
 0x998   :  { %v5629_v16 = vadd.f32 %v6007_v53, %v5589_v40 }
 0x999   :  { %v6009_v5 = vpop.f32.mrf.mxu0 }
 0x99a   :  { %v5641_v35 = vadd.f32 %v5911_v55, %v5629_v16 }
 0x99c   :  { %v5642_v4 = vmul.f32 0.1, %v5641_v35 }
 0x99e   :  { %v5643_v28 = vmax.f32 %v5641_v35, %v5642_v4 }
 0x9a0   :  { %v5644_v34 = vpack.c.bf16 %v5643_v28, %v5643_v28 }
 0x9a2   :  { %6029 = vmatmul.mubr.msk.bf16.vlgmr.msra.gmra.mxu1 %vm5668_vm3, %v5644_v34 }
 0x9a3   :  { %6040 = vmatprep.mubr.msk.bf16.mxu1 %vm6499_vm1, %v6498_v61  ;;  %v5777_v61 = vld [vmem:[%s7839_s24] sm:$0xf] }
 0x9a4   :  { %v5789_v20 = vsel %vm5046_vm0, %v5777_v61, 0 }
 0x9a5   :  { %6039 = vmatpush3.bf16.msra.mxu1 %v5789_v20 }
 0xa62   :  { %v5706_v50 = vpop.f32.mrf.mxu1 }
 0xa63   :  { %v5707_v60 = vadd.f32 %v5912_v63, %v5706_v50 }
 0xa64   :  { %v6030_v59 = vpop.f32.mrf.mxu1 }
 0xa65   :  { %v5712_v15 = vmul.f32 0.1, %v5707_v60 }
 0xa66   :  { %v5709_v48 = vpop.f32.mrf.mxu1 }
 0xa67   :  { %v5713_v26 = vmax.f32 %v5707_v60, %v5712_v15 }
 0xa68   :  { %v6031_v32 = vpop.f32.mrf.mxu1 }
 0xa69   :  { %v5714_v57 = vpack.c.bf16 %v5713_v26, %v5713_v26 }
 0xa6b   :  { %6035 = vmatmul.mubr.msk.bf16.vlgmr.msra.gmra.mxu0 %vm5730_vm4, %v5714_v57 }
 0xb2b   :  { %v5768_v41 = vpop.f32.mrf.mxu0 }
 0xb2c   :  { %v5769_v2 = vadd.f32 %v5916_v13, %v5768_v41 }
 0xb2d   :  { %v6036_v8 = vpop.f32.mrf.mxu0 }
 0xb2e   :  { %v5774_v22 = vmul.f32 0.1, %v5769_v2 }
 0xb2f   :  { %v5771_v42 = vpop.f32.mrf.mxu0 }
 0xb30   :  { %v5775_v51 = vmax.f32 %v5769_v2, %v5774_v22 }
 0xb31   :  { %v6037_v30 = vpop.f32.mrf.mxu0 }
 0xb32   :  { %v5776_v39 = vpack.c.bf16 %v5775_v51, %v5775_v51 }
 0xb34   :  { %6041 = vmatmul.mubr.msk.bf16.vlgmr.msra.gmra.mxu1 %vm5042_vm2, %v5776_v39 }
 0xbf4   :  { %v5825_v37 = vpop.f32.mrf.mxu1 }
 0xbf5   :  { %v5826_v46 = vadd.f32 %v5919_v29, %v5825_v37 }
 0xbf6   :  { %v6042_v58 = vpop.f32.mrf.mxu1 }
 0xbf7   :  { %5832 = vst.msk [vmem:[%s7841_s26] sm:$0x3] %vm5831_vm5, %v5826_v46 }
 0xbf8   :  { %v5828_v19 = vpop.f32.mrf.mxu1 }
 0xbfa   :  { %v6043_v38 = vpop.f32.mrf.mxu1 }
 0xbfb   :  { %5837 = vsyncpa [#allocation4], 1 }
 0xbfc   :  { %5838 = vsyncpa [#allocation6], 1 }
 0xbfd   :  { %5839 = vsyncpa [#allocation9], 1 }
 0xbfe   :  { %5840 = vsyncpa [#allocation12], 1 }
 0xbff   :  { %5841 = vsyncpa [#allocation15], 1 }
 0xc00   :  { %5842 = vsyncpa [#allocation18], 1 }
 0xc01   :  { %5843 = vsyncpa [#allocation21], 1 }
 0xc02   :  { %5844 = vsyncpa [#allocation24], 1 }
 0xc03   :  { %5845 = vsyncpa [#allocation27], 1 }

</bundles_post_ra>
